<compile_context>
chip_gen: v7x
topology: tpu7x:2x2x1
jax: 0.10.0
libtpu: 0.0.40
codegen_flags: <defaults>
</compile_context>

<pallas_src>
import functools

import jax
import jax.numpy as jnp
from jax.experimental import pallas as pl
from jax.experimental.pallas import tpu as pltpu

# Model hyper-parameters.
CNN_OUT_CHANNELS = 32
HIDDEN_DIM = 64
KERNEL_SIZE = 3
LSTM_LAYERS = 2
INPUT_DIM = 1
OUTPUT_DIM = 1


def _sigmoid(x):
    # Reference-side sigmoid (the kernel uses the exact tanh identity instead).
    return 1.0 / (1.0 + jnp.exp(-x))


def _cnn_lstm_kernel(xproj_ref, w_hh0_ref, w_ih1_ref, w_hh1_ref, b1_ref,
                     w_x0_ref, b_dec0_ref, postmul_ref, postadd_ref,
                     h1_hist_ref):
    S = xproj_ref.shape[0]               # encoder length
    T, BP, H = h1_hist_ref.shape          # forecast steps, sublane-padded batch, hidden
    G = 4 * H                             # native gate width (no per-gate lane padding)
    f32 = jnp.float32

    # Only small, reused constants are hoisted & pre-broadcast once (JAX does not
    # CSE broadcast_in_dim).  Large weights are read at the dot call sites so the
    # MXU streams them straight from VMEM (they can never be vreg-resident).
    postmul = jnp.broadcast_to(postmul_ref[...], (BP, G))
    postadd = jnp.broadcast_to(postadd_ref[...], (BP, G))
    b1 = jnp.broadcast_to(b1_ref[...], (BP, G))
    b_dec0 = jnp.broadcast_to(b_dec0_ref[...], (BP, G))

    def cell(gates, c):
        # i/f/o pre-activations are pre-scaled by 0.5 host-side, so a single tanh
        # over the whole (BP, 4H) block + a per-lane affine repair yields
        # sigmoid(z) = 0.5*tanh(0.5 z) + 0.5 for i/f/o and tanh(z) for g.
        t = jnp.tanh(gates)
        act = t * postmul + postadd
        i = act[:, 0 * H:1 * H]
        f = act[:, 1 * H:2 * H]
        g = act[:, 2 * H:3 * H]
        o = act[:, 3 * H:4 * H]
        c_new = f * c + i * g
        return o * jnp.tanh(c_new), c_new

    # ---- encoder: 2-layer LSTM over the S conv outputs.  Layer-0 input
    # projection was precomputed by XLA (xproj); gate matmuls are concat-free
    # accumulating dots.
    def encode_body(t, state):
        h0, c0, h1, c1 = state
        g0 = xproj_ref[t] + jnp.dot(h0, w_hh0_ref[...], preferred_element_type=f32)
        h0, c0 = cell(g0, c0)
        g1 = (jnp.dot(h0, w_ih1_ref[...], preferred_element_type=f32)
              + jnp.dot(h1, w_hh1_ref[...], preferred_element_type=f32) + b1)
        h1, c1 = cell(g1, c1)
        return (h0, c0, h1, c1)

    zeros = jnp.zeros((BP, H), f32)       # h_0 / c_0 are zeros
    state = jax.lax.fori_loop(0, S, encode_body, (zeros, zeros, zeros, zeros),
                              unroll=True)

    # First forecast uses the encoder-final top-layer hidden state.
    h1_hist_ref[0] = state[2]

    # ---- autoregressive decoder: fc -> centre-tap conv -> layer-0 input
    # projection are folded into w_x0, so each step is four small dots + two
    # fused gate activations; the fc head is applied outside the kernel.  Only
    # T-1 updates are needed (the T-th update would be dead work).
    def decode_body(t, state):
        h0, c0, h1, c1 = state
        g0 = (jnp.dot(h1, w_x0_ref[...], preferred_element_type=f32)
              + jnp.dot(h0, w_hh0_ref[...], preferred_element_type=f32) + b_dec0)
        h0, c0 = cell(g0, c0)
        g1 = (jnp.dot(h0, w_ih1_ref[...], preferred_element_type=f32)
              + jnp.dot(h1, w_hh1_ref[...], preferred_element_type=f32) + b1)
        h1, c1 = cell(g1, c1)
        h1_hist_ref[t + 1] = h1
        return (h0, c0, h1, c1)

    jax.lax.fori_loop(0, T - 1, decode_body, state, unroll=True)


@functools.partial(jax.jit, static_argnames=("future_steps",))
def cnn_lstm_forward(x, params, future_steps=24):
    """Pallas implementation of CNNLSTMModel.forward.  x: (B, S, input_dim) f32."""
    (w_conv, b_conv, w_ih0, w_hh0, b0, w_ih1, w_hh1, b1, w_fc, b_fc) = params
    f32 = jnp.float32
    hi = jax.lax.Precision.HIGHEST        # weight folding at full precision
    B, S, Din = x.shape
    K, _, Cc = w_conv.shape
    H = w_hh0.shape[0]
    Dout = w_fc.shape[1]
    G = 4 * H
    pad = K // 2
    T = future_steps
    BP = max(8, ((B + 7) // 8) * 8)       # sublane-align the batch

    w_conv = w_conv.astype(f32); b_conv = b_conv.astype(f32)
    w_ih0 = w_ih0.astype(f32); w_hh0 = w_hh0.astype(f32); b0 = b0.astype(f32)
    w_ih1 = w_ih1.astype(f32); w_hh1 = w_hh1.astype(f32); b1 = b1.astype(f32)
    w_fc = w_fc.astype(f32); b_fc = b_fc.astype(f32)

    def scale_ifo(w):
        # Fold the 0.5 of sigmoid(z) = 0.5*tanh(0.5 z) + 0.5 into the i/f/o gate
        # columns; the g gate keeps its native tanh pre-activation.
        i, f, g, o = jnp.split(w, 4, axis=-1)
        return jnp.concatenate([0.5 * i, 0.5 * f, g, 0.5 * o], axis=-1)

    # ---- encoder input projection computed by XLA, off the serial recurrence:
    # Conv1d ('same') over the sequence, then the layer-0 input->gates projection.
    x_pad = jnp.pad(x.astype(f32), ((0, 0), (pad, pad), (0, 0)))
    conv = jnp.zeros((B, S, Cc), f32) + b_conv
    for k in range(K):
        conv = conv + jnp.einsum('bsi,io->bso', x_pad[:, k:k + S, :], w_conv[k],
                                 precision=hi)
    xproj = jnp.einsum('bsc,cg->bsg', conv, scale_ifo(w_ih0), precision=hi) \
        + scale_ifo(b0)                                            # (B, S, G)
    xproj = jnp.transpose(xproj, (1, 0, 2))                        # (S, B, G)
    xproj = jnp.pad(xproj, ((0, 0), (0, BP - B), (0, 0)))          # (S, BP, G)

    # ---- decoder layer-0 folding: fc -> centre-tap conv -> input projection,
    # so each autoregressive step needs only h1: gates0 = h1@w_x0 + h0@w_hh0 + b.
    w_center = w_conv[K // 2]                                      # (Din == Dout, Cc)
    w_x0 = scale_ifo(jnp.dot(jnp.dot(w_fc, w_center, precision=hi), w_ih0,
                             precision=hi))                        # (H, G)
    b_dec0 = scale_ifo(jnp.dot(jnp.dot(b_fc, w_center, precision=hi) + b_conv,
                               w_ih0, precision=hi) + b0)          # (1, G)

    w_hh0_s = scale_ifo(w_hh0)                                     # (H, G)
    w_ih1_s = scale_ifo(w_ih1)                                     # (H, G)
    w_hh1_s = scale_ifo(w_hh1)                                     # (H, G)
    b1_s = scale_ifo(b1)                                           # (1, G)

    # Per-lane affine repair: sigmoid for i/f/o lanes, tanh for g lanes.
    ones = jnp.ones((1, H), f32)
    zero = jnp.zeros((1, H), f32)
    postmul = jnp.concatenate([0.5 * ones, 0.5 * ones, ones, 0.5 * ones], axis=-1)
    postadd = jnp.concatenate([0.5 * ones, 0.5 * ones, zero, 0.5 * ones], axis=-1)

    vmem = pl.BlockSpec(memory_space=pltpu.MemorySpace.VMEM)       # whole array in VMEM
    # TODO(synk): on v7x (2 TensorCores) the batch could be sharded over cores
    # (grid + dimension_semantics=("parallel",)) once there are >=16 real rows;
    # at B=2 the single-call, no-grid form is the right structure.
    h1_hist = pl.pallas_call(
        _cnn_lstm_kernel,
        out_shape=jax.ShapeDtypeStruct((T, BP, H), f32),
        in_specs=[vmem] * 9,
        out_specs=vmem,
    )(xproj, w_hh0_s, w_ih1_s, w_hh1_s, b1_s, w_x0, b_dec0, postmul, postadd)

    # fc output head applied once outside the serialized kernel.
    out = jnp.einsum('tbh,hd->tbd', h1_hist, w_fc, precision=hi) + b_fc
    return jnp.transpose(out, (1, 0, 2))[:B]                       # (B, T, Dout)


def init_params(key, input_dim, hidden_dim, cnn_out, kernel_size, output_dim):
    ks = jax.random.split(key, 10)
    s = 0.1

    def rnd(k, shape):
        return (s * jax.random.normal(k, shape)).astype(jnp.float32)

    w_conv = rnd(ks[0], (kernel_size, input_dim, cnn_out))    # (K, Cin, Cout)
    b_conv = rnd(ks[1], (1, cnn_out))
    w_ih0 = rnd(ks[2], (cnn_out, 4 * hidden_dim))             # layer 0 input->gates
    w_hh0 = rnd(ks[3], (hidden_dim, 4 * hidden_dim))
    b0 = rnd(ks[4], (1, 4 * hidden_dim))                      # b_ih0 + b_hh0 pre-summed
    w_ih1 = rnd(ks[5], (hidden_dim, 4 * hidden_dim))          # layer 1 input->gates
    w_hh1 = rnd(ks[6], (hidden_dim, 4 * hidden_dim))
    b1 = rnd(ks[7], (1, 4 * hidden_dim))
    w_fc = rnd(ks[8], (hidden_dim, output_dim))
    b_fc = rnd(ks[9], (1, output_dim))
    return (w_conv, b_conv, w_ih0, w_hh0, b0, w_ih1, w_hh1, b1, w_fc, b_fc)


def reference_forward(x, params, future_steps=24):
    """Pure-JAX reference with the module's original (unfolded) math."""
    (w_conv, b_conv, w_ih0, w_hh0, b0, w_ih1, w_hh1, b1, w_fc, b_fc) = params
    B, S, _ = x.shape
    K = w_conv.shape[0]
    H = w_hh0.shape[0]
    pad = K // 2
    x_pad = jnp.pad(x, ((0, 0), (pad, pad), (0, 0)))
    conv = jnp.zeros((B, S, w_conv.shape[2]), jnp.float32) + b_conv
    for k in range(K):
        conv = conv + jnp.einsum('bsi,io->bso', x_pad[:, k:k + S, :], w_conv[k])

    def cell(x_t, h, c, w_ih, w_hh, b):
        g = x_t @ w_ih + h @ w_hh + b
        i, f, gg, o = jnp.split(g, 4, axis=-1)
        c = _sigmoid(f) * c + _sigmoid(i) * jnp.tanh(gg)
        h = _sigmoid(o) * jnp.tanh(c)
        return h, c

    def step(state, x_t):
        h0, c0, h1, c1 = state
        h0, c0 = cell(x_t, h0, c0, w_ih0, w_hh0, b0)
        h1, c1 = cell(h0, h1, c1, w_ih1, w_hh1, b1)
        return (h0, c0, h1, c1)

    z = jnp.zeros((B, H), jnp.float32)
    state = (z, z, z, z)
    for t in range(S):
        state = step(state, conv[:, t, :])
    outs = []
    for _ in range(future_steps):
        y = state[2] @ w_fc + b_fc
        outs.append(y[:, None, :])
        x_t = y @ w_conv[K // 2] + b_conv
        state = step(state, x_t)
    return jnp.concatenate(outs, axis=1)


if __name__ == "__main__":
    key = jax.random.PRNGKey(0)
    k_param, k_x = jax.random.split(key)
    params = init_params(k_param, INPUT_DIM, HIDDEN_DIM, CNN_OUT_CHANNELS,
                         KERNEL_SIZE, OUTPUT_DIM)

    batch, seq, future_steps = 2, 16, 24
    x = jax.random.normal(k_x, (batch, seq, INPUT_DIM), jnp.float32)

    out = cnn_lstm_forward(x, params, future_steps=future_steps)
    out = jax.block_until_ready(out)

    assert out.shape == (batch, future_steps, OUTPUT_DIM)
    assert bool(jnp.all(jnp.isfinite(out)))

    ref = reference_forward(x, params, future_steps=future_steps)
    err = float(jnp.max(jnp.abs(out - ref)))
    assert bool(jnp.allclose(out, ref, atol=2e-3, rtol=2e-3)), err

    print("KERNEL_OK")
</pallas_src>

<mosaic_0001>
module attributes {stable_mosaic.version = 11 : i64} {
  func.func @_cnn_lstm_kernel(%arg0: memref<16x8x256xf32, #tpu.memory_space<vmem>>, %arg1: memref<64x256xf32, #tpu.memory_space<vmem>>, %arg2: memref<64x256xf32, #tpu.memory_space<vmem>>, %arg3: memref<64x256xf32, #tpu.memory_space<vmem>>, %arg4: memref<1x256xf32, #tpu.memory_space<vmem>>, %arg5: memref<64x256xf32, #tpu.memory_space<vmem>>, %arg6: memref<1x256xf32, #tpu.memory_space<vmem>>, %arg7: memref<1x256xf32, #tpu.memory_space<vmem>>, %arg8: memref<1x256xf32, #tpu.memory_space<vmem>>, %arg9: memref<24x8x64xf32, #tpu.memory_space<vmem>>) attributes {dimension_semantics = [], scalar_prefetch = 0 : i64, scratch_operands = 0 : i64, tpu.core_type = #tpu.core_type<tc>} {
    %c0 = arith.constant 0 : index
    %c0_0 = arith.constant 0 : index
    %0 = vector.load %arg7[%c0, %c0_0] : memref<1x256xf32, #tpu.memory_space<vmem>>, vector<1x256xf32>
    %1 = vector.shape_cast %0 : vector<1x256xf32> to vector<1x256xf32>
    %2 = vector.broadcast %1 : vector<1x256xf32> to vector<8x256xf32>
    %c0_1 = arith.constant 0 : index
    %c0_2 = arith.constant 0 : index
    %3 = vector.load %arg8[%c0_1, %c0_2] : memref<1x256xf32, #tpu.memory_space<vmem>>, vector<1x256xf32>
    %4 = vector.shape_cast %3 : vector<1x256xf32> to vector<1x256xf32>
    %5 = vector.broadcast %4 : vector<1x256xf32> to vector<8x256xf32>
    %c0_3 = arith.constant 0 : index
    %c0_4 = arith.constant 0 : index
    %6 = vector.load %arg4[%c0_3, %c0_4] : memref<1x256xf32, #tpu.memory_space<vmem>>, vector<1x256xf32>
    %7 = vector.shape_cast %6 : vector<1x256xf32> to vector<1x256xf32>
    %8 = vector.broadcast %7 : vector<1x256xf32> to vector<8x256xf32>
    %c0_5 = arith.constant 0 : index
    %c0_6 = arith.constant 0 : index
    %9 = vector.load %arg6[%c0_5, %c0_6] : memref<1x256xf32, #tpu.memory_space<vmem>>, vector<1x256xf32>
    %10 = vector.shape_cast %9 : vector<1x256xf32> to vector<1x256xf32>
    %11 = vector.broadcast %10 : vector<1x256xf32> to vector<8x256xf32>
    %cst = arith.constant 0.000000e+00 : f32
    %12 = vector.broadcast %cst : f32 to vector<8x64xf32>
    %c0_i32 = arith.constant 0 : i32
    %13 = arith.index_cast %c0_i32 : i32 to index
    %c0_7 = arith.constant 0 : index
    %c0_8 = arith.constant 0 : index
    %14 = vector.load %arg0[%13, %c0_7, %c0_8] : memref<16x8x256xf32, #tpu.memory_space<vmem>>, vector<1x8x256xf32>
    %15 = vector.shape_cast %14 : vector<1x8x256xf32> to vector<8x256xf32>
    %c0_9 = arith.constant 0 : index
    %c0_10 = arith.constant 0 : index
    %16 = vector.load %arg1[%c0_9, %c0_10] : memref<64x256xf32, #tpu.memory_space<vmem>>, vector<64x256xf32>
    %cst_11 = arith.constant dense<0.000000e+00> : vector<8x256xf32>
    %17 = tpu.matmul %12, %16, %cst_11 {dimension_numbers = #tpu.dot_dimension_numbers<[1], [0], [0], [1], [0, 0, 1, 1], [], []>} : vector<8x64xf32>, vector<64x256xf32>, vector<8x256xf32> -> vector<8x256xf32>
    %18 = arith.addf %15, %17 : vector<8x256xf32>
    %19 = math.tanh %18 : vector<8x256xf32>
    %20 = arith.mulf %19, %2 : vector<8x256xf32>
    %21 = arith.addf %20, %5 : vector<8x256xf32>
    %22 = vector.extract_strided_slice %21 {offsets = [0, 0], sizes = [8, 64], strides = [1, 1]} : vector<8x256xf32> to vector<8x64xf32>
    %23 = vector.extract_strided_slice %21 {offsets = [0, 64], sizes = [8, 64], strides = [1, 1]} : vector<8x256xf32> to vector<8x64xf32>
    %24 = vector.extract_strided_slice %21 {offsets = [0, 128], sizes = [8, 64], strides = [1, 1]} : vector<8x256xf32> to vector<8x64xf32>
    %25 = vector.extract_strided_slice %21 {offsets = [0, 192], sizes = [8, 64], strides = [1, 1]} : vector<8x256xf32> to vector<8x64xf32>
    %26 = arith.mulf %23, %12 : vector<8x64xf32>
    %27 = arith.mulf %22, %24 : vector<8x64xf32>
    %28 = arith.addf %26, %27 : vector<8x64xf32>
    %29 = math.tanh %28 : vector<8x64xf32>
    %30 = arith.mulf %25, %29 : vector<8x64xf32>
    %c0_12 = arith.constant 0 : index
    %c0_13 = arith.constant 0 : index
    %31 = vector.load %arg2[%c0_12, %c0_13] : memref<64x256xf32, #tpu.memory_space<vmem>>, vector<64x256xf32>
    %cst_14 = arith.constant dense<0.000000e+00> : vector<8x256xf32>
    %32 = tpu.matmul %30, %31, %cst_14 {dimension_numbers = #tpu.dot_dimension_numbers<[1], [0], [0], [1], [0, 0, 1, 1], [], []>} : vector<8x64xf32>, vector<64x256xf32>, vector<8x256xf32> -> vector<8x256xf32>
    %c0_15 = arith.constant 0 : index
    %c0_16 = arith.constant 0 : index
    %33 = vector.load %arg3[%c0_15, %c0_16] : memref<64x256xf32, #tpu.memory_space<vmem>>, vector<64x256xf32>
    %cst_17 = arith.constant dense<0.000000e+00> : vector<8x256xf32>
    %34 = tpu.matmul %12, %33, %cst_17 {dimension_numbers = #tpu.dot_dimension_numbers<[1], [0], [0], [1], [0, 0, 1, 1], [], []>} : vector<8x64xf32>, vector<64x256xf32>, vector<8x256xf32> -> vector<8x256xf32>
    %35 = arith.addf %32, %34 : vector<8x256xf32>
    %36 = arith.addf %35, %8 : vector<8x256xf32>
    %37 = math.tanh %36 : vector<8x256xf32>
    %38 = arith.mulf %37, %2 : vector<8x256xf32>
    %39 = arith.addf %38, %5 : vector<8x256xf32>
    %40 = vector.extract_strided_slice %39 {offsets = [0, 0], sizes = [8, 64], strides = [1, 1]} : vector<8x256xf32> to vector<8x64xf32>
    %41 = vector.extract_strided_slice %39 {offsets = [0, 64], sizes = [8, 64], strides = [1, 1]} : vector<8x256xf32> to vector<8x64xf32>
    %42 = vector.extract_strided_slice %39 {offsets = [0, 128], sizes = [8, 64], strides = [1, 1]} : vector<8x256xf32> to vector<8x64xf32>
    %43 = vector.extract_strided_slice %39 {offsets = [0, 192], sizes = [8, 64], strides = [1, 1]} : vector<8x256xf32> to vector<8x64xf32>
    %44 = arith.mulf %41, %12 : vector<8x64xf32>
    %45 = arith.mulf %40, %42 : vector<8x64xf32>
    %46 = arith.addf %44, %45 : vector<8x64xf32>
    %47 = math.tanh %46 : vector<8x64xf32>
    %48 = arith.mulf %43, %47 : vector<8x64xf32>
    %c1_i32 = arith.constant 1 : i32
    %49 = arith.index_cast %c1_i32 : i32 to index
    %c0_18 = arith.constant 0 : index
    %c0_19 = arith.constant 0 : index
    %50 = vector.load %arg0[%49, %c0_18, %c0_19] : memref<16x8x256xf32, #tpu.memory_space<vmem>>, vector<1x8x256xf32>
    %51 = vector.shape_cast %50 : vector<1x8x256xf32> to vector<8x256xf32>
    %c0_20 = arith.constant 0 : index
    %c0_21 = arith.constant 0 : index
    %52 = vector.load %arg1[%c0_20, %c0_21] : memref<64x256xf32, #tpu.memory_space<vmem>>, vector<64x256xf32>
    %cst_22 = arith.constant dense<0.000000e+00> : vector<8x256xf32>
    %53 = tpu.matmul %30, %52, %cst_22 {dimension_numbers = #tpu.dot_dimension_numbers<[1], [0], [0], [1], [0, 0, 1, 1], [], []>} : vector<8x64xf32>, vector<64x256xf32>, vector<8x256xf32> -> vector<8x256xf32>
    %54 = arith.addf %51, %53 : vector<8x256xf32>
    %55 = math.tanh %54 : vector<8x256xf32>
    %56 = arith.mulf %55, %2 : vector<8x256xf32>
    %57 = arith.addf %56, %5 : vector<8x256xf32>
    %58 = vector.extract_strided_slice %57 {offsets = [0, 0], sizes = [8, 64], strides = [1, 1]} : vector<8x256xf32> to vector<8x64xf32>
    %59 = vector.extract_strided_slice %57 {offsets = [0, 64], sizes = [8, 64], strides = [1, 1]} : vector<8x256xf32> to vector<8x64xf32>
    %60 = vector.extract_strided_slice %57 {offsets = [0, 128], sizes = [8, 64], strides = [1, 1]} : vector<8x256xf32> to vector<8x64xf32>
    %61 = vector.extract_strided_slice %57 {offsets = [0, 192], sizes = [8, 64], strides = [1, 1]} : vector<8x256xf32> to vector<8x64xf32>
    %62 = arith.mulf %59, %28 : vector<8x64xf32>
    %63 = arith.mulf %58, %60 : vector<8x64xf32>
    %64 = arith.addf %62, %63 : vector<8x64xf32>
    %65 = math.tanh %64 : vector<8x64xf32>
    %66 = arith.mulf %61, %65 : vector<8x64xf32>
    %c0_23 = arith.constant 0 : index
    %c0_24 = arith.constant 0 : index
    %67 = vector.load %arg2[%c0_23, %c0_24] : memref<64x256xf32, #tpu.memory_space<vmem>>, vector<64x256xf32>
    %cst_25 = arith.constant dense<0.000000e+00> : vector<8x256xf32>
    %68 = tpu.matmul %66, %67, %cst_25 {dimension_numbers = #tpu.dot_dimension_numbers<[1], [0], [0], [1], [0, 0, 1, 1], [], []>} : vector<8x64xf32>, vector<64x256xf32>, vector<8x256xf32> -> vector<8x256xf32>
    %c0_26 = arith.constant 0 : index
    %c0_27 = arith.constant 0 : index
    %69 = vector.load %arg3[%c0_26, %c0_27] : memref<64x256xf32, #tpu.memory_space<vmem>>, vector<64x256xf32>
    %cst_28 = arith.constant dense<0.000000e+00> : vector<8x256xf32>
    %70 = tpu.matmul %48, %69, %cst_28 {dimension_numbers = #tpu.dot_dimension_numbers<[1], [0], [0], [1], [0, 0, 1, 1], [], []>} : vector<8x64xf32>, vector<64x256xf32>, vector<8x256xf32> -> vector<8x256xf32>
    %71 = arith.addf %68, %70 : vector<8x256xf32>
    %72 = arith.addf %71, %8 : vector<8x256xf32>
    %73 = math.tanh %72 : vector<8x256xf32>
    %74 = arith.mulf %73, %2 : vector<8x256xf32>
    %75 = arith.addf %74, %5 : vector<8x256xf32>
    %76 = vector.extract_strided_slice %75 {offsets = [0, 0], sizes = [8, 64], strides = [1, 1]} : vector<8x256xf32> to vector<8x64xf32>
    %77 = vector.extract_strided_slice %75 {offsets = [0, 64], sizes = [8, 64], strides = [1, 1]} : vector<8x256xf32> to vector<8x64xf32>
    %78 = vector.extract_strided_slice %75 {offsets = [0, 128], sizes = [8, 64], strides = [1, 1]} : vector<8x256xf32> to vector<8x64xf32>
    %79 = vector.extract_strided_slice %75 {offsets = [0, 192], sizes = [8, 64], strides = [1, 1]} : vector<8x256xf32> to vector<8x64xf32>
    %80 = arith.mulf %77, %46 : vector<8x64xf32>
    %81 = arith.mulf %76, %78 : vector<8x64xf32>
    %82 = arith.addf %80, %81 : vector<8x64xf32>
    %83 = math.tanh %82 : vector<8x64xf32>
    %84 = arith.mulf %79, %83 : vector<8x64xf32>
    %c2_i32 = arith.constant 2 : i32
    %85 = arith.index_cast %c2_i32 : i32 to index
    %c0_29 = arith.constant 0 : index
    %c0_30 = arith.constant 0 : index
    %86 = vector.load %arg0[%85, %c0_29, %c0_30] : memref<16x8x256xf32, #tpu.memory_space<vmem>>, vector<1x8x256xf32>
    %87 = vector.shape_cast %86 : vector<1x8x256xf32> to vector<8x256xf32>
    %c0_31 = arith.constant 0 : index
    %c0_32 = arith.constant 0 : index
    %88 = vector.load %arg1[%c0_31, %c0_32] : memref<64x256xf32, #tpu.memory_space<vmem>>, vector<64x256xf32>
    %cst_33 = arith.constant dense<0.000000e+00> : vector<8x256xf32>
    %89 = tpu.matmul %66, %88, %cst_33 {dimension_numbers = #tpu.dot_dimension_numbers<[1], [0], [0], [1], [0, 0, 1, 1], [], []>} : vector<8x64xf32>, vector<64x256xf32>, vector<8x256xf32> -> vector<8x256xf32>
    %90 = arith.addf %87, %89 : vector<8x256xf32>
    %91 = math.tanh %90 : vector<8x256xf32>
    %92 = arith.mulf %91, %2 : vector<8x256xf32>
    %93 = arith.addf %92, %5 : vector<8x256xf32>
    %94 = vector.extract_strided_slice %93 {offsets = [0, 0], sizes = [8, 64], strides = [1, 1]} : vector<8x256xf32> to vector<8x64xf32>
    %95 = vector.extract_strided_slice %93 {offsets = [0, 64], sizes = [8, 64], strides = [1, 1]} : vector<8x256xf32> to vector<8x64xf32>
    %96 = vector.extract_strided_slice %93 {offsets = [0, 128], sizes = [8, 64], strides = [1, 1]} : vector<8x256xf32> to vector<8x64xf32>
    %97 = vector.extract_strided_slice %93 {offsets = [0, 192], sizes = [8, 64], strides = [1, 1]} : vector<8x256xf32> to vector<8x64xf32>
    %98 = arith.mulf %95, %64 : vector<8x64xf32>
    %99 = arith.mulf %94, %96 : vector<8x64xf32>
    %100 = arith.addf %98, %99 : vector<8x64xf32>
    %101 = math.tanh %100 : vector<8x64xf32>
    %102 = arith.mulf %97, %101 : vector<8x64xf32>
    %c0_34 = arith.constant 0 : index
    %c0_35 = arith.constant 0 : index
    %103 = vector.load %arg2[%c0_34, %c0_35] : memref<64x256xf32, #tpu.memory_space<vmem>>, vector<64x256xf32>
    %cst_36 = arith.constant dense<0.000000e+00> : vector<8x256xf32>
    %104 = tpu.matmul %102, %103, %cst_36 {dimension_numbers = #tpu.dot_dimension_numbers<[1], [0], [0], [1], [0, 0, 1, 1], [], []>} : vector<8x64xf32>, vector<64x256xf32>, vector<8x256xf32> -> vector<8x256xf32>
    %c0_37 = arith.constant 0 : index
    %c0_38 = arith.constant 0 : index
    %105 = vector.load %arg3[%c0_37, %c0_38] : memref<64x256xf32, #tpu.memory_space<vmem>>, vector<64x256xf32>
    %cst_39 = arith.constant dense<0.000000e+00> : vector<8x256xf32>
    %106 = tpu.matmul %84, %105, %cst_39 {dimension_numbers = #tpu.dot_dimension_numbers<[1], [0], [0], [1], [0, 0, 1, 1], [], []>} : vector<8x64xf32>, vector<64x256xf32>, vector<8x256xf32> -> vector<8x256xf32>
    %107 = arith.addf %104, %106 : vector<8x256xf32>
    %108 = arith.addf %107, %8 : vector<8x256xf32>
    %109 = math.tanh %108 : vector<8x256xf32>
    %110 = arith.mulf %109, %2 : vector<8x256xf32>
    %111 = arith.addf %110, %5 : vector<8x256xf32>
    %112 = vector.extract_strided_slice %111 {offsets = [0, 0], sizes = [8, 64], strides = [1, 1]} : vector<8x256xf32> to vector<8x64xf32>
    %113 = vector.extract_strided_slice %111 {offsets = [0, 64], sizes = [8, 64], strides = [1, 1]} : vector<8x256xf32> to vector<8x64xf32>
    %114 = vector.extract_strided_slice %111 {offsets = [0, 128], sizes = [8, 64], strides = [1, 1]} : vector<8x256xf32> to vector<8x64xf32>
    %115 = vector.extract_strided_slice %111 {offsets = [0, 192], sizes = [8, 64], strides = [1, 1]} : vector<8x256xf32> to vector<8x64xf32>
    %116 = arith.mulf %113, %82 : vector<8x64xf32>
    %117 = arith.mulf %112, %114 : vector<8x64xf32>
    %118 = arith.addf %116, %117 : vector<8x64xf32>
    %119 = math.tanh %118 : vector<8x64xf32>
    %120 = arith.mulf %115, %119 : vector<8x64xf32>
    %c3_i32 = arith.constant 3 : i32
    %121 = arith.index_cast %c3_i32 : i32 to index
    %c0_40 = arith.constant 0 : index
    %c0_41 = arith.constant 0 : index
    %122 = vector.load %arg0[%121, %c0_40, %c0_41] : memref<16x8x256xf32, #tpu.memory_space<vmem>>, vector<1x8x256xf32>
    %123 = vector.shape_cast %122 : vector<1x8x256xf32> to vector<8x256xf32>
    %c0_42 = arith.constant 0 : index
    %c0_43 = arith.constant 0 : index
    %124 = vector.load %arg1[%c0_42, %c0_43] : memref<64x256xf32, #tpu.memory_space<vmem>>, vector<64x256xf32>
    %cst_44 = arith.constant dense<0.000000e+00> : vector<8x256xf32>
    %125 = tpu.matmul %102, %124, %cst_44 {dimension_numbers = #tpu.dot_dimension_numbers<[1], [0], [0], [1], [0, 0, 1, 1], [], []>} : vector<8x64xf32>, vector<64x256xf32>, vector<8x256xf32> -> vector<8x256xf32>
    %126 = arith.addf %123, %125 : vector<8x256xf32>
    %127 = math.tanh %126 : vector<8x256xf32>
    %128 = arith.mulf %127, %2 : vector<8x256xf32>
    %129 = arith.addf %128, %5 : vector<8x256xf32>
    %130 = vector.extract_strided_slice %129 {offsets = [0, 0], sizes = [8, 64], strides = [1, 1]} : vector<8x256xf32> to vector<8x64xf32>
    %131 = vector.extract_strided_slice %129 {offsets = [0, 64], sizes = [8, 64], strides = [1, 1]} : vector<8x256xf32> to vector<8x64xf32>
    %132 = vector.extract_strided_slice %129 {offsets = [0, 128], sizes = [8, 64], strides = [1, 1]} : vector<8x256xf32> to vector<8x64xf32>
    %133 = vector.extract_strided_slice %129 {offsets = [0, 192], sizes = [8, 64], strides = [1, 1]} : vector<8x256xf32> to vector<8x64xf32>
    %134 = arith.mulf %131, %100 : vector<8x64xf32>
    %135 = arith.mulf %130, %132 : vector<8x64xf32>
    %136 = arith.addf %134, %135 : vector<8x64xf32>
    %137 = math.tanh %136 : vector<8x64xf32>
    %138 = arith.mulf %133, %137 : vector<8x64xf32>
    %c0_45 = arith.constant 0 : index
    %c0_46 = arith.constant 0 : index
    %139 = vector.load %arg2[%c0_45, %c0_46] : memref<64x256xf32, #tpu.memory_space<vmem>>, vector<64x256xf32>
    %cst_47 = arith.constant dense<0.000000e+00> : vector<8x256xf32>
    %140 = tpu.matmul %138, %139, %cst_47 {dimension_numbers = #tpu.dot_dimension_numbers<[1], [0], [0], [1], [0, 0, 1, 1], [], []>} : vector<8x64xf32>, vector<64x256xf32>, vector<8x256xf32> -> vector<8x256xf32>
    %c0_48 = arith.constant 0 : index
    %c0_49 = arith.constant 0 : index
    %141 = vector.load %arg3[%c0_48, %c0_49] : memref<64x256xf32, #tpu.memory_space<vmem>>, vector<64x256xf32>
    %cst_50 = arith.constant dense<0.000000e+00> : vector<8x256xf32>
    %142 = tpu.matmul %120, %141, %cst_50 {dimension_numbers = #tpu.dot_dimension_numbers<[1], [0], [0], [1], [0, 0, 1, 1], [], []>} : vector<8x64xf32>, vector<64x256xf32>, vector<8x256xf32> -> vector<8x256xf32>
    %143 = arith.addf %140, %142 : vector<8x256xf32>
    %144 = arith.addf %143, %8 : vector<8x256xf32>
    %145 = math.tanh %144 : vector<8x256xf32>
    %146 = arith.mulf %145, %2 : vector<8x256xf32>
    %147 = arith.addf %146, %5 : vector<8x256xf32>
    %148 = vector.extract_strided_slice %147 {offsets = [0, 0], sizes = [8, 64], strides = [1, 1]} : vector<8x256xf32> to vector<8x64xf32>
    %149 = vector.extract_strided_slice %147 {offsets = [0, 64], sizes = [8, 64], strides = [1, 1]} : vector<8x256xf32> to vector<8x64xf32>
    %150 = vector.extract_strided_slice %147 {offsets = [0, 128], sizes = [8, 64], strides = [1, 1]} : vector<8x256xf32> to vector<8x64xf32>
    %151 = vector.extract_strided_slice %147 {offsets = [0, 192], sizes = [8, 64], strides = [1, 1]} : vector<8x256xf32> to vector<8x64xf32>
    %152 = arith.mulf %149, %118 : vector<8x64xf32>
    %153 = arith.mulf %148, %150 : vector<8x64xf32>
    %154 = arith.addf %152, %153 : vector<8x64xf32>
    %155 = math.tanh %154 : vector<8x64xf32>
    %156 = arith.mulf %151, %155 : vector<8x64xf32>
    %c4_i32 = arith.constant 4 : i32
    %157 = arith.index_cast %c4_i32 : i32 to index
    %c0_51 = arith.constant 0 : index
    %c0_52 = arith.constant 0 : index
    %158 = vector.load %arg0[%157, %c0_51, %c0_52] : memref<16x8x256xf32, #tpu.memory_space<vmem>>, vector<1x8x256xf32>
    %159 = vector.shape_cast %158 : vector<1x8x256xf32> to vector<8x256xf32>
    %c0_53 = arith.constant 0 : index
    %c0_54 = arith.constant 0 : index
    %160 = vector.load %arg1[%c0_53, %c0_54] : memref<64x256xf32, #tpu.memory_space<vmem>>, vector<64x256xf32>
    %cst_55 = arith.constant dense<0.000000e+00> : vector<8x256xf32>
    %161 = tpu.matmul %138, %160, %cst_55 {dimension_numbers = #tpu.dot_dimension_numbers<[1], [0], [0], [1], [0, 0, 1, 1], [], []>} : vector<8x64xf32>, vector<64x256xf32>, vector<8x256xf32> -> vector<8x256xf32>
    %162 = arith.addf %159, %161 : vector<8x256xf32>
    %163 = math.tanh %162 : vector<8x256xf32>
    %164 = arith.mulf %163, %2 : vector<8x256xf32>
    %165 = arith.addf %164, %5 : vector<8x256xf32>
    %166 = vector.extract_strided_slice %165 {offsets = [0, 0], sizes = [8, 64], strides = [1, 1]} : vector<8x256xf32> to vector<8x64xf32>
    %167 = vector.extract_strided_slice %165 {offsets = [0, 64], sizes = [8, 64], strides = [1, 1]} : vector<8x256xf32> to vector<8x64xf32>
    %168 = vector.extract_strided_slice %165 {offsets = [0, 128], sizes = [8, 64], strides = [1, 1]} : vector<8x256xf32> to vector<8x64xf32>
    %169 = vector.extract_strided_slice %165 {offsets = [0, 192], sizes = [8, 64], strides = [1, 1]} : vector<8x256xf32> to vector<8x64xf32>
    %170 = arith.mulf %167, %136 : vector<8x64xf32>
    %171 = arith.mulf %166, %168 : vector<8x64xf32>
    %172 = arith.addf %170, %171 : vector<8x64xf32>
    %173 = math.tanh %172 : vector<8x64xf32>
    %174 = arith.mulf %169, %173 : vector<8x64xf32>
    %c0_56 = arith.constant 0 : index
    %c0_57 = arith.constant 0 : index
    %175 = vector.load %arg2[%c0_56, %c0_57] : memref<64x256xf32, #tpu.memory_space<vmem>>, vector<64x256xf32>
    %cst_58 = arith.constant dense<0.000000e+00> : vector<8x256xf32>
    %176 = tpu.matmul %174, %175, %cst_58 {dimension_numbers = #tpu.dot_dimension_numbers<[1], [0], [0], [1], [0, 0, 1, 1], [], []>} : vector<8x64xf32>, vector<64x256xf32>, vector<8x256xf32> -> vector<8x256xf32>
    %c0_59 = arith.constant 0 : index
    %c0_60 = arith.constant 0 : index
    %177 = vector.load %arg3[%c0_59, %c0_60] : memref<64x256xf32, #tpu.memory_space<vmem>>, vector<64x256xf32>
    %cst_61 = arith.constant dense<0.000000e+00> : vector<8x256xf32>
    %178 = tpu.matmul %156, %177, %cst_61 {dimension_numbers = #tpu.dot_dimension_numbers<[1], [0], [0], [1], [0, 0, 1, 1], [], []>} : vector<8x64xf32>, vector<64x256xf32>, vector<8x256xf32> -> vector<8x256xf32>
    %179 = arith.addf %176, %178 : vector<8x256xf32>
    %180 = arith.addf %179, %8 : vector<8x256xf32>
    %181 = math.tanh %180 : vector<8x256xf32>
    %182 = arith.mulf %181, %2 : vector<8x256xf32>
    %183 = arith.addf %182, %5 : vector<8x256xf32>
    %184 = vector.extract_strided_slice %183 {offsets = [0, 0], sizes = [8, 64], strides = [1, 1]} : vector<8x256xf32> to vector<8x64xf32>
    %185 = vector.extract_strided_slice %183 {offsets = [0, 64], sizes = [8, 64], strides = [1, 1]} : vector<8x256xf32> to vector<8x64xf32>
    %186 = vector.extract_strided_slice %183 {offsets = [0, 128], sizes = [8, 64], strides = [1, 1]} : vector<8x256xf32> to vector<8x64xf32>
    %187 = vector.extract_strided_slice %183 {offsets = [0, 192], sizes = [8, 64], strides = [1, 1]} : vector<8x256xf32> to vector<8x64xf32>
    %188 = arith.mulf %185, %154 : vector<8x64xf32>
    %189 = arith.mulf %184, %186 : vector<8x64xf32>
    %190 = arith.addf %188, %189 : vector<8x64xf32>
    %191 = math.tanh %190 : vector<8x64xf32>
    %192 = arith.mulf %187, %191 : vector<8x64xf32>
    %c5_i32 = arith.constant 5 : i32
    %193 = arith.index_cast %c5_i32 : i32 to index
    %c0_62 = arith.constant 0 : index
    %c0_63 = arith.constant 0 : index
    %194 = vector.load %arg0[%193, %c0_62, %c0_63] : memref<16x8x256xf32, #tpu.memory_space<vmem>>, vector<1x8x256xf32>
    %195 = vector.shape_cast %194 : vector<1x8x256xf32> to vector<8x256xf32>
    %c0_64 = arith.constant 0 : index
    %c0_65 = arith.constant 0 : index
    %196 = vector.load %arg1[%c0_64, %c0_65] : memref<64x256xf32, #tpu.memory_space<vmem>>, vector<64x256xf32>
    %cst_66 = arith.constant dense<0.000000e+00> : vector<8x256xf32>
    %197 = tpu.matmul %174, %196, %cst_66 {dimension_numbers = #tpu.dot_dimension_numbers<[1], [0], [0], [1], [0, 0, 1, 1], [], []>} : vector<8x64xf32>, vector<64x256xf32>, vector<8x256xf32> -> vector<8x256xf32>
    %198 = arith.addf %195, %197 : vector<8x256xf32>
    %199 = math.tanh %198 : vector<8x256xf32>
    %200 = arith.mulf %199, %2 : vector<8x256xf32>
    %201 = arith.addf %200, %5 : vector<8x256xf32>
    %202 = vector.extract_strided_slice %201 {offsets = [0, 0], sizes = [8, 64], strides = [1, 1]} : vector<8x256xf32> to vector<8x64xf32>
    %203 = vector.extract_strided_slice %201 {offsets = [0, 64], sizes = [8, 64], strides = [1, 1]} : vector<8x256xf32> to vector<8x64xf32>
    %204 = vector.extract_strided_slice %201 {offsets = [0, 128], sizes = [8, 64], strides = [1, 1]} : vector<8x256xf32> to vector<8x64xf32>
    %205 = vector.extract_strided_slice %201 {offsets = [0, 192], sizes = [8, 64], strides = [1, 1]} : vector<8x256xf32> to vector<8x64xf32>
    %206 = arith.mulf %203, %172 : vector<8x64xf32>
    %207 = arith.mulf %202, %204 : vector<8x64xf32>
    %208 = arith.addf %206, %207 : vector<8x64xf32>
    %209 = math.tanh %208 : vector<8x64xf32>
    %210 = arith.mulf %205, %209 : vector<8x64xf32>
    %c0_67 = arith.constant 0 : index
    %c0_68 = arith.constant 0 : index
    %211 = vector.load %arg2[%c0_67, %c0_68] : memref<64x256xf32, #tpu.memory_space<vmem>>, vector<64x256xf32>
    %cst_69 = arith.constant dense<0.000000e+00> : vector<8x256xf32>
    %212 = tpu.matmul %210, %211, %cst_69 {dimension_numbers = #tpu.dot_dimension_numbers<[1], [0], [0], [1], [0, 0, 1, 1], [], []>} : vector<8x64xf32>, vector<64x256xf32>, vector<8x256xf32> -> vector<8x256xf32>
    %c0_70 = arith.constant 0 : index
    %c0_71 = arith.constant 0 : index
    %213 = vector.load %arg3[%c0_70, %c0_71] : memref<64x256xf32, #tpu.memory_space<vmem>>, vector<64x256xf32>
    %cst_72 = arith.constant dense<0.000000e+00> : vector<8x256xf32>
    %214 = tpu.matmul %192, %213, %cst_72 {dimension_numbers = #tpu.dot_dimension_numbers<[1], [0], [0], [1], [0, 0, 1, 1], [], []>} : vector<8x64xf32>, vector<64x256xf32>, vector<8x256xf32> -> vector<8x256xf32>
    %215 = arith.addf %212, %214 : vector<8x256xf32>
    %216 = arith.addf %215, %8 : vector<8x256xf32>
    %217 = math.tanh %216 : vector<8x256xf32>
    %218 = arith.mulf %217, %2 : vector<8x256xf32>
    %219 = arith.addf %218, %5 : vector<8x256xf32>
    %220 = vector.extract_strided_slice %219 {offsets = [0, 0], sizes = [8, 64], strides = [1, 1]} : vector<8x256xf32> to vector<8x64xf32>
    %221 = vector.extract_strided_slice %219 {offsets = [0, 64], sizes = [8, 64], strides = [1, 1]} : vector<8x256xf32> to vector<8x64xf32>
    %222 = vector.extract_strided_slice %219 {offsets = [0, 128], sizes = [8, 64], strides = [1, 1]} : vector<8x256xf32> to vector<8x64xf32>
    %223 = vector.extract_strided_slice %219 {offsets = [0, 192], sizes = [8, 64], strides = [1, 1]} : vector<8x256xf32> to vector<8x64xf32>
    %224 = arith.mulf %221, %190 : vector<8x64xf32>
    %225 = arith.mulf %220, %222 : vector<8x64xf32>
    %226 = arith.addf %224, %225 : vector<8x64xf32>
    %227 = math.tanh %226 : vector<8x64xf32>
    %228 = arith.mulf %223, %227 : vector<8x64xf32>
    %c6_i32 = arith.constant 6 : i32
    %229 = arith.index_cast %c6_i32 : i32 to index
    %c0_73 = arith.constant 0 : index
    %c0_74 = arith.constant 0 : index
    %230 = vector.load %arg0[%229, %c0_73, %c0_74] : memref<16x8x256xf32, #tpu.memory_space<vmem>>, vector<1x8x256xf32>
    %231 = vector.shape_cast %230 : vector<1x8x256xf32> to vector<8x256xf32>
    %c0_75 = arith.constant 0 : index
    %c0_76 = arith.constant 0 : index
    %232 = vector.load %arg1[%c0_75, %c0_76] : memref<64x256xf32, #tpu.memory_space<vmem>>, vector<64x256xf32>
    %cst_77 = arith.constant dense<0.000000e+00> : vector<8x256xf32>
    %233 = tpu.matmul %210, %232, %cst_77 {dimension_numbers = #tpu.dot_dimension_numbers<[1], [0], [0], [1], [0, 0, 1, 1], [], []>} : vector<8x64xf32>, vector<64x256xf32>, vector<8x256xf32> -> vector<8x256xf32>
    %234 = arith.addf %231, %233 : vector<8x256xf32>
    %235 = math.tanh %234 : vector<8x256xf32>
    %236 = arith.mulf %235, %2 : vector<8x256xf32>
    %237 = arith.addf %236, %5 : vector<8x256xf32>
    %238 = vector.extract_strided_slice %237 {offsets = [0, 0], sizes = [8, 64], strides = [1, 1]} : vector<8x256xf32> to vector<8x64xf32>
    %239 = vector.extract_strided_slice %237 {offsets = [0, 64], sizes = [8, 64], strides = [1, 1]} : vector<8x256xf32> to vector<8x64xf32>
    %240 = vector.extract_strided_slice %237 {offsets = [0, 128], sizes = [8, 64], strides = [1, 1]} : vector<8x256xf32> to vector<8x64xf32>
    %241 = vector.extract_strided_slice %237 {offsets = [0, 192], sizes = [8, 64], strides = [1, 1]} : vector<8x256xf32> to vector<8x64xf32>
    %242 = arith.mulf %239, %208 : vector<8x64xf32>
    %243 = arith.mulf %238, %240 : vector<8x64xf32>
    %244 = arith.addf %242, %243 : vector<8x64xf32>
    %245 = math.tanh %244 : vector<8x64xf32>
    %246 = arith.mulf %241, %245 : vector<8x64xf32>
    %c0_78 = arith.constant 0 : index
    %c0_79 = arith.constant 0 : index
    %247 = vector.load %arg2[%c0_78, %c0_79] : memref<64x256xf32, #tpu.memory_space<vmem>>, vector<64x256xf32>
    %cst_80 = arith.constant dense<0.000000e+00> : vector<8x256xf32>
    %248 = tpu.matmul %246, %247, %cst_80 {dimension_numbers = #tpu.dot_dimension_numbers<[1], [0], [0], [1], [0, 0, 1, 1], [], []>} : vector<8x64xf32>, vector<64x256xf32>, vector<8x256xf32> -> vector<8x256xf32>
    %c0_81 = arith.constant 0 : index
    %c0_82 = arith.constant 0 : index
    %249 = vector.load %arg3[%c0_81, %c0_82] : memref<64x256xf32, #tpu.memory_space<vmem>>, vector<64x256xf32>
    %cst_83 = arith.constant dense<0.000000e+00> : vector<8x256xf32>
    %250 = tpu.matmul %228, %249, %cst_83 {dimension_numbers = #tpu.dot_dimension_numbers<[1], [0], [0], [1], [0, 0, 1, 1], [], []>} : vector<8x64xf32>, vector<64x256xf32>, vector<8x256xf32> -> vector<8x256xf32>
    %251 = arith.addf %248, %250 : vector<8x256xf32>
    %252 = arith.addf %251, %8 : vector<8x256xf32>
    %253 = math.tanh %252 : vector<8x256xf32>
    %254 = arith.mulf %253, %2 : vector<8x256xf32>
    %255 = arith.addf %254, %5 : vector<8x256xf32>
    %256 = vector.extract_strided_slice %255 {offsets = [0, 0], sizes = [8, 64], strides = [1, 1]} : vector<8x256xf32> to vector<8x64xf32>
    %257 = vector.extract_strided_slice %255 {offsets = [0, 64], sizes = [8, 64], strides = [1, 1]} : vector<8x256xf32> to vector<8x64xf32>
    %258 = vector.extract_strided_slice %255 {offsets = [0, 128], sizes = [8, 64], strides = [1, 1]} : vector<8x256xf32> to vector<8x64xf32>
    %259 = vector.extract_strided_slice %255 {offsets = [0, 192], sizes = [8, 64], strides = [1, 1]} : vector<8x256xf32> to vector<8x64xf32>
    %260 = arith.mulf %257, %226 : vector<8x64xf32>
    %261 = arith.mulf %256, %258 : vector<8x64xf32>
    %262 = arith.addf %260, %261 : vector<8x64xf32>
    %263 = math.tanh %262 : vector<8x64xf32>
    %264 = arith.mulf %259, %263 : vector<8x64xf32>
    %c7_i32 = arith.constant 7 : i32
    %265 = arith.index_cast %c7_i32 : i32 to index
    %c0_84 = arith.constant 0 : index
    %c0_85 = arith.constant 0 : index
    %266 = vector.load %arg0[%265, %c0_84, %c0_85] : memref<16x8x256xf32, #tpu.memory_space<vmem>>, vector<1x8x256xf32>
    %267 = vector.shape_cast %266 : vector<1x8x256xf32> to vector<8x256xf32>
    %c0_86 = arith.constant 0 : index
    %c0_87 = arith.constant 0 : index
    %268 = vector.load %arg1[%c0_86, %c0_87] : memref<64x256xf32, #tpu.memory_space<vmem>>, vector<64x256xf32>
    %cst_88 = arith.constant dense<0.000000e+00> : vector<8x256xf32>
    %269 = tpu.matmul %246, %268, %cst_88 {dimension_numbers = #tpu.dot_dimension_numbers<[1], [0], [0], [1], [0, 0, 1, 1], [], []>} : vector<8x64xf32>, vector<64x256xf32>, vector<8x256xf32> -> vector<8x256xf32>
    %270 = arith.addf %267, %269 : vector<8x256xf32>
    %271 = math.tanh %270 : vector<8x256xf32>
    %272 = arith.mulf %271, %2 : vector<8x256xf32>
    %273 = arith.addf %272, %5 : vector<8x256xf32>
    %274 = vector.extract_strided_slice %273 {offsets = [0, 0], sizes = [8, 64], strides = [1, 1]} : vector<8x256xf32> to vector<8x64xf32>
    %275 = vector.extract_strided_slice %273 {offsets = [0, 64], sizes = [8, 64], strides = [1, 1]} : vector<8x256xf32> to vector<8x64xf32>
    %276 = vector.extract_strided_slice %273 {offsets = [0, 128], sizes = [8, 64], strides = [1, 1]} : vector<8x256xf32> to vector<8x64xf32>
    %277 = vector.extract_strided_slice %273 {offsets = [0, 192], sizes = [8, 64], strides = [1, 1]} : vector<8x256xf32> to vector<8x64xf32>
    %278 = arith.mulf %275, %244 : vector<8x64xf32>
    %279 = arith.mulf %274, %276 : vector<8x64xf32>
    %280 = arith.addf %278, %279 : vector<8x64xf32>
    %281 = math.tanh %280 : vector<8x64xf32>
    %282 = arith.mulf %277, %281 : vector<8x64xf32>
    %c0_89 = arith.constant 0 : index
    %c0_90 = arith.constant 0 : index
    %283 = vector.load %arg2[%c0_89, %c0_90] : memref<64x256xf32, #tpu.memory_space<vmem>>, vector<64x256xf32>
    %cst_91 = arith.constant dense<0.000000e+00> : vector<8x256xf32>
    %284 = tpu.matmul %282, %283, %cst_91 {dimension_numbers = #tpu.dot_dimension_numbers<[1], [0], [0], [1], [0, 0, 1, 1], [], []>} : vector<8x64xf32>, vector<64x256xf32>, vector<8x256xf32> -> vector<8x256xf32>
    %c0_92 = arith.constant 0 : index
    %c0_93 = arith.constant 0 : index
    %285 = vector.load %arg3[%c0_92, %c0_93] : memref<64x256xf32, #tpu.memory_space<vmem>>, vector<64x256xf32>
    %cst_94 = arith.constant dense<0.000000e+00> : vector<8x256xf32>
    %286 = tpu.matmul %264, %285, %cst_94 {dimension_numbers = #tpu.dot_dimension_numbers<[1], [0], [0], [1], [0, 0, 1, 1], [], []>} : vector<8x64xf32>, vector<64x256xf32>, vector<8x256xf32> -> vector<8x256xf32>
    %287 = arith.addf %284, %286 : vector<8x256xf32>
    %288 = arith.addf %287, %8 : vector<8x256xf32>
    %289 = math.tanh %288 : vector<8x256xf32>
    %290 = arith.mulf %289, %2 : vector<8x256xf32>
    %291 = arith.addf %290, %5 : vector<8x256xf32>
    %292 = vector.extract_strided_slice %291 {offsets = [0, 0], sizes = [8, 64], strides = [1, 1]} : vector<8x256xf32> to vector<8x64xf32>
    %293 = vector.extract_strided_slice %291 {offsets = [0, 64], sizes = [8, 64], strides = [1, 1]} : vector<8x256xf32> to vector<8x64xf32>
    %294 = vector.extract_strided_slice %291 {offsets = [0, 128], sizes = [8, 64], strides = [1, 1]} : vector<8x256xf32> to vector<8x64xf32>
    %295 = vector.extract_strided_slice %291 {offsets = [0, 192], sizes = [8, 64], strides = [1, 1]} : vector<8x256xf32> to vector<8x64xf32>
    %296 = arith.mulf %293, %262 : vector<8x64xf32>
    %297 = arith.mulf %292, %294 : vector<8x64xf32>
    %298 = arith.addf %296, %297 : vector<8x64xf32>
    %299 = math.tanh %298 : vector<8x64xf32>
    %300 = arith.mulf %295, %299 : vector<8x64xf32>
    %c8_i32 = arith.constant 8 : i32
    %301 = arith.index_cast %c8_i32 : i32 to index
    %c0_95 = arith.constant 0 : index
    %c0_96 = arith.constant 0 : index
    %302 = vector.load %arg0[%301, %c0_95, %c0_96] : memref<16x8x256xf32, #tpu.memory_space<vmem>>, vector<1x8x256xf32>
    %303 = vector.shape_cast %302 : vector<1x8x256xf32> to vector<8x256xf32>
    %c0_97 = arith.constant 0 : index
    %c0_98 = arith.constant 0 : index
    %304 = vector.load %arg1[%c0_97, %c0_98] : memref<64x256xf32, #tpu.memory_space<vmem>>, vector<64x256xf32>
    %cst_99 = arith.constant dense<0.000000e+00> : vector<8x256xf32>
    %305 = tpu.matmul %282, %304, %cst_99 {dimension_numbers = #tpu.dot_dimension_numbers<[1], [0], [0], [1], [0, 0, 1, 1], [], []>} : vector<8x64xf32>, vector<64x256xf32>, vector<8x256xf32> -> vector<8x256xf32>
    %306 = arith.addf %303, %305 : vector<8x256xf32>
    %307 = math.tanh %306 : vector<8x256xf32>
    %308 = arith.mulf %307, %2 : vector<8x256xf32>
    %309 = arith.addf %308, %5 : vector<8x256xf32>
    %310 = vector.extract_strided_slice %309 {offsets = [0, 0], sizes = [8, 64], strides = [1, 1]} : vector<8x256xf32> to vector<8x64xf32>
    %311 = vector.extract_strided_slice %309 {offsets = [0, 64], sizes = [8, 64], strides = [1, 1]} : vector<8x256xf32> to vector<8x64xf32>
    %312 = vector.extract_strided_slice %309 {offsets = [0, 128], sizes = [8, 64], strides = [1, 1]} : vector<8x256xf32> to vector<8x64xf32>
    %313 = vector.extract_strided_slice %309 {offsets = [0, 192], sizes = [8, 64], strides = [1, 1]} : vector<8x256xf32> to vector<8x64xf32>
    %314 = arith.mulf %311, %280 : vector<8x64xf32>
    %315 = arith.mulf %310, %312 : vector<8x64xf32>
    %316 = arith.addf %314, %315 : vector<8x64xf32>
    %317 = math.tanh %316 : vector<8x64xf32>
    %318 = arith.mulf %313, %317 : vector<8x64xf32>
    %c0_100 = arith.constant 0 : index
    %c0_101 = arith.constant 0 : index
    %319 = vector.load %arg2[%c0_100, %c0_101] : memref<64x256xf32, #tpu.memory_space<vmem>>, vector<64x256xf32>
    %cst_102 = arith.constant dense<0.000000e+00> : vector<8x256xf32>
    %320 = tpu.matmul %318, %319, %cst_102 {dimension_numbers = #tpu.dot_dimension_numbers<[1], [0], [0], [1], [0, 0, 1, 1], [], []>} : vector<8x64xf32>, vector<64x256xf32>, vector<8x256xf32> -> vector<8x256xf32>
    %c0_103 = arith.constant 0 : index
    %c0_104 = arith.constant 0 : index
    %321 = vector.load %arg3[%c0_103, %c0_104] : memref<64x256xf32, #tpu.memory_space<vmem>>, vector<64x256xf32>
    %cst_105 = arith.constant dense<0.000000e+00> : vector<8x256xf32>
    %322 = tpu.matmul %300, %321, %cst_105 {dimension_numbers = #tpu.dot_dimension_numbers<[1], [0], [0], [1], [0, 0, 1, 1], [], []>} : vector<8x64xf32>, vector<64x256xf32>, vector<8x256xf32> -> vector<8x256xf32>
    %323 = arith.addf %320, %322 : vector<8x256xf32>
    %324 = arith.addf %323, %8 : vector<8x256xf32>
    %325 = math.tanh %324 : vector<8x256xf32>
    %326 = arith.mulf %325, %2 : vector<8x256xf32>
    %327 = arith.addf %326, %5 : vector<8x256xf32>
    %328 = vector.extract_strided_slice %327 {offsets = [0, 0], sizes = [8, 64], strides = [1, 1]} : vector<8x256xf32> to vector<8x64xf32>
    %329 = vector.extract_strided_slice %327 {offsets = [0, 64], sizes = [8, 64], strides = [1, 1]} : vector<8x256xf32> to vector<8x64xf32>
    %330 = vector.extract_strided_slice %327 {offsets = [0, 128], sizes = [8, 64], strides = [1, 1]} : vector<8x256xf32> to vector<8x64xf32>
    %331 = vector.extract_strided_slice %327 {offsets = [0, 192], sizes = [8, 64], strides = [1, 1]} : vector<8x256xf32> to vector<8x64xf32>
    %332 = arith.mulf %329, %298 : vector<8x64xf32>
    %333 = arith.mulf %328, %330 : vector<8x64xf32>
    %334 = arith.addf %332, %333 : vector<8x64xf32>
    %335 = math.tanh %334 : vector<8x64xf32>
    %336 = arith.mulf %331, %335 : vector<8x64xf32>
    %c9_i32 = arith.constant 9 : i32
    %337 = arith.index_cast %c9_i32 : i32 to index
    %c0_106 = arith.constant 0 : index
    %c0_107 = arith.constant 0 : index
    %338 = vector.load %arg0[%337, %c0_106, %c0_107] : memref<16x8x256xf32, #tpu.memory_space<vmem>>, vector<1x8x256xf32>
    %339 = vector.shape_cast %338 : vector<1x8x256xf32> to vector<8x256xf32>
    %c0_108 = arith.constant 0 : index
    %c0_109 = arith.constant 0 : index
    %340 = vector.load %arg1[%c0_108, %c0_109] : memref<64x256xf32, #tpu.memory_space<vmem>>, vector<64x256xf32>
    %cst_110 = arith.constant dense<0.000000e+00> : vector<8x256xf32>
    %341 = tpu.matmul %318, %340, %cst_110 {dimension_numbers = #tpu.dot_dimension_numbers<[1], [0], [0], [1], [0, 0, 1, 1], [], []>} : vector<8x64xf32>, vector<64x256xf32>, vector<8x256xf32> -> vector<8x256xf32>
    %342 = arith.addf %339, %341 : vector<8x256xf32>
    %343 = math.tanh %342 : vector<8x256xf32>
    %344 = arith.mulf %343, %2 : vector<8x256xf32>
    %345 = arith.addf %344, %5 : vector<8x256xf32>
    %346 = vector.extract_strided_slice %345 {offsets = [0, 0], sizes = [8, 64], strides = [1, 1]} : vector<8x256xf32> to vector<8x64xf32>
    %347 = vector.extract_strided_slice %345 {offsets = [0, 64], sizes = [8, 64], strides = [1, 1]} : vector<8x256xf32> to vector<8x64xf32>
    %348 = vector.extract_strided_slice %345 {offsets = [0, 128], sizes = [8, 64], strides = [1, 1]} : vector<8x256xf32> to vector<8x64xf32>
    %349 = vector.extract_strided_slice %345 {offsets = [0, 192], sizes = [8, 64], strides = [1, 1]} : vector<8x256xf32> to vector<8x64xf32>
    %350 = arith.mulf %347, %316 : vector<8x64xf32>
    %351 = arith.mulf %346, %348 : vector<8x64xf32>
    %352 = arith.addf %350, %351 : vector<8x64xf32>
    %353 = math.tanh %352 : vector<8x64xf32>
    %354 = arith.mulf %349, %353 : vector<8x64xf32>
    %c0_111 = arith.constant 0 : index
    %c0_112 = arith.constant 0 : index
    %355 = vector.load %arg2[%c0_111, %c0_112] : memref<64x256xf32, #tpu.memory_space<vmem>>, vector<64x256xf32>
    %cst_113 = arith.constant dense<0.000000e+00> : vector<8x256xf32>
    %356 = tpu.matmul %354, %355, %cst_113 {dimension_numbers = #tpu.dot_dimension_numbers<[1], [0], [0], [1], [0, 0, 1, 1], [], []>} : vector<8x64xf32>, vector<64x256xf32>, vector<8x256xf32> -> vector<8x256xf32>
    %c0_114 = arith.constant 0 : index
    %c0_115 = arith.constant 0 : index
    %357 = vector.load %arg3[%c0_114, %c0_115] : memref<64x256xf32, #tpu.memory_space<vmem>>, vector<64x256xf32>
    %cst_116 = arith.constant dense<0.000000e+00> : vector<8x256xf32>
    %358 = tpu.matmul %336, %357, %cst_116 {dimension_numbers = #tpu.dot_dimension_numbers<[1], [0], [0], [1], [0, 0, 1, 1], [], []>} : vector<8x64xf32>, vector<64x256xf32>, vector<8x256xf32> -> vector<8x256xf32>
    %359 = arith.addf %356, %358 : vector<8x256xf32>
    %360 = arith.addf %359, %8 : vector<8x256xf32>
    %361 = math.tanh %360 : vector<8x256xf32>
    %362 = arith.mulf %361, %2 : vector<8x256xf32>
    %363 = arith.addf %362, %5 : vector<8x256xf32>
    %364 = vector.extract_strided_slice %363 {offsets = [0, 0], sizes = [8, 64], strides = [1, 1]} : vector<8x256xf32> to vector<8x64xf32>
    %365 = vector.extract_strided_slice %363 {offsets = [0, 64], sizes = [8, 64], strides = [1, 1]} : vector<8x256xf32> to vector<8x64xf32>
    %366 = vector.extract_strided_slice %363 {offsets = [0, 128], sizes = [8, 64], strides = [1, 1]} : vector<8x256xf32> to vector<8x64xf32>
    %367 = vector.extract_strided_slice %363 {offsets = [0, 192], sizes = [8, 64], strides = [1, 1]} : vector<8x256xf32> to vector<8x64xf32>
    %368 = arith.mulf %365, %334 : vector<8x64xf32>
    %369 = arith.mulf %364, %366 : vector<8x64xf32>
    %370 = arith.addf %368, %369 : vector<8x64xf32>
    %371 = math.tanh %370 : vector<8x64xf32>
    %372 = arith.mulf %367, %371 : vector<8x64xf32>
    %c10_i32 = arith.constant 10 : i32
    %373 = arith.index_cast %c10_i32 : i32 to index
    %c0_117 = arith.constant 0 : index
    %c0_118 = arith.constant 0 : index
    %374 = vector.load %arg0[%373, %c0_117, %c0_118] : memref<16x8x256xf32, #tpu.memory_space<vmem>>, vector<1x8x256xf32>
    %375 = vector.shape_cast %374 : vector<1x8x256xf32> to vector<8x256xf32>
    %c0_119 = arith.constant 0 : index
    %c0_120 = arith.constant 0 : index
    %376 = vector.load %arg1[%c0_119, %c0_120] : memref<64x256xf32, #tpu.memory_space<vmem>>, vector<64x256xf32>
    %cst_121 = arith.constant dense<0.000000e+00> : vector<8x256xf32>
    %377 = tpu.matmul %354, %376, %cst_121 {dimension_numbers = #tpu.dot_dimension_numbers<[1], [0], [0], [1], [0, 0, 1, 1], [], []>} : vector<8x64xf32>, vector<64x256xf32>, vector<8x256xf32> -> vector<8x256xf32>
    %378 = arith.addf %375, %377 : vector<8x256xf32>
    %379 = math.tanh %378 : vector<8x256xf32>
    %380 = arith.mulf %379, %2 : vector<8x256xf32>
    %381 = arith.addf %380, %5 : vector<8x256xf32>
    %382 = vector.extract_strided_slice %381 {offsets = [0, 0], sizes = [8, 64], strides = [1, 1]} : vector<8x256xf32> to vector<8x64xf32>
    %383 = vector.extract_strided_slice %381 {offsets = [0, 64], sizes = [8, 64], strides = [1, 1]} : vector<8x256xf32> to vector<8x64xf32>
    %384 = vector.extract_strided_slice %381 {offsets = [0, 128], sizes = [8, 64], strides = [1, 1]} : vector<8x256xf32> to vector<8x64xf32>
    %385 = vector.extract_strided_slice %381 {offsets = [0, 192], sizes = [8, 64], strides = [1, 1]} : vector<8x256xf32> to vector<8x64xf32>
    %386 = arith.mulf %383, %352 : vector<8x64xf32>
    %387 = arith.mulf %382, %384 : vector<8x64xf32>
    %388 = arith.addf %386, %387 : vector<8x64xf32>
    %389 = math.tanh %388 : vector<8x64xf32>
    %390 = arith.mulf %385, %389 : vector<8x64xf32>
    %c0_122 = arith.constant 0 : index
    %c0_123 = arith.constant 0 : index
    %391 = vector.load %arg2[%c0_122, %c0_123] : memref<64x256xf32, #tpu.memory_space<vmem>>, vector<64x256xf32>
    %cst_124 = arith.constant dense<0.000000e+00> : vector<8x256xf32>
    %392 = tpu.matmul %390, %391, %cst_124 {dimension_numbers = #tpu.dot_dimension_numbers<[1], [0], [0], [1], [0, 0, 1, 1], [], []>} : vector<8x64xf32>, vector<64x256xf32>, vector<8x256xf32> -> vector<8x256xf32>
    %c0_125 = arith.constant 0 : index
    %c0_126 = arith.constant 0 : index
    %393 = vector.load %arg3[%c0_125, %c0_126] : memref<64x256xf32, #tpu.memory_space<vmem>>, vector<64x256xf32>
    %cst_127 = arith.constant dense<0.000000e+00> : vector<8x256xf32>
    %394 = tpu.matmul %372, %393, %cst_127 {dimension_numbers = #tpu.dot_dimension_numbers<[1], [0], [0], [1], [0, 0, 1, 1], [], []>} : vector<8x64xf32>, vector<64x256xf32>, vector<8x256xf32> -> vector<8x256xf32>
    %395 = arith.addf %392, %394 : vector<8x256xf32>
    %396 = arith.addf %395, %8 : vector<8x256xf32>
    %397 = math.tanh %396 : vector<8x256xf32>
    %398 = arith.mulf %397, %2 : vector<8x256xf32>
    %399 = arith.addf %398, %5 : vector<8x256xf32>
    %400 = vector.extract_strided_slice %399 {offsets = [0, 0], sizes = [8, 64], strides = [1, 1]} : vector<8x256xf32> to vector<8x64xf32>
    %401 = vector.extract_strided_slice %399 {offsets = [0, 64], sizes = [8, 64], strides = [1, 1]} : vector<8x256xf32> to vector<8x64xf32>
    %402 = vector.extract_strided_slice %399 {offsets = [0, 128], sizes = [8, 64], strides = [1, 1]} : vector<8x256xf32> to vector<8x64xf32>
    %403 = vector.extract_strided_slice %399 {offsets = [0, 192], sizes = [8, 64], strides = [1, 1]} : vector<8x256xf32> to vector<8x64xf32>
    %404 = arith.mulf %401, %370 : vector<8x64xf32>
    %405 = arith.mulf %400, %402 : vector<8x64xf32>
    %406 = arith.addf %404, %405 : vector<8x64xf32>
    %407 = math.tanh %406 : vector<8x64xf32>
    %408 = arith.mulf %403, %407 : vector<8x64xf32>
    %c11_i32 = arith.constant 11 : i32
    %409 = arith.index_cast %c11_i32 : i32 to index
    %c0_128 = arith.constant 0 : index
    %c0_129 = arith.constant 0 : index
    %410 = vector.load %arg0[%409, %c0_128, %c0_129] : memref<16x8x256xf32, #tpu.memory_space<vmem>>, vector<1x8x256xf32>
    %411 = vector.shape_cast %410 : vector<1x8x256xf32> to vector<8x256xf32>
    %c0_130 = arith.constant 0 : index
    %c0_131 = arith.constant 0 : index
    %412 = vector.load %arg1[%c0_130, %c0_131] : memref<64x256xf32, #tpu.memory_space<vmem>>, vector<64x256xf32>
    %cst_132 = arith.constant dense<0.000000e+00> : vector<8x256xf32>
    %413 = tpu.matmul %390, %412, %cst_132 {dimension_numbers = #tpu.dot_dimension_numbers<[1], [0], [0], [1], [0, 0, 1, 1], [], []>} : vector<8x64xf32>, vector<64x256xf32>, vector<8x256xf32> -> vector<8x256xf32>
    %414 = arith.addf %411, %413 : vector<8x256xf32>
    %415 = math.tanh %414 : vector<8x256xf32>
    %416 = arith.mulf %415, %2 : vector<8x256xf32>
    %417 = arith.addf %416, %5 : vector<8x256xf32>
    %418 = vector.extract_strided_slice %417 {offsets = [0, 0], sizes = [8, 64], strides = [1, 1]} : vector<8x256xf32> to vector<8x64xf32>
    %419 = vector.extract_strided_slice %417 {offsets = [0, 64], sizes = [8, 64], strides = [1, 1]} : vector<8x256xf32> to vector<8x64xf32>
    %420 = vector.extract_strided_slice %417 {offsets = [0, 128], sizes = [8, 64], strides = [1, 1]} : vector<8x256xf32> to vector<8x64xf32>
    %421 = vector.extract_strided_slice %417 {offsets = [0, 192], sizes = [8, 64], strides = [1, 1]} : vector<8x256xf32> to vector<8x64xf32>
    %422 = arith.mulf %419, %388 : vector<8x64xf32>
    %423 = arith.mulf %418, %420 : vector<8x64xf32>
    %424 = arith.addf %422, %423 : vector<8x64xf32>
    %425 = math.tanh %424 : vector<8x64xf32>
    %426 = arith.mulf %421, %425 : vector<8x64xf32>
    %c0_133 = arith.constant 0 : index
    %c0_134 = arith.constant 0 : index
    %427 = vector.load %arg2[%c0_133, %c0_134] : memref<64x256xf32, #tpu.memory_space<vmem>>, vector<64x256xf32>
    %cst_135 = arith.constant dense<0.000000e+00> : vector<8x256xf32>
    %428 = tpu.matmul %426, %427, %cst_135 {dimension_numbers = #tpu.dot_dimension_numbers<[1], [0], [0], [1], [0, 0, 1, 1], [], []>} : vector<8x64xf32>, vector<64x256xf32>, vector<8x256xf32> -> vector<8x256xf32>
    %c0_136 = arith.constant 0 : index
    %c0_137 = arith.constant 0 : index
    %429 = vector.load %arg3[%c0_136, %c0_137] : memref<64x256xf32, #tpu.memory_space<vmem>>, vector<64x256xf32>
    %cst_138 = arith.constant dense<0.000000e+00> : vector<8x256xf32>
    %430 = tpu.matmul %408, %429, %cst_138 {dimension_numbers = #tpu.dot_dimension_numbers<[1], [0], [0], [1], [0, 0, 1, 1], [], []>} : vector<8x64xf32>, vector<64x256xf32>, vector<8x256xf32> -> vector<8x256xf32>
    %431 = arith.addf %428, %430 : vector<8x256xf32>
    %432 = arith.addf %431, %8 : vector<8x256xf32>
    %433 = math.tanh %432 : vector<8x256xf32>
    %434 = arith.mulf %433, %2 : vector<8x256xf32>
    %435 = arith.addf %434, %5 : vector<8x256xf32>
    %436 = vector.extract_strided_slice %435 {offsets = [0, 0], sizes = [8, 64], strides = [1, 1]} : vector<8x256xf32> to vector<8x64xf32>
    %437 = vector.extract_strided_slice %435 {offsets = [0, 64], sizes = [8, 64], strides = [1, 1]} : vector<8x256xf32> to vector<8x64xf32>
    %438 = vector.extract_strided_slice %435 {offsets = [0, 128], sizes = [8, 64], strides = [1, 1]} : vector<8x256xf32> to vector<8x64xf32>
    %439 = vector.extract_strided_slice %435 {offsets = [0, 192], sizes = [8, 64], strides = [1, 1]} : vector<8x256xf32> to vector<8x64xf32>
    %440 = arith.mulf %437, %406 : vector<8x64xf32>
    %441 = arith.mulf %436, %438 : vector<8x64xf32>
    %442 = arith.addf %440, %441 : vector<8x64xf32>
    %443 = math.tanh %442 : vector<8x64xf32>
    %444 = arith.mulf %439, %443 : vector<8x64xf32>
    %c12_i32 = arith.constant 12 : i32
    %445 = arith.index_cast %c12_i32 : i32 to index
    %c0_139 = arith.constant 0 : index
    %c0_140 = arith.constant 0 : index
    %446 = vector.load %arg0[%445, %c0_139, %c0_140] : memref<16x8x256xf32, #tpu.memory_space<vmem>>, vector<1x8x256xf32>
    %447 = vector.shape_cast %446 : vector<1x8x256xf32> to vector<8x256xf32>
    %c0_141 = arith.constant 0 : index
    %c0_142 = arith.constant 0 : index
    %448 = vector.load %arg1[%c0_141, %c0_142] : memref<64x256xf32, #tpu.memory_space<vmem>>, vector<64x256xf32>
    %cst_143 = arith.constant dense<0.000000e+00> : vector<8x256xf32>
    %449 = tpu.matmul %426, %448, %cst_143 {dimension_numbers = #tpu.dot_dimension_numbers<[1], [0], [0], [1], [0, 0, 1, 1], [], []>} : vector<8x64xf32>, vector<64x256xf32>, vector<8x256xf32> -> vector<8x256xf32>
    %450 = arith.addf %447, %449 : vector<8x256xf32>
    %451 = math.tanh %450 : vector<8x256xf32>
    %452 = arith.mulf %451, %2 : vector<8x256xf32>
    %453 = arith.addf %452, %5 : vector<8x256xf32>
    %454 = vector.extract_strided_slice %453 {offsets = [0, 0], sizes = [8, 64], strides = [1, 1]} : vector<8x256xf32> to vector<8x64xf32>
    %455 = vector.extract_strided_slice %453 {offsets = [0, 64], sizes = [8, 64], strides = [1, 1]} : vector<8x256xf32> to vector<8x64xf32>
    %456 = vector.extract_strided_slice %453 {offsets = [0, 128], sizes = [8, 64], strides = [1, 1]} : vector<8x256xf32> to vector<8x64xf32>
    %457 = vector.extract_strided_slice %453 {offsets = [0, 192], sizes = [8, 64], strides = [1, 1]} : vector<8x256xf32> to vector<8x64xf32>
    %458 = arith.mulf %455, %424 : vector<8x64xf32>
    %459 = arith.mulf %454, %456 : vector<8x64xf32>
    %460 = arith.addf %458, %459 : vector<8x64xf32>
    %461 = math.tanh %460 : vector<8x64xf32>
    %462 = arith.mulf %457, %461 : vector<8x64xf32>
    %c0_144 = arith.constant 0 : index
    %c0_145 = arith.constant 0 : index
    %463 = vector.load %arg2[%c0_144, %c0_145] : memref<64x256xf32, #tpu.memory_space<vmem>>, vector<64x256xf32>
    %cst_146 = arith.constant dense<0.000000e+00> : vector<8x256xf32>
    %464 = tpu.matmul %462, %463, %cst_146 {dimension_numbers = #tpu.dot_dimension_numbers<[1], [0], [0], [1], [0, 0, 1, 1], [], []>} : vector<8x64xf32>, vector<64x256xf32>, vector<8x256xf32> -> vector<8x256xf32>
    %c0_147 = arith.constant 0 : index
    %c0_148 = arith.constant 0 : index
    %465 = vector.load %arg3[%c0_147, %c0_148] : memref<64x256xf32, #tpu.memory_space<vmem>>, vector<64x256xf32>
    %cst_149 = arith.constant dense<0.000000e+00> : vector<8x256xf32>
    %466 = tpu.matmul %444, %465, %cst_149 {dimension_numbers = #tpu.dot_dimension_numbers<[1], [0], [0], [1], [0, 0, 1, 1], [], []>} : vector<8x64xf32>, vector<64x256xf32>, vector<8x256xf32> -> vector<8x256xf32>
    %467 = arith.addf %464, %466 : vector<8x256xf32>
    %468 = arith.addf %467, %8 : vector<8x256xf32>
    %469 = math.tanh %468 : vector<8x256xf32>
    %470 = arith.mulf %469, %2 : vector<8x256xf32>
    %471 = arith.addf %470, %5 : vector<8x256xf32>
    %472 = vector.extract_strided_slice %471 {offsets = [0, 0], sizes = [8, 64], strides = [1, 1]} : vector<8x256xf32> to vector<8x64xf32>
    %473 = vector.extract_strided_slice %471 {offsets = [0, 64], sizes = [8, 64], strides = [1, 1]} : vector<8x256xf32> to vector<8x64xf32>
    %474 = vector.extract_strided_slice %471 {offsets = [0, 128], sizes = [8, 64], strides = [1, 1]} : vector<8x256xf32> to vector<8x64xf32>
    %475 = vector.extract_strided_slice %471 {offsets = [0, 192], sizes = [8, 64], strides = [1, 1]} : vector<8x256xf32> to vector<8x64xf32>
    %476 = arith.mulf %473, %442 : vector<8x64xf32>
    %477 = arith.mulf %472, %474 : vector<8x64xf32>
    %478 = arith.addf %476, %477 : vector<8x64xf32>
    %479 = math.tanh %478 : vector<8x64xf32>
    %480 = arith.mulf %475, %479 : vector<8x64xf32>
    %c13_i32 = arith.constant 13 : i32
    %481 = arith.index_cast %c13_i32 : i32 to index
    %c0_150 = arith.constant 0 : index
    %c0_151 = arith.constant 0 : index
    %482 = vector.load %arg0[%481, %c0_150, %c0_151] : memref<16x8x256xf32, #tpu.memory_space<vmem>>, vector<1x8x256xf32>
    %483 = vector.shape_cast %482 : vector<1x8x256xf32> to vector<8x256xf32>
    %c0_152 = arith.constant 0 : index
    %c0_153 = arith.constant 0 : index
    %484 = vector.load %arg1[%c0_152, %c0_153] : memref<64x256xf32, #tpu.memory_space<vmem>>, vector<64x256xf32>
    %cst_154 = arith.constant dense<0.000000e+00> : vector<8x256xf32>
    %485 = tpu.matmul %462, %484, %cst_154 {dimension_numbers = #tpu.dot_dimension_numbers<[1], [0], [0], [1], [0, 0, 1, 1], [], []>} : vector<8x64xf32>, vector<64x256xf32>, vector<8x256xf32> -> vector<8x256xf32>
    %486 = arith.addf %483, %485 : vector<8x256xf32>
    %487 = math.tanh %486 : vector<8x256xf32>
    %488 = arith.mulf %487, %2 : vector<8x256xf32>
    %489 = arith.addf %488, %5 : vector<8x256xf32>
    %490 = vector.extract_strided_slice %489 {offsets = [0, 0], sizes = [8, 64], strides = [1, 1]} : vector<8x256xf32> to vector<8x64xf32>
    %491 = vector.extract_strided_slice %489 {offsets = [0, 64], sizes = [8, 64], strides = [1, 1]} : vector<8x256xf32> to vector<8x64xf32>
    %492 = vector.extract_strided_slice %489 {offsets = [0, 128], sizes = [8, 64], strides = [1, 1]} : vector<8x256xf32> to vector<8x64xf32>
    %493 = vector.extract_strided_slice %489 {offsets = [0, 192], sizes = [8, 64], strides = [1, 1]} : vector<8x256xf32> to vector<8x64xf32>
    %494 = arith.mulf %491, %460 : vector<8x64xf32>
    %495 = arith.mulf %490, %492 : vector<8x64xf32>
    %496 = arith.addf %494, %495 : vector<8x64xf32>
    %497 = math.tanh %496 : vector<8x64xf32>
    %498 = arith.mulf %493, %497 : vector<8x64xf32>
    %c0_155 = arith.constant 0 : index
    %c0_156 = arith.constant 0 : index
    %499 = vector.load %arg2[%c0_155, %c0_156] : memref<64x256xf32, #tpu.memory_space<vmem>>, vector<64x256xf32>
    %cst_157 = arith.constant dense<0.000000e+00> : vector<8x256xf32>
    %500 = tpu.matmul %498, %499, %cst_157 {dimension_numbers = #tpu.dot_dimension_numbers<[1], [0], [0], [1], [0, 0, 1, 1], [], []>} : vector<8x64xf32>, vector<64x256xf32>, vector<8x256xf32> -> vector<8x256xf32>
    %c0_158 = arith.constant 0 : index
    %c0_159 = arith.constant 0 : index
    %501 = vector.load %arg3[%c0_158, %c0_159] : memref<64x256xf32, #tpu.memory_space<vmem>>, vector<64x256xf32>
    %cst_160 = arith.constant dense<0.000000e+00> : vector<8x256xf32>
    %502 = tpu.matmul %480, %501, %cst_160 {dimension_numbers = #tpu.dot_dimension_numbers<[1], [0], [0], [1], [0, 0, 1, 1], [], []>} : vector<8x64xf32>, vector<64x256xf32>, vector<8x256xf32> -> vector<8x256xf32>
    %503 = arith.addf %500, %502 : vector<8x256xf32>
    %504 = arith.addf %503, %8 : vector<8x256xf32>
    %505 = math.tanh %504 : vector<8x256xf32>
    %506 = arith.mulf %505, %2 : vector<8x256xf32>
    %507 = arith.addf %506, %5 : vector<8x256xf32>
    %508 = vector.extract_strided_slice %507 {offsets = [0, 0], sizes = [8, 64], strides = [1, 1]} : vector<8x256xf32> to vector<8x64xf32>
    %509 = vector.extract_strided_slice %507 {offsets = [0, 64], sizes = [8, 64], strides = [1, 1]} : vector<8x256xf32> to vector<8x64xf32>
    %510 = vector.extract_strided_slice %507 {offsets = [0, 128], sizes = [8, 64], strides = [1, 1]} : vector<8x256xf32> to vector<8x64xf32>
    %511 = vector.extract_strided_slice %507 {offsets = [0, 192], sizes = [8, 64], strides = [1, 1]} : vector<8x256xf32> to vector<8x64xf32>
    %512 = arith.mulf %509, %478 : vector<8x64xf32>
    %513 = arith.mulf %508, %510 : vector<8x64xf32>
    %514 = arith.addf %512, %513 : vector<8x64xf32>
    %515 = math.tanh %514 : vector<8x64xf32>
    %516 = arith.mulf %511, %515 : vector<8x64xf32>
    %c14_i32 = arith.constant 14 : i32
    %517 = arith.index_cast %c14_i32 : i32 to index
    %c0_161 = arith.constant 0 : index
    %c0_162 = arith.constant 0 : index
    %518 = vector.load %arg0[%517, %c0_161, %c0_162] : memref<16x8x256xf32, #tpu.memory_space<vmem>>, vector<1x8x256xf32>
    %519 = vector.shape_cast %518 : vector<1x8x256xf32> to vector<8x256xf32>
    %c0_163 = arith.constant 0 : index
    %c0_164 = arith.constant 0 : index
    %520 = vector.load %arg1[%c0_163, %c0_164] : memref<64x256xf32, #tpu.memory_space<vmem>>, vector<64x256xf32>
    %cst_165 = arith.constant dense<0.000000e+00> : vector<8x256xf32>
    %521 = tpu.matmul %498, %520, %cst_165 {dimension_numbers = #tpu.dot_dimension_numbers<[1], [0], [0], [1], [0, 0, 1, 1], [], []>} : vector<8x64xf32>, vector<64x256xf32>, vector<8x256xf32> -> vector<8x256xf32>
    %522 = arith.addf %519, %521 : vector<8x256xf32>
    %523 = math.tanh %522 : vector<8x256xf32>
    %524 = arith.mulf %523, %2 : vector<8x256xf32>
    %525 = arith.addf %524, %5 : vector<8x256xf32>
    %526 = vector.extract_strided_slice %525 {offsets = [0, 0], sizes = [8, 64], strides = [1, 1]} : vector<8x256xf32> to vector<8x64xf32>
    %527 = vector.extract_strided_slice %525 {offsets = [0, 64], sizes = [8, 64], strides = [1, 1]} : vector<8x256xf32> to vector<8x64xf32>
    %528 = vector.extract_strided_slice %525 {offsets = [0, 128], sizes = [8, 64], strides = [1, 1]} : vector<8x256xf32> to vector<8x64xf32>
    %529 = vector.extract_strided_slice %525 {offsets = [0, 192], sizes = [8, 64], strides = [1, 1]} : vector<8x256xf32> to vector<8x64xf32>
    %530 = arith.mulf %527, %496 : vector<8x64xf32>
    %531 = arith.mulf %526, %528 : vector<8x64xf32>
    %532 = arith.addf %530, %531 : vector<8x64xf32>
    %533 = math.tanh %532 : vector<8x64xf32>
    %534 = arith.mulf %529, %533 : vector<8x64xf32>
    %c0_166 = arith.constant 0 : index
    %c0_167 = arith.constant 0 : index
    %535 = vector.load %arg2[%c0_166, %c0_167] : memref<64x256xf32, #tpu.memory_space<vmem>>, vector<64x256xf32>
    %cst_168 = arith.constant dense<0.000000e+00> : vector<8x256xf32>
    %536 = tpu.matmul %534, %535, %cst_168 {dimension_numbers = #tpu.dot_dimension_numbers<[1], [0], [0], [1], [0, 0, 1, 1], [], []>} : vector<8x64xf32>, vector<64x256xf32>, vector<8x256xf32> -> vector<8x256xf32>
    %c0_169 = arith.constant 0 : index
    %c0_170 = arith.constant 0 : index
    %537 = vector.load %arg3[%c0_169, %c0_170] : memref<64x256xf32, #tpu.memory_space<vmem>>, vector<64x256xf32>
    %cst_171 = arith.constant dense<0.000000e+00> : vector<8x256xf32>
    %538 = tpu.matmul %516, %537, %cst_171 {dimension_numbers = #tpu.dot_dimension_numbers<[1], [0], [0], [1], [0, 0, 1, 1], [], []>} : vector<8x64xf32>, vector<64x256xf32>, vector<8x256xf32> -> vector<8x256xf32>
    %539 = arith.addf %536, %538 : vector<8x256xf32>
    %540 = arith.addf %539, %8 : vector<8x256xf32>
    %541 = math.tanh %540 : vector<8x256xf32>
    %542 = arith.mulf %541, %2 : vector<8x256xf32>
    %543 = arith.addf %542, %5 : vector<8x256xf32>
    %544 = vector.extract_strided_slice %543 {offsets = [0, 0], sizes = [8, 64], strides = [1, 1]} : vector<8x256xf32> to vector<8x64xf32>
    %545 = vector.extract_strided_slice %543 {offsets = [0, 64], sizes = [8, 64], strides = [1, 1]} : vector<8x256xf32> to vector<8x64xf32>
    %546 = vector.extract_strided_slice %543 {offsets = [0, 128], sizes = [8, 64], strides = [1, 1]} : vector<8x256xf32> to vector<8x64xf32>
    %547 = vector.extract_strided_slice %543 {offsets = [0, 192], sizes = [8, 64], strides = [1, 1]} : vector<8x256xf32> to vector<8x64xf32>
    %548 = arith.mulf %545, %514 : vector<8x64xf32>
    %549 = arith.mulf %544, %546 : vector<8x64xf32>
    %550 = arith.addf %548, %549 : vector<8x64xf32>
    %551 = math.tanh %550 : vector<8x64xf32>
    %552 = arith.mulf %547, %551 : vector<8x64xf32>
    %c15_i32 = arith.constant 15 : i32
    %553 = arith.index_cast %c15_i32 : i32 to index
    %c0_172 = arith.constant 0 : index
    %c0_173 = arith.constant 0 : index
    %554 = vector.load %arg0[%553, %c0_172, %c0_173] : memref<16x8x256xf32, #tpu.memory_space<vmem>>, vector<1x8x256xf32>
    %555 = vector.shape_cast %554 : vector<1x8x256xf32> to vector<8x256xf32>
    %c0_174 = arith.constant 0 : index
    %c0_175 = arith.constant 0 : index
    %556 = vector.load %arg1[%c0_174, %c0_175] : memref<64x256xf32, #tpu.memory_space<vmem>>, vector<64x256xf32>
    %cst_176 = arith.constant dense<0.000000e+00> : vector<8x256xf32>
    %557 = tpu.matmul %534, %556, %cst_176 {dimension_numbers = #tpu.dot_dimension_numbers<[1], [0], [0], [1], [0, 0, 1, 1], [], []>} : vector<8x64xf32>, vector<64x256xf32>, vector<8x256xf32> -> vector<8x256xf32>
    %558 = arith.addf %555, %557 : vector<8x256xf32>
    %559 = math.tanh %558 : vector<8x256xf32>
    %560 = arith.mulf %559, %2 : vector<8x256xf32>
    %561 = arith.addf %560, %5 : vector<8x256xf32>
    %562 = vector.extract_strided_slice %561 {offsets = [0, 0], sizes = [8, 64], strides = [1, 1]} : vector<8x256xf32> to vector<8x64xf32>
    %563 = vector.extract_strided_slice %561 {offsets = [0, 64], sizes = [8, 64], strides = [1, 1]} : vector<8x256xf32> to vector<8x64xf32>
    %564 = vector.extract_strided_slice %561 {offsets = [0, 128], sizes = [8, 64], strides = [1, 1]} : vector<8x256xf32> to vector<8x64xf32>
    %565 = vector.extract_strided_slice %561 {offsets = [0, 192], sizes = [8, 64], strides = [1, 1]} : vector<8x256xf32> to vector<8x64xf32>
    %566 = arith.mulf %563, %532 : vector<8x64xf32>
    %567 = arith.mulf %562, %564 : vector<8x64xf32>
    %568 = arith.addf %566, %567 : vector<8x64xf32>
    %569 = math.tanh %568 : vector<8x64xf32>
    %570 = arith.mulf %565, %569 : vector<8x64xf32>
    %c0_177 = arith.constant 0 : index
    %c0_178 = arith.constant 0 : index
    %571 = vector.load %arg2[%c0_177, %c0_178] : memref<64x256xf32, #tpu.memory_space<vmem>>, vector<64x256xf32>
    %cst_179 = arith.constant dense<0.000000e+00> : vector<8x256xf32>
    %572 = tpu.matmul %570, %571, %cst_179 {dimension_numbers = #tpu.dot_dimension_numbers<[1], [0], [0], [1], [0, 0, 1, 1], [], []>} : vector<8x64xf32>, vector<64x256xf32>, vector<8x256xf32> -> vector<8x256xf32>
    %c0_180 = arith.constant 0 : index
    %c0_181 = arith.constant 0 : index
    %573 = vector.load %arg3[%c0_180, %c0_181] : memref<64x256xf32, #tpu.memory_space<vmem>>, vector<64x256xf32>
    %cst_182 = arith.constant dense<0.000000e+00> : vector<8x256xf32>
    %574 = tpu.matmul %552, %573, %cst_182 {dimension_numbers = #tpu.dot_dimension_numbers<[1], [0], [0], [1], [0, 0, 1, 1], [], []>} : vector<8x64xf32>, vector<64x256xf32>, vector<8x256xf32> -> vector<8x256xf32>
    %575 = arith.addf %572, %574 : vector<8x256xf32>
    %576 = arith.addf %575, %8 : vector<8x256xf32>
    %577 = math.tanh %576 : vector<8x256xf32>
    %578 = arith.mulf %577, %2 : vector<8x256xf32>
    %579 = arith.addf %578, %5 : vector<8x256xf32>
    %580 = vector.extract_strided_slice %579 {offsets = [0, 0], sizes = [8, 64], strides = [1, 1]} : vector<8x256xf32> to vector<8x64xf32>
    %581 = vector.extract_strided_slice %579 {offsets = [0, 64], sizes = [8, 64], strides = [1, 1]} : vector<8x256xf32> to vector<8x64xf32>
    %582 = vector.extract_strided_slice %579 {offsets = [0, 128], sizes = [8, 64], strides = [1, 1]} : vector<8x256xf32> to vector<8x64xf32>
    %583 = vector.extract_strided_slice %579 {offsets = [0, 192], sizes = [8, 64], strides = [1, 1]} : vector<8x256xf32> to vector<8x64xf32>
    %584 = arith.mulf %581, %550 : vector<8x64xf32>
    %585 = arith.mulf %580, %582 : vector<8x64xf32>
    %586 = arith.addf %584, %585 : vector<8x64xf32>
    %587 = math.tanh %586 : vector<8x64xf32>
    %588 = arith.mulf %583, %587 : vector<8x64xf32>
    %c16_i32 = arith.constant 16 : i32
    %c0_183 = arith.constant 0 : index
    %c0_184 = arith.constant 0 : index
    %c0_185 = arith.constant 0 : index
    %589 = vector.load %arg9[%c0_183, %c0_184, %c0_185] : memref<24x8x64xf32, #tpu.memory_space<vmem>>, vector<1x8x64xf32>
    %590 = vector.shape_cast %589 : vector<1x8x64xf32> to vector<8x64xf32>
    %591 = vector.shape_cast %588 : vector<8x64xf32> to vector<1x8x64xf32>
    tpu.vector_store %arg9[%c0_183, %c0_184, %c0_185], %591 {strides = array<i32>} : memref<24x8x64xf32, #tpu.memory_space<vmem>>, vector<1x8x64xf32>,
    %c0_i32_186 = arith.constant 0 : i32
    %c0_187 = arith.constant 0 : index
    %c0_188 = arith.constant 0 : index
    %592 = vector.load %arg5[%c0_187, %c0_188] : memref<64x256xf32, #tpu.memory_space<vmem>>, vector<64x256xf32>
    %cst_189 = arith.constant dense<0.000000e+00> : vector<8x256xf32>
    %593 = tpu.matmul %588, %592, %cst_189 {dimension_numbers = #tpu.dot_dimension_numbers<[1], [0], [0], [1], [0, 0, 1, 1], [], []>} : vector<8x64xf32>, vector<64x256xf32>, vector<8x256xf32> -> vector<8x256xf32>
    %c0_190 = arith.constant 0 : index
    %c0_191 = arith.constant 0 : index
    %594 = vector.load %arg1[%c0_190, %c0_191] : memref<64x256xf32, #tpu.memory_space<vmem>>, vector<64x256xf32>
    %cst_192 = arith.constant dense<0.000000e+00> : vector<8x256xf32>
    %595 = tpu.matmul %570, %594, %cst_192 {dimension_numbers = #tpu.dot_dimension_numbers<[1], [0], [0], [1], [0, 0, 1, 1], [], []>} : vector<8x64xf32>, vector<64x256xf32>, vector<8x256xf32> -> vector<8x256xf32>
    %596 = arith.addf %593, %595 : vector<8x256xf32>
    %597 = arith.addf %596, %11 : vector<8x256xf32>
    %598 = math.tanh %597 : vector<8x256xf32>
    %599 = arith.mulf %598, %2 : vector<8x256xf32>
    %600 = arith.addf %599, %5 : vector<8x256xf32>
    %601 = vector.extract_strided_slice %600 {offsets = [0, 0], sizes = [8, 64], strides = [1, 1]} : vector<8x256xf32> to vector<8x64xf32>
    %602 = vector.extract_strided_slice %600 {offsets = [0, 64], sizes = [8, 64], strides = [1, 1]} : vector<8x256xf32> to vector<8x64xf32>
    %603 = vector.extract_strided_slice %600 {offsets = [0, 128], sizes = [8, 64], strides = [1, 1]} : vector<8x256xf32> to vector<8x64xf32>
    %604 = vector.extract_strided_slice %600 {offsets = [0, 192], sizes = [8, 64], strides = [1, 1]} : vector<8x256xf32> to vector<8x64xf32>
    %605 = arith.mulf %602, %568 : vector<8x64xf32>
    %606 = arith.mulf %601, %603 : vector<8x64xf32>
    %607 = arith.addf %605, %606 : vector<8x64xf32>
    %608 = math.tanh %607 : vector<8x64xf32>
    %609 = arith.mulf %604, %608 : vector<8x64xf32>
    %c0_193 = arith.constant 0 : index
    %c0_194 = arith.constant 0 : index
    %610 = vector.load %arg2[%c0_193, %c0_194] : memref<64x256xf32, #tpu.memory_space<vmem>>, vector<64x256xf32>
    %cst_195 = arith.constant dense<0.000000e+00> : vector<8x256xf32>
    %611 = tpu.matmul %609, %610, %cst_195 {dimension_numbers = #tpu.dot_dimension_numbers<[1], [0], [0], [1], [0, 0, 1, 1], [], []>} : vector<8x64xf32>, vector<64x256xf32>, vector<8x256xf32> -> vector<8x256xf32>
    %c0_196 = arith.constant 0 : index
    %c0_197 = arith.constant 0 : index
    %612 = vector.load %arg3[%c0_196, %c0_197] : memref<64x256xf32, #tpu.memory_space<vmem>>, vector<64x256xf32>
    %cst_198 = arith.constant dense<0.000000e+00> : vector<8x256xf32>
    %613 = tpu.matmul %588, %612, %cst_198 {dimension_numbers = #tpu.dot_dimension_numbers<[1], [0], [0], [1], [0, 0, 1, 1], [], []>} : vector<8x64xf32>, vector<64x256xf32>, vector<8x256xf32> -> vector<8x256xf32>
    %614 = arith.addf %611, %613 : vector<8x256xf32>
    %615 = arith.addf %614, %8 : vector<8x256xf32>
    %616 = math.tanh %615 : vector<8x256xf32>
    %617 = arith.mulf %616, %2 : vector<8x256xf32>
    %618 = arith.addf %617, %5 : vector<8x256xf32>
    %619 = vector.extract_strided_slice %618 {offsets = [0, 0], sizes = [8, 64], strides = [1, 1]} : vector<8x256xf32> to vector<8x64xf32>
    %620 = vector.extract_strided_slice %618 {offsets = [0, 64], sizes = [8, 64], strides = [1, 1]} : vector<8x256xf32> to vector<8x64xf32>
    %621 = vector.extract_strided_slice %618 {offsets = [0, 128], sizes = [8, 64], strides = [1, 1]} : vector<8x256xf32> to vector<8x64xf32>
    %622 = vector.extract_strided_slice %618 {offsets = [0, 192], sizes = [8, 64], strides = [1, 1]} : vector<8x256xf32> to vector<8x64xf32>
    %623 = arith.mulf %620, %586 : vector<8x64xf32>
    %624 = arith.mulf %619, %621 : vector<8x64xf32>
    %625 = arith.addf %623, %624 : vector<8x64xf32>
    %626 = math.tanh %625 : vector<8x64xf32>
    %627 = arith.mulf %622, %626 : vector<8x64xf32>
    %c1_i32_199 = arith.constant 1 : i32
    %628 = arith.addi %c0_i32_186, %c1_i32_199 : i32
    %629 = arith.index_cast %628 : i32 to index
    %c0_200 = arith.constant 0 : index
    %c0_201 = arith.constant 0 : index
    %630 = vector.load %arg9[%629, %c0_200, %c0_201] : memref<24x8x64xf32, #tpu.memory_space<vmem>>, vector<1x8x64xf32>
    %631 = vector.shape_cast %630 : vector<1x8x64xf32> to vector<8x64xf32>
    %632 = vector.shape_cast %627 : vector<8x64xf32> to vector<1x8x64xf32>
    tpu.vector_store %arg9[%629, %c0_200, %c0_201], %632 {strides = array<i32>} : memref<24x8x64xf32, #tpu.memory_space<vmem>>, vector<1x8x64xf32>,
    %c1_i32_202 = arith.constant 1 : i32
    %c0_203 = arith.constant 0 : index
    %c0_204 = arith.constant 0 : index
    %633 = vector.load %arg5[%c0_203, %c0_204] : memref<64x256xf32, #tpu.memory_space<vmem>>, vector<64x256xf32>
    %cst_205 = arith.constant dense<0.000000e+00> : vector<8x256xf32>
    %634 = tpu.matmul %627, %633, %cst_205 {dimension_numbers = #tpu.dot_dimension_numbers<[1], [0], [0], [1], [0, 0, 1, 1], [], []>} : vector<8x64xf32>, vector<64x256xf32>, vector<8x256xf32> -> vector<8x256xf32>
    %c0_206 = arith.constant 0 : index
    %c0_207 = arith.constant 0 : index
    %635 = vector.load %arg1[%c0_206, %c0_207] : memref<64x256xf32, #tpu.memory_space<vmem>>, vector<64x256xf32>
    %cst_208 = arith.constant dense<0.000000e+00> : vector<8x256xf32>
    %636 = tpu.matmul %609, %635, %cst_208 {dimension_numbers = #tpu.dot_dimension_numbers<[1], [0], [0], [1], [0, 0, 1, 1], [], []>} : vector<8x64xf32>, vector<64x256xf32>, vector<8x256xf32> -> vector<8x256xf32>
    %637 = arith.addf %634, %636 : vector<8x256xf32>
    %638 = arith.addf %637, %11 : vector<8x256xf32>
    %639 = math.tanh %638 : vector<8x256xf32>
    %640 = arith.mulf %639, %2 : vector<8x256xf32>
    %641 = arith.addf %640, %5 : vector<8x256xf32>
    %642 = vector.extract_strided_slice %641 {offsets = [0, 0], sizes = [8, 64], strides = [1, 1]} : vector<8x256xf32> to vector<8x64xf32>
    %643 = vector.extract_strided_slice %641 {offsets = [0, 64], sizes = [8, 64], strides = [1, 1]} : vector<8x256xf32> to vector<8x64xf32>
    %644 = vector.extract_strided_slice %641 {offsets = [0, 128], sizes = [8, 64], strides = [1, 1]} : vector<8x256xf32> to vector<8x64xf32>
    %645 = vector.extract_strided_slice %641 {offsets = [0, 192], sizes = [8, 64], strides = [1, 1]} : vector<8x256xf32> to vector<8x64xf32>
    %646 = arith.mulf %643, %607 : vector<8x64xf32>
    %647 = arith.mulf %642, %644 : vector<8x64xf32>
    %648 = arith.addf %646, %647 : vector<8x64xf32>
    %649 = math.tanh %648 : vector<8x64xf32>
    %650 = arith.mulf %645, %649 : vector<8x64xf32>
    %c0_209 = arith.constant 0 : index
    %c0_210 = arith.constant 0 : index
    %651 = vector.load %arg2[%c0_209, %c0_210] : memref<64x256xf32, #tpu.memory_space<vmem>>, vector<64x256xf32>
    %cst_211 = arith.constant dense<0.000000e+00> : vector<8x256xf32>
    %652 = tpu.matmul %650, %651, %cst_211 {dimension_numbers = #tpu.dot_dimension_numbers<[1], [0], [0], [1], [0, 0, 1, 1], [], []>} : vector<8x64xf32>, vector<64x256xf32>, vector<8x256xf32> -> vector<8x256xf32>
    %c0_212 = arith.constant 0 : index
    %c0_213 = arith.constant 0 : index
    %653 = vector.load %arg3[%c0_212, %c0_213] : memref<64x256xf32, #tpu.memory_space<vmem>>, vector<64x256xf32>
    %cst_214 = arith.constant dense<0.000000e+00> : vector<8x256xf32>
    %654 = tpu.matmul %627, %653, %cst_214 {dimension_numbers = #tpu.dot_dimension_numbers<[1], [0], [0], [1], [0, 0, 1, 1], [], []>} : vector<8x64xf32>, vector<64x256xf32>, vector<8x256xf32> -> vector<8x256xf32>
    %655 = arith.addf %652, %654 : vector<8x256xf32>
    %656 = arith.addf %655, %8 : vector<8x256xf32>
    %657 = math.tanh %656 : vector<8x256xf32>
    %658 = arith.mulf %657, %2 : vector<8x256xf32>
    %659 = arith.addf %658, %5 : vector<8x256xf32>
    %660 = vector.extract_strided_slice %659 {offsets = [0, 0], sizes = [8, 64], strides = [1, 1]} : vector<8x256xf32> to vector<8x64xf32>
    %661 = vector.extract_strided_slice %659 {offsets = [0, 64], sizes = [8, 64], strides = [1, 1]} : vector<8x256xf32> to vector<8x64xf32>
    %662 = vector.extract_strided_slice %659 {offsets = [0, 128], sizes = [8, 64], strides = [1, 1]} : vector<8x256xf32> to vector<8x64xf32>
    %663 = vector.extract_strided_slice %659 {offsets = [0, 192], sizes = [8, 64], strides = [1, 1]} : vector<8x256xf32> to vector<8x64xf32>
    %664 = arith.mulf %661, %625 : vector<8x64xf32>
    %665 = arith.mulf %660, %662 : vector<8x64xf32>
    %666 = arith.addf %664, %665 : vector<8x64xf32>
    %667 = math.tanh %666 : vector<8x64xf32>
    %668 = arith.mulf %663, %667 : vector<8x64xf32>
    %c1_i32_215 = arith.constant 1 : i32
    %669 = arith.addi %c1_i32_202, %c1_i32_215 : i32
    %670 = arith.index_cast %669 : i32 to index
    %c0_216 = arith.constant 0 : index
    %c0_217 = arith.constant 0 : index
    %671 = vector.load %arg9[%670, %c0_216, %c0_217] : memref<24x8x64xf32, #tpu.memory_space<vmem>>, vector<1x8x64xf32>
    %672 = vector.shape_cast %671 : vector<1x8x64xf32> to vector<8x64xf32>
    %673 = vector.shape_cast %668 : vector<8x64xf32> to vector<1x8x64xf32>
    tpu.vector_store %arg9[%670, %c0_216, %c0_217], %673 {strides = array<i32>} : memref<24x8x64xf32, #tpu.memory_space<vmem>>, vector<1x8x64xf32>,
    %c2_i32_218 = arith.constant 2 : i32
    %c0_219 = arith.constant 0 : index
    %c0_220 = arith.constant 0 : index
    %674 = vector.load %arg5[%c0_219, %c0_220] : memref<64x256xf32, #tpu.memory_space<vmem>>, vector<64x256xf32>
    %cst_221 = arith.constant dense<0.000000e+00> : vector<8x256xf32>
    %675 = tpu.matmul %668, %674, %cst_221 {dimension_numbers = #tpu.dot_dimension_numbers<[1], [0], [0], [1], [0, 0, 1, 1], [], []>} : vector<8x64xf32>, vector<64x256xf32>, vector<8x256xf32> -> vector<8x256xf32>
    %c0_222 = arith.constant 0 : index
    %c0_223 = arith.constant 0 : index
    %676 = vector.load %arg1[%c0_222, %c0_223] : memref<64x256xf32, #tpu.memory_space<vmem>>, vector<64x256xf32>
    %cst_224 = arith.constant dense<0.000000e+00> : vector<8x256xf32>
    %677 = tpu.matmul %650, %676, %cst_224 {dimension_numbers = #tpu.dot_dimension_numbers<[1], [0], [0], [1], [0, 0, 1, 1], [], []>} : vector<8x64xf32>, vector<64x256xf32>, vector<8x256xf32> -> vector<8x256xf32>
    %678 = arith.addf %675, %677 : vector<8x256xf32>
    %679 = arith.addf %678, %11 : vector<8x256xf32>
    %680 = math.tanh %679 : vector<8x256xf32>
    %681 = arith.mulf %680, %2 : vector<8x256xf32>
    %682 = arith.addf %681, %5 : vector<8x256xf32>
    %683 = vector.extract_strided_slice %682 {offsets = [0, 0], sizes = [8, 64], strides = [1, 1]} : vector<8x256xf32> to vector<8x64xf32>
    %684 = vector.extract_strided_slice %682 {offsets = [0, 64], sizes = [8, 64], strides = [1, 1]} : vector<8x256xf32> to vector<8x64xf32>
    %685 = vector.extract_strided_slice %682 {offsets = [0, 128], sizes = [8, 64], strides = [1, 1]} : vector<8x256xf32> to vector<8x64xf32>
    %686 = vector.extract_strided_slice %682 {offsets = [0, 192], sizes = [8, 64], strides = [1, 1]} : vector<8x256xf32> to vector<8x64xf32>
    %687 = arith.mulf %684, %648 : vector<8x64xf32>
    %688 = arith.mulf %683, %685 : vector<8x64xf32>
    %689 = arith.addf %687, %688 : vector<8x64xf32>
    %690 = math.tanh %689 : vector<8x64xf32>
    %691 = arith.mulf %686, %690 : vector<8x64xf32>
    %c0_225 = arith.constant 0 : index
    %c0_226 = arith.constant 0 : index
    %692 = vector.load %arg2[%c0_225, %c0_226] : memref<64x256xf32, #tpu.memory_space<vmem>>, vector<64x256xf32>
    %cst_227 = arith.constant dense<0.000000e+00> : vector<8x256xf32>
    %693 = tpu.matmul %691, %692, %cst_227 {dimension_numbers = #tpu.dot_dimension_numbers<[1], [0], [0], [1], [0, 0, 1, 1], [], []>} : vector<8x64xf32>, vector<64x256xf32>, vector<8x256xf32> -> vector<8x256xf32>
    %c0_228 = arith.constant 0 : index
    %c0_229 = arith.constant 0 : index
    %694 = vector.load %arg3[%c0_228, %c0_229] : memref<64x256xf32, #tpu.memory_space<vmem>>, vector<64x256xf32>
    %cst_230 = arith.constant dense<0.000000e+00> : vector<8x256xf32>
    %695 = tpu.matmul %668, %694, %cst_230 {dimension_numbers = #tpu.dot_dimension_numbers<[1], [0], [0], [1], [0, 0, 1, 1], [], []>} : vector<8x64xf32>, vector<64x256xf32>, vector<8x256xf32> -> vector<8x256xf32>
    %696 = arith.addf %693, %695 : vector<8x256xf32>
    %697 = arith.addf %696, %8 : vector<8x256xf32>
    %698 = math.tanh %697 : vector<8x256xf32>
    %699 = arith.mulf %698, %2 : vector<8x256xf32>
    %700 = arith.addf %699, %5 : vector<8x256xf32>
    %701 = vector.extract_strided_slice %700 {offsets = [0, 0], sizes = [8, 64], strides = [1, 1]} : vector<8x256xf32> to vector<8x64xf32>
    %702 = vector.extract_strided_slice %700 {offsets = [0, 64], sizes = [8, 64], strides = [1, 1]} : vector<8x256xf32> to vector<8x64xf32>
    %703 = vector.extract_strided_slice %700 {offsets = [0, 128], sizes = [8, 64], strides = [1, 1]} : vector<8x256xf32> to vector<8x64xf32>
    %704 = vector.extract_strided_slice %700 {offsets = [0, 192], sizes = [8, 64], strides = [1, 1]} : vector<8x256xf32> to vector<8x64xf32>
    %705 = arith.mulf %702, %666 : vector<8x64xf32>
    %706 = arith.mulf %701, %703 : vector<8x64xf32>
    %707 = arith.addf %705, %706 : vector<8x64xf32>
    %708 = math.tanh %707 : vector<8x64xf32>
    %709 = arith.mulf %704, %708 : vector<8x64xf32>
    %c1_i32_231 = arith.constant 1 : i32
    %710 = arith.addi %c2_i32_218, %c1_i32_231 : i32
    %711 = arith.index_cast %710 : i32 to index
    %c0_232 = arith.constant 0 : index
    %c0_233 = arith.constant 0 : index
    %712 = vector.load %arg9[%711, %c0_232, %c0_233] : memref<24x8x64xf32, #tpu.memory_space<vmem>>, vector<1x8x64xf32>
    %713 = vector.shape_cast %712 : vector<1x8x64xf32> to vector<8x64xf32>
    %714 = vector.shape_cast %709 : vector<8x64xf32> to vector<1x8x64xf32>
    tpu.vector_store %arg9[%711, %c0_232, %c0_233], %714 {strides = array<i32>} : memref<24x8x64xf32, #tpu.memory_space<vmem>>, vector<1x8x64xf32>,
    %c3_i32_234 = arith.constant 3 : i32
    %c0_235 = arith.constant 0 : index
    %c0_236 = arith.constant 0 : index
    %715 = vector.load %arg5[%c0_235, %c0_236] : memref<64x256xf32, #tpu.memory_space<vmem>>, vector<64x256xf32>
    %cst_237 = arith.constant dense<0.000000e+00> : vector<8x256xf32>
    %716 = tpu.matmul %709, %715, %cst_237 {dimension_numbers = #tpu.dot_dimension_numbers<[1], [0], [0], [1], [0, 0, 1, 1], [], []>} : vector<8x64xf32>, vector<64x256xf32>, vector<8x256xf32> -> vector<8x256xf32>
    %c0_238 = arith.constant 0 : index
    %c0_239 = arith.constant 0 : index
    %717 = vector.load %arg1[%c0_238, %c0_239] : memref<64x256xf32, #tpu.memory_space<vmem>>, vector<64x256xf32>
    %cst_240 = arith.constant dense<0.000000e+00> : vector<8x256xf32>
    %718 = tpu.matmul %691, %717, %cst_240 {dimension_numbers = #tpu.dot_dimension_numbers<[1], [0], [0], [1], [0, 0, 1, 1], [], []>} : vector<8x64xf32>, vector<64x256xf32>, vector<8x256xf32> -> vector<8x256xf32>
    %719 = arith.addf %716, %718 : vector<8x256xf32>
    %720 = arith.addf %719, %11 : vector<8x256xf32>
    %721 = math.tanh %720 : vector<8x256xf32>
    %722 = arith.mulf %721, %2 : vector<8x256xf32>
    %723 = arith.addf %722, %5 : vector<8x256xf32>
    %724 = vector.extract_strided_slice %723 {offsets = [0, 0], sizes = [8, 64], strides = [1, 1]} : vector<8x256xf32> to vector<8x64xf32>
    %725 = vector.extract_strided_slice %723 {offsets = [0, 64], sizes = [8, 64], strides = [1, 1]} : vector<8x256xf32> to vector<8x64xf32>
    %726 = vector.extract_strided_slice %723 {offsets = [0, 128], sizes = [8, 64], strides = [1, 1]} : vector<8x256xf32> to vector<8x64xf32>
    %727 = vector.extract_strided_slice %723 {offsets = [0, 192], sizes = [8, 64], strides = [1, 1]} : vector<8x256xf32> to vector<8x64xf32>
    %728 = arith.mulf %725, %689 : vector<8x64xf32>
    %729 = arith.mulf %724, %726 : vector<8x64xf32>
    %730 = arith.addf %728, %729 : vector<8x64xf32>
    %731 = math.tanh %730 : vector<8x64xf32>
    %732 = arith.mulf %727, %731 : vector<8x64xf32>
    %c0_241 = arith.constant 0 : index
    %c0_242 = arith.constant 0 : index
    %733 = vector.load %arg2[%c0_241, %c0_242] : memref<64x256xf32, #tpu.memory_space<vmem>>, vector<64x256xf32>
    %cst_243 = arith.constant dense<0.000000e+00> : vector<8x256xf32>
    %734 = tpu.matmul %732, %733, %cst_243 {dimension_numbers = #tpu.dot_dimension_numbers<[1], [0], [0], [1], [0, 0, 1, 1], [], []>} : vector<8x64xf32>, vector<64x256xf32>, vector<8x256xf32> -> vector<8x256xf32>
    %c0_244 = arith.constant 0 : index
    %c0_245 = arith.constant 0 : index
    %735 = vector.load %arg3[%c0_244, %c0_245] : memref<64x256xf32, #tpu.memory_space<vmem>>, vector<64x256xf32>
    %cst_246 = arith.constant dense<0.000000e+00> : vector<8x256xf32>
    %736 = tpu.matmul %709, %735, %cst_246 {dimension_numbers = #tpu.dot_dimension_numbers<[1], [0], [0], [1], [0, 0, 1, 1], [], []>} : vector<8x64xf32>, vector<64x256xf32>, vector<8x256xf32> -> vector<8x256xf32>
    %737 = arith.addf %734, %736 : vector<8x256xf32>
    %738 = arith.addf %737, %8 : vector<8x256xf32>
    %739 = math.tanh %738 : vector<8x256xf32>
    %740 = arith.mulf %739, %2 : vector<8x256xf32>
    %741 = arith.addf %740, %5 : vector<8x256xf32>
    %742 = vector.extract_strided_slice %741 {offsets = [0, 0], sizes = [8, 64], strides = [1, 1]} : vector<8x256xf32> to vector<8x64xf32>
    %743 = vector.extract_strided_slice %741 {offsets = [0, 64], sizes = [8, 64], strides = [1, 1]} : vector<8x256xf32> to vector<8x64xf32>
    %744 = vector.extract_strided_slice %741 {offsets = [0, 128], sizes = [8, 64], strides = [1, 1]} : vector<8x256xf32> to vector<8x64xf32>
    %745 = vector.extract_strided_slice %741 {offsets = [0, 192], sizes = [8, 64], strides = [1, 1]} : vector<8x256xf32> to vector<8x64xf32>
    %746 = arith.mulf %743, %707 : vector<8x64xf32>
    %747 = arith.mulf %742, %744 : vector<8x64xf32>
    %748 = arith.addf %746, %747 : vector<8x64xf32>
    %749 = math.tanh %748 : vector<8x64xf32>
    %750 = arith.mulf %745, %749 : vector<8x64xf32>
    %c1_i32_247 = arith.constant 1 : i32
    %751 = arith.addi %c3_i32_234, %c1_i32_247 : i32
    %752 = arith.index_cast %751 : i32 to index
    %c0_248 = arith.constant 0 : index
    %c0_249 = arith.constant 0 : index
    %753 = vector.load %arg9[%752, %c0_248, %c0_249] : memref<24x8x64xf32, #tpu.memory_space<vmem>>, vector<1x8x64xf32>
    %754 = vector.shape_cast %753 : vector<1x8x64xf32> to vector<8x64xf32>
    %755 = vector.shape_cast %750 : vector<8x64xf32> to vector<1x8x64xf32>
    tpu.vector_store %arg9[%752, %c0_248, %c0_249], %755 {strides = array<i32>} : memref<24x8x64xf32, #tpu.memory_space<vmem>>, vector<1x8x64xf32>,
    %c4_i32_250 = arith.constant 4 : i32
    %c0_251 = arith.constant 0 : index
    %c0_252 = arith.constant 0 : index
    %756 = vector.load %arg5[%c0_251, %c0_252] : memref<64x256xf32, #tpu.memory_space<vmem>>, vector<64x256xf32>
    %cst_253 = arith.constant dense<0.000000e+00> : vector<8x256xf32>
    %757 = tpu.matmul %750, %756, %cst_253 {dimension_numbers = #tpu.dot_dimension_numbers<[1], [0], [0], [1], [0, 0, 1, 1], [], []>} : vector<8x64xf32>, vector<64x256xf32>, vector<8x256xf32> -> vector<8x256xf32>
    %c0_254 = arith.constant 0 : index
    %c0_255 = arith.constant 0 : index
    %758 = vector.load %arg1[%c0_254, %c0_255] : memref<64x256xf32, #tpu.memory_space<vmem>>, vector<64x256xf32>
    %cst_256 = arith.constant dense<0.000000e+00> : vector<8x256xf32>
    %759 = tpu.matmul %732, %758, %cst_256 {dimension_numbers = #tpu.dot_dimension_numbers<[1], [0], [0], [1], [0, 0, 1, 1], [], []>} : vector<8x64xf32>, vector<64x256xf32>, vector<8x256xf32> -> vector<8x256xf32>
    %760 = arith.addf %757, %759 : vector<8x256xf32>
    %761 = arith.addf %760, %11 : vector<8x256xf32>
    %762 = math.tanh %761 : vector<8x256xf32>
    %763 = arith.mulf %762, %2 : vector<8x256xf32>
    %764 = arith.addf %763, %5 : vector<8x256xf32>
    %765 = vector.extract_strided_slice %764 {offsets = [0, 0], sizes = [8, 64], strides = [1, 1]} : vector<8x256xf32> to vector<8x64xf32>
    %766 = vector.extract_strided_slice %764 {offsets = [0, 64], sizes = [8, 64], strides = [1, 1]} : vector<8x256xf32> to vector<8x64xf32>
    %767 = vector.extract_strided_slice %764 {offsets = [0, 128], sizes = [8, 64], strides = [1, 1]} : vector<8x256xf32> to vector<8x64xf32>
    %768 = vector.extract_strided_slice %764 {offsets = [0, 192], sizes = [8, 64], strides = [1, 1]} : vector<8x256xf32> to vector<8x64xf32>
    %769 = arith.mulf %766, %730 : vector<8x64xf32>
    %770 = arith.mulf %765, %767 : vector<8x64xf32>
    %771 = arith.addf %769, %770 : vector<8x64xf32>
    %772 = math.tanh %771 : vector<8x64xf32>
    %773 = arith.mulf %768, %772 : vector<8x64xf32>
    %c0_257 = arith.constant 0 : index
    %c0_258 = arith.constant 0 : index
    %774 = vector.load %arg2[%c0_257, %c0_258] : memref<64x256xf32, #tpu.memory_space<vmem>>, vector<64x256xf32>
    %cst_259 = arith.constant dense<0.000000e+00> : vector<8x256xf32>
    %775 = tpu.matmul %773, %774, %cst_259 {dimension_numbers = #tpu.dot_dimension_numbers<[1], [0], [0], [1], [0, 0, 1, 1], [], []>} : vector<8x64xf32>, vector<64x256xf32>, vector<8x256xf32> -> vector<8x256xf32>
    %c0_260 = arith.constant 0 : index
    %c0_261 = arith.constant 0 : index
    %776 = vector.load %arg3[%c0_260, %c0_261] : memref<64x256xf32, #tpu.memory_space<vmem>>, vector<64x256xf32>
    %cst_262 = arith.constant dense<0.000000e+00> : vector<8x256xf32>
    %777 = tpu.matmul %750, %776, %cst_262 {dimension_numbers = #tpu.dot_dimension_numbers<[1], [0], [0], [1], [0, 0, 1, 1], [], []>} : vector<8x64xf32>, vector<64x256xf32>, vector<8x256xf32> -> vector<8x256xf32>
    %778 = arith.addf %775, %777 : vector<8x256xf32>
    %779 = arith.addf %778, %8 : vector<8x256xf32>
    %780 = math.tanh %779 : vector<8x256xf32>
    %781 = arith.mulf %780, %2 : vector<8x256xf32>
    %782 = arith.addf %781, %5 : vector<8x256xf32>
    %783 = vector.extract_strided_slice %782 {offsets = [0, 0], sizes = [8, 64], strides = [1, 1]} : vector<8x256xf32> to vector<8x64xf32>
    %784 = vector.extract_strided_slice %782 {offsets = [0, 64], sizes = [8, 64], strides = [1, 1]} : vector<8x256xf32> to vector<8x64xf32>
    %785 = vector.extract_strided_slice %782 {offsets = [0, 128], sizes = [8, 64], strides = [1, 1]} : vector<8x256xf32> to vector<8x64xf32>
    %786 = vector.extract_strided_slice %782 {offsets = [0, 192], sizes = [8, 64], strides = [1, 1]} : vector<8x256xf32> to vector<8x64xf32>
    %787 = arith.mulf %784, %748 : vector<8x64xf32>
    %788 = arith.mulf %783, %785 : vector<8x64xf32>
    %789 = arith.addf %787, %788 : vector<8x64xf32>
    %790 = math.tanh %789 : vector<8x64xf32>
    %791 = arith.mulf %786, %790 : vector<8x64xf32>
    %c1_i32_263 = arith.constant 1 : i32
    %792 = arith.addi %c4_i32_250, %c1_i32_263 : i32
    %793 = arith.index_cast %792 : i32 to index
    %c0_264 = arith.constant 0 : index
    %c0_265 = arith.constant 0 : index
    %794 = vector.load %arg9[%793, %c0_264, %c0_265] : memref<24x8x64xf32, #tpu.memory_space<vmem>>, vector<1x8x64xf32>
    %795 = vector.shape_cast %794 : vector<1x8x64xf32> to vector<8x64xf32>
    %796 = vector.shape_cast %791 : vector<8x64xf32> to vector<1x8x64xf32>
    tpu.vector_store %arg9[%793, %c0_264, %c0_265], %796 {strides = array<i32>} : memref<24x8x64xf32, #tpu.memory_space<vmem>>, vector<1x8x64xf32>,
    %c5_i32_266 = arith.constant 5 : i32
    %c0_267 = arith.constant 0 : index
    %c0_268 = arith.constant 0 : index
    %797 = vector.load %arg5[%c0_267, %c0_268] : memref<64x256xf32, #tpu.memory_space<vmem>>, vector<64x256xf32>
    %cst_269 = arith.constant dense<0.000000e+00> : vector<8x256xf32>
    %798 = tpu.matmul %791, %797, %cst_269 {dimension_numbers = #tpu.dot_dimension_numbers<[1], [0], [0], [1], [0, 0, 1, 1], [], []>} : vector<8x64xf32>, vector<64x256xf32>, vector<8x256xf32> -> vector<8x256xf32>
    %c0_270 = arith.constant 0 : index
    %c0_271 = arith.constant 0 : index
    %799 = vector.load %arg1[%c0_270, %c0_271] : memref<64x256xf32, #tpu.memory_space<vmem>>, vector<64x256xf32>
    %cst_272 = arith.constant dense<0.000000e+00> : vector<8x256xf32>
    %800 = tpu.matmul %773, %799, %cst_272 {dimension_numbers = #tpu.dot_dimension_numbers<[1], [0], [0], [1], [0, 0, 1, 1], [], []>} : vector<8x64xf32>, vector<64x256xf32>, vector<8x256xf32> -> vector<8x256xf32>
    %801 = arith.addf %798, %800 : vector<8x256xf32>
    %802 = arith.addf %801, %11 : vector<8x256xf32>
    %803 = math.tanh %802 : vector<8x256xf32>
    %804 = arith.mulf %803, %2 : vector<8x256xf32>
    %805 = arith.addf %804, %5 : vector<8x256xf32>
    %806 = vector.extract_strided_slice %805 {offsets = [0, 0], sizes = [8, 64], strides = [1, 1]} : vector<8x256xf32> to vector<8x64xf32>
    %807 = vector.extract_strided_slice %805 {offsets = [0, 64], sizes = [8, 64], strides = [1, 1]} : vector<8x256xf32> to vector<8x64xf32>
    %808 = vector.extract_strided_slice %805 {offsets = [0, 128], sizes = [8, 64], strides = [1, 1]} : vector<8x256xf32> to vector<8x64xf32>
    %809 = vector.extract_strided_slice %805 {offsets = [0, 192], sizes = [8, 64], strides = [1, 1]} : vector<8x256xf32> to vector<8x64xf32>
    %810 = arith.mulf %807, %771 : vector<8x64xf32>
    %811 = arith.mulf %806, %808 : vector<8x64xf32>
    %812 = arith.addf %810, %811 : vector<8x64xf32>
    %813 = math.tanh %812 : vector<8x64xf32>
    %814 = arith.mulf %809, %813 : vector<8x64xf32>
    %c0_273 = arith.constant 0 : index
    %c0_274 = arith.constant 0 : index
    %815 = vector.load %arg2[%c0_273, %c0_274] : memref<64x256xf32, #tpu.memory_space<vmem>>, vector<64x256xf32>
    %cst_275 = arith.constant dense<0.000000e+00> : vector<8x256xf32>
    %816 = tpu.matmul %814, %815, %cst_275 {dimension_numbers = #tpu.dot_dimension_numbers<[1], [0], [0], [1], [0, 0, 1, 1], [], []>} : vector<8x64xf32>, vector<64x256xf32>, vector<8x256xf32> -> vector<8x256xf32>
    %c0_276 = arith.constant 0 : index
    %c0_277 = arith.constant 0 : index
    %817 = vector.load %arg3[%c0_276, %c0_277] : memref<64x256xf32, #tpu.memory_space<vmem>>, vector<64x256xf32>
    %cst_278 = arith.constant dense<0.000000e+00> : vector<8x256xf32>
    %818 = tpu.matmul %791, %817, %cst_278 {dimension_numbers = #tpu.dot_dimension_numbers<[1], [0], [0], [1], [0, 0, 1, 1], [], []>} : vector<8x64xf32>, vector<64x256xf32>, vector<8x256xf32> -> vector<8x256xf32>
    %819 = arith.addf %816, %818 : vector<8x256xf32>
    %820 = arith.addf %819, %8 : vector<8x256xf32>
    %821 = math.tanh %820 : vector<8x256xf32>
    %822 = arith.mulf %821, %2 : vector<8x256xf32>
    %823 = arith.addf %822, %5 : vector<8x256xf32>
    %824 = vector.extract_strided_slice %823 {offsets = [0, 0], sizes = [8, 64], strides = [1, 1]} : vector<8x256xf32> to vector<8x64xf32>
    %825 = vector.extract_strided_slice %823 {offsets = [0, 64], sizes = [8, 64], strides = [1, 1]} : vector<8x256xf32> to vector<8x64xf32>
    %826 = vector.extract_strided_slice %823 {offsets = [0, 128], sizes = [8, 64], strides = [1, 1]} : vector<8x256xf32> to vector<8x64xf32>
    %827 = vector.extract_strided_slice %823 {offsets = [0, 192], sizes = [8, 64], strides = [1, 1]} : vector<8x256xf32> to vector<8x64xf32>
    %828 = arith.mulf %825, %789 : vector<8x64xf32>
    %829 = arith.mulf %824, %826 : vector<8x64xf32>
    %830 = arith.addf %828, %829 : vector<8x64xf32>
    %831 = math.tanh %830 : vector<8x64xf32>
    %832 = arith.mulf %827, %831 : vector<8x64xf32>
    %c1_i32_279 = arith.constant 1 : i32
    %833 = arith.addi %c5_i32_266, %c1_i32_279 : i32
    %834 = arith.index_cast %833 : i32 to index
    %c0_280 = arith.constant 0 : index
    %c0_281 = arith.constant 0 : index
    %835 = vector.load %arg9[%834, %c0_280, %c0_281] : memref<24x8x64xf32, #tpu.memory_space<vmem>>, vector<1x8x64xf32>
    %836 = vector.shape_cast %835 : vector<1x8x64xf32> to vector<8x64xf32>
    %837 = vector.shape_cast %832 : vector<8x64xf32> to vector<1x8x64xf32>
    tpu.vector_store %arg9[%834, %c0_280, %c0_281], %837 {strides = array<i32>} : memref<24x8x64xf32, #tpu.memory_space<vmem>>, vector<1x8x64xf32>,
    %c6_i32_282 = arith.constant 6 : i32
    %c0_283 = arith.constant 0 : index
    %c0_284 = arith.constant 0 : index
    %838 = vector.load %arg5[%c0_283, %c0_284] : memref<64x256xf32, #tpu.memory_space<vmem>>, vector<64x256xf32>
    %cst_285 = arith.constant dense<0.000000e+00> : vector<8x256xf32>
    %839 = tpu.matmul %832, %838, %cst_285 {dimension_numbers = #tpu.dot_dimension_numbers<[1], [0], [0], [1], [0, 0, 1, 1], [], []>} : vector<8x64xf32>, vector<64x256xf32>, vector<8x256xf32> -> vector<8x256xf32>
    %c0_286 = arith.constant 0 : index
    %c0_287 = arith.constant 0 : index
    %840 = vector.load %arg1[%c0_286, %c0_287] : memref<64x256xf32, #tpu.memory_space<vmem>>, vector<64x256xf32>
    %cst_288 = arith.constant dense<0.000000e+00> : vector<8x256xf32>
    %841 = tpu.matmul %814, %840, %cst_288 {dimension_numbers = #tpu.dot_dimension_numbers<[1], [0], [0], [1], [0, 0, 1, 1], [], []>} : vector<8x64xf32>, vector<64x256xf32>, vector<8x256xf32> -> vector<8x256xf32>
    %842 = arith.addf %839, %841 : vector<8x256xf32>
    %843 = arith.addf %842, %11 : vector<8x256xf32>
    %844 = math.tanh %843 : vector<8x256xf32>
    %845 = arith.mulf %844, %2 : vector<8x256xf32>
    %846 = arith.addf %845, %5 : vector<8x256xf32>
    %847 = vector.extract_strided_slice %846 {offsets = [0, 0], sizes = [8, 64], strides = [1, 1]} : vector<8x256xf32> to vector<8x64xf32>
    %848 = vector.extract_strided_slice %846 {offsets = [0, 64], sizes = [8, 64], strides = [1, 1]} : vector<8x256xf32> to vector<8x64xf32>
    %849 = vector.extract_strided_slice %846 {offsets = [0, 128], sizes = [8, 64], strides = [1, 1]} : vector<8x256xf32> to vector<8x64xf32>
    %850 = vector.extract_strided_slice %846 {offsets = [0, 192], sizes = [8, 64], strides = [1, 1]} : vector<8x256xf32> to vector<8x64xf32>
    %851 = arith.mulf %848, %812 : vector<8x64xf32>
    %852 = arith.mulf %847, %849 : vector<8x64xf32>
    %853 = arith.addf %851, %852 : vector<8x64xf32>
    %854 = math.tanh %853 : vector<8x64xf32>
    %855 = arith.mulf %850, %854 : vector<8x64xf32>
    %c0_289 = arith.constant 0 : index
    %c0_290 = arith.constant 0 : index
    %856 = vector.load %arg2[%c0_289, %c0_290] : memref<64x256xf32, #tpu.memory_space<vmem>>, vector<64x256xf32>
    %cst_291 = arith.constant dense<0.000000e+00> : vector<8x256xf32>
    %857 = tpu.matmul %855, %856, %cst_291 {dimension_numbers = #tpu.dot_dimension_numbers<[1], [0], [0], [1], [0, 0, 1, 1], [], []>} : vector<8x64xf32>, vector<64x256xf32>, vector<8x256xf32> -> vector<8x256xf32>
    %c0_292 = arith.constant 0 : index
    %c0_293 = arith.constant 0 : index
    %858 = vector.load %arg3[%c0_292, %c0_293] : memref<64x256xf32, #tpu.memory_space<vmem>>, vector<64x256xf32>
    %cst_294 = arith.constant dense<0.000000e+00> : vector<8x256xf32>
    %859 = tpu.matmul %832, %858, %cst_294 {dimension_numbers = #tpu.dot_dimension_numbers<[1], [0], [0], [1], [0, 0, 1, 1], [], []>} : vector<8x64xf32>, vector<64x256xf32>, vector<8x256xf32> -> vector<8x256xf32>
    %860 = arith.addf %857, %859 : vector<8x256xf32>
    %861 = arith.addf %860, %8 : vector<8x256xf32>
    %862 = math.tanh %861 : vector<8x256xf32>
    %863 = arith.mulf %862, %2 : vector<8x256xf32>
    %864 = arith.addf %863, %5 : vector<8x256xf32>
    %865 = vector.extract_strided_slice %864 {offsets = [0, 0], sizes = [8, 64], strides = [1, 1]} : vector<8x256xf32> to vector<8x64xf32>
    %866 = vector.extract_strided_slice %864 {offsets = [0, 64], sizes = [8, 64], strides = [1, 1]} : vector<8x256xf32> to vector<8x64xf32>
    %867 = vector.extract_strided_slice %864 {offsets = [0, 128], sizes = [8, 64], strides = [1, 1]} : vector<8x256xf32> to vector<8x64xf32>
    %868 = vector.extract_strided_slice %864 {offsets = [0, 192], sizes = [8, 64], strides = [1, 1]} : vector<8x256xf32> to vector<8x64xf32>
    %869 = arith.mulf %866, %830 : vector<8x64xf32>
    %870 = arith.mulf %865, %867 : vector<8x64xf32>
    %871 = arith.addf %869, %870 : vector<8x64xf32>
    %872 = math.tanh %871 : vector<8x64xf32>
    %873 = arith.mulf %868, %872 : vector<8x64xf32>
    %c1_i32_295 = arith.constant 1 : i32
    %874 = arith.addi %c6_i32_282, %c1_i32_295 : i32
    %875 = arith.index_cast %874 : i32 to index
    %c0_296 = arith.constant 0 : index
    %c0_297 = arith.constant 0 : index
    %876 = vector.load %arg9[%875, %c0_296, %c0_297] : memref<24x8x64xf32, #tpu.memory_space<vmem>>, vector<1x8x64xf32>
    %877 = vector.shape_cast %876 : vector<1x8x64xf32> to vector<8x64xf32>
    %878 = vector.shape_cast %873 : vector<8x64xf32> to vector<1x8x64xf32>
    tpu.vector_store %arg9[%875, %c0_296, %c0_297], %878 {strides = array<i32>} : memref<24x8x64xf32, #tpu.memory_space<vmem>>, vector<1x8x64xf32>,
    %c7_i32_298 = arith.constant 7 : i32
    %c0_299 = arith.constant 0 : index
    %c0_300 = arith.constant 0 : index
    %879 = vector.load %arg5[%c0_299, %c0_300] : memref<64x256xf32, #tpu.memory_space<vmem>>, vector<64x256xf32>
    %cst_301 = arith.constant dense<0.000000e+00> : vector<8x256xf32>
    %880 = tpu.matmul %873, %879, %cst_301 {dimension_numbers = #tpu.dot_dimension_numbers<[1], [0], [0], [1], [0, 0, 1, 1], [], []>} : vector<8x64xf32>, vector<64x256xf32>, vector<8x256xf32> -> vector<8x256xf32>
    %c0_302 = arith.constant 0 : index
    %c0_303 = arith.constant 0 : index
    %881 = vector.load %arg1[%c0_302, %c0_303] : memref<64x256xf32, #tpu.memory_space<vmem>>, vector<64x256xf32>
    %cst_304 = arith.constant dense<0.000000e+00> : vector<8x256xf32>
    %882 = tpu.matmul %855, %881, %cst_304 {dimension_numbers = #tpu.dot_dimension_numbers<[1], [0], [0], [1], [0, 0, 1, 1], [], []>} : vector<8x64xf32>, vector<64x256xf32>, vector<8x256xf32> -> vector<8x256xf32>
    %883 = arith.addf %880, %882 : vector<8x256xf32>
    %884 = arith.addf %883, %11 : vector<8x256xf32>
    %885 = math.tanh %884 : vector<8x256xf32>
    %886 = arith.mulf %885, %2 : vector<8x256xf32>
    %887 = arith.addf %886, %5 : vector<8x256xf32>
    %888 = vector.extract_strided_slice %887 {offsets = [0, 0], sizes = [8, 64], strides = [1, 1]} : vector<8x256xf32> to vector<8x64xf32>
    %889 = vector.extract_strided_slice %887 {offsets = [0, 64], sizes = [8, 64], strides = [1, 1]} : vector<8x256xf32> to vector<8x64xf32>
    %890 = vector.extract_strided_slice %887 {offsets = [0, 128], sizes = [8, 64], strides = [1, 1]} : vector<8x256xf32> to vector<8x64xf32>
    %891 = vector.extract_strided_slice %887 {offsets = [0, 192], sizes = [8, 64], strides = [1, 1]} : vector<8x256xf32> to vector<8x64xf32>
    %892 = arith.mulf %889, %853 : vector<8x64xf32>
    %893 = arith.mulf %888, %890 : vector<8x64xf32>
    %894 = arith.addf %892, %893 : vector<8x64xf32>
    %895 = math.tanh %894 : vector<8x64xf32>
    %896 = arith.mulf %891, %895 : vector<8x64xf32>
    %c0_305 = arith.constant 0 : index
    %c0_306 = arith.constant 0 : index
    %897 = vector.load %arg2[%c0_305, %c0_306] : memref<64x256xf32, #tpu.memory_space<vmem>>, vector<64x256xf32>
    %cst_307 = arith.constant dense<0.000000e+00> : vector<8x256xf32>
    %898 = tpu.matmul %896, %897, %cst_307 {dimension_numbers = #tpu.dot_dimension_numbers<[1], [0], [0], [1], [0, 0, 1, 1], [], []>} : vector<8x64xf32>, vector<64x256xf32>, vector<8x256xf32> -> vector<8x256xf32>
    %c0_308 = arith.constant 0 : index
    %c0_309 = arith.constant 0 : index
    %899 = vector.load %arg3[%c0_308, %c0_309] : memref<64x256xf32, #tpu.memory_space<vmem>>, vector<64x256xf32>
    %cst_310 = arith.constant dense<0.000000e+00> : vector<8x256xf32>
    %900 = tpu.matmul %873, %899, %cst_310 {dimension_numbers = #tpu.dot_dimension_numbers<[1], [0], [0], [1], [0, 0, 1, 1], [], []>} : vector<8x64xf32>, vector<64x256xf32>, vector<8x256xf32> -> vector<8x256xf32>
    %901 = arith.addf %898, %900 : vector<8x256xf32>
    %902 = arith.addf %901, %8 : vector<8x256xf32>
    %903 = math.tanh %902 : vector<8x256xf32>
    %904 = arith.mulf %903, %2 : vector<8x256xf32>
    %905 = arith.addf %904, %5 : vector<8x256xf32>
    %906 = vector.extract_strided_slice %905 {offsets = [0, 0], sizes = [8, 64], strides = [1, 1]} : vector<8x256xf32> to vector<8x64xf32>
    %907 = vector.extract_strided_slice %905 {offsets = [0, 64], sizes = [8, 64], strides = [1, 1]} : vector<8x256xf32> to vector<8x64xf32>
    %908 = vector.extract_strided_slice %905 {offsets = [0, 128], sizes = [8, 64], strides = [1, 1]} : vector<8x256xf32> to vector<8x64xf32>
    %909 = vector.extract_strided_slice %905 {offsets = [0, 192], sizes = [8, 64], strides = [1, 1]} : vector<8x256xf32> to vector<8x64xf32>
    %910 = arith.mulf %907, %871 : vector<8x64xf32>
    %911 = arith.mulf %906, %908 : vector<8x64xf32>
    %912 = arith.addf %910, %911 : vector<8x64xf32>
    %913 = math.tanh %912 : vector<8x64xf32>
    %914 = arith.mulf %909, %913 : vector<8x64xf32>
    %c1_i32_311 = arith.constant 1 : i32
    %915 = arith.addi %c7_i32_298, %c1_i32_311 : i32
    %916 = arith.index_cast %915 : i32 to index
    %c0_312 = arith.constant 0 : index
    %c0_313 = arith.constant 0 : index
    %917 = vector.load %arg9[%916, %c0_312, %c0_313] : memref<24x8x64xf32, #tpu.memory_space<vmem>>, vector<1x8x64xf32>
    %918 = vector.shape_cast %917 : vector<1x8x64xf32> to vector<8x64xf32>
    %919 = vector.shape_cast %914 : vector<8x64xf32> to vector<1x8x64xf32>
    tpu.vector_store %arg9[%916, %c0_312, %c0_313], %919 {strides = array<i32>} : memref<24x8x64xf32, #tpu.memory_space<vmem>>, vector<1x8x64xf32>,
    %c8_i32_314 = arith.constant 8 : i32
    %c0_315 = arith.constant 0 : index
    %c0_316 = arith.constant 0 : index
    %920 = vector.load %arg5[%c0_315, %c0_316] : memref<64x256xf32, #tpu.memory_space<vmem>>, vector<64x256xf32>
    %cst_317 = arith.constant dense<0.000000e+00> : vector<8x256xf32>
    %921 = tpu.matmul %914, %920, %cst_317 {dimension_numbers = #tpu.dot_dimension_numbers<[1], [0], [0], [1], [0, 0, 1, 1], [], []>} : vector<8x64xf32>, vector<64x256xf32>, vector<8x256xf32> -> vector<8x256xf32>
    %c0_318 = arith.constant 0 : index
    %c0_319 = arith.constant 0 : index
    %922 = vector.load %arg1[%c0_318, %c0_319] : memref<64x256xf32, #tpu.memory_space<vmem>>, vector<64x256xf32>
    %cst_320 = arith.constant dense<0.000000e+00> : vector<8x256xf32>
    %923 = tpu.matmul %896, %922, %cst_320 {dimension_numbers = #tpu.dot_dimension_numbers<[1], [0], [0], [1], [0, 0, 1, 1], [], []>} : vector<8x64xf32>, vector<64x256xf32>, vector<8x256xf32> -> vector<8x256xf32>
    %924 = arith.addf %921, %923 : vector<8x256xf32>
    %925 = arith.addf %924, %11 : vector<8x256xf32>
    %926 = math.tanh %925 : vector<8x256xf32>
    %927 = arith.mulf %926, %2 : vector<8x256xf32>
    %928 = arith.addf %927, %5 : vector<8x256xf32>
    %929 = vector.extract_strided_slice %928 {offsets = [0, 0], sizes = [8, 64], strides = [1, 1]} : vector<8x256xf32> to vector<8x64xf32>
    %930 = vector.extract_strided_slice %928 {offsets = [0, 64], sizes = [8, 64], strides = [1, 1]} : vector<8x256xf32> to vector<8x64xf32>
    %931 = vector.extract_strided_slice %928 {offsets = [0, 128], sizes = [8, 64], strides = [1, 1]} : vector<8x256xf32> to vector<8x64xf32>
    %932 = vector.extract_strided_slice %928 {offsets = [0, 192], sizes = [8, 64], strides = [1, 1]} : vector<8x256xf32> to vector<8x64xf32>
    %933 = arith.mulf %930, %894 : vector<8x64xf32>
    %934 = arith.mulf %929, %931 : vector<8x64xf32>
    %935 = arith.addf %933, %934 : vector<8x64xf32>
    %936 = math.tanh %935 : vector<8x64xf32>
    %937 = arith.mulf %932, %936 : vector<8x64xf32>
    %c0_321 = arith.constant 0 : index
    %c0_322 = arith.constant 0 : index
    %938 = vector.load %arg2[%c0_321, %c0_322] : memref<64x256xf32, #tpu.memory_space<vmem>>, vector<64x256xf32>
    %cst_323 = arith.constant dense<0.000000e+00> : vector<8x256xf32>
    %939 = tpu.matmul %937, %938, %cst_323 {dimension_numbers = #tpu.dot_dimension_numbers<[1], [0], [0], [1], [0, 0, 1, 1], [], []>} : vector<8x64xf32>, vector<64x256xf32>, vector<8x256xf32> -> vector<8x256xf32>
    %c0_324 = arith.constant 0 : index
    %c0_325 = arith.constant 0 : index
    %940 = vector.load %arg3[%c0_324, %c0_325] : memref<64x256xf32, #tpu.memory_space<vmem>>, vector<64x256xf32>
    %cst_326 = arith.constant dense<0.000000e+00> : vector<8x256xf32>
    %941 = tpu.matmul %914, %940, %cst_326 {dimension_numbers = #tpu.dot_dimension_numbers<[1], [0], [0], [1], [0, 0, 1, 1], [], []>} : vector<8x64xf32>, vector<64x256xf32>, vector<8x256xf32> -> vector<8x256xf32>
    %942 = arith.addf %939, %941 : vector<8x256xf32>
    %943 = arith.addf %942, %8 : vector<8x256xf32>
    %944 = math.tanh %943 : vector<8x256xf32>
    %945 = arith.mulf %944, %2 : vector<8x256xf32>
    %946 = arith.addf %945, %5 : vector<8x256xf32>
    %947 = vector.extract_strided_slice %946 {offsets = [0, 0], sizes = [8, 64], strides = [1, 1]} : vector<8x256xf32> to vector<8x64xf32>
    %948 = vector.extract_strided_slice %946 {offsets = [0, 64], sizes = [8, 64], strides = [1, 1]} : vector<8x256xf32> to vector<8x64xf32>
    %949 = vector.extract_strided_slice %946 {offsets = [0, 128], sizes = [8, 64], strides = [1, 1]} : vector<8x256xf32> to vector<8x64xf32>
    %950 = vector.extract_strided_slice %946 {offsets = [0, 192], sizes = [8, 64], strides = [1, 1]} : vector<8x256xf32> to vector<8x64xf32>
    %951 = arith.mulf %948, %912 : vector<8x64xf32>
    %952 = arith.mulf %947, %949 : vector<8x64xf32>
    %953 = arith.addf %951, %952 : vector<8x64xf32>
    %954 = math.tanh %953 : vector<8x64xf32>
    %955 = arith.mulf %950, %954 : vector<8x64xf32>
    %c1_i32_327 = arith.constant 1 : i32
    %956 = arith.addi %c8_i32_314, %c1_i32_327 : i32
    %957 = arith.index_cast %956 : i32 to index
    %c0_328 = arith.constant 0 : index
    %c0_329 = arith.constant 0 : index
    %958 = vector.load %arg9[%957, %c0_328, %c0_329] : memref<24x8x64xf32, #tpu.memory_space<vmem>>, vector<1x8x64xf32>
    %959 = vector.shape_cast %958 : vector<1x8x64xf32> to vector<8x64xf32>
    %960 = vector.shape_cast %955 : vector<8x64xf32> to vector<1x8x64xf32>
    tpu.vector_store %arg9[%957, %c0_328, %c0_329], %960 {strides = array<i32>} : memref<24x8x64xf32, #tpu.memory_space<vmem>>, vector<1x8x64xf32>,
    %c9_i32_330 = arith.constant 9 : i32
    %c0_331 = arith.constant 0 : index
    %c0_332 = arith.constant 0 : index
    %961 = vector.load %arg5[%c0_331, %c0_332] : memref<64x256xf32, #tpu.memory_space<vmem>>, vector<64x256xf32>
    %cst_333 = arith.constant dense<0.000000e+00> : vector<8x256xf32>
    %962 = tpu.matmul %955, %961, %cst_333 {dimension_numbers = #tpu.dot_dimension_numbers<[1], [0], [0], [1], [0, 0, 1, 1], [], []>} : vector<8x64xf32>, vector<64x256xf32>, vector<8x256xf32> -> vector<8x256xf32>
    %c0_334 = arith.constant 0 : index
    %c0_335 = arith.constant 0 : index
    %963 = vector.load %arg1[%c0_334, %c0_335] : memref<64x256xf32, #tpu.memory_space<vmem>>, vector<64x256xf32>
    %cst_336 = arith.constant dense<0.000000e+00> : vector<8x256xf32>
    %964 = tpu.matmul %937, %963, %cst_336 {dimension_numbers = #tpu.dot_dimension_numbers<[1], [0], [0], [1], [0, 0, 1, 1], [], []>} : vector<8x64xf32>, vector<64x256xf32>, vector<8x256xf32> -> vector<8x256xf32>
    %965 = arith.addf %962, %964 : vector<8x256xf32>
    %966 = arith.addf %965, %11 : vector<8x256xf32>
    %967 = math.tanh %966 : vector<8x256xf32>
    %968 = arith.mulf %967, %2 : vector<8x256xf32>
    %969 = arith.addf %968, %5 : vector<8x256xf32>
    %970 = vector.extract_strided_slice %969 {offsets = [0, 0], sizes = [8, 64], strides = [1, 1]} : vector<8x256xf32> to vector<8x64xf32>
    %971 = vector.extract_strided_slice %969 {offsets = [0, 64], sizes = [8, 64], strides = [1, 1]} : vector<8x256xf32> to vector<8x64xf32>
    %972 = vector.extract_strided_slice %969 {offsets = [0, 128], sizes = [8, 64], strides = [1, 1]} : vector<8x256xf32> to vector<8x64xf32>
    %973 = vector.extract_strided_slice %969 {offsets = [0, 192], sizes = [8, 64], strides = [1, 1]} : vector<8x256xf32> to vector<8x64xf32>
    %974 = arith.mulf %971, %935 : vector<8x64xf32>
    %975 = arith.mulf %970, %972 : vector<8x64xf32>
    %976 = arith.addf %974, %975 : vector<8x64xf32>
    %977 = math.tanh %976 : vector<8x64xf32>
    %978 = arith.mulf %973, %977 : vector<8x64xf32>
    %c0_337 = arith.constant 0 : index
    %c0_338 = arith.constant 0 : index
    %979 = vector.load %arg2[%c0_337, %c0_338] : memref<64x256xf32, #tpu.memory_space<vmem>>, vector<64x256xf32>
    %cst_339 = arith.constant dense<0.000000e+00> : vector<8x256xf32>
    %980 = tpu.matmul %978, %979, %cst_339 {dimension_numbers = #tpu.dot_dimension_numbers<[1], [0], [0], [1], [0, 0, 1, 1], [], []>} : vector<8x64xf32>, vector<64x256xf32>, vector<8x256xf32> -> vector<8x256xf32>
    %c0_340 = arith.constant 0 : index
    %c0_341 = arith.constant 0 : index
    %981 = vector.load %arg3[%c0_340, %c0_341] : memref<64x256xf32, #tpu.memory_space<vmem>>, vector<64x256xf32>
    %cst_342 = arith.constant dense<0.000000e+00> : vector<8x256xf32>
    %982 = tpu.matmul %955, %981, %cst_342 {dimension_numbers = #tpu.dot_dimension_numbers<[1], [0], [0], [1], [0, 0, 1, 1], [], []>} : vector<8x64xf32>, vector<64x256xf32>, vector<8x256xf32> -> vector<8x256xf32>
    %983 = arith.addf %980, %982 : vector<8x256xf32>
    %984 = arith.addf %983, %8 : vector<8x256xf32>
    %985 = math.tanh %984 : vector<8x256xf32>
    %986 = arith.mulf %985, %2 : vector<8x256xf32>
    %987 = arith.addf %986, %5 : vector<8x256xf32>
    %988 = vector.extract_strided_slice %987 {offsets = [0, 0], sizes = [8, 64], strides = [1, 1]} : vector<8x256xf32> to vector<8x64xf32>
    %989 = vector.extract_strided_slice %987 {offsets = [0, 64], sizes = [8, 64], strides = [1, 1]} : vector<8x256xf32> to vector<8x64xf32>
    %990 = vector.extract_strided_slice %987 {offsets = [0, 128], sizes = [8, 64], strides = [1, 1]} : vector<8x256xf32> to vector<8x64xf32>
    %991 = vector.extract_strided_slice %987 {offsets = [0, 192], sizes = [8, 64], strides = [1, 1]} : vector<8x256xf32> to vector<8x64xf32>
    %992 = arith.mulf %989, %953 : vector<8x64xf32>
    %993 = arith.mulf %988, %990 : vector<8x64xf32>
    %994 = arith.addf %992, %993 : vector<8x64xf32>
    %995 = math.tanh %994 : vector<8x64xf32>
    %996 = arith.mulf %991, %995 : vector<8x64xf32>
    %c1_i32_343 = arith.constant 1 : i32
    %997 = arith.addi %c9_i32_330, %c1_i32_343 : i32
    %998 = arith.index_cast %997 : i32 to index
    %c0_344 = arith.constant 0 : index
    %c0_345 = arith.constant 0 : index
    %999 = vector.load %arg9[%998, %c0_344, %c0_345] : memref<24x8x64xf32, #tpu.memory_space<vmem>>, vector<1x8x64xf32>
    %1000 = vector.shape_cast %999 : vector<1x8x64xf32> to vector<8x64xf32>
    %1001 = vector.shape_cast %996 : vector<8x64xf32> to vector<1x8x64xf32>
    tpu.vector_store %arg9[%998, %c0_344, %c0_345], %1001 {strides = array<i32>} : memref<24x8x64xf32, #tpu.memory_space<vmem>>, vector<1x8x64xf32>,
    %c10_i32_346 = arith.constant 10 : i32
    %c0_347 = arith.constant 0 : index
    %c0_348 = arith.constant 0 : index
    %1002 = vector.load %arg5[%c0_347, %c0_348] : memref<64x256xf32, #tpu.memory_space<vmem>>, vector<64x256xf32>
    %cst_349 = arith.constant dense<0.000000e+00> : vector<8x256xf32>
    %1003 = tpu.matmul %996, %1002, %cst_349 {dimension_numbers = #tpu.dot_dimension_numbers<[1], [0], [0], [1], [0, 0, 1, 1], [], []>} : vector<8x64xf32>, vector<64x256xf32>, vector<8x256xf32> -> vector<8x256xf32>
    %c0_350 = arith.constant 0 : index
    %c0_351 = arith.constant 0 : index
    %1004 = vector.load %arg1[%c0_350, %c0_351] : memref<64x256xf32, #tpu.memory_space<vmem>>, vector<64x256xf32>
    %cst_352 = arith.constant dense<0.000000e+00> : vector<8x256xf32>
    %1005 = tpu.matmul %978, %1004, %cst_352 {dimension_numbers = #tpu.dot_dimension_numbers<[1], [0], [0], [1], [0, 0, 1, 1], [], []>} : vector<8x64xf32>, vector<64x256xf32>, vector<8x256xf32> -> vector<8x256xf32>
    %1006 = arith.addf %1003, %1005 : vector<8x256xf32>
    %1007 = arith.addf %1006, %11 : vector<8x256xf32>
    %1008 = math.tanh %1007 : vector<8x256xf32>
    %1009 = arith.mulf %1008, %2 : vector<8x256xf32>
    %1010 = arith.addf %1009, %5 : vector<8x256xf32>
    %1011 = vector.extract_strided_slice %1010 {offsets = [0, 0], sizes = [8, 64], strides = [1, 1]} : vector<8x256xf32> to vector<8x64xf32>
    %1012 = vector.extract_strided_slice %1010 {offsets = [0, 64], sizes = [8, 64], strides = [1, 1]} : vector<8x256xf32> to vector<8x64xf32>
    %1013 = vector.extract_strided_slice %1010 {offsets = [0, 128], sizes = [8, 64], strides = [1, 1]} : vector<8x256xf32> to vector<8x64xf32>
    %1014 = vector.extract_strided_slice %1010 {offsets = [0, 192], sizes = [8, 64], strides = [1, 1]} : vector<8x256xf32> to vector<8x64xf32>
    %1015 = arith.mulf %1012, %976 : vector<8x64xf32>
    %1016 = arith.mulf %1011, %1013 : vector<8x64xf32>
    %1017 = arith.addf %1015, %1016 : vector<8x64xf32>
    %1018 = math.tanh %1017 : vector<8x64xf32>
    %1019 = arith.mulf %1014, %1018 : vector<8x64xf32>
    %c0_353 = arith.constant 0 : index
    %c0_354 = arith.constant 0 : index
    %1020 = vector.load %arg2[%c0_353, %c0_354] : memref<64x256xf32, #tpu.memory_space<vmem>>, vector<64x256xf32>
    %cst_355 = arith.constant dense<0.000000e+00> : vector<8x256xf32>
    %1021 = tpu.matmul %1019, %1020, %cst_355 {dimension_numbers = #tpu.dot_dimension_numbers<[1], [0], [0], [1], [0, 0, 1, 1], [], []>} : vector<8x64xf32>, vector<64x256xf32>, vector<8x256xf32> -> vector<8x256xf32>
    %c0_356 = arith.constant 0 : index
    %c0_357 = arith.constant 0 : index
    %1022 = vector.load %arg3[%c0_356, %c0_357] : memref<64x256xf32, #tpu.memory_space<vmem>>, vector<64x256xf32>
    %cst_358 = arith.constant dense<0.000000e+00> : vector<8x256xf32>
    %1023 = tpu.matmul %996, %1022, %cst_358 {dimension_numbers = #tpu.dot_dimension_numbers<[1], [0], [0], [1], [0, 0, 1, 1], [], []>} : vector<8x64xf32>, vector<64x256xf32>, vector<8x256xf32> -> vector<8x256xf32>
    %1024 = arith.addf %1021, %1023 : vector<8x256xf32>
    %1025 = arith.addf %1024, %8 : vector<8x256xf32>
    %1026 = math.tanh %1025 : vector<8x256xf32>
    %1027 = arith.mulf %1026, %2 : vector<8x256xf32>
    %1028 = arith.addf %1027, %5 : vector<8x256xf32>
    %1029 = vector.extract_strided_slice %1028 {offsets = [0, 0], sizes = [8, 64], strides = [1, 1]} : vector<8x256xf32> to vector<8x64xf32>
    %1030 = vector.extract_strided_slice %1028 {offsets = [0, 64], sizes = [8, 64], strides = [1, 1]} : vector<8x256xf32> to vector<8x64xf32>
    %1031 = vector.extract_strided_slice %1028 {offsets = [0, 128], sizes = [8, 64], strides = [1, 1]} : vector<8x256xf32> to vector<8x64xf32>
    %1032 = vector.extract_strided_slice %1028 {offsets = [0, 192], sizes = [8, 64], strides = [1, 1]} : vector<8x256xf32> to vector<8x64xf32>
    %1033 = arith.mulf %1030, %994 : vector<8x64xf32>
    %1034 = arith.mulf %1029, %1031 : vector<8x64xf32>
    %1035 = arith.addf %1033, %1034 : vector<8x64xf32>
    %1036 = math.tanh %1035 : vector<8x64xf32>
    %1037 = arith.mulf %1032, %1036 : vector<8x64xf32>
    %c1_i32_359 = arith.constant 1 : i32
    %1038 = arith.addi %c10_i32_346, %c1_i32_359 : i32
    %1039 = arith.index_cast %1038 : i32 to index
    %c0_360 = arith.constant 0 : index
    %c0_361 = arith.constant 0 : index
    %1040 = vector.load %arg9[%1039, %c0_360, %c0_361] : memref<24x8x64xf32, #tpu.memory_space<vmem>>, vector<1x8x64xf32>
    %1041 = vector.shape_cast %1040 : vector<1x8x64xf32> to vector<8x64xf32>
    %1042 = vector.shape_cast %1037 : vector<8x64xf32> to vector<1x8x64xf32>
    tpu.vector_store %arg9[%1039, %c0_360, %c0_361], %1042 {strides = array<i32>} : memref<24x8x64xf32, #tpu.memory_space<vmem>>, vector<1x8x64xf32>,
    %c11_i32_362 = arith.constant 11 : i32
    %c0_363 = arith.constant 0 : index
    %c0_364 = arith.constant 0 : index
    %1043 = vector.load %arg5[%c0_363, %c0_364] : memref<64x256xf32, #tpu.memory_space<vmem>>, vector<64x256xf32>
    %cst_365 = arith.constant dense<0.000000e+00> : vector<8x256xf32>
    %1044 = tpu.matmul %1037, %1043, %cst_365 {dimension_numbers = #tpu.dot_dimension_numbers<[1], [0], [0], [1], [0, 0, 1, 1], [], []>} : vector<8x64xf32>, vector<64x256xf32>, vector<8x256xf32> -> vector<8x256xf32>
    %c0_366 = arith.constant 0 : index
    %c0_367 = arith.constant 0 : index
    %1045 = vector.load %arg1[%c0_366, %c0_367] : memref<64x256xf32, #tpu.memory_space<vmem>>, vector<64x256xf32>
    %cst_368 = arith.constant dense<0.000000e+00> : vector<8x256xf32>
    %1046 = tpu.matmul %1019, %1045, %cst_368 {dimension_numbers = #tpu.dot_dimension_numbers<[1], [0], [0], [1], [0, 0, 1, 1], [], []>} : vector<8x64xf32>, vector<64x256xf32>, vector<8x256xf32> -> vector<8x256xf32>
    %1047 = arith.addf %1044, %1046 : vector<8x256xf32>
    %1048 = arith.addf %1047, %11 : vector<8x256xf32>
    %1049 = math.tanh %1048 : vector<8x256xf32>
    %1050 = arith.mulf %1049, %2 : vector<8x256xf32>
    %1051 = arith.addf %1050, %5 : vector<8x256xf32>
    %1052 = vector.extract_strided_slice %1051 {offsets = [0, 0], sizes = [8, 64], strides = [1, 1]} : vector<8x256xf32> to vector<8x64xf32>
    %1053 = vector.extract_strided_slice %1051 {offsets = [0, 64], sizes = [8, 64], strides = [1, 1]} : vector<8x256xf32> to vector<8x64xf32>
    %1054 = vector.extract_strided_slice %1051 {offsets = [0, 128], sizes = [8, 64], strides = [1, 1]} : vector<8x256xf32> to vector<8x64xf32>
    %1055 = vector.extract_strided_slice %1051 {offsets = [0, 192], sizes = [8, 64], strides = [1, 1]} : vector<8x256xf32> to vector<8x64xf32>
    %1056 = arith.mulf %1053, %1017 : vector<8x64xf32>
    %1057 = arith.mulf %1052, %1054 : vector<8x64xf32>
    %1058 = arith.addf %1056, %1057 : vector<8x64xf32>
    %1059 = math.tanh %1058 : vector<8x64xf32>
    %1060 = arith.mulf %1055, %1059 : vector<8x64xf32>
    %c0_369 = arith.constant 0 : index
    %c0_370 = arith.constant 0 : index
    %1061 = vector.load %arg2[%c0_369, %c0_370] : memref<64x256xf32, #tpu.memory_space<vmem>>, vector<64x256xf32>
    %cst_371 = arith.constant dense<0.000000e+00> : vector<8x256xf32>
    %1062 = tpu.matmul %1060, %1061, %cst_371 {dimension_numbers = #tpu.dot_dimension_numbers<[1], [0], [0], [1], [0, 0, 1, 1], [], []>} : vector<8x64xf32>, vector<64x256xf32>, vector<8x256xf32> -> vector<8x256xf32>
    %c0_372 = arith.constant 0 : index
    %c0_373 = arith.constant 0 : index
    %1063 = vector.load %arg3[%c0_372, %c0_373] : memref<64x256xf32, #tpu.memory_space<vmem>>, vector<64x256xf32>
    %cst_374 = arith.constant dense<0.000000e+00> : vector<8x256xf32>
    %1064 = tpu.matmul %1037, %1063, %cst_374 {dimension_numbers = #tpu.dot_dimension_numbers<[1], [0], [0], [1], [0, 0, 1, 1], [], []>} : vector<8x64xf32>, vector<64x256xf32>, vector<8x256xf32> -> vector<8x256xf32>
    %1065 = arith.addf %1062, %1064 : vector<8x256xf32>
    %1066 = arith.addf %1065, %8 : vector<8x256xf32>
    %1067 = math.tanh %1066 : vector<8x256xf32>
    %1068 = arith.mulf %1067, %2 : vector<8x256xf32>
    %1069 = arith.addf %1068, %5 : vector<8x256xf32>
    %1070 = vector.extract_strided_slice %1069 {offsets = [0, 0], sizes = [8, 64], strides = [1, 1]} : vector<8x256xf32> to vector<8x64xf32>
    %1071 = vector.extract_strided_slice %1069 {offsets = [0, 64], sizes = [8, 64], strides = [1, 1]} : vector<8x256xf32> to vector<8x64xf32>
    %1072 = vector.extract_strided_slice %1069 {offsets = [0, 128], sizes = [8, 64], strides = [1, 1]} : vector<8x256xf32> to vector<8x64xf32>
    %1073 = vector.extract_strided_slice %1069 {offsets = [0, 192], sizes = [8, 64], strides = [1, 1]} : vector<8x256xf32> to vector<8x64xf32>
    %1074 = arith.mulf %1071, %1035 : vector<8x64xf32>
    %1075 = arith.mulf %1070, %1072 : vector<8x64xf32>
    %1076 = arith.addf %1074, %1075 : vector<8x64xf32>
    %1077 = math.tanh %1076 : vector<8x64xf32>
    %1078 = arith.mulf %1073, %1077 : vector<8x64xf32>
    %c1_i32_375 = arith.constant 1 : i32
    %1079 = arith.addi %c11_i32_362, %c1_i32_375 : i32
    %1080 = arith.index_cast %1079 : i32 to index
    %c0_376 = arith.constant 0 : index
    %c0_377 = arith.constant 0 : index
    %1081 = vector.load %arg9[%1080, %c0_376, %c0_377] : memref<24x8x64xf32, #tpu.memory_space<vmem>>, vector<1x8x64xf32>
    %1082 = vector.shape_cast %1081 : vector<1x8x64xf32> to vector<8x64xf32>
    %1083 = vector.shape_cast %1078 : vector<8x64xf32> to vector<1x8x64xf32>
    tpu.vector_store %arg9[%1080, %c0_376, %c0_377], %1083 {strides = array<i32>} : memref<24x8x64xf32, #tpu.memory_space<vmem>>, vector<1x8x64xf32>,
    %c12_i32_378 = arith.constant 12 : i32
    %c0_379 = arith.constant 0 : index
    %c0_380 = arith.constant 0 : index
    %1084 = vector.load %arg5[%c0_379, %c0_380] : memref<64x256xf32, #tpu.memory_space<vmem>>, vector<64x256xf32>
    %cst_381 = arith.constant dense<0.000000e+00> : vector<8x256xf32>
    %1085 = tpu.matmul %1078, %1084, %cst_381 {dimension_numbers = #tpu.dot_dimension_numbers<[1], [0], [0], [1], [0, 0, 1, 1], [], []>} : vector<8x64xf32>, vector<64x256xf32>, vector<8x256xf32> -> vector<8x256xf32>
    %c0_382 = arith.constant 0 : index
    %c0_383 = arith.constant 0 : index
    %1086 = vector.load %arg1[%c0_382, %c0_383] : memref<64x256xf32, #tpu.memory_space<vmem>>, vector<64x256xf32>
    %cst_384 = arith.constant dense<0.000000e+00> : vector<8x256xf32>
    %1087 = tpu.matmul %1060, %1086, %cst_384 {dimension_numbers = #tpu.dot_dimension_numbers<[1], [0], [0], [1], [0, 0, 1, 1], [], []>} : vector<8x64xf32>, vector<64x256xf32>, vector<8x256xf32> -> vector<8x256xf32>
    %1088 = arith.addf %1085, %1087 : vector<8x256xf32>
    %1089 = arith.addf %1088, %11 : vector<8x256xf32>
    %1090 = math.tanh %1089 : vector<8x256xf32>
    %1091 = arith.mulf %1090, %2 : vector<8x256xf32>
    %1092 = arith.addf %1091, %5 : vector<8x256xf32>
    %1093 = vector.extract_strided_slice %1092 {offsets = [0, 0], sizes = [8, 64], strides = [1, 1]} : vector<8x256xf32> to vector<8x64xf32>
    %1094 = vector.extract_strided_slice %1092 {offsets = [0, 64], sizes = [8, 64], strides = [1, 1]} : vector<8x256xf32> to vector<8x64xf32>
    %1095 = vector.extract_strided_slice %1092 {offsets = [0, 128], sizes = [8, 64], strides = [1, 1]} : vector<8x256xf32> to vector<8x64xf32>
    %1096 = vector.extract_strided_slice %1092 {offsets = [0, 192], sizes = [8, 64], strides = [1, 1]} : vector<8x256xf32> to vector<8x64xf32>
    %1097 = arith.mulf %1094, %1058 : vector<8x64xf32>
    %1098 = arith.mulf %1093, %1095 : vector<8x64xf32>
    %1099 = arith.addf %1097, %1098 : vector<8x64xf32>
    %1100 = math.tanh %1099 : vector<8x64xf32>
    %1101 = arith.mulf %1096, %1100 : vector<8x64xf32>
    %c0_385 = arith.constant 0 : index
    %c0_386 = arith.constant 0 : index
    %1102 = vector.load %arg2[%c0_385, %c0_386] : memref<64x256xf32, #tpu.memory_space<vmem>>, vector<64x256xf32>
    %cst_387 = arith.constant dense<0.000000e+00> : vector<8x256xf32>
    %1103 = tpu.matmul %1101, %1102, %cst_387 {dimension_numbers = #tpu.dot_dimension_numbers<[1], [0], [0], [1], [0, 0, 1, 1], [], []>} : vector<8x64xf32>, vector<64x256xf32>, vector<8x256xf32> -> vector<8x256xf32>
    %c0_388 = arith.constant 0 : index
    %c0_389 = arith.constant 0 : index
    %1104 = vector.load %arg3[%c0_388, %c0_389] : memref<64x256xf32, #tpu.memory_space<vmem>>, vector<64x256xf32>
    %cst_390 = arith.constant dense<0.000000e+00> : vector<8x256xf32>
    %1105 = tpu.matmul %1078, %1104, %cst_390 {dimension_numbers = #tpu.dot_dimension_numbers<[1], [0], [0], [1], [0, 0, 1, 1], [], []>} : vector<8x64xf32>, vector<64x256xf32>, vector<8x256xf32> -> vector<8x256xf32>
    %1106 = arith.addf %1103, %1105 : vector<8x256xf32>
    %1107 = arith.addf %1106, %8 : vector<8x256xf32>
    %1108 = math.tanh %1107 : vector<8x256xf32>
    %1109 = arith.mulf %1108, %2 : vector<8x256xf32>
    %1110 = arith.addf %1109, %5 : vector<8x256xf32>
    %1111 = vector.extract_strided_slice %1110 {offsets = [0, 0], sizes = [8, 64], strides = [1, 1]} : vector<8x256xf32> to vector<8x64xf32>
    %1112 = vector.extract_strided_slice %1110 {offsets = [0, 64], sizes = [8, 64], strides = [1, 1]} : vector<8x256xf32> to vector<8x64xf32>
    %1113 = vector.extract_strided_slice %1110 {offsets = [0, 128], sizes = [8, 64], strides = [1, 1]} : vector<8x256xf32> to vector<8x64xf32>
    %1114 = vector.extract_strided_slice %1110 {offsets = [0, 192], sizes = [8, 64], strides = [1, 1]} : vector<8x256xf32> to vector<8x64xf32>
    %1115 = arith.mulf %1112, %1076 : vector<8x64xf32>
    %1116 = arith.mulf %1111, %1113 : vector<8x64xf32>
    %1117 = arith.addf %1115, %1116 : vector<8x64xf32>
    %1118 = math.tanh %1117 : vector<8x64xf32>
    %1119 = arith.mulf %1114, %1118 : vector<8x64xf32>
    %c1_i32_391 = arith.constant 1 : i32
    %1120 = arith.addi %c12_i32_378, %c1_i32_391 : i32
    %1121 = arith.index_cast %1120 : i32 to index
    %c0_392 = arith.constant 0 : index
    %c0_393 = arith.constant 0 : index
    %1122 = vector.load %arg9[%1121, %c0_392, %c0_393] : memref<24x8x64xf32, #tpu.memory_space<vmem>>, vector<1x8x64xf32>
    %1123 = vector.shape_cast %1122 : vector<1x8x64xf32> to vector<8x64xf32>
    %1124 = vector.shape_cast %1119 : vector<8x64xf32> to vector<1x8x64xf32>
    tpu.vector_store %arg9[%1121, %c0_392, %c0_393], %1124 {strides = array<i32>} : memref<24x8x64xf32, #tpu.memory_space<vmem>>, vector<1x8x64xf32>,
    %c13_i32_394 = arith.constant 13 : i32
    %c0_395 = arith.constant 0 : index
    %c0_396 = arith.constant 0 : index
    %1125 = vector.load %arg5[%c0_395, %c0_396] : memref<64x256xf32, #tpu.memory_space<vmem>>, vector<64x256xf32>
    %cst_397 = arith.constant dense<0.000000e+00> : vector<8x256xf32>
    %1126 = tpu.matmul %1119, %1125, %cst_397 {dimension_numbers = #tpu.dot_dimension_numbers<[1], [0], [0], [1], [0, 0, 1, 1], [], []>} : vector<8x64xf32>, vector<64x256xf32>, vector<8x256xf32> -> vector<8x256xf32>
    %c0_398 = arith.constant 0 : index
    %c0_399 = arith.constant 0 : index
    %1127 = vector.load %arg1[%c0_398, %c0_399] : memref<64x256xf32, #tpu.memory_space<vmem>>, vector<64x256xf32>
    %cst_400 = arith.constant dense<0.000000e+00> : vector<8x256xf32>
    %1128 = tpu.matmul %1101, %1127, %cst_400 {dimension_numbers = #tpu.dot_dimension_numbers<[1], [0], [0], [1], [0, 0, 1, 1], [], []>} : vector<8x64xf32>, vector<64x256xf32>, vector<8x256xf32> -> vector<8x256xf32>
    %1129 = arith.addf %1126, %1128 : vector<8x256xf32>
    %1130 = arith.addf %1129, %11 : vector<8x256xf32>
    %1131 = math.tanh %1130 : vector<8x256xf32>
    %1132 = arith.mulf %1131, %2 : vector<8x256xf32>
    %1133 = arith.addf %1132, %5 : vector<8x256xf32>
    %1134 = vector.extract_strided_slice %1133 {offsets = [0, 0], sizes = [8, 64], strides = [1, 1]} : vector<8x256xf32> to vector<8x64xf32>
    %1135 = vector.extract_strided_slice %1133 {offsets = [0, 64], sizes = [8, 64], strides = [1, 1]} : vector<8x256xf32> to vector<8x64xf32>
    %1136 = vector.extract_strided_slice %1133 {offsets = [0, 128], sizes = [8, 64], strides = [1, 1]} : vector<8x256xf32> to vector<8x64xf32>
    %1137 = vector.extract_strided_slice %1133 {offsets = [0, 192], sizes = [8, 64], strides = [1, 1]} : vector<8x256xf32> to vector<8x64xf32>
    %1138 = arith.mulf %1135, %1099 : vector<8x64xf32>
    %1139 = arith.mulf %1134, %1136 : vector<8x64xf32>
    %1140 = arith.addf %1138, %1139 : vector<8x64xf32>
    %1141 = math.tanh %1140 : vector<8x64xf32>
    %1142 = arith.mulf %1137, %1141 : vector<8x64xf32>
    %c0_401 = arith.constant 0 : index
    %c0_402 = arith.constant 0 : index
    %1143 = vector.load %arg2[%c0_401, %c0_402] : memref<64x256xf32, #tpu.memory_space<vmem>>, vector<64x256xf32>
    %cst_403 = arith.constant dense<0.000000e+00> : vector<8x256xf32>
    %1144 = tpu.matmul %1142, %1143, %cst_403 {dimension_numbers = #tpu.dot_dimension_numbers<[1], [0], [0], [1], [0, 0, 1, 1], [], []>} : vector<8x64xf32>, vector<64x256xf32>, vector<8x256xf32> -> vector<8x256xf32>
    %c0_404 = arith.constant 0 : index
    %c0_405 = arith.constant 0 : index
    %1145 = vector.load %arg3[%c0_404, %c0_405] : memref<64x256xf32, #tpu.memory_space<vmem>>, vector<64x256xf32>
    %cst_406 = arith.constant dense<0.000000e+00> : vector<8x256xf32>
    %1146 = tpu.matmul %1119, %1145, %cst_406 {dimension_numbers = #tpu.dot_dimension_numbers<[1], [0], [0], [1], [0, 0, 1, 1], [], []>} : vector<8x64xf32>, vector<64x256xf32>, vector<8x256xf32> -> vector<8x256xf32>
    %1147 = arith.addf %1144, %1146 : vector<8x256xf32>
    %1148 = arith.addf %1147, %8 : vector<8x256xf32>
    %1149 = math.tanh %1148 : vector<8x256xf32>
    %1150 = arith.mulf %1149, %2 : vector<8x256xf32>
    %1151 = arith.addf %1150, %5 : vector<8x256xf32>
    %1152 = vector.extract_strided_slice %1151 {offsets = [0, 0], sizes = [8, 64], strides = [1, 1]} : vector<8x256xf32> to vector<8x64xf32>
    %1153 = vector.extract_strided_slice %1151 {offsets = [0, 64], sizes = [8, 64], strides = [1, 1]} : vector<8x256xf32> to vector<8x64xf32>
    %1154 = vector.extract_strided_slice %1151 {offsets = [0, 128], sizes = [8, 64], strides = [1, 1]} : vector<8x256xf32> to vector<8x64xf32>
    %1155 = vector.extract_strided_slice %1151 {offsets = [0, 192], sizes = [8, 64], strides = [1, 1]} : vector<8x256xf32> to vector<8x64xf32>
    %1156 = arith.mulf %1153, %1117 : vector<8x64xf32>
    %1157 = arith.mulf %1152, %1154 : vector<8x64xf32>
    %1158 = arith.addf %1156, %1157 : vector<8x64xf32>
    %1159 = math.tanh %1158 : vector<8x64xf32>
    %1160 = arith.mulf %1155, %1159 : vector<8x64xf32>
    %c1_i32_407 = arith.constant 1 : i32
    %1161 = arith.addi %c13_i32_394, %c1_i32_407 : i32
    %1162 = arith.index_cast %1161 : i32 to index
    %c0_408 = arith.constant 0 : index
    %c0_409 = arith.constant 0 : index
    %1163 = vector.load %arg9[%1162, %c0_408, %c0_409] : memref<24x8x64xf32, #tpu.memory_space<vmem>>, vector<1x8x64xf32>
    %1164 = vector.shape_cast %1163 : vector<1x8x64xf32> to vector<8x64xf32>
    %1165 = vector.shape_cast %1160 : vector<8x64xf32> to vector<1x8x64xf32>
    tpu.vector_store %arg9[%1162, %c0_408, %c0_409], %1165 {strides = array<i32>} : memref<24x8x64xf32, #tpu.memory_space<vmem>>, vector<1x8x64xf32>,
    %c14_i32_410 = arith.constant 14 : i32
    %c0_411 = arith.constant 0 : index
    %c0_412 = arith.constant 0 : index
    %1166 = vector.load %arg5[%c0_411, %c0_412] : memref<64x256xf32, #tpu.memory_space<vmem>>, vector<64x256xf32>
    %cst_413 = arith.constant dense<0.000000e+00> : vector<8x256xf32>
    %1167 = tpu.matmul %1160, %1166, %cst_413 {dimension_numbers = #tpu.dot_dimension_numbers<[1], [0], [0], [1], [0, 0, 1, 1], [], []>} : vector<8x64xf32>, vector<64x256xf32>, vector<8x256xf32> -> vector<8x256xf32>
    %c0_414 = arith.constant 0 : index
    %c0_415 = arith.constant 0 : index
    %1168 = vector.load %arg1[%c0_414, %c0_415] : memref<64x256xf32, #tpu.memory_space<vmem>>, vector<64x256xf32>
    %cst_416 = arith.constant dense<0.000000e+00> : vector<8x256xf32>
    %1169 = tpu.matmul %1142, %1168, %cst_416 {dimension_numbers = #tpu.dot_dimension_numbers<[1], [0], [0], [1], [0, 0, 1, 1], [], []>} : vector<8x64xf32>, vector<64x256xf32>, vector<8x256xf32> -> vector<8x256xf32>
    %1170 = arith.addf %1167, %1169 : vector<8x256xf32>
    %1171 = arith.addf %1170, %11 : vector<8x256xf32>
    %1172 = math.tanh %1171 : vector<8x256xf32>
    %1173 = arith.mulf %1172, %2 : vector<8x256xf32>
    %1174 = arith.addf %1173, %5 : vector<8x256xf32>
    %1175 = vector.extract_strided_slice %1174 {offsets = [0, 0], sizes = [8, 64], strides = [1, 1]} : vector<8x256xf32> to vector<8x64xf32>
    %1176 = vector.extract_strided_slice %1174 {offsets = [0, 64], sizes = [8, 64], strides = [1, 1]} : vector<8x256xf32> to vector<8x64xf32>
    %1177 = vector.extract_strided_slice %1174 {offsets = [0, 128], sizes = [8, 64], strides = [1, 1]} : vector<8x256xf32> to vector<8x64xf32>
    %1178 = vector.extract_strided_slice %1174 {offsets = [0, 192], sizes = [8, 64], strides = [1, 1]} : vector<8x256xf32> to vector<8x64xf32>
    %1179 = arith.mulf %1176, %1140 : vector<8x64xf32>
    %1180 = arith.mulf %1175, %1177 : vector<8x64xf32>
    %1181 = arith.addf %1179, %1180 : vector<8x64xf32>
    %1182 = math.tanh %1181 : vector<8x64xf32>
    %1183 = arith.mulf %1178, %1182 : vector<8x64xf32>
    %c0_417 = arith.constant 0 : index
    %c0_418 = arith.constant 0 : index
    %1184 = vector.load %arg2[%c0_417, %c0_418] : memref<64x256xf32, #tpu.memory_space<vmem>>, vector<64x256xf32>
    %cst_419 = arith.constant dense<0.000000e+00> : vector<8x256xf32>
    %1185 = tpu.matmul %1183, %1184, %cst_419 {dimension_numbers = #tpu.dot_dimension_numbers<[1], [0], [0], [1], [0, 0, 1, 1], [], []>} : vector<8x64xf32>, vector<64x256xf32>, vector<8x256xf32> -> vector<8x256xf32>
    %c0_420 = arith.constant 0 : index
    %c0_421 = arith.constant 0 : index
    %1186 = vector.load %arg3[%c0_420, %c0_421] : memref<64x256xf32, #tpu.memory_space<vmem>>, vector<64x256xf32>
    %cst_422 = arith.constant dense<0.000000e+00> : vector<8x256xf32>
    %1187 = tpu.matmul %1160, %1186, %cst_422 {dimension_numbers = #tpu.dot_dimension_numbers<[1], [0], [0], [1], [0, 0, 1, 1], [], []>} : vector<8x64xf32>, vector<64x256xf32>, vector<8x256xf32> -> vector<8x256xf32>
    %1188 = arith.addf %1185, %1187 : vector<8x256xf32>
    %1189 = arith.addf %1188, %8 : vector<8x256xf32>
    %1190 = math.tanh %1189 : vector<8x256xf32>
    %1191 = arith.mulf %1190, %2 : vector<8x256xf32>
    %1192 = arith.addf %1191, %5 : vector<8x256xf32>
    %1193 = vector.extract_strided_slice %1192 {offsets = [0, 0], sizes = [8, 64], strides = [1, 1]} : vector<8x256xf32> to vector<8x64xf32>
    %1194 = vector.extract_strided_slice %1192 {offsets = [0, 64], sizes = [8, 64], strides = [1, 1]} : vector<8x256xf32> to vector<8x64xf32>
    %1195 = vector.extract_strided_slice %1192 {offsets = [0, 128], sizes = [8, 64], strides = [1, 1]} : vector<8x256xf32> to vector<8x64xf32>
    %1196 = vector.extract_strided_slice %1192 {offsets = [0, 192], sizes = [8, 64], strides = [1, 1]} : vector<8x256xf32> to vector<8x64xf32>
    %1197 = arith.mulf %1194, %1158 : vector<8x64xf32>
    %1198 = arith.mulf %1193, %1195 : vector<8x64xf32>
    %1199 = arith.addf %1197, %1198 : vector<8x64xf32>
    %1200 = math.tanh %1199 : vector<8x64xf32>
    %1201 = arith.mulf %1196, %1200 : vector<8x64xf32>
    %c1_i32_423 = arith.constant 1 : i32
    %1202 = arith.addi %c14_i32_410, %c1_i32_423 : i32
    %1203 = arith.index_cast %1202 : i32 to index
    %c0_424 = arith.constant 0 : index
    %c0_425 = arith.constant 0 : index
    %1204 = vector.load %arg9[%1203, %c0_424, %c0_425] : memref<24x8x64xf32, #tpu.memory_space<vmem>>, vector<1x8x64xf32>
    %1205 = vector.shape_cast %1204 : vector<1x8x64xf32> to vector<8x64xf32>
    %1206 = vector.shape_cast %1201 : vector<8x64xf32> to vector<1x8x64xf32>
    tpu.vector_store %arg9[%1203, %c0_424, %c0_425], %1206 {strides = array<i32>} : memref<24x8x64xf32, #tpu.memory_space<vmem>>, vector<1x8x64xf32>,
    %c15_i32_426 = arith.constant 15 : i32
    %c0_427 = arith.constant 0 : index
    %c0_428 = arith.constant 0 : index
    %1207 = vector.load %arg5[%c0_427, %c0_428] : memref<64x256xf32, #tpu.memory_space<vmem>>, vector<64x256xf32>
    %cst_429 = arith.constant dense<0.000000e+00> : vector<8x256xf32>
    %1208 = tpu.matmul %1201, %1207, %cst_429 {dimension_numbers = #tpu.dot_dimension_numbers<[1], [0], [0], [1], [0, 0, 1, 1], [], []>} : vector<8x64xf32>, vector<64x256xf32>, vector<8x256xf32> -> vector<8x256xf32>
    %c0_430 = arith.constant 0 : index
    %c0_431 = arith.constant 0 : index
    %1209 = vector.load %arg1[%c0_430, %c0_431] : memref<64x256xf32, #tpu.memory_space<vmem>>, vector<64x256xf32>
    %cst_432 = arith.constant dense<0.000000e+00> : vector<8x256xf32>
    %1210 = tpu.matmul %1183, %1209, %cst_432 {dimension_numbers = #tpu.dot_dimension_numbers<[1], [0], [0], [1], [0, 0, 1, 1], [], []>} : vector<8x64xf32>, vector<64x256xf32>, vector<8x256xf32> -> vector<8x256xf32>
    %1211 = arith.addf %1208, %1210 : vector<8x256xf32>
    %1212 = arith.addf %1211, %11 : vector<8x256xf32>
    %1213 = math.tanh %1212 : vector<8x256xf32>
    %1214 = arith.mulf %1213, %2 : vector<8x256xf32>
    %1215 = arith.addf %1214, %5 : vector<8x256xf32>
    %1216 = vector.extract_strided_slice %1215 {offsets = [0, 0], sizes = [8, 64], strides = [1, 1]} : vector<8x256xf32> to vector<8x64xf32>
    %1217 = vector.extract_strided_slice %1215 {offsets = [0, 64], sizes = [8, 64], strides = [1, 1]} : vector<8x256xf32> to vector<8x64xf32>
    %1218 = vector.extract_strided_slice %1215 {offsets = [0, 128], sizes = [8, 64], strides = [1, 1]} : vector<8x256xf32> to vector<8x64xf32>
    %1219 = vector.extract_strided_slice %1215 {offsets = [0, 192], sizes = [8, 64], strides = [1, 1]} : vector<8x256xf32> to vector<8x64xf32>
    %1220 = arith.mulf %1217, %1181 : vector<8x64xf32>
    %1221 = arith.mulf %1216, %1218 : vector<8x64xf32>
    %1222 = arith.addf %1220, %1221 : vector<8x64xf32>
    %1223 = math.tanh %1222 : vector<8x64xf32>
    %1224 = arith.mulf %1219, %1223 : vector<8x64xf32>
    %c0_433 = arith.constant 0 : index
    %c0_434 = arith.constant 0 : index
    %1225 = vector.load %arg2[%c0_433, %c0_434] : memref<64x256xf32, #tpu.memory_space<vmem>>, vector<64x256xf32>
    %cst_435 = arith.constant dense<0.000000e+00> : vector<8x256xf32>
    %1226 = tpu.matmul %1224, %1225, %cst_435 {dimension_numbers = #tpu.dot_dimension_numbers<[1], [0], [0], [1], [0, 0, 1, 1], [], []>} : vector<8x64xf32>, vector<64x256xf32>, vector<8x256xf32> -> vector<8x256xf32>
    %c0_436 = arith.constant 0 : index
    %c0_437 = arith.constant 0 : index
    %1227 = vector.load %arg3[%c0_436, %c0_437] : memref<64x256xf32, #tpu.memory_space<vmem>>, vector<64x256xf32>
    %cst_438 = arith.constant dense<0.000000e+00> : vector<8x256xf32>
    %1228 = tpu.matmul %1201, %1227, %cst_438 {dimension_numbers = #tpu.dot_dimension_numbers<[1], [0], [0], [1], [0, 0, 1, 1], [], []>} : vector<8x64xf32>, vector<64x256xf32>, vector<8x256xf32> -> vector<8x256xf32>
    %1229 = arith.addf %1226, %1228 : vector<8x256xf32>
    %1230 = arith.addf %1229, %8 : vector<8x256xf32>
    %1231 = math.tanh %1230 : vector<8x256xf32>
    %1232 = arith.mulf %1231, %2 : vector<8x256xf32>
    %1233 = arith.addf %1232, %5 : vector<8x256xf32>
    %1234 = vector.extract_strided_slice %1233 {offsets = [0, 0], sizes = [8, 64], strides = [1, 1]} : vector<8x256xf32> to vector<8x64xf32>
    %1235 = vector.extract_strided_slice %1233 {offsets = [0, 64], sizes = [8, 64], strides = [1, 1]} : vector<8x256xf32> to vector<8x64xf32>
    %1236 = vector.extract_strided_slice %1233 {offsets = [0, 128], sizes = [8, 64], strides = [1, 1]} : vector<8x256xf32> to vector<8x64xf32>
    %1237 = vector.extract_strided_slice %1233 {offsets = [0, 192], sizes = [8, 64], strides = [1, 1]} : vector<8x256xf32> to vector<8x64xf32>
    %1238 = arith.mulf %1235, %1199 : vector<8x64xf32>
    %1239 = arith.mulf %1234, %1236 : vector<8x64xf32>
    %1240 = arith.addf %1238, %1239 : vector<8x64xf32>
    %1241 = math.tanh %1240 : vector<8x64xf32>
    %1242 = arith.mulf %1237, %1241 : vector<8x64xf32>
    %c1_i32_439 = arith.constant 1 : i32
    %1243 = arith.addi %c15_i32_426, %c1_i32_439 : i32
    %1244 = arith.index_cast %1243 : i32 to index
    %c0_440 = arith.constant 0 : index
    %c0_441 = arith.constant 0 : index
    %1245 = vector.load %arg9[%1244, %c0_440, %c0_441] : memref<24x8x64xf32, #tpu.memory_space<vmem>>, vector<1x8x64xf32>
    %1246 = vector.shape_cast %1245 : vector<1x8x64xf32> to vector<8x64xf32>
    %1247 = vector.shape_cast %1242 : vector<8x64xf32> to vector<1x8x64xf32>
    tpu.vector_store %arg9[%1244, %c0_440, %c0_441], %1247 {strides = array<i32>} : memref<24x8x64xf32, #tpu.memory_space<vmem>>, vector<1x8x64xf32>,
    %c16_i32_442 = arith.constant 16 : i32
    %c0_443 = arith.constant 0 : index
    %c0_444 = arith.constant 0 : index
    %1248 = vector.load %arg5[%c0_443, %c0_444] : memref<64x256xf32, #tpu.memory_space<vmem>>, vector<64x256xf32>
    %cst_445 = arith.constant dense<0.000000e+00> : vector<8x256xf32>
    %1249 = tpu.matmul %1242, %1248, %cst_445 {dimension_numbers = #tpu.dot_dimension_numbers<[1], [0], [0], [1], [0, 0, 1, 1], [], []>} : vector<8x64xf32>, vector<64x256xf32>, vector<8x256xf32> -> vector<8x256xf32>
    %c0_446 = arith.constant 0 : index
    %c0_447 = arith.constant 0 : index
    %1250 = vector.load %arg1[%c0_446, %c0_447] : memref<64x256xf32, #tpu.memory_space<vmem>>, vector<64x256xf32>
    %cst_448 = arith.constant dense<0.000000e+00> : vector<8x256xf32>
    %1251 = tpu.matmul %1224, %1250, %cst_448 {dimension_numbers = #tpu.dot_dimension_numbers<[1], [0], [0], [1], [0, 0, 1, 1], [], []>} : vector<8x64xf32>, vector<64x256xf32>, vector<8x256xf32> -> vector<8x256xf32>
    %1252 = arith.addf %1249, %1251 : vector<8x256xf32>
    %1253 = arith.addf %1252, %11 : vector<8x256xf32>
    %1254 = math.tanh %1253 : vector<8x256xf32>
    %1255 = arith.mulf %1254, %2 : vector<8x256xf32>
    %1256 = arith.addf %1255, %5 : vector<8x256xf32>
    %1257 = vector.extract_strided_slice %1256 {offsets = [0, 0], sizes = [8, 64], strides = [1, 1]} : vector<8x256xf32> to vector<8x64xf32>
    %1258 = vector.extract_strided_slice %1256 {offsets = [0, 64], sizes = [8, 64], strides = [1, 1]} : vector<8x256xf32> to vector<8x64xf32>
    %1259 = vector.extract_strided_slice %1256 {offsets = [0, 128], sizes = [8, 64], strides = [1, 1]} : vector<8x256xf32> to vector<8x64xf32>
    %1260 = vector.extract_strided_slice %1256 {offsets = [0, 192], sizes = [8, 64], strides = [1, 1]} : vector<8x256xf32> to vector<8x64xf32>
    %1261 = arith.mulf %1258, %1222 : vector<8x64xf32>
    %1262 = arith.mulf %1257, %1259 : vector<8x64xf32>
    %1263 = arith.addf %1261, %1262 : vector<8x64xf32>
    %1264 = math.tanh %1263 : vector<8x64xf32>
    %1265 = arith.mulf %1260, %1264 : vector<8x64xf32>
    %c0_449 = arith.constant 0 : index
    %c0_450 = arith.constant 0 : index
    %1266 = vector.load %arg2[%c0_449, %c0_450] : memref<64x256xf32, #tpu.memory_space<vmem>>, vector<64x256xf32>
    %cst_451 = arith.constant dense<0.000000e+00> : vector<8x256xf32>
    %1267 = tpu.matmul %1265, %1266, %cst_451 {dimension_numbers = #tpu.dot_dimension_numbers<[1], [0], [0], [1], [0, 0, 1, 1], [], []>} : vector<8x64xf32>, vector<64x256xf32>, vector<8x256xf32> -> vector<8x256xf32>
    %c0_452 = arith.constant 0 : index
    %c0_453 = arith.constant 0 : index
    %1268 = vector.load %arg3[%c0_452, %c0_453] : memref<64x256xf32, #tpu.memory_space<vmem>>, vector<64x256xf32>
    %cst_454 = arith.constant dense<0.000000e+00> : vector<8x256xf32>
    %1269 = tpu.matmul %1242, %1268, %cst_454 {dimension_numbers = #tpu.dot_dimension_numbers<[1], [0], [0], [1], [0, 0, 1, 1], [], []>} : vector<8x64xf32>, vector<64x256xf32>, vector<8x256xf32> -> vector<8x256xf32>
    %1270 = arith.addf %1267, %1269 : vector<8x256xf32>
    %1271 = arith.addf %1270, %8 : vector<8x256xf32>
    %1272 = math.tanh %1271 : vector<8x256xf32>
    %1273 = arith.mulf %1272, %2 : vector<8x256xf32>
    %1274 = arith.addf %1273, %5 : vector<8x256xf32>
    %1275 = vector.extract_strided_slice %1274 {offsets = [0, 0], sizes = [8, 64], strides = [1, 1]} : vector<8x256xf32> to vector<8x64xf32>
    %1276 = vector.extract_strided_slice %1274 {offsets = [0, 64], sizes = [8, 64], strides = [1, 1]} : vector<8x256xf32> to vector<8x64xf32>
    %1277 = vector.extract_strided_slice %1274 {offsets = [0, 128], sizes = [8, 64], strides = [1, 1]} : vector<8x256xf32> to vector<8x64xf32>
    %1278 = vector.extract_strided_slice %1274 {offsets = [0, 192], sizes = [8, 64], strides = [1, 1]} : vector<8x256xf32> to vector<8x64xf32>
    %1279 = arith.mulf %1276, %1240 : vector<8x64xf32>
    %1280 = arith.mulf %1275, %1277 : vector<8x64xf32>
    %1281 = arith.addf %1279, %1280 : vector<8x64xf32>
    %1282 = math.tanh %1281 : vector<8x64xf32>
    %1283 = arith.mulf %1278, %1282 : vector<8x64xf32>
    %c1_i32_455 = arith.constant 1 : i32
    %1284 = arith.addi %c16_i32_442, %c1_i32_455 : i32
    %1285 = arith.index_cast %1284 : i32 to index
    %c0_456 = arith.constant 0 : index
    %c0_457 = arith.constant 0 : index
    %1286 = vector.load %arg9[%1285, %c0_456, %c0_457] : memref<24x8x64xf32, #tpu.memory_space<vmem>>, vector<1x8x64xf32>
    %1287 = vector.shape_cast %1286 : vector<1x8x64xf32> to vector<8x64xf32>
    %1288 = vector.shape_cast %1283 : vector<8x64xf32> to vector<1x8x64xf32>
    tpu.vector_store %arg9[%1285, %c0_456, %c0_457], %1288 {strides = array<i32>} : memref<24x8x64xf32, #tpu.memory_space<vmem>>, vector<1x8x64xf32>,
    %c17_i32 = arith.constant 17 : i32
    %c0_458 = arith.constant 0 : index
    %c0_459 = arith.constant 0 : index
    %1289 = vector.load %arg5[%c0_458, %c0_459] : memref<64x256xf32, #tpu.memory_space<vmem>>, vector<64x256xf32>
    %cst_460 = arith.constant dense<0.000000e+00> : vector<8x256xf32>
    %1290 = tpu.matmul %1283, %1289, %cst_460 {dimension_numbers = #tpu.dot_dimension_numbers<[1], [0], [0], [1], [0, 0, 1, 1], [], []>} : vector<8x64xf32>, vector<64x256xf32>, vector<8x256xf32> -> vector<8x256xf32>
    %c0_461 = arith.constant 0 : index
    %c0_462 = arith.constant 0 : index
    %1291 = vector.load %arg1[%c0_461, %c0_462] : memref<64x256xf32, #tpu.memory_space<vmem>>, vector<64x256xf32>
    %cst_463 = arith.constant dense<0.000000e+00> : vector<8x256xf32>
    %1292 = tpu.matmul %1265, %1291, %cst_463 {dimension_numbers = #tpu.dot_dimension_numbers<[1], [0], [0], [1], [0, 0, 1, 1], [], []>} : vector<8x64xf32>, vector<64x256xf32>, vector<8x256xf32> -> vector<8x256xf32>
    %1293 = arith.addf %1290, %1292 : vector<8x256xf32>
    %1294 = arith.addf %1293, %11 : vector<8x256xf32>
    %1295 = math.tanh %1294 : vector<8x256xf32>
    %1296 = arith.mulf %1295, %2 : vector<8x256xf32>
    %1297 = arith.addf %1296, %5 : vector<8x256xf32>
    %1298 = vector.extract_strided_slice %1297 {offsets = [0, 0], sizes = [8, 64], strides = [1, 1]} : vector<8x256xf32> to vector<8x64xf32>
    %1299 = vector.extract_strided_slice %1297 {offsets = [0, 64], sizes = [8, 64], strides = [1, 1]} : vector<8x256xf32> to vector<8x64xf32>
    %1300 = vector.extract_strided_slice %1297 {offsets = [0, 128], sizes = [8, 64], strides = [1, 1]} : vector<8x256xf32> to vector<8x64xf32>
    %1301 = vector.extract_strided_slice %1297 {offsets = [0, 192], sizes = [8, 64], strides = [1, 1]} : vector<8x256xf32> to vector<8x64xf32>
    %1302 = arith.mulf %1299, %1263 : vector<8x64xf32>
    %1303 = arith.mulf %1298, %1300 : vector<8x64xf32>
    %1304 = arith.addf %1302, %1303 : vector<8x64xf32>
    %1305 = math.tanh %1304 : vector<8x64xf32>
    %1306 = arith.mulf %1301, %1305 : vector<8x64xf32>
    %c0_464 = arith.constant 0 : index
    %c0_465 = arith.constant 0 : index
    %1307 = vector.load %arg2[%c0_464, %c0_465] : memref<64x256xf32, #tpu.memory_space<vmem>>, vector<64x256xf32>
    %cst_466 = arith.constant dense<0.000000e+00> : vector<8x256xf32>
    %1308 = tpu.matmul %1306, %1307, %cst_466 {dimension_numbers = #tpu.dot_dimension_numbers<[1], [0], [0], [1], [0, 0, 1, 1], [], []>} : vector<8x64xf32>, vector<64x256xf32>, vector<8x256xf32> -> vector<8x256xf32>
    %c0_467 = arith.constant 0 : index
    %c0_468 = arith.constant 0 : index
    %1309 = vector.load %arg3[%c0_467, %c0_468] : memref<64x256xf32, #tpu.memory_space<vmem>>, vector<64x256xf32>
    %cst_469 = arith.constant dense<0.000000e+00> : vector<8x256xf32>
    %1310 = tpu.matmul %1283, %1309, %cst_469 {dimension_numbers = #tpu.dot_dimension_numbers<[1], [0], [0], [1], [0, 0, 1, 1], [], []>} : vector<8x64xf32>, vector<64x256xf32>, vector<8x256xf32> -> vector<8x256xf32>
    %1311 = arith.addf %1308, %1310 : vector<8x256xf32>
    %1312 = arith.addf %1311, %8 : vector<8x256xf32>
    %1313 = math.tanh %1312 : vector<8x256xf32>
    %1314 = arith.mulf %1313, %2 : vector<8x256xf32>
    %1315 = arith.addf %1314, %5 : vector<8x256xf32>
    %1316 = vector.extract_strided_slice %1315 {offsets = [0, 0], sizes = [8, 64], strides = [1, 1]} : vector<8x256xf32> to vector<8x64xf32>
    %1317 = vector.extract_strided_slice %1315 {offsets = [0, 64], sizes = [8, 64], strides = [1, 1]} : vector<8x256xf32> to vector<8x64xf32>
    %1318 = vector.extract_strided_slice %1315 {offsets = [0, 128], sizes = [8, 64], strides = [1, 1]} : vector<8x256xf32> to vector<8x64xf32>
    %1319 = vector.extract_strided_slice %1315 {offsets = [0, 192], sizes = [8, 64], strides = [1, 1]} : vector<8x256xf32> to vector<8x64xf32>
    %1320 = arith.mulf %1317, %1281 : vector<8x64xf32>
    %1321 = arith.mulf %1316, %1318 : vector<8x64xf32>
    %1322 = arith.addf %1320, %1321 : vector<8x64xf32>
    %1323 = math.tanh %1322 : vector<8x64xf32>
    %1324 = arith.mulf %1319, %1323 : vector<8x64xf32>
    %c1_i32_470 = arith.constant 1 : i32
    %1325 = arith.addi %c17_i32, %c1_i32_470 : i32
    %1326 = arith.index_cast %1325 : i32 to index
    %c0_471 = arith.constant 0 : index
    %c0_472 = arith.constant 0 : index
    %1327 = vector.load %arg9[%1326, %c0_471, %c0_472] : memref<24x8x64xf32, #tpu.memory_space<vmem>>, vector<1x8x64xf32>
    %1328 = vector.shape_cast %1327 : vector<1x8x64xf32> to vector<8x64xf32>
    %1329 = vector.shape_cast %1324 : vector<8x64xf32> to vector<1x8x64xf32>
    tpu.vector_store %arg9[%1326, %c0_471, %c0_472], %1329 {strides = array<i32>} : memref<24x8x64xf32, #tpu.memory_space<vmem>>, vector<1x8x64xf32>,
    %c18_i32 = arith.constant 18 : i32
    %c0_473 = arith.constant 0 : index
    %c0_474 = arith.constant 0 : index
    %1330 = vector.load %arg5[%c0_473, %c0_474] : memref<64x256xf32, #tpu.memory_space<vmem>>, vector<64x256xf32>
    %cst_475 = arith.constant dense<0.000000e+00> : vector<8x256xf32>
    %1331 = tpu.matmul %1324, %1330, %cst_475 {dimension_numbers = #tpu.dot_dimension_numbers<[1], [0], [0], [1], [0, 0, 1, 1], [], []>} : vector<8x64xf32>, vector<64x256xf32>, vector<8x256xf32> -> vector<8x256xf32>
    %c0_476 = arith.constant 0 : index
    %c0_477 = arith.constant 0 : index
    %1332 = vector.load %arg1[%c0_476, %c0_477] : memref<64x256xf32, #tpu.memory_space<vmem>>, vector<64x256xf32>
    %cst_478 = arith.constant dense<0.000000e+00> : vector<8x256xf32>
    %1333 = tpu.matmul %1306, %1332, %cst_478 {dimension_numbers = #tpu.dot_dimension_numbers<[1], [0], [0], [1], [0, 0, 1, 1], [], []>} : vector<8x64xf32>, vector<64x256xf32>, vector<8x256xf32> -> vector<8x256xf32>
    %1334 = arith.addf %1331, %1333 : vector<8x256xf32>
    %1335 = arith.addf %1334, %11 : vector<8x256xf32>
    %1336 = math.tanh %1335 : vector<8x256xf32>
    %1337 = arith.mulf %1336, %2 : vector<8x256xf32>
    %1338 = arith.addf %1337, %5 : vector<8x256xf32>
    %1339 = vector.extract_strided_slice %1338 {offsets = [0, 0], sizes = [8, 64], strides = [1, 1]} : vector<8x256xf32> to vector<8x64xf32>
    %1340 = vector.extract_strided_slice %1338 {offsets = [0, 64], sizes = [8, 64], strides = [1, 1]} : vector<8x256xf32> to vector<8x64xf32>
    %1341 = vector.extract_strided_slice %1338 {offsets = [0, 128], sizes = [8, 64], strides = [1, 1]} : vector<8x256xf32> to vector<8x64xf32>
    %1342 = vector.extract_strided_slice %1338 {offsets = [0, 192], sizes = [8, 64], strides = [1, 1]} : vector<8x256xf32> to vector<8x64xf32>
    %1343 = arith.mulf %1340, %1304 : vector<8x64xf32>
    %1344 = arith.mulf %1339, %1341 : vector<8x64xf32>
    %1345 = arith.addf %1343, %1344 : vector<8x64xf32>
    %1346 = math.tanh %1345 : vector<8x64xf32>
    %1347 = arith.mulf %1342, %1346 : vector<8x64xf32>
    %c0_479 = arith.constant 0 : index
    %c0_480 = arith.constant 0 : index
    %1348 = vector.load %arg2[%c0_479, %c0_480] : memref<64x256xf32, #tpu.memory_space<vmem>>, vector<64x256xf32>
    %cst_481 = arith.constant dense<0.000000e+00> : vector<8x256xf32>
    %1349 = tpu.matmul %1347, %1348, %cst_481 {dimension_numbers = #tpu.dot_dimension_numbers<[1], [0], [0], [1], [0, 0, 1, 1], [], []>} : vector<8x64xf32>, vector<64x256xf32>, vector<8x256xf32> -> vector<8x256xf32>
    %c0_482 = arith.constant 0 : index
    %c0_483 = arith.constant 0 : index
    %1350 = vector.load %arg3[%c0_482, %c0_483] : memref<64x256xf32, #tpu.memory_space<vmem>>, vector<64x256xf32>
    %cst_484 = arith.constant dense<0.000000e+00> : vector<8x256xf32>
    %1351 = tpu.matmul %1324, %1350, %cst_484 {dimension_numbers = #tpu.dot_dimension_numbers<[1], [0], [0], [1], [0, 0, 1, 1], [], []>} : vector<8x64xf32>, vector<64x256xf32>, vector<8x256xf32> -> vector<8x256xf32>
    %1352 = arith.addf %1349, %1351 : vector<8x256xf32>
    %1353 = arith.addf %1352, %8 : vector<8x256xf32>
    %1354 = math.tanh %1353 : vector<8x256xf32>
    %1355 = arith.mulf %1354, %2 : vector<8x256xf32>
    %1356 = arith.addf %1355, %5 : vector<8x256xf32>
    %1357 = vector.extract_strided_slice %1356 {offsets = [0, 0], sizes = [8, 64], strides = [1, 1]} : vector<8x256xf32> to vector<8x64xf32>
    %1358 = vector.extract_strided_slice %1356 {offsets = [0, 64], sizes = [8, 64], strides = [1, 1]} : vector<8x256xf32> to vector<8x64xf32>
    %1359 = vector.extract_strided_slice %1356 {offsets = [0, 128], sizes = [8, 64], strides = [1, 1]} : vector<8x256xf32> to vector<8x64xf32>
    %1360 = vector.extract_strided_slice %1356 {offsets = [0, 192], sizes = [8, 64], strides = [1, 1]} : vector<8x256xf32> to vector<8x64xf32>
    %1361 = arith.mulf %1358, %1322 : vector<8x64xf32>
    %1362 = arith.mulf %1357, %1359 : vector<8x64xf32>
    %1363 = arith.addf %1361, %1362 : vector<8x64xf32>
    %1364 = math.tanh %1363 : vector<8x64xf32>
    %1365 = arith.mulf %1360, %1364 : vector<8x64xf32>
    %c1_i32_485 = arith.constant 1 : i32
    %1366 = arith.addi %c18_i32, %c1_i32_485 : i32
    %1367 = arith.index_cast %1366 : i32 to index
    %c0_486 = arith.constant 0 : index
    %c0_487 = arith.constant 0 : index
    %1368 = vector.load %arg9[%1367, %c0_486, %c0_487] : memref<24x8x64xf32, #tpu.memory_space<vmem>>, vector<1x8x64xf32>
    %1369 = vector.shape_cast %1368 : vector<1x8x64xf32> to vector<8x64xf32>
    %1370 = vector.shape_cast %1365 : vector<8x64xf32> to vector<1x8x64xf32>
    tpu.vector_store %arg9[%1367, %c0_486, %c0_487], %1370 {strides = array<i32>} : memref<24x8x64xf32, #tpu.memory_space<vmem>>, vector<1x8x64xf32>,
    %c19_i32 = arith.constant 19 : i32
    %c0_488 = arith.constant 0 : index
    %c0_489 = arith.constant 0 : index
    %1371 = vector.load %arg5[%c0_488, %c0_489] : memref<64x256xf32, #tpu.memory_space<vmem>>, vector<64x256xf32>
    %cst_490 = arith.constant dense<0.000000e+00> : vector<8x256xf32>
    %1372 = tpu.matmul %1365, %1371, %cst_490 {dimension_numbers = #tpu.dot_dimension_numbers<[1], [0], [0], [1], [0, 0, 1, 1], [], []>} : vector<8x64xf32>, vector<64x256xf32>, vector<8x256xf32> -> vector<8x256xf32>
    %c0_491 = arith.constant 0 : index
    %c0_492 = arith.constant 0 : index
    %1373 = vector.load %arg1[%c0_491, %c0_492] : memref<64x256xf32, #tpu.memory_space<vmem>>, vector<64x256xf32>
    %cst_493 = arith.constant dense<0.000000e+00> : vector<8x256xf32>
    %1374 = tpu.matmul %1347, %1373, %cst_493 {dimension_numbers = #tpu.dot_dimension_numbers<[1], [0], [0], [1], [0, 0, 1, 1], [], []>} : vector<8x64xf32>, vector<64x256xf32>, vector<8x256xf32> -> vector<8x256xf32>
    %1375 = arith.addf %1372, %1374 : vector<8x256xf32>
    %1376 = arith.addf %1375, %11 : vector<8x256xf32>
    %1377 = math.tanh %1376 : vector<8x256xf32>
    %1378 = arith.mulf %1377, %2 : vector<8x256xf32>
    %1379 = arith.addf %1378, %5 : vector<8x256xf32>
    %1380 = vector.extract_strided_slice %1379 {offsets = [0, 0], sizes = [8, 64], strides = [1, 1]} : vector<8x256xf32> to vector<8x64xf32>
    %1381 = vector.extract_strided_slice %1379 {offsets = [0, 64], sizes = [8, 64], strides = [1, 1]} : vector<8x256xf32> to vector<8x64xf32>
    %1382 = vector.extract_strided_slice %1379 {offsets = [0, 128], sizes = [8, 64], strides = [1, 1]} : vector<8x256xf32> to vector<8x64xf32>
    %1383 = vector.extract_strided_slice %1379 {offsets = [0, 192], sizes = [8, 64], strides = [1, 1]} : vector<8x256xf32> to vector<8x64xf32>
    %1384 = arith.mulf %1381, %1345 : vector<8x64xf32>
    %1385 = arith.mulf %1380, %1382 : vector<8x64xf32>
    %1386 = arith.addf %1384, %1385 : vector<8x64xf32>
    %1387 = math.tanh %1386 : vector<8x64xf32>
    %1388 = arith.mulf %1383, %1387 : vector<8x64xf32>
    %c0_494 = arith.constant 0 : index
    %c0_495 = arith.constant 0 : index
    %1389 = vector.load %arg2[%c0_494, %c0_495] : memref<64x256xf32, #tpu.memory_space<vmem>>, vector<64x256xf32>
    %cst_496 = arith.constant dense<0.000000e+00> : vector<8x256xf32>
    %1390 = tpu.matmul %1388, %1389, %cst_496 {dimension_numbers = #tpu.dot_dimension_numbers<[1], [0], [0], [1], [0, 0, 1, 1], [], []>} : vector<8x64xf32>, vector<64x256xf32>, vector<8x256xf32> -> vector<8x256xf32>
    %c0_497 = arith.constant 0 : index
    %c0_498 = arith.constant 0 : index
    %1391 = vector.load %arg3[%c0_497, %c0_498] : memref<64x256xf32, #tpu.memory_space<vmem>>, vector<64x256xf32>
    %cst_499 = arith.constant dense<0.000000e+00> : vector<8x256xf32>
    %1392 = tpu.matmul %1365, %1391, %cst_499 {dimension_numbers = #tpu.dot_dimension_numbers<[1], [0], [0], [1], [0, 0, 1, 1], [], []>} : vector<8x64xf32>, vector<64x256xf32>, vector<8x256xf32> -> vector<8x256xf32>
    %1393 = arith.addf %1390, %1392 : vector<8x256xf32>
    %1394 = arith.addf %1393, %8 : vector<8x256xf32>
    %1395 = math.tanh %1394 : vector<8x256xf32>
    %1396 = arith.mulf %1395, %2 : vector<8x256xf32>
    %1397 = arith.addf %1396, %5 : vector<8x256xf32>
    %1398 = vector.extract_strided_slice %1397 {offsets = [0, 0], sizes = [8, 64], strides = [1, 1]} : vector<8x256xf32> to vector<8x64xf32>
    %1399 = vector.extract_strided_slice %1397 {offsets = [0, 64], sizes = [8, 64], strides = [1, 1]} : vector<8x256xf32> to vector<8x64xf32>
    %1400 = vector.extract_strided_slice %1397 {offsets = [0, 128], sizes = [8, 64], strides = [1, 1]} : vector<8x256xf32> to vector<8x64xf32>
    %1401 = vector.extract_strided_slice %1397 {offsets = [0, 192], sizes = [8, 64], strides = [1, 1]} : vector<8x256xf32> to vector<8x64xf32>
    %1402 = arith.mulf %1399, %1363 : vector<8x64xf32>
    %1403 = arith.mulf %1398, %1400 : vector<8x64xf32>
    %1404 = arith.addf %1402, %1403 : vector<8x64xf32>
    %1405 = math.tanh %1404 : vector<8x64xf32>
    %1406 = arith.mulf %1401, %1405 : vector<8x64xf32>
    %c1_i32_500 = arith.constant 1 : i32
    %1407 = arith.addi %c19_i32, %c1_i32_500 : i32
    %1408 = arith.index_cast %1407 : i32 to index
    %c0_501 = arith.constant 0 : index
    %c0_502 = arith.constant 0 : index
    %1409 = vector.load %arg9[%1408, %c0_501, %c0_502] : memref<24x8x64xf32, #tpu.memory_space<vmem>>, vector<1x8x64xf32>
    %1410 = vector.shape_cast %1409 : vector<1x8x64xf32> to vector<8x64xf32>
    %1411 = vector.shape_cast %1406 : vector<8x64xf32> to vector<1x8x64xf32>
    tpu.vector_store %arg9[%1408, %c0_501, %c0_502], %1411 {strides = array<i32>} : memref<24x8x64xf32, #tpu.memory_space<vmem>>, vector<1x8x64xf32>,
    %c20_i32 = arith.constant 20 : i32
    %c0_503 = arith.constant 0 : index
    %c0_504 = arith.constant 0 : index
    %1412 = vector.load %arg5[%c0_503, %c0_504] : memref<64x256xf32, #tpu.memory_space<vmem>>, vector<64x256xf32>
    %cst_505 = arith.constant dense<0.000000e+00> : vector<8x256xf32>
    %1413 = tpu.matmul %1406, %1412, %cst_505 {dimension_numbers = #tpu.dot_dimension_numbers<[1], [0], [0], [1], [0, 0, 1, 1], [], []>} : vector<8x64xf32>, vector<64x256xf32>, vector<8x256xf32> -> vector<8x256xf32>
    %c0_506 = arith.constant 0 : index
    %c0_507 = arith.constant 0 : index
    %1414 = vector.load %arg1[%c0_506, %c0_507] : memref<64x256xf32, #tpu.memory_space<vmem>>, vector<64x256xf32>
    %cst_508 = arith.constant dense<0.000000e+00> : vector<8x256xf32>
    %1415 = tpu.matmul %1388, %1414, %cst_508 {dimension_numbers = #tpu.dot_dimension_numbers<[1], [0], [0], [1], [0, 0, 1, 1], [], []>} : vector<8x64xf32>, vector<64x256xf32>, vector<8x256xf32> -> vector<8x256xf32>
    %1416 = arith.addf %1413, %1415 : vector<8x256xf32>
    %1417 = arith.addf %1416, %11 : vector<8x256xf32>
    %1418 = math.tanh %1417 : vector<8x256xf32>
    %1419 = arith.mulf %1418, %2 : vector<8x256xf32>
    %1420 = arith.addf %1419, %5 : vector<8x256xf32>
    %1421 = vector.extract_strided_slice %1420 {offsets = [0, 0], sizes = [8, 64], strides = [1, 1]} : vector<8x256xf32> to vector<8x64xf32>
    %1422 = vector.extract_strided_slice %1420 {offsets = [0, 64], sizes = [8, 64], strides = [1, 1]} : vector<8x256xf32> to vector<8x64xf32>
    %1423 = vector.extract_strided_slice %1420 {offsets = [0, 128], sizes = [8, 64], strides = [1, 1]} : vector<8x256xf32> to vector<8x64xf32>
    %1424 = vector.extract_strided_slice %1420 {offsets = [0, 192], sizes = [8, 64], strides = [1, 1]} : vector<8x256xf32> to vector<8x64xf32>
    %1425 = arith.mulf %1422, %1386 : vector<8x64xf32>
    %1426 = arith.mulf %1421, %1423 : vector<8x64xf32>
    %1427 = arith.addf %1425, %1426 : vector<8x64xf32>
    %1428 = math.tanh %1427 : vector<8x64xf32>
    %1429 = arith.mulf %1424, %1428 : vector<8x64xf32>
    %c0_509 = arith.constant 0 : index
    %c0_510 = arith.constant 0 : index
    %1430 = vector.load %arg2[%c0_509, %c0_510] : memref<64x256xf32, #tpu.memory_space<vmem>>, vector<64x256xf32>
    %cst_511 = arith.constant dense<0.000000e+00> : vector<8x256xf32>
    %1431 = tpu.matmul %1429, %1430, %cst_511 {dimension_numbers = #tpu.dot_dimension_numbers<[1], [0], [0], [1], [0, 0, 1, 1], [], []>} : vector<8x64xf32>, vector<64x256xf32>, vector<8x256xf32> -> vector<8x256xf32>
    %c0_512 = arith.constant 0 : index
    %c0_513 = arith.constant 0 : index
    %1432 = vector.load %arg3[%c0_512, %c0_513] : memref<64x256xf32, #tpu.memory_space<vmem>>, vector<64x256xf32>
    %cst_514 = arith.constant dense<0.000000e+00> : vector<8x256xf32>
    %1433 = tpu.matmul %1406, %1432, %cst_514 {dimension_numbers = #tpu.dot_dimension_numbers<[1], [0], [0], [1], [0, 0, 1, 1], [], []>} : vector<8x64xf32>, vector<64x256xf32>, vector<8x256xf32> -> vector<8x256xf32>
    %1434 = arith.addf %1431, %1433 : vector<8x256xf32>
    %1435 = arith.addf %1434, %8 : vector<8x256xf32>
    %1436 = math.tanh %1435 : vector<8x256xf32>
    %1437 = arith.mulf %1436, %2 : vector<8x256xf32>
    %1438 = arith.addf %1437, %5 : vector<8x256xf32>
    %1439 = vector.extract_strided_slice %1438 {offsets = [0, 0], sizes = [8, 64], strides = [1, 1]} : vector<8x256xf32> to vector<8x64xf32>
    %1440 = vector.extract_strided_slice %1438 {offsets = [0, 64], sizes = [8, 64], strides = [1, 1]} : vector<8x256xf32> to vector<8x64xf32>
    %1441 = vector.extract_strided_slice %1438 {offsets = [0, 128], sizes = [8, 64], strides = [1, 1]} : vector<8x256xf32> to vector<8x64xf32>
    %1442 = vector.extract_strided_slice %1438 {offsets = [0, 192], sizes = [8, 64], strides = [1, 1]} : vector<8x256xf32> to vector<8x64xf32>
    %1443 = arith.mulf %1440, %1404 : vector<8x64xf32>
    %1444 = arith.mulf %1439, %1441 : vector<8x64xf32>
    %1445 = arith.addf %1443, %1444 : vector<8x64xf32>
    %1446 = math.tanh %1445 : vector<8x64xf32>
    %1447 = arith.mulf %1442, %1446 : vector<8x64xf32>
    %c1_i32_515 = arith.constant 1 : i32
    %1448 = arith.addi %c20_i32, %c1_i32_515 : i32
    %1449 = arith.index_cast %1448 : i32 to index
    %c0_516 = arith.constant 0 : index
    %c0_517 = arith.constant 0 : index
    %1450 = vector.load %arg9[%1449, %c0_516, %c0_517] : memref<24x8x64xf32, #tpu.memory_space<vmem>>, vector<1x8x64xf32>
    %1451 = vector.shape_cast %1450 : vector<1x8x64xf32> to vector<8x64xf32>
    %1452 = vector.shape_cast %1447 : vector<8x64xf32> to vector<1x8x64xf32>
    tpu.vector_store %arg9[%1449, %c0_516, %c0_517], %1452 {strides = array<i32>} : memref<24x8x64xf32, #tpu.memory_space<vmem>>, vector<1x8x64xf32>,
    %c21_i32 = arith.constant 21 : i32
    %c0_518 = arith.constant 0 : index
    %c0_519 = arith.constant 0 : index
    %1453 = vector.load %arg5[%c0_518, %c0_519] : memref<64x256xf32, #tpu.memory_space<vmem>>, vector<64x256xf32>
    %cst_520 = arith.constant dense<0.000000e+00> : vector<8x256xf32>
    %1454 = tpu.matmul %1447, %1453, %cst_520 {dimension_numbers = #tpu.dot_dimension_numbers<[1], [0], [0], [1], [0, 0, 1, 1], [], []>} : vector<8x64xf32>, vector<64x256xf32>, vector<8x256xf32> -> vector<8x256xf32>
    %c0_521 = arith.constant 0 : index
    %c0_522 = arith.constant 0 : index
    %1455 = vector.load %arg1[%c0_521, %c0_522] : memref<64x256xf32, #tpu.memory_space<vmem>>, vector<64x256xf32>
    %cst_523 = arith.constant dense<0.000000e+00> : vector<8x256xf32>
    %1456 = tpu.matmul %1429, %1455, %cst_523 {dimension_numbers = #tpu.dot_dimension_numbers<[1], [0], [0], [1], [0, 0, 1, 1], [], []>} : vector<8x64xf32>, vector<64x256xf32>, vector<8x256xf32> -> vector<8x256xf32>
    %1457 = arith.addf %1454, %1456 : vector<8x256xf32>
    %1458 = arith.addf %1457, %11 : vector<8x256xf32>
    %1459 = math.tanh %1458 : vector<8x256xf32>
    %1460 = arith.mulf %1459, %2 : vector<8x256xf32>
    %1461 = arith.addf %1460, %5 : vector<8x256xf32>
    %1462 = vector.extract_strided_slice %1461 {offsets = [0, 0], sizes = [8, 64], strides = [1, 1]} : vector<8x256xf32> to vector<8x64xf32>
    %1463 = vector.extract_strided_slice %1461 {offsets = [0, 64], sizes = [8, 64], strides = [1, 1]} : vector<8x256xf32> to vector<8x64xf32>
    %1464 = vector.extract_strided_slice %1461 {offsets = [0, 128], sizes = [8, 64], strides = [1, 1]} : vector<8x256xf32> to vector<8x64xf32>
    %1465 = vector.extract_strided_slice %1461 {offsets = [0, 192], sizes = [8, 64], strides = [1, 1]} : vector<8x256xf32> to vector<8x64xf32>
    %1466 = arith.mulf %1463, %1427 : vector<8x64xf32>
    %1467 = arith.mulf %1462, %1464 : vector<8x64xf32>
    %1468 = arith.addf %1466, %1467 : vector<8x64xf32>
    %1469 = math.tanh %1468 : vector<8x64xf32>
    %1470 = arith.mulf %1465, %1469 : vector<8x64xf32>
    %c0_524 = arith.constant 0 : index
    %c0_525 = arith.constant 0 : index
    %1471 = vector.load %arg2[%c0_524, %c0_525] : memref<64x256xf32, #tpu.memory_space<vmem>>, vector<64x256xf32>
    %cst_526 = arith.constant dense<0.000000e+00> : vector<8x256xf32>
    %1472 = tpu.matmul %1470, %1471, %cst_526 {dimension_numbers = #tpu.dot_dimension_numbers<[1], [0], [0], [1], [0, 0, 1, 1], [], []>} : vector<8x64xf32>, vector<64x256xf32>, vector<8x256xf32> -> vector<8x256xf32>
    %c0_527 = arith.constant 0 : index
    %c0_528 = arith.constant 0 : index
    %1473 = vector.load %arg3[%c0_527, %c0_528] : memref<64x256xf32, #tpu.memory_space<vmem>>, vector<64x256xf32>
    %cst_529 = arith.constant dense<0.000000e+00> : vector<8x256xf32>
    %1474 = tpu.matmul %1447, %1473, %cst_529 {dimension_numbers = #tpu.dot_dimension_numbers<[1], [0], [0], [1], [0, 0, 1, 1], [], []>} : vector<8x64xf32>, vector<64x256xf32>, vector<8x256xf32> -> vector<8x256xf32>
    %1475 = arith.addf %1472, %1474 : vector<8x256xf32>
    %1476 = arith.addf %1475, %8 : vector<8x256xf32>
    %1477 = math.tanh %1476 : vector<8x256xf32>
    %1478 = arith.mulf %1477, %2 : vector<8x256xf32>
    %1479 = arith.addf %1478, %5 : vector<8x256xf32>
    %1480 = vector.extract_strided_slice %1479 {offsets = [0, 0], sizes = [8, 64], strides = [1, 1]} : vector<8x256xf32> to vector<8x64xf32>
    %1481 = vector.extract_strided_slice %1479 {offsets = [0, 64], sizes = [8, 64], strides = [1, 1]} : vector<8x256xf32> to vector<8x64xf32>
    %1482 = vector.extract_strided_slice %1479 {offsets = [0, 128], sizes = [8, 64], strides = [1, 1]} : vector<8x256xf32> to vector<8x64xf32>
    %1483 = vector.extract_strided_slice %1479 {offsets = [0, 192], sizes = [8, 64], strides = [1, 1]} : vector<8x256xf32> to vector<8x64xf32>
    %1484 = arith.mulf %1481, %1445 : vector<8x64xf32>
    %1485 = arith.mulf %1480, %1482 : vector<8x64xf32>
    %1486 = arith.addf %1484, %1485 : vector<8x64xf32>
    %1487 = math.tanh %1486 : vector<8x64xf32>
    %1488 = arith.mulf %1483, %1487 : vector<8x64xf32>
    %c1_i32_530 = arith.constant 1 : i32
    %1489 = arith.addi %c21_i32, %c1_i32_530 : i32
    %1490 = arith.index_cast %1489 : i32 to index
    %c0_531 = arith.constant 0 : index
    %c0_532 = arith.constant 0 : index
    %1491 = vector.load %arg9[%1490, %c0_531, %c0_532] : memref<24x8x64xf32, #tpu.memory_space<vmem>>, vector<1x8x64xf32>
    %1492 = vector.shape_cast %1491 : vector<1x8x64xf32> to vector<8x64xf32>
    %1493 = vector.shape_cast %1488 : vector<8x64xf32> to vector<1x8x64xf32>
    tpu.vector_store %arg9[%1490, %c0_531, %c0_532], %1493 {strides = array<i32>} : memref<24x8x64xf32, #tpu.memory_space<vmem>>, vector<1x8x64xf32>,
    %c22_i32 = arith.constant 22 : i32
    %c0_533 = arith.constant 0 : index
    %c0_534 = arith.constant 0 : index
    %1494 = vector.load %arg5[%c0_533, %c0_534] : memref<64x256xf32, #tpu.memory_space<vmem>>, vector<64x256xf32>
    %cst_535 = arith.constant dense<0.000000e+00> : vector<8x256xf32>
    %1495 = tpu.matmul %1488, %1494, %cst_535 {dimension_numbers = #tpu.dot_dimension_numbers<[1], [0], [0], [1], [0, 0, 1, 1], [], []>} : vector<8x64xf32>, vector<64x256xf32>, vector<8x256xf32> -> vector<8x256xf32>
    %c0_536 = arith.constant 0 : index
    %c0_537 = arith.constant 0 : index
    %1496 = vector.load %arg1[%c0_536, %c0_537] : memref<64x256xf32, #tpu.memory_space<vmem>>, vector<64x256xf32>
    %cst_538 = arith.constant dense<0.000000e+00> : vector<8x256xf32>
    %1497 = tpu.matmul %1470, %1496, %cst_538 {dimension_numbers = #tpu.dot_dimension_numbers<[1], [0], [0], [1], [0, 0, 1, 1], [], []>} : vector<8x64xf32>, vector<64x256xf32>, vector<8x256xf32> -> vector<8x256xf32>
    %1498 = arith.addf %1495, %1497 : vector<8x256xf32>
    %1499 = arith.addf %1498, %11 : vector<8x256xf32>
    %1500 = math.tanh %1499 : vector<8x256xf32>
    %1501 = arith.mulf %1500, %2 : vector<8x256xf32>
    %1502 = arith.addf %1501, %5 : vector<8x256xf32>
    %1503 = vector.extract_strided_slice %1502 {offsets = [0, 0], sizes = [8, 64], strides = [1, 1]} : vector<8x256xf32> to vector<8x64xf32>
    %1504 = vector.extract_strided_slice %1502 {offsets = [0, 64], sizes = [8, 64], strides = [1, 1]} : vector<8x256xf32> to vector<8x64xf32>
    %1505 = vector.extract_strided_slice %1502 {offsets = [0, 128], sizes = [8, 64], strides = [1, 1]} : vector<8x256xf32> to vector<8x64xf32>
    %1506 = vector.extract_strided_slice %1502 {offsets = [0, 192], sizes = [8, 64], strides = [1, 1]} : vector<8x256xf32> to vector<8x64xf32>
    %1507 = arith.mulf %1504, %1468 : vector<8x64xf32>
    %1508 = arith.mulf %1503, %1505 : vector<8x64xf32>
    %1509 = arith.addf %1507, %1508 : vector<8x64xf32>
    %1510 = math.tanh %1509 : vector<8x64xf32>
    %1511 = arith.mulf %1506, %1510 : vector<8x64xf32>
    %c0_539 = arith.constant 0 : index
    %c0_540 = arith.constant 0 : index
    %1512 = vector.load %arg2[%c0_539, %c0_540] : memref<64x256xf32, #tpu.memory_space<vmem>>, vector<64x256xf32>
    %cst_541 = arith.constant dense<0.000000e+00> : vector<8x256xf32>
    %1513 = tpu.matmul %1511, %1512, %cst_541 {dimension_numbers = #tpu.dot_dimension_numbers<[1], [0], [0], [1], [0, 0, 1, 1], [], []>} : vector<8x64xf32>, vector<64x256xf32>, vector<8x256xf32> -> vector<8x256xf32>
    %c0_542 = arith.constant 0 : index
    %c0_543 = arith.constant 0 : index
    %1514 = vector.load %arg3[%c0_542, %c0_543] : memref<64x256xf32, #tpu.memory_space<vmem>>, vector<64x256xf32>
    %cst_544 = arith.constant dense<0.000000e+00> : vector<8x256xf32>
    %1515 = tpu.matmul %1488, %1514, %cst_544 {dimension_numbers = #tpu.dot_dimension_numbers<[1], [0], [0], [1], [0, 0, 1, 1], [], []>} : vector<8x64xf32>, vector<64x256xf32>, vector<8x256xf32> -> vector<8x256xf32>
    %1516 = arith.addf %1513, %1515 : vector<8x256xf32>
    %1517 = arith.addf %1516, %8 : vector<8x256xf32>
    %1518 = math.tanh %1517 : vector<8x256xf32>
    %1519 = arith.mulf %1518, %2 : vector<8x256xf32>
    %1520 = arith.addf %1519, %5 : vector<8x256xf32>
    %1521 = vector.extract_strided_slice %1520 {offsets = [0, 0], sizes = [8, 64], strides = [1, 1]} : vector<8x256xf32> to vector<8x64xf32>
    %1522 = vector.extract_strided_slice %1520 {offsets = [0, 64], sizes = [8, 64], strides = [1, 1]} : vector<8x256xf32> to vector<8x64xf32>
    %1523 = vector.extract_strided_slice %1520 {offsets = [0, 128], sizes = [8, 64], strides = [1, 1]} : vector<8x256xf32> to vector<8x64xf32>
    %1524 = vector.extract_strided_slice %1520 {offsets = [0, 192], sizes = [8, 64], strides = [1, 1]} : vector<8x256xf32> to vector<8x64xf32>
    %1525 = arith.mulf %1522, %1486 : vector<8x64xf32>
    %1526 = arith.mulf %1521, %1523 : vector<8x64xf32>
    %1527 = arith.addf %1525, %1526 : vector<8x64xf32>
    %1528 = math.tanh %1527 : vector<8x64xf32>
    %1529 = arith.mulf %1524, %1528 : vector<8x64xf32>
    %c1_i32_545 = arith.constant 1 : i32
    %1530 = arith.addi %c22_i32, %c1_i32_545 : i32
    %1531 = arith.index_cast %1530 : i32 to index
    %c0_546 = arith.constant 0 : index
    %c0_547 = arith.constant 0 : index
    %1532 = vector.load %arg9[%1531, %c0_546, %c0_547] : memref<24x8x64xf32, #tpu.memory_space<vmem>>, vector<1x8x64xf32>
    %1533 = vector.shape_cast %1532 : vector<1x8x64xf32> to vector<8x64xf32>
    %1534 = vector.shape_cast %1529 : vector<8x64xf32> to vector<1x8x64xf32>
    tpu.vector_store %arg9[%1531, %c0_546, %c0_547], %1534 {strides = array<i32>} : memref<24x8x64xf32, #tpu.memory_space<vmem>>, vector<1x8x64xf32>,
    %c23_i32 = arith.constant 23 : i32
    return
  }
}

</mosaic_0001>

<bundles_post_ra>
// kernel: cnn_lstm_forward.1
= control target key start
LH: loop header
LB: loop body
LE: loop exit
PB: predicated region body
PF: predicated region fallthrough
CT: control target
= control target key end

     0   :  { %v16405_v3 = vmov 0.0   ;;  %v34_v26 = vlaneseq  ;;  %vm98_vm0 = vcmask 523264   ;;  %s21285_s1 = inlined_call_operand.vmem [shape: f32[64,256], index: 1, kind: input, shape index: {}]   ;;  %s21286_s0 = inlined_call_operand.vmem [shape: f32[16,8,256], index: 0, kind: input, shape index: {}]   ;;  %s21287_s7 = inlined_call_operand.vmem [shape: f32[1,256], index: 7, kind: input, shape index: {}]   ;;  %s21288_s8 = inlined_call_operand.vmem [shape: f32[1,256], index: 8, kind: input, shape index: {}]   ;;  %s21289_s3 = inlined_call_operand.vmem [shape: f32[64,256], index: 3, kind: input, shape index: {}]   ;;  %s21290_s2 = inlined_call_operand.vmem [shape: f32[64,256], index: 2, kind: input, shape index: {}]   ;;  %s21291_s4 = inlined_call_operand.vmem [shape: f32[1,256], index: 4, kind: input, shape index: {}]   ;;  %s21292_s5 = inlined_call_operand.vmem [shape: f32[64,256], index: 5, kind: input, shape index: {}]   ;;  %s21293_s9 = inlined_call_operand.vmem [shape: f32[24,8,64], index: 9, kind: output, shape index: {}]   ;;  %s21294_s6 = inlined_call_operand.vmem [shape: f32[1,256], index: 6, kind: input, shape index: {}]  }
   0x1   :  { %v83_v0 = vld [vmem:[%s21285_s1 + $0x8] sm:$0xff]  ;;  %v85_v1 = vld [vmem:[%s21285_s1 + $0x18] sm:$0xff]  ;;  %v82_v2 = vld [vmem:[%s21285_s1] sm:$0xff]  ;;  %166 = vmatprep.mubr.f32.mxu1 %v16405_v3  ;;  %453 = vmatprep.mubr.f32.mxu0 %v16405_v3 }
   0x2   :  { %v16468_v4 = vpack.c.bf16 %v85_v1, %v83_v0  ;;  %v84_v5 = vld [vmem:[%s21285_s1 + $0x10] sm:$0xff]  ;;  %v87_v6 = vld [vmem:[%s21285_s1 + $0x28] sm:$0xff]  ;;  %v89_v7 = vld [vmem:[%s21285_s1 + $0x38] sm:$0xff]  ;;  %v35_v32 = vshrl.u32 %v34_v26, 7 }
   0x3   :  { %v16479_v8 = vpack.c.bf16 %v84_v5, %v82_v2  ;;  %v16481_v9 = vpack.c.bf16 %v89_v7, %v87_v6  ;;  %v86_v10 = vld [vmem:[%s21285_s1 + $0x20] sm:$0xff]  ;;  %v88_v11 = vld [vmem:[%s21285_s1 + $0x30] sm:$0xff]  ;;  %v91_v12 = vld [vmem:[%s21285_s1 + $0x48] sm:$0xff] }
   0x4   :  { %13572 = vmatprep.subr.bf16.mxu1 %v16468_v4  ;;  %v93_v13 = vld [vmem:[%s21285_s1 + $0x58] sm:$0xff]  ;;  %13620 = vmatprep.subr.bf16.mxu0 %v16468_v4  ;;  %v16498_v14 = vpack.c.bf16 %v88_v11, %v86_v10  ;;  %v90_v16 = vld [vmem:[%s21285_s1 + $0x40] sm:$0xff]  ;;  %v92_v17 = vld [vmem:[%s21285_s1 + $0x50] sm:$0xff]  ;;  %v16547_v33 = vsub.s32 0, %v35_v32  ;;  %v16552_v35 = vsub.s32 1, %v35_v32 }
   0x5   :  { %13574 = vmatpush1.bf16.msra.mxu1 %v16479_v8  ;;  %13622 = vmatpush1.bf16.msra.mxu0 %v16479_v8  ;;  %v16502_v15 = vpack.c.bf16 %v93_v13, %v91_v12  ;;  %v95_v18 = vld [vmem:[%s21285_s1 + $0x68] sm:$0xff]  ;;  %v97_v19 = vld [vmem:[%s21285_s1 + $0x78] sm:$0xff]  ;;  %v16518_v20 = vpack.c.bf16 %v92_v17, %v90_v16  ;;  %v94_v22 = vld [vmem:[%s21285_s1 + $0x60] sm:$0xff] }
   0x6   :  { %13576 = vmatprep.subr.bf16.mxu1 %v16481_v9  ;;  %13624 = vmatprep.subr.bf16.mxu0 %v16481_v9  ;;  %v16522_v21 = vpack.c.bf16 %v97_v19, %v95_v18  ;;  %v96_v23 = vld [vmem:[%s21285_s1 + $0x70] sm:$0xff]  ;;  %v80_v25 = vld [vmem:[%s21286_s0] sm:$0xff]  ;;  %v81_v27 = vld [vmem:[%s21286_s0 + $0x8] sm:$0xff] }
   0x7   :  { %v16532_v24 = vpack.c.bf16 %v96_v23, %v94_v22  ;;  %v32_v34 = vld [vmem:[%s21287_s7] sm:$0x3]  ;;  %s16406_s7 = smov 64   ;;  %v207_v48 = vld [vmem:[%s21289_s3 + $0x8] sm:$0xff]  ;;  %v209_v49 = vld [vmem:[%s21289_s3 + $0x18] sm:$0xff] }
   0x8   :  { %v44_v36 = vld [vmem:[%s21288_s8] sm:$0x3]  ;;  %v16558_v37 = vrot.slane %v32_v34, %v16547_v33  ;;  %v16561_v38 = vrot.slane %v32_v34, %v16552_v35  ;;  %v16589_v51 = vpack.c.bf16 %v209_v49, %v207_v48  ;;  %v208_v52 = vld [vmem:[%s21289_s3 + $0x10] sm:$0xff]  ;;  %v211_v53 = vld [vmem:[%s21289_s3 + $0x28] sm:$0xff] }
   0x9   :  { %13578 = vmatpush1.bf16.msra.mxu1 %v16498_v14  ;;  %13626 = vmatpush1.bf16.msra.mxu0 %v16498_v14  ;;  %v16564_v39 = vrot.slane %v44_v36, %v16547_v33  ;;  %v16567_v41 = vrot.slane %v44_v36, %v16552_v35  ;;  %v206_v50 = vld [vmem:[%s21289_s3] sm:$0xff]  ;;  %v213_v54 = vld [vmem:[%s21289_s3 + $0x38] sm:$0xff]  ;;  %v212_v58 = vld [vmem:[%s21289_s3 + $0x30] sm:$0xff] }
   0xa   :  { %13580 = vmatprep.subr.bf16.mxu1 %v16502_v15  ;;  %13628 = vmatprep.subr.bf16.mxu0 %v16502_v15  ;;  %v16600_v55 = vpack.c.bf16 %v208_v52, %v206_v50  ;;  %v16602_v56 = vpack.c.bf16 %v213_v54, %v211_v53  ;;  %v210_v57 = vld [vmem:[%s21289_s3 + $0x20] sm:$0xff]  ;;  %v215_v59 = vld [vmem:[%s21289_s3 + $0x48] sm:$0xff]  ;;  %v217_v60 = vld [vmem:[%s21289_s3 + $0x58] sm:$0xff] }
   0xb   :  { %v16619_v61 = vpack.c.bf16 %v212_v58, %v210_v57  ;;  %v16622_v62 = vpack.c.bf16 %v217_v60, %v215_v59  ;;  %v214_v63 = vld [vmem:[%s21289_s3 + $0x40] sm:$0xff]  ;;  %v216_v0 = vld [vmem:[%s21289_s3 + $0x50] sm:$0xff]  ;;  %v219_v1 = vld [vmem:[%s21289_s3 + $0x68] sm:$0xff] }
   0xc   :  { %v221_v2 = vld [vmem:[%s21289_s3 + $0x78] sm:$0xff]  ;;  %v16637_v5 = vpack.c.bf16 %v216_v0, %v214_v63  ;;  %v218_v7 = vld [vmem:[%s21289_s3 + $0x60] sm:$0xff]  ;;  %v220_v10 = vld [vmem:[%s21289_s3 + $0x70] sm:$0xff] }
   0xd   :  { %13582 = vmatpush1.bf16.msra.mxu1 %v16518_v20  ;;  %13630 = vmatpush1.bf16.msra.mxu0 %v16518_v20  ;;  %v16640_v6 = vpack.c.bf16 %v221_v2, %v219_v1  ;;  %v191_v11 = vld [vmem:[%s21290_s2 + $0x8] sm:$0xff]  ;;  %v193_v12 = vld [vmem:[%s21290_s2 + $0x18] sm:$0xff]  ;;  %v16655_v13 = vpack.c.bf16 %v220_v10, %v218_v7  ;;  %v190_v17 = vld [vmem:[%s21290_s2] sm:$0xff] }
   0xe   :  { %13584 = vmatprep.subr.bf16.mxu1 %v16522_v21  ;;  %13632 = vmatprep.subr.bf16.mxu0 %v16522_v21  ;;  %v16658_v16 = vpack.c.bf16 %v193_v12, %v191_v11  ;;  %v192_v18 = vld [vmem:[%s21290_s2 + $0x10] sm:$0xff]  ;;  %v195_v19 = vld [vmem:[%s21290_s2 + $0x28] sm:$0xff]  ;;  %v197_v22 = vld [vmem:[%s21290_s2 + $0x38] sm:$0xff] }
   0xf   :  { %v16673_v23 = vpack.c.bf16 %v192_v18, %v190_v17  ;;  %v194_v26 = vld [vmem:[%s21290_s2 + $0x20] sm:$0xff]  ;;  %v200_v34 = vld [vmem:[%s21290_s2 + $0x50] sm:$0xff]  ;;  %v203_v36 = vld [vmem:[%s21290_s2 + $0x68] sm:$0xff] }
  0x10   :  { %v198_v32 = vld [vmem:[%s21290_s2 + $0x40] sm:$0xff]  ;;  %v13381_v58 = vld [vmem:[%s21286_s0 + $0x10] sm:$0xff]  ;;  %v13382_v60 = vld [vmem:[%s21286_s0 + $0x18] sm:$0xff] }
  0x11   :  { %13586 = vmatpush1.bf16.msra.mxu1 %v16532_v24  ;;  %13634 = vmatpush1.bf16.msra.mxu0 %v16532_v24 }
  0x12   :  { %13588 = vmatprep.subr.bf16.mxu1 %v16589_v51  ;;  %13636 = vmatprep.subr.bf16.mxu0 %v16589_v51 }
  0x14   :  { %167 = vmatmul.mubr.f32.vlgmr.msra.gmra.mrb[0].mxu1 %v16405_v3 }
  0x15   :  { %286 = vmatprep.mubr.f32.mxu1 %v16405_v3  ;;  %13590 = vmatpush1.bf16.msra.mxu1 %v16600_v55 }
  0x16   :  { %13592 = vmatprep.subr.bf16.mxu1 %v16602_v56 }
  0x19   :  { %13594 = vmatpush1.bf16.msra.mxu1 %v16619_v61 }
  0x1a   :  { %13596 = vmatprep.subr.bf16.mxu1 %v16622_v62 }
  0x1d   :  { %13598 = vmatpush1.bf16.msra.mxu1 %v16637_v5 }
  0x1e   :  { %13600 = vmatprep.subr.bf16.mxu1 %v16640_v6 }
  0x21   :  { %13602 = vmatpush1.bf16.msra.mxu1 %v16655_v13 }
  0x22   :  { %13604 = vmatprep.subr.bf16.mxu1 %v16658_v16 }
  0x24   :  { %287 = vmatmul.mubr.f32.vlgmr.msra.gmra.mrb[2].mxu1 %v16405_v3 }
  0x25   :  { %13606 = vmatpush1.bf16.msra.mxu1 %v16673_v23  ;;  %362 = vmatprep.mubr.f32.mxu1 %v16405_v3 }
  0xe7   :  { %v168_v28 = vpop.f32.mrb[0].mxu1 }
  0xe8   :  { %v173_v29 = vadd.f32 %v168_v28, %v80_v25  ;;  %v170_v30 = vpop.f32.mrb[1].mxu1  ;;  %v16676_v25 = vpack.c.bf16 %v197_v22, %v195_v19  ;;  %v199_v28 = vld [vmem:[%s21290_s2 + $0x48] sm:$0xff] }
  0xe9   :  { %v174_v31 = vadd.f32 %v170_v30, %v81_v27  ;;  %v196_v27 = vld [vmem:[%s21290_s2 + $0x30] sm:$0xff] }
  0xea   :  { %15937 = vtanh.f32 %v173_v29  ;;  %v201_v29 = vld [vmem:[%s21290_s2 + $0x58] sm:$0xff]  ;;  %v16692_v30 = vpack.c.bf16 %v196_v27, %v194_v26  ;;  %13608 = vmatprep.subr.bf16.mxu1 %v16676_v25 }
  0xeb   :  { %15939 = vtanh.f32 %v174_v31  ;;  %v16696_v31 = vpack.c.bf16 %v201_v29, %v199_v28 }
  0xec   :  { %13610 = vmatpush1.bf16.msra.mxu1 %v16692_v30 }
  0xed   :  { %13612 = vmatprep.subr.bf16.mxu1 %v16696_v31 }
  0xf4   :  { %v15938_v40 = vpop.eup %15937 }
  0xf5   :  { %v15940_v42 = vpop.eup %15939  ;;  %v177_v43 = vmul.f32 %v15938_v40, %v16558_v37  ;;  %v205_v40 = vld [vmem:[%s21290_s2 + $0x78] sm:$0xff] }
  0xf6   :  { %v178_v44 = vmul.f32 %v15940_v42, %v16561_v38  ;;  %v16711_v42 = vpack.c.bf16 %v200_v34, %v198_v32 }
  0xf7   :  { %v16572_v45 = vadd.f32 %v177_v43, %v16564_v39  ;;  %v16714_v43 = vpack.c.bf16 %v205_v40, %v203_v36 }
  0xf8   :  { %v16575_v46 = vadd.f32 %v178_v44, %v16567_v41  ;;  %v202_v44 = vld [vmem:[%s21290_s2 + $0x60] sm:$0xff]  ;;  %13614 = vmatpush1.bf16.msra.mxu1 %v16711_v42 }
  0xf9   :  { %13616 = vmatprep.subr.bf16.mxu1 %v16714_v43  ;;  %v181_v49 = vmul.f32 0.0, %v16572_v45 }
  0xfa   :  { %v182_v47 = vmul.f32 %v16575_v46, %v16572_v45  ;;  %v56_v45 = vld [vmem:[%s21291_s4] sm:$0x3] }
  0xfb   :  { %v16764_v59 = vrot.slane %v56_v45, %v16552_v35 }
  0xfc   :  { %184 = vrot.lane.b32.xlu0 %v182_v47, %s16406_s7  ;;  %v204_v47 = vld [vmem:[%s21290_s2 + $0x70] sm:$0xff] }
  0xfd   :  { %v16723_v48 = vpack.c.bf16 %v204_v47, %v202_v44 }
  0xff   :  { %13618 = vmatpush1.bf16.msra.mxu1 %v16723_v48 }
 0x100   :  { %13668 = vmatprep.subr.bf16.mxu1 %v16468_v4 }
 0x16e   :  { %v185_v50 = vpop.permute.xlu0 %184 }
 0x16f   :  { %v16729_v52 = vadd.f32 %v185_v50, %v181_v49 }
 0x171   :  { %15941 = vtanh.f32 %v16729_v52 }
 0x17b   :  { %v15942_v53 = vpop.eup %15941 }
 0x17c   :  { %v189_v54 = vmul.f32 %v15942_v53, %v16575_v46  ;;  %v16758_v46 = vrot.slane %v56_v45, %v16547_v33 }
 0x17e   :  { %294 = vrot.lane.b32.xlu0 %v189_v54, %s16406_s7 }
 0x1f0   :  { %v295_v57 = vpop.permute.xlu0 %294 }
 0x1f1   :  { %13380 = vmatmul.mubr.msk.f32.vlgmr.msra.gmra.mrb[2].mxu1 %vm98_vm0, %v295_v57  ;;  %13383 = vmatmul.mubr.msk.f32.vlgmr.msra.gmra.mrb[0].mxu0 %vm98_vm0, %v295_v57 }
 0x1f2   :  { %13638 = vmatpush1.bf16.msra.mxu0 %v16600_v55  ;;  %13670 = vmatpush1.bf16.msra.mxu1 %v16479_v8 }
 0x1f3   :  { %13640 = vmatprep.subr.bf16.mxu0 %v16602_v56  ;;  %13672 = vmatprep.subr.bf16.mxu1 %v16481_v9 }
 0x1f4   :  { %546 = vmatprep.mubr.f32.mxu0 %v16405_v3  ;;  %713 = vmatprep.mubr.f32.mxu1 %v16405_v3 }
 0x1f6   :  { %13642 = vmatpush1.bf16.msra.mxu0 %v16619_v61  ;;  %13674 = vmatpush1.bf16.msra.mxu1 %v16498_v14 }
 0x1f7   :  { %13644 = vmatprep.subr.bf16.mxu0 %v16622_v62  ;;  %13676 = vmatprep.subr.bf16.mxu1 %v16502_v15 }
 0x1fa   :  { %13646 = vmatpush1.bf16.msra.mxu0 %v16637_v5  ;;  %13678 = vmatpush1.bf16.msra.mxu1 %v16518_v20 }
 0x1fb   :  { %13648 = vmatprep.subr.bf16.mxu0 %v16640_v6  ;;  %13680 = vmatprep.subr.bf16.mxu1 %v16522_v21 }
 0x1fe   :  { %13650 = vmatpush1.bf16.msra.mxu0 %v16655_v13  ;;  %13682 = vmatpush1.bf16.msra.mxu1 %v16532_v24 }
 0x1ff   :  { %13652 = vmatprep.subr.bf16.mxu0 %v16658_v16  ;;  %13684 = vmatprep.subr.bf16.mxu1 %v16589_v51 }
 0x2c4   :  { %v364_v63 = vpop.f32.mrb[2].mxu1  ;;  %v455_v0 = vpop.f32.mrb[0].mxu0 }
 0x2c5   :  { %v369_v1 = vadd.f32 %v364_v63, %v16758_v46  ;;  %v460_v2 = vadd.f32 %v13381_v58, %v455_v0  ;;  %v366_v7 = vpop.f32.mrb[3].mxu1  ;;  %v457_v10 = vpop.f32.mrb[1].mxu0 }
 0x2c6   :  { %v370_v11 = vadd.f32 %v366_v7, %v16764_v59  ;;  %v461_v12 = vadd.f32 %v13382_v60, %v457_v10  ;;  %v13387_v7 = vld [vmem:[%s21286_s0 + $0x28] sm:$0xff] }
 0x2c7   :  { %15943 = vtanh.f32 %v369_v1 }
 0x2c8   :  { %15945 = vtanh.f32 %v460_v2  ;;  %v13386_v2 = vld [vmem:[%s21286_s0 + $0x20] sm:$0xff] }
 0x2c9   :  { %15947 = vtanh.f32 %v370_v11 }
 0x2ca   :  { %15949 = vtanh.f32 %v461_v12 }
 0x2d1   :  { %v15944_v17 = vpop.eup %15943 }
 0x2d2   :  { %v15946_v18 = vpop.eup %15945  ;;  %v373_v19 = vmul.f32 %v15944_v17, %v16558_v37 }
 0x2d3   :  { %v15948_v22 = vpop.eup %15947  ;;  %v464_v29 = vmul.f32 %v15946_v18, %v16558_v37 }
 0x2d4   :  { %v15950_v26 = vpop.eup %15949  ;;  %v374_v27 = vmul.f32 %v15948_v22, %v16561_v38  ;;  %v375_v28 = vadd.f32 %v373_v19, %v16564_v39 }
 0x2d5   :  { %v465_v32 = vmul.f32 %v15950_v26, %v16561_v38  ;;  %v466_v40 = vadd.f32 %v464_v29, %v16564_v39 }
 0x2d6   :  { %v376_v34 = vadd.f32 %v374_v27, %v16567_v41  ;;  %v377_v49 = vmul.f32 0.0, %v375_v28 }
 0x2d7   :  { %v467_v44 = vadd.f32 %v465_v32, %v16567_v41  ;;  %v468_v54 = vmul.f32 %v466_v40, %v16729_v52 }
 0x2d8   :  { %v378_v36 = vmul.f32 %v376_v34, %v375_v28 }
 0x2d9   :  { %v469_v47 = vmul.f32 %v467_v44, %v466_v40 }
 0x2da   :  { %380 = vrot.lane.b32.xlu1 %v378_v36, %s16406_s7 }
 0x2de   :  { %471 = vrot.lane.b32.xlu1 %v469_v47, %s16406_s7 }
 0x34c   :  { %v381_v50 = vpop.permute.xlu1 %380 }
 0x34d   :  { %v16781_v53 = vadd.f32 %v381_v50, %v377_v49 }
 0x34f   :  { %15951 = vtanh.f32 %v16781_v53 }
 0x350   :  { %v472_v57 = vpop.permute.xlu1 %471 }
 0x351   :  { %v16785_v45 = vadd.f32 %v472_v57, %v468_v54 }
 0x353   :  { %15953 = vtanh.f32 %v16785_v45 }
 0x359   :  { %v15952_v58 = vpop.eup %15951 }
 0x35a   :  { %v385_v60 = vmul.f32 %v15952_v58, %v376_v34 }
 0x35c   :  { %478 = vrot.lane.b32.xlu0 %v385_v60, %s16406_s7 }
 0x35d   :  { %v15954_v63 = vpop.eup %15953 }
 0x35e   :  { %v476_v0 = vmul.f32 %v15954_v63, %v467_v44 }
 0x360   :  { %554 = vrot.lane.b32.xlu1 %v476_v0, %s16406_s7 }
 0x3ce   :  { %v479_v1 = vpop.permute.xlu0 %478 }
 0x3cf   :  { %13384 = vmatmul.mubr.msk.f32.vlgmr.msra.gmra.mrb[2].mxu0 %vm98_vm0, %v479_v1 }
 0x3d0   :  { %13654 = vmatpush1.bf16.msra.mxu0 %v16673_v23  ;;  %622 = vmatprep.mubr.f32.mxu0 %v16405_v3 }
 0x3d1   :  { %13656 = vmatprep.subr.bf16.mxu0 %v16676_v25 }
 0x3d2   :  { %v555_v52 = vpop.permute.xlu1 %554 }
 0x3d3   :  { %13388 = vmatmul.mubr.msk.f32.vlgmr.msra.gmra.mrb[4].mxu1 %vm98_vm0, %v555_v52 }
 0x3d4   :  { %13658 = vmatpush1.bf16.msra.mxu0 %v16692_v30  ;;  %13686 = vmatpush1.bf16.msra.mxu1 %v16600_v55 }
 0x3d5   :  { %13660 = vmatprep.subr.bf16.mxu0 %v16696_v31  ;;  %13688 = vmatprep.subr.bf16.mxu1 %v16602_v56 }
 0x3d6   :  { %806 = vmatprep.mubr.f32.mxu1 %v16405_v3 }
 0x3d8   :  { %13662 = vmatpush1.bf16.msra.mxu0 %v16711_v42  ;;  %13690 = vmatpush1.bf16.msra.mxu1 %v16619_v61 }
 0x3d9   :  { %13664 = vmatprep.subr.bf16.mxu0 %v16714_v43  ;;  %13692 = vmatprep.subr.bf16.mxu1 %v16622_v62 }
 0x3dc   :  { %13666 = vmatpush1.bf16.msra.mxu0 %v16723_v48  ;;  %13694 = vmatpush1.bf16.msra.mxu1 %v16637_v5 }
 0x3dd   :  { %13716 = vmatprep.subr.bf16.mxu0 %v16468_v4  ;;  %13696 = vmatprep.subr.bf16.mxu1 %v16640_v6 }
 0x3df   :  { %13385 = vmatmul.mubr.msk.f32.vlgmr.msra.gmra.mrb[2].mxu0 %vm98_vm0, %v555_v52 }
 0x3e0   :  { %13718 = vmatpush1.bf16.msra.mxu0 %v16479_v8  ;;  %973 = vmatprep.mubr.f32.mxu0 %v16405_v3 }
 0x3e1   :  { %13720 = vmatprep.subr.bf16.mxu0 %v16481_v9  ;;  %13698 = vmatpush1.bf16.msra.mxu1 %v16655_v13 }
 0x3e2   :  { %13700 = vmatprep.subr.bf16.mxu1 %v16658_v16 }
 0x3e4   :  { %13722 = vmatpush1.bf16.msra.mxu0 %v16498_v14 }
 0x3e5   :  { %13724 = vmatprep.subr.bf16.mxu0 %v16502_v15 }
 0x3e8   :  { %13726 = vmatpush1.bf16.msra.mxu0 %v16518_v20 }
 0x3e9   :  { %13728 = vmatprep.subr.bf16.mxu0 %v16522_v21 }
 0x3ec   :  { %13730 = vmatpush1.bf16.msra.mxu0 %v16532_v24 }
 0x3ed   :  { %13732 = vmatprep.subr.bf16.mxu0 %v16589_v51 }
 0x4a6   :  { %v715_v10 = vpop.f32.mrb[4].mxu1 }
 0x4a7   :  { %v720_v11 = vadd.f32 %v13386_v2, %v715_v10  ;;  %v717_v12 = vpop.f32.mrb[5].mxu1 }
 0x4a8   :  { %v721_v17 = vadd.f32 %v13387_v7, %v717_v12 }
 0x4a9   :  { %15955 = vtanh.f32 %v720_v11 }
 0x4aa   :  { %15957 = vtanh.f32 %v721_v17  ;;  %v13391_v17 = vld [vmem:[%s21286_s0 + $0x30] sm:$0xff] }
 0x4b2   :  { %v624_v18 = vpop.f32.mrb[2].mxu0 }
 0x4b3   :  { %v15956_v19 = vpop.eup %15955  ;;  %v629_v22 = vadd.f32 %v624_v18, %v16758_v46  ;;  %v626_v26 = vpop.f32.mrb[3].mxu0  ;;  %v13392_v18 = vld [vmem:[%s21286_s0 + $0x38] sm:$0xff] }
 0x4b4   :  { %v15958_v27 = vpop.eup %15957  ;;  %v630_v28 = vadd.f32 %v626_v26, %v16764_v59  ;;  %v724_v29 = vmul.f32 %v15956_v19, %v16558_v37 }
 0x4b5   :  { %15959 = vtanh.f32 %v629_v22  ;;  %v725_v32 = vmul.f32 %v15958_v27, %v16561_v38 }
 0x4b6   :  { %15961 = vtanh.f32 %v630_v28  ;;  %v726_v34 = vadd.f32 %v724_v29, %v16564_v39 }
 0x4b7   :  { %v727_v36 = vadd.f32 %v725_v32, %v16567_v41 }
 0x4b8   :  { %v728_v60 = vmul.f32 %v726_v34, %v16785_v45 }
 0x4b9   :  { %v729_v40 = vmul.f32 %v727_v36, %v726_v34 }
 0x4bb   :  { %731 = vrot.lane.b32.xlu1 %v729_v40, %s16406_s7 }
 0x4bf   :  { %v15960_v44 = vpop.eup %15959 }
 0x4c0   :  { %v15962_v47 = vpop.eup %15961  ;;  %v633_v49 = vmul.f32 %v15960_v44, %v16558_v37 }
 0x4c1   :  { %v634_v50 = vmul.f32 %v15962_v47, %v16561_v38 }
 0x4c2   :  { %v635_v54 = vadd.f32 %v633_v49, %v16564_v39 }
 0x4c3   :  { %v636_v57 = vadd.f32 %v634_v50, %v16567_v41 }
 0x4c4   :  { %v637_v1 = vmul.f32 %v635_v54, %v16781_v53 }
 0x4c5   :  { %v638_v58 = vmul.f32 %v636_v57, %v635_v54 }
 0x4c7   :  { %640 = vrot.lane.b32.xlu0 %v638_v58, %s16406_s7 }
 0x52d   :  { %v732_v63 = vpop.permute.xlu1 %731 }
 0x52e   :  { %v16839_v0 = vadd.f32 %v732_v63, %v728_v60 }
 0x530   :  { %15963 = vtanh.f32 %v16839_v0 }
 0x539   :  { %v641_v52 = vpop.permute.xlu0 %640 }
 0x53a   :  { %v15964_v2 = vpop.eup %15963  ;;  %v16843_v7 = vadd.f32 %v641_v52, %v637_v1 }
 0x53b   :  { %v736_v10 = vmul.f32 %v15964_v2, %v727_v36 }
 0x53c   :  { %15965 = vtanh.f32 %v16843_v7 }
 0x53d   :  { %814 = vrot.lane.b32.xlu1 %v736_v10, %s16406_s7 }
 0x546   :  { %v15966_v11 = vpop.eup %15965 }
 0x547   :  { %v645_v12 = vmul.f32 %v15966_v11, %v636_v57 }
 0x549   :  { %738 = vrot.lane.b32.xlu0 %v645_v12, %s16406_s7 }
 0x5af   :  { %v815_v45 = vpop.permute.xlu1 %814 }
 0x5b0   :  { %13393 = vmatmul.mubr.msk.f32.vlgmr.msra.gmra.mrb[4].mxu0 %vm98_vm0, %v815_v45 }
 0x5b1   :  { %13734 = vmatpush1.bf16.msra.mxu0 %v16600_v55  ;;  %1066 = vmatprep.mubr.f32.mxu0 %v16405_v3 }
 0x5b2   :  { %13736 = vmatprep.subr.bf16.mxu0 %v16602_v56 }
 0x5b5   :  { %13738 = vmatpush1.bf16.msra.mxu0 %v16619_v61 }
 0x5b6   :  { %13740 = vmatprep.subr.bf16.mxu0 %v16622_v62 }
 0x5b9   :  { %13742 = vmatpush1.bf16.msra.mxu0 %v16637_v5 }
 0x5ba   :  { %13744 = vmatprep.subr.bf16.mxu0 %v16640_v6 }
 0x5bb   :  { %v739_v53 = vpop.permute.xlu0 %738 }
 0x5bc   :  { %13389 = vmatmul.mubr.msk.f32.vlgmr.msra.gmra.mrb[6].mxu1 %vm98_vm0, %v739_v53 }
 0x5bd   :  { %13702 = vmatpush1.bf16.msra.mxu1 %v16673_v23  ;;  %882 = vmatprep.mubr.f32.mxu1 %v16405_v3 }
 0x5be   :  { %13704 = vmatprep.subr.bf16.mxu1 %v16676_v25  ;;  %13746 = vmatpush1.bf16.msra.mxu0 %v16655_v13 }
 0x5bf   :  { %13748 = vmatprep.subr.bf16.mxu0 %v16658_v16 }
 0x5c1   :  { %13706 = vmatpush1.bf16.msra.mxu1 %v16692_v30 }
 0x5c2   :  { %13708 = vmatprep.subr.bf16.mxu1 %v16696_v31 }
 0x5c5   :  { %13710 = vmatpush1.bf16.msra.mxu1 %v16711_v42 }
 0x5c6   :  { %13712 = vmatprep.subr.bf16.mxu1 %v16714_v43 }
 0x5c9   :  { %13714 = vmatpush1.bf16.msra.mxu1 %v16723_v48 }
 0x5ca   :  { %13764 = vmatprep.subr.bf16.mxu1 %v16468_v4 }
 0x5cc   :  { %13390 = vmatmul.mubr.msk.f32.vlgmr.msra.gmra.mrb[6].mxu1 %vm98_vm0, %v815_v45 }
 0x5cd   :  { %13766 = vmatpush1.bf16.msra.mxu1 %v16479_v8  ;;  %1233 = vmatprep.mubr.f32.mxu1 %v16405_v3 }
 0x5ce   :  { %13768 = vmatprep.subr.bf16.mxu1 %v16481_v9 }
 0x5d1   :  { %13770 = vmatpush1.bf16.msra.mxu1 %v16498_v14 }
 0x5d2   :  { %13772 = vmatprep.subr.bf16.mxu1 %v16502_v15 }
 0x5d5   :  { %13774 = vmatpush1.bf16.msra.mxu1 %v16518_v20 }
 0x5d6   :  { %13776 = vmatprep.subr.bf16.mxu1 %v16522_v21 }
 0x5d9   :  { %13778 = vmatpush1.bf16.msra.mxu1 %v16532_v24 }
 0x5da   :  { %13780 = vmatprep.subr.bf16.mxu1 %v16589_v51 }
 0x683   :  { %v975_v19 = vpop.f32.mrb[4].mxu0 }
 0x684   :  { %v980_v22 = vadd.f32 %v13391_v17, %v975_v19  ;;  %v977_v26 = vpop.f32.mrb[5].mxu0 }
 0x685   :  { %v981_v27 = vadd.f32 %v13392_v18, %v977_v26 }
 0x686   :  { %15967 = vtanh.f32 %v980_v22 }
 0x687   :  { %15969 = vtanh.f32 %v981_v27  ;;  %v13396_v27 = vld [vmem:[%s21286_s0 + $0x40] sm:$0xff] }
 0x690   :  { %v15968_v28 = vpop.eup %15967 }
 0x691   :  { %v15970_v29 = vpop.eup %15969  ;;  %v984_v32 = vmul.f32 %v15968_v28, %v16558_v37  ;;  %v13397_v28 = vld [vmem:[%s21286_s0 + $0x48] sm:$0xff] }
 0x692   :  { %v985_v34 = vmul.f32 %v15970_v29, %v16561_v38 }
 0x693   :  { %v986_v36 = vadd.f32 %v984_v32, %v16564_v39 }
 0x694   :  { %v987_v40 = vadd.f32 %v985_v34, %v16567_v41 }
 0x695   :  { %v988_v10 = vmul.f32 %v986_v36, %v16839_v0 }
 0x696   :  { %v989_v44 = vmul.f32 %v987_v40, %v986_v36 }
 0x698   :  { %991 = vrot.lane.b32.xlu1 %v989_v44, %s16406_s7 }
 0x69f   :  { %v884_v47 = vpop.f32.mrb[6].mxu1 }
 0x6a0   :  { %v889_v49 = vadd.f32 %v884_v47, %v16758_v46  ;;  %v886_v50 = vpop.f32.mrb[7].mxu1 }
 0x6a1   :  { %v890_v54 = vadd.f32 %v886_v50, %v16764_v59 }
 0x6a2   :  { %15971 = vtanh.f32 %v889_v49 }
 0x6a3   :  { %15973 = vtanh.f32 %v890_v54 }
 0x6ac   :  { %v15972_v57 = vpop.eup %15971 }
 0x6ad   :  { %v15974_v58 = vpop.eup %15973  ;;  %v893_v60 = vmul.f32 %v15972_v57, %v16558_v37 }
 0x6ae   :  { %v894_v63 = vmul.f32 %v15974_v58, %v16561_v38 }
 0x6af   :  { %v895_v1 = vadd.f32 %v893_v60, %v16564_v39 }
 0x6b0   :  { %v896_v52 = vadd.f32 %v894_v63, %v16567_v41 }
 0x6b1   :  { %v897_v17 = vmul.f32 %v895_v1, %v16843_v7 }
 0x6b2   :  { %v898_v2 = vmul.f32 %v896_v52, %v895_v1 }
 0x6b4   :  { %900 = vrot.lane.b32.xlu0 %v898_v2, %s16406_s7 }
 0x70a   :  { %v992_v11 = vpop.permute.xlu1 %991 }
 0x70b   :  { %v16897_v12 = vadd.f32 %v992_v11, %v988_v10 }
 0x70d   :  { %15975 = vtanh.f32 %v16897_v12 }
 0x717   :  { %v15976_v45 = vpop.eup %15975 }
 0x718   :  { %v996_v53 = vmul.f32 %v15976_v45, %v987_v40 }
 0x71a   :  { %1074 = vrot.lane.b32.xlu1 %v996_v53, %s16406_s7 }
 0x726   :  { %v901_v18 = vpop.permute.xlu0 %900 }
 0x727   :  { %v16902_v19 = vadd.f32 %v901_v18, %v897_v17 }
 0x729   :  { %15977 = vtanh.f32 %v16902_v19 }
 0x733   :  { %v15978_v22 = vpop.eup %15977 }
 0x734   :  { %v905_v26 = vmul.f32 %v15978_v22, %v896_v52 }
 0x736   :  { %998 = vrot.lane.b32.xlu0 %v905_v26, %s16406_s7 }
 0x78c   :  { %v1075_v0 = vpop.permute.xlu1 %1074 }
 0x78d   :  { %13398 = vmatmul.mubr.msk.f32.vlgmr.msra.gmra.mrb[8].mxu1 %vm98_vm0, %v1075_v0 }
 0x78e   :  { %13782 = vmatpush1.bf16.msra.mxu1 %v16600_v55  ;;  %1326 = vmatprep.mubr.f32.mxu1 %v16405_v3 }
 0x78f   :  { %13784 = vmatprep.subr.bf16.mxu1 %v16602_v56 }
 0x792   :  { %13786 = vmatpush1.bf16.msra.mxu1 %v16619_v61 }
 0x793   :  { %13788 = vmatprep.subr.bf16.mxu1 %v16622_v62 }
 0x796   :  { %13790 = vmatpush1.bf16.msra.mxu1 %v16637_v5 }
 0x797   :  { %13792 = vmatprep.subr.bf16.mxu1 %v16640_v6 }
 0x79a   :  { %13794 = vmatpush1.bf16.msra.mxu1 %v16655_v13 }
 0x79b   :  { %13796 = vmatprep.subr.bf16.mxu1 %v16658_v16 }
 0x7a8   :  { %v999_v7 = vpop.permute.xlu0 %998 }
 0x7a9   :  { %13394 = vmatmul.mubr.msk.f32.vlgmr.msra.gmra.mrb[6].mxu0 %vm98_vm0, %v999_v7 }
 0x7aa   :  { %13750 = vmatpush1.bf16.msra.mxu0 %v16673_v23  ;;  %1142 = vmatprep.mubr.f32.mxu0 %v16405_v3 }
 0x7ab   :  { %13752 = vmatprep.subr.bf16.mxu0 %v16676_v25 }
 0x7ae   :  { %13754 = vmatpush1.bf16.msra.mxu0 %v16692_v30 }
 0x7af   :  { %13756 = vmatprep.subr.bf16.mxu0 %v16696_v31 }
 0x7b2   :  { %13758 = vmatpush1.bf16.msra.mxu0 %v16711_v42 }
 0x7b3   :  { %13760 = vmatprep.subr.bf16.mxu0 %v16714_v43 }
 0x7b6   :  { %13762 = vmatpush1.bf16.msra.mxu0 %v16723_v48 }
 0x7b7   :  { %13812 = vmatprep.subr.bf16.mxu0 %v16468_v4 }
 0x7b9   :  { %13395 = vmatmul.mubr.msk.f32.vlgmr.msra.gmra.mrb[6].mxu0 %vm98_vm0, %v1075_v0 }
 0x7ba   :  { %13814 = vmatpush1.bf16.msra.mxu0 %v16479_v8  ;;  %1493 = vmatprep.mubr.f32.mxu0 %v16405_v3 }
 0x7bb   :  { %13816 = vmatprep.subr.bf16.mxu0 %v16481_v9 }
 0x7be   :  { %13818 = vmatpush1.bf16.msra.mxu0 %v16498_v14 }
 0x7bf   :  { %13820 = vmatprep.subr.bf16.mxu0 %v16502_v15 }
 0x7c2   :  { %13822 = vmatpush1.bf16.msra.mxu0 %v16518_v20 }
 0x7c3   :  { %13824 = vmatprep.subr.bf16.mxu0 %v16522_v21 }
 0x7c6   :  { %13826 = vmatpush1.bf16.msra.mxu0 %v16532_v24 }
 0x7c7   :  { %13828 = vmatprep.subr.bf16.mxu0 %v16589_v51 }
 0x860   :  { %v1235_v29 = vpop.f32.mrb[8].mxu1 }
 0x861   :  { %v1240_v32 = vadd.f32 %v13396_v27, %v1235_v29  ;;  %v1237_v34 = vpop.f32.mrb[9].mxu1 }
 0x862   :  { %v1241_v36 = vadd.f32 %v13397_v28, %v1237_v34 }
 0x863   :  { %15979 = vtanh.f32 %v1240_v32 }
 0x864   :  { %15981 = vtanh.f32 %v1241_v36  ;;  %v13401_v36 = vld [vmem:[%s21286_s0 + $0x50] sm:$0xff] }
 0x86d   :  { %v15980_v40 = vpop.eup %15979 }
 0x86e   :  { %v15982_v44 = vpop.eup %15981  ;;  %v1244_v47 = vmul.f32 %v15980_v40, %v16558_v37  ;;  %v13402_v40 = vld [vmem:[%s21286_s0 + $0x58] sm:$0xff] }
 0x86f   :  { %v1245_v49 = vmul.f32 %v15982_v44, %v16561_v38 }
 0x870   :  { %v1246_v50 = vadd.f32 %v1244_v47, %v16564_v39 }
 0x871   :  { %v1247_v54 = vadd.f32 %v1245_v49, %v16567_v41 }
 0x872   :  { %v1248_v18 = vmul.f32 %v1246_v50, %v16897_v12 }
 0x873   :  { %v1249_v57 = vmul.f32 %v1247_v54, %v1246_v50 }
 0x875   :  { %1251 = vrot.lane.b32.xlu1 %v1249_v57, %s16406_s7 }
 0x88c   :  { %v1144_v58 = vpop.f32.mrb[6].mxu0 }
 0x88d   :  { %v1149_v60 = vadd.f32 %v1144_v58, %v16758_v46  ;;  %v1146_v63 = vpop.f32.mrb[7].mxu0 }
 0x88e   :  { %v1150_v1 = vadd.f32 %v1146_v63, %v16764_v59 }
 0x88f   :  { %15983 = vtanh.f32 %v1149_v60 }
 0x890   :  { %15985 = vtanh.f32 %v1150_v1 }
 0x899   :  { %v15984_v52 = vpop.eup %15983 }
 0x89a   :  { %v15986_v2 = vpop.eup %15985  ;;  %v1153_v10 = vmul.f32 %v15984_v52, %v16558_v37 }
 0x89b   :  { %v1154_v11 = vmul.f32 %v15986_v2, %v16561_v38 }
 0x89c   :  { %v1155_v45 = vadd.f32 %v1153_v10, %v16564_v39 }
 0x89d   :  { %v1156_v53 = vadd.f32 %v1154_v11, %v16567_v41 }
 0x89e   :  { %v1157_v27 = vmul.f32 %v1155_v45, %v16902_v19 }
 0x89f   :  { %v1158_v17 = vmul.f32 %v1156_v53, %v1155_v45 }
 0x8a1   :  { %1160 = vrot.lane.b32.xlu0 %v1158_v17, %s16406_s7 }
 0x8e7   :  { %v1252_v22 = vpop.permute.xlu1 %1251 }
 0x8e8   :  { %v16955_v26 = vadd.f32 %v1252_v22, %v1248_v18 }
 0x8ea   :  { %15987 = vtanh.f32 %v16955_v26 }
 0x8f4   :  { %v15988_v0 = vpop.eup %15987 }
 0x8f5   :  { %v1256_v7 = vmul.f32 %v15988_v0, %v1247_v54 }
 0x8f7   :  { %1334 = vrot.lane.b32.xlu1 %v1256_v7, %s16406_s7 }
 0x913   :  { %v1161_v28 = vpop.permute.xlu0 %1160 }
 0x914   :  { %v16960_v29 = vadd.f32 %v1161_v28, %v1157_v27 }
 0x916   :  { %15989 = vtanh.f32 %v16960_v29 }
 0x920   :  { %v15990_v32 = vpop.eup %15989 }
 0x921   :  { %v1165_v34 = vmul.f32 %v15990_v32, %v1156_v53 }
 0x923   :  { %1258 = vrot.lane.b32.xlu0 %v1165_v34, %s16406_s7 }
 0x969   :  { %v1335_v12 = vpop.permute.xlu1 %1334 }
 0x96a   :  { %13403 = vmatmul.mubr.msk.f32.vlgmr.msra.gmra.mrb[8].mxu0 %vm98_vm0, %v1335_v12 }
 0x96b   :  { %13830 = vmatpush1.bf16.msra.mxu0 %v16600_v55  ;;  %1586 = vmatprep.mubr.f32.mxu0 %v16405_v3 }
 0x96c   :  { %13832 = vmatprep.subr.bf16.mxu0 %v16602_v56 }
 0x96f   :  { %13834 = vmatpush1.bf16.msra.mxu0 %v16619_v61 }
 0x970   :  { %13836 = vmatprep.subr.bf16.mxu0 %v16622_v62 }
 0x973   :  { %13838 = vmatpush1.bf16.msra.mxu0 %v16637_v5 }
 0x974   :  { %13840 = vmatprep.subr.bf16.mxu0 %v16640_v6 }
 0x977   :  { %13842 = vmatpush1.bf16.msra.mxu0 %v16655_v13 }
 0x978   :  { %13844 = vmatprep.subr.bf16.mxu0 %v16658_v16 }
 0x995   :  { %v1259_v19 = vpop.permute.xlu0 %1258 }
 0x996   :  { %13399 = vmatmul.mubr.msk.f32.vlgmr.msra.gmra.mrb[10].mxu1 %vm98_vm0, %v1259_v19 }
 0x997   :  { %13798 = vmatpush1.bf16.msra.mxu1 %v16673_v23  ;;  %1402 = vmatprep.mubr.f32.mxu1 %v16405_v3 }
 0x998   :  { %13800 = vmatprep.subr.bf16.mxu1 %v16676_v25 }
 0x99b   :  { %13802 = vmatpush1.bf16.msra.mxu1 %v16692_v30 }
 0x99c   :  { %13804 = vmatprep.subr.bf16.mxu1 %v16696_v31 }
 0x99f   :  { %13806 = vmatpush1.bf16.msra.mxu1 %v16711_v42 }
 0x9a0   :  { %13808 = vmatprep.subr.bf16.mxu1 %v16714_v43 }
 0x9a3   :  { %13810 = vmatpush1.bf16.msra.mxu1 %v16723_v48 }
 0x9a4   :  { %13860 = vmatprep.subr.bf16.mxu1 %v16468_v4 }
 0x9a6   :  { %13400 = vmatmul.mubr.msk.f32.vlgmr.msra.gmra.mrb[10].mxu1 %vm98_vm0, %v1335_v12 }
 0x9a7   :  { %13862 = vmatpush1.bf16.msra.mxu1 %v16479_v8  ;;  %1753 = vmatprep.mubr.f32.mxu1 %v16405_v3 }
 0x9a8   :  { %13864 = vmatprep.subr.bf16.mxu1 %v16481_v9 }
 0x9ab   :  { %13866 = vmatpush1.bf16.msra.mxu1 %v16498_v14 }
 0x9ac   :  { %13868 = vmatprep.subr.bf16.mxu1 %v16502_v15 }
 0x9af   :  { %13870 = vmatpush1.bf16.msra.mxu1 %v16518_v20 }
 0x9b0   :  { %13872 = vmatprep.subr.bf16.mxu1 %v16522_v21 }
 0x9b3   :  { %13874 = vmatpush1.bf16.msra.mxu1 %v16532_v24 }
 0x9b4   :  { %13876 = vmatprep.subr.bf16.mxu1 %v16589_v51 }
 0xa3d   :  { %v1495_v44 = vpop.f32.mrb[8].mxu0 }
 0xa3e   :  { %v1500_v47 = vadd.f32 %v13401_v36, %v1495_v44  ;;  %v1497_v49 = vpop.f32.mrb[9].mxu0 }
 0xa3f   :  { %v1501_v50 = vadd.f32 %v13402_v40, %v1497_v49 }
 0xa40   :  { %15991 = vtanh.f32 %v1500_v47 }
 0xa41   :  { %15993 = vtanh.f32 %v1501_v50  ;;  %v13406_v50 = vld [vmem:[%s21286_s0 + $0x60] sm:$0xff] }
 0xa4a   :  { %v15992_v54 = vpop.eup %15991 }
 0xa4b   :  { %v15994_v57 = vpop.eup %15993  ;;  %v1504_v58 = vmul.f32 %v15992_v54, %v16558_v37  ;;  %v13407_v54 = vld [vmem:[%s21286_s0 + $0x68] sm:$0xff] }
 0xa4c   :  { %v1505_v60 = vmul.f32 %v15994_v57, %v16561_v38 }
 0xa4d   :  { %v1506_v63 = vadd.f32 %v1504_v58, %v16564_v39 }
 0xa4e   :  { %v1507_v1 = vadd.f32 %v1505_v60, %v16567_v41 }
 0xa4f   :  { %v1508_v28 = vmul.f32 %v1506_v63, %v16955_v26 }
 0xa50   :  { %v1509_v52 = vmul.f32 %v1507_v1, %v1506_v63 }
 0xa52   :  { %1511 = vrot.lane.b32.xlu1 %v1509_v52, %s16406_s7 }
 0xa79   :  { %v1404_v2 = vpop.f32.mrb[10].mxu1 }
 0xa7a   :  { %v1409_v10 = vadd.f32 %v1404_v2, %v16758_v46  ;;  %v1406_v11 = vpop.f32.mrb[11].mxu1 }
 0xa7b   :  { %v1410_v45 = vadd.f32 %v1406_v11, %v16764_v59 }
 0xa7c   :  { %15995 = vtanh.f32 %v1409_v10 }
 0xa7d   :  { %15997 = vtanh.f32 %v1410_v45 }
 0xa86   :  { %v15996_v53 = vpop.eup %15995 }
 0xa87   :  { %v15998_v17 = vpop.eup %15997  ;;  %v1413_v18 = vmul.f32 %v15996_v53, %v16558_v37 }
 0xa88   :  { %v1414_v22 = vmul.f32 %v15998_v17, %v16561_v38 }
 0xa89   :  { %v1415_v0 = vadd.f32 %v1413_v18, %v16564_v39 }
 0xa8a   :  { %v1416_v7 = vadd.f32 %v1414_v22, %v16567_v41 }
 0xa8b   :  { %v1417_v36 = vmul.f32 %v1415_v0, %v16960_v29 }
 0xa8c   :  { %v1418_v27 = vmul.f32 %v1416_v7, %v1415_v0 }
 0xa8e   :  { %1420 = vrot.lane.b32.xlu0 %v1418_v27, %s16406_s7 }
 0xac4   :  { %v1512_v32 = vpop.permute.xlu1 %1511 }
 0xac5   :  { %v17013_v34 = vadd.f32 %v1512_v32, %v1508_v28 }
 0xac7   :  { %15999 = vtanh.f32 %v17013_v34 }
 0xad1   :  { %v16000_v12 = vpop.eup %15999 }
 0xad2   :  { %v1516_v19 = vmul.f32 %v16000_v12, %v1507_v1 }
 0xad4   :  { %1594 = vrot.lane.b32.xlu1 %v1516_v19, %s16406_s7 }
 0xb00   :  { %v1421_v40 = vpop.permute.xlu0 %1420 }
 0xb01   :  { %v17018_v44 = vadd.f32 %v1421_v40, %v1417_v36 }
 0xb03   :  { %16001 = vtanh.f32 %v17018_v44 }
 0xb0d   :  { %v16002_v47 = vpop.eup %16001 }
 0xb0e   :  { %v1425_v49 = vmul.f32 %v16002_v47, %v1416_v7 }
 0xb10   :  { %1518 = vrot.lane.b32.xlu0 %v1425_v49, %s16406_s7 }
 0xb46   :  { %v1595_v26 = vpop.permute.xlu1 %1594 }
 0xb47   :  { %13408 = vmatmul.mubr.msk.f32.vlgmr.msra.gmra.mrb[12].mxu1 %vm98_vm0, %v1595_v26 }
 0xb48   :  { %13878 = vmatpush1.bf16.msra.mxu1 %v16600_v55  ;;  %1846 = vmatprep.mubr.f32.mxu1 %v16405_v3 }
 0xb49   :  { %13880 = vmatprep.subr.bf16.mxu1 %v16602_v56 }
 0xb4c   :  { %13882 = vmatpush1.bf16.msra.mxu1 %v16619_v61 }
 0xb4d   :  { %13884 = vmatprep.subr.bf16.mxu1 %v16622_v62 }
 0xb50   :  { %13886 = vmatpush1.bf16.msra.mxu1 %v16637_v5 }
 0xb51   :  { %13888 = vmatprep.subr.bf16.mxu1 %v16640_v6 }
 0xb54   :  { %13890 = vmatpush1.bf16.msra.mxu1 %v16655_v13 }
 0xb55   :  { %13892 = vmatprep.subr.bf16.mxu1 %v16658_v16 }
 0xb82   :  { %v1519_v29 = vpop.permute.xlu0 %1518 }
 0xb83   :  { %13404 = vmatmul.mubr.msk.f32.vlgmr.msra.gmra.mrb[10].mxu0 %vm98_vm0, %v1519_v29 }
 0xb84   :  { %13846 = vmatpush1.bf16.msra.mxu0 %v16673_v23  ;;  %1662 = vmatprep.mubr.f32.mxu0 %v16405_v3 }
 0xb85   :  { %13848 = vmatprep.subr.bf16.mxu0 %v16676_v25 }
 0xb88   :  { %13850 = vmatpush1.bf16.msra.mxu0 %v16692_v30 }
 0xb89   :  { %13852 = vmatprep.subr.bf16.mxu0 %v16696_v31 }
 0xb8c   :  { %13854 = vmatpush1.bf16.msra.mxu0 %v16711_v42 }
 0xb8d   :  { %13856 = vmatprep.subr.bf16.mxu0 %v16714_v43 }
 0xb90   :  { %13858 = vmatpush1.bf16.msra.mxu0 %v16723_v48 }
 0xb91   :  { %13908 = vmatprep.subr.bf16.mxu0 %v16468_v4 }
 0xb93   :  { %13405 = vmatmul.mubr.msk.f32.vlgmr.msra.gmra.mrb[10].mxu0 %vm98_vm0, %v1595_v26 }
 0xb94   :  { %13910 = vmatpush1.bf16.msra.mxu0 %v16479_v8  ;;  %2013 = vmatprep.mubr.f32.mxu0 %v16405_v3 }
 0xb95   :  { %13912 = vmatprep.subr.bf16.mxu0 %v16481_v9 }
 0xb98   :  { %13914 = vmatpush1.bf16.msra.mxu0 %v16498_v14 }
 0xb99   :  { %13916 = vmatprep.subr.bf16.mxu0 %v16502_v15 }
 0xb9c   :  { %13918 = vmatpush1.bf16.msra.mxu0 %v16518_v20 }
 0xb9d   :  { %13920 = vmatprep.subr.bf16.mxu0 %v16522_v21 }
 0xba0   :  { %13922 = vmatpush1.bf16.msra.mxu0 %v16532_v24 }
 0xba1   :  { %13924 = vmatprep.subr.bf16.mxu0 %v16589_v51 }
 0xc1a   :  { %v1755_v57 = vpop.f32.mrb[12].mxu1 }
 0xc1b   :  { %v1760_v58 = vadd.f32 %v13406_v50, %v1755_v57  ;;  %v1757_v60 = vpop.f32.mrb[13].mxu1 }
 0xc1c   :  { %v1761_v63 = vadd.f32 %v13407_v54, %v1757_v60 }
 0xc1d   :  { %16003 = vtanh.f32 %v1760_v58 }
 0xc1e   :  { %16005 = vtanh.f32 %v1761_v63  ;;  %v13411_v63 = vld [vmem:[%s21286_s0 + $0x70] sm:$0xff] }
 0xc27   :  { %v16004_v1 = vpop.eup %16003 }
 0xc28   :  { %v16006_v52 = vpop.eup %16005  ;;  %v1764_v2 = vmul.f32 %v16004_v1, %v16558_v37  ;;  %v13412_v1 = vld [vmem:[%s21286_s0 + $0x78] sm:$0xff] }
 0xc29   :  { %v1765_v10 = vmul.f32 %v16006_v52, %v16561_v38 }
 0xc2a   :  { %v1766_v11 = vadd.f32 %v1764_v2, %v16564_v39 }
 0xc2b   :  { %v1767_v45 = vadd.f32 %v1765_v10, %v16567_v41 }
 0xc2c   :  { %v1768_v40 = vmul.f32 %v1766_v11, %v17013_v34 }
 0xc2d   :  { %v1769_v53 = vmul.f32 %v1767_v45, %v1766_v11 }
 0xc2f   :  { %1771 = vrot.lane.b32.xlu1 %v1769_v53, %s16406_s7 }
 0xc66   :  { %v1664_v17 = vpop.f32.mrb[10].mxu0 }
 0xc67   :  { %v1669_v18 = vadd.f32 %v1664_v17, %v16758_v46  ;;  %v1666_v22 = vpop.f32.mrb[11].mxu0 }
 0xc68   :  { %v1670_v0 = vadd.f32 %v1666_v22, %v16764_v59 }
 0xc69   :  { %16007 = vtanh.f32 %v1669_v18 }
 0xc6a   :  { %16009 = vtanh.f32 %v1670_v0 }
 0xc73   :  { %v16008_v7 = vpop.eup %16007 }
 0xc74   :  { %v16010_v27 = vpop.eup %16009  ;;  %v1673_v28 = vmul.f32 %v16008_v7, %v16558_v37 }
 0xc75   :  { %v1674_v32 = vmul.f32 %v16010_v27, %v16561_v38 }
 0xc76   :  { %v1675_v12 = vadd.f32 %v1673_v28, %v16564_v39 }
 0xc77   :  { %v1676_v19 = vadd.f32 %v1674_v32, %v16567_v41 }
 0xc78   :  { %v1677_v50 = vmul.f32 %v1675_v12, %v17018_v44 }
 0xc79   :  { %v1678_v36 = vmul.f32 %v1676_v19, %v1675_v12 }
 0xc7b   :  { %1680 = vrot.lane.b32.xlu0 %v1678_v36, %s16406_s7 }
 0xca1   :  { %v1772_v47 = vpop.permute.xlu1 %1771 }
 0xca2   :  { %v17071_v49 = vadd.f32 %v1772_v47, %v1768_v40 }
 0xca4   :  { %16011 = vtanh.f32 %v17071_v49 }
 0xcae   :  { %v16012_v26 = vpop.eup %16011 }
 0xcaf   :  { %v1776_v29 = vmul.f32 %v16012_v26, %v1767_v45 }
 0xcb1   :  { %1854 = vrot.lane.b32.xlu1 %v1776_v29, %s16406_s7 }
 0xced   :  { %v1681_v54 = vpop.permute.xlu0 %1680 }
 0xcee   :  { %v17076_v57 = vadd.f32 %v1681_v54, %v1677_v50 }
 0xcf0   :  { %16013 = vtanh.f32 %v17076_v57 }
 0xcfa   :  { %v16014_v58 = vpop.eup %16013 }
 0xcfb   :  { %v1685_v60 = vmul.f32 %v16014_v58, %v1676_v19 }
 0xcfd   :  { %1778 = vrot.lane.b32.xlu0 %v1685_v60, %s16406_s7 }
 0xd23   :  { %v1855_v34 = vpop.permute.xlu1 %1854 }
 0xd24   :  { %13413 = vmatmul.mubr.msk.f32.vlgmr.msra.gmra.mrb[12].mxu0 %vm98_vm0, %v1855_v34 }
 0xd25   :  { %13926 = vmatpush1.bf16.msra.mxu0 %v16600_v55  ;;  %2106 = vmatprep.mubr.f32.mxu0 %v16405_v3 }
 0xd26   :  { %13928 = vmatprep.subr.bf16.mxu0 %v16602_v56 }
 0xd29   :  { %13930 = vmatpush1.bf16.msra.mxu0 %v16619_v61 }
 0xd2a   :  { %13932 = vmatprep.subr.bf16.mxu0 %v16622_v62 }
 0xd2d   :  { %13934 = vmatpush1.bf16.msra.mxu0 %v16637_v5 }
 0xd2e   :  { %13936 = vmatprep.subr.bf16.mxu0 %v16640_v6 }
 0xd31   :  { %13938 = vmatpush1.bf16.msra.mxu0 %v16655_v13 }
 0xd32   :  { %13940 = vmatprep.subr.bf16.mxu0 %v16658_v16 }
 0xd6f   :  { %v1779_v44 = vpop.permute.xlu0 %1778 }
 0xd70   :  { %13409 = vmatmul.mubr.msk.f32.vlgmr.msra.gmra.mrb[14].mxu1 %vm98_vm0, %v1779_v44 }
 0xd71   :  { %13894 = vmatpush1.bf16.msra.mxu1 %v16673_v23  ;;  %1922 = vmatprep.mubr.f32.mxu1 %v16405_v3 }
 0xd72   :  { %13896 = vmatprep.subr.bf16.mxu1 %v16676_v25 }
 0xd75   :  { %13898 = vmatpush1.bf16.msra.mxu1 %v16692_v30 }
 0xd76   :  { %13900 = vmatprep.subr.bf16.mxu1 %v16696_v31 }
 0xd79   :  { %13902 = vmatpush1.bf16.msra.mxu1 %v16711_v42 }
 0xd7a   :  { %13904 = vmatprep.subr.bf16.mxu1 %v16714_v43 }
 0xd7d   :  { %13906 = vmatpush1.bf16.msra.mxu1 %v16723_v48 }
 0xd7e   :  { %13956 = vmatprep.subr.bf16.mxu1 %v16468_v4 }
 0xd80   :  { %13410 = vmatmul.mubr.msk.f32.vlgmr.msra.gmra.mrb[14].mxu1 %vm98_vm0, %v1855_v34 }
 0xd81   :  { %13958 = vmatpush1.bf16.msra.mxu1 %v16479_v8  ;;  %2273 = vmatprep.mubr.f32.mxu1 %v16405_v3 }
 0xd82   :  { %13960 = vmatprep.subr.bf16.mxu1 %v16481_v9 }
 0xd85   :  { %13962 = vmatpush1.bf16.msra.mxu1 %v16498_v14 }
 0xd86   :  { %13964 = vmatprep.subr.bf16.mxu1 %v16502_v15 }
 0xd89   :  { %13966 = vmatpush1.bf16.msra.mxu1 %v16518_v20 }
 0xd8a   :  { %13968 = vmatprep.subr.bf16.mxu1 %v16522_v21 }
 0xd8d   :  { %13970 = vmatpush1.bf16.msra.mxu1 %v16532_v24 }
 0xd8e   :  { %13972 = vmatprep.subr.bf16.mxu1 %v16589_v51 }
 0xdf7   :  { %v2015_v52 = vpop.f32.mrb[12].mxu0 }
 0xdf8   :  { %v2020_v2 = vadd.f32 %v13411_v63, %v2015_v52  ;;  %v2017_v10 = vpop.f32.mrb[13].mxu0 }
 0xdf9   :  { %v2021_v11 = vadd.f32 %v13412_v1, %v2017_v10 }
 0xdfa   :  { %16015 = vtanh.f32 %v2020_v2 }
 0xdfb   :  { %16017 = vtanh.f32 %v2021_v11  ;;  %v13416_v11 = vld [vmem:[%s21286_s0 + $0x80] sm:$0xff] }
 0xe04   :  { %v16016_v45 = vpop.eup %16015 }
 0xe05   :  { %v16018_v53 = vpop.eup %16017  ;;  %v2024_v17 = vmul.f32 %v16016_v45, %v16558_v37  ;;  %v13417_v45 = vld [vmem:[%s21286_s0 + $0x88] sm:$0xff] }
 0xe06   :  { %v2025_v18 = vmul.f32 %v16018_v53, %v16561_v38 }
 0xe07   :  { %v2026_v22 = vadd.f32 %v2024_v17, %v16564_v39 }
 0xe08   :  { %v2027_v0 = vadd.f32 %v2025_v18, %v16567_v41 }
 0xe09   :  { %v2028_v54 = vmul.f32 %v2026_v22, %v17071_v49 }
 0xe0a   :  { %v2029_v7 = vmul.f32 %v2027_v0, %v2026_v22 }
 0xe0c   :  { %2031 = vrot.lane.b32.xlu1 %v2029_v7, %s16406_s7 }
 0xe53   :  { %v1924_v27 = vpop.f32.mrb[14].mxu1 }
 0xe54   :  { %v1929_v28 = vadd.f32 %v1924_v27, %v16758_v46  ;;  %v1926_v32 = vpop.f32.mrb[15].mxu1 }
 0xe55   :  { %v1930_v12 = vadd.f32 %v1926_v32, %v16764_v59 }
 0xe56   :  { %16019 = vtanh.f32 %v1929_v28 }
 0xe57   :  { %16021 = vtanh.f32 %v1930_v12 }
 0xe60   :  { %v16020_v19 = vpop.eup %16019 }
 0xe61   :  { %v16022_v36 = vpop.eup %16021  ;;  %v1933_v40 = vmul.f32 %v16020_v19, %v16558_v37 }
 0xe62   :  { %v1934_v47 = vmul.f32 %v16022_v36, %v16561_v38 }
 0xe63   :  { %v1935_v26 = vadd.f32 %v1933_v40, %v16564_v39 }
 0xe64   :  { %v1936_v29 = vadd.f32 %v1934_v47, %v16567_v41 }
 0xe65   :  { %v1937_v63 = vmul.f32 %v1935_v26, %v17076_v57 }
 0xe66   :  { %v1938_v50 = vmul.f32 %v1936_v29, %v1935_v26 }
 0xe68   :  { %1940 = vrot.lane.b32.xlu0 %v1938_v50, %s16406_s7 }
 0xe7e   :  { %v2032_v58 = vpop.permute.xlu1 %2031 }
 0xe7f   :  { %v17129_v60 = vadd.f32 %v2032_v58, %v2028_v54 }
 0xe81   :  { %16023 = vtanh.f32 %v17129_v60 }
 0xe8b   :  { %v16024_v34 = vpop.eup %16023 }
 0xe8c   :  { %v2036_v44 = vmul.f32 %v16024_v34, %v2027_v0 }
 0xe8e   :  { %2114 = vrot.lane.b32.xlu1 %v2036_v44, %s16406_s7 }
 0xeda   :  { %v1941_v1 = vpop.permute.xlu0 %1940 }
 0xedb   :  { %v17134_v52 = vadd.f32 %v1941_v1, %v1937_v63 }
 0xedd   :  { %16025 = vtanh.f32 %v17134_v52 }
 0xee7   :  { %v16026_v2 = vpop.eup %16025 }
 0xee8   :  { %v1945_v10 = vmul.f32 %v16026_v2, %v1936_v29 }
 0xeea   :  { %2038 = vrot.lane.b32.xlu0 %v1945_v10, %s16406_s7 }
 0xf00   :  { %v2115_v49 = vpop.permute.xlu1 %2114 }
 0xf01   :  { %13418 = vmatmul.mubr.msk.f32.vlgmr.msra.gmra.mrb[16].mxu1 %vm98_vm0, %v2115_v49 }
 0xf02   :  { %13974 = vmatpush1.bf16.msra.mxu1 %v16600_v55  ;;  %2366 = vmatprep.mubr.f32.mxu1 %v16405_v3 }
 0xf03   :  { %13976 = vmatprep.subr.bf16.mxu1 %v16602_v56 }
 0xf06   :  { %13978 = vmatpush1.bf16.msra.mxu1 %v16619_v61 }
 0xf07   :  { %13980 = vmatprep.subr.bf16.mxu1 %v16622_v62 }
 0xf0a   :  { %13982 = vmatpush1.bf16.msra.mxu1 %v16637_v5 }
 0xf0b   :  { %13984 = vmatprep.subr.bf16.mxu1 %v16640_v6 }
 0xf0e   :  { %13986 = vmatpush1.bf16.msra.mxu1 %v16655_v13 }
 0xf0f   :  { %13988 = vmatprep.subr.bf16.mxu1 %v16658_v16 }
 0xf5c   :  { %v2039_v57 = vpop.permute.xlu0 %2038 }
 0xf5d   :  { %13414 = vmatmul.mubr.msk.f32.vlgmr.msra.gmra.mrb[14].mxu0 %vm98_vm0, %v2039_v57 }
 0xf5e   :  { %13942 = vmatpush1.bf16.msra.mxu0 %v16673_v23  ;;  %2182 = vmatprep.mubr.f32.mxu0 %v16405_v3 }
 0xf5f   :  { %13944 = vmatprep.subr.bf16.mxu0 %v16676_v25 }
 0xf62   :  { %13946 = vmatpush1.bf16.msra.mxu0 %v16692_v30 }
 0xf63   :  { %13948 = vmatprep.subr.bf16.mxu0 %v16696_v31 }
 0xf66   :  { %13950 = vmatpush1.bf16.msra.mxu0 %v16711_v42 }
 0xf67   :  { %13952 = vmatprep.subr.bf16.mxu0 %v16714_v43 }
 0xf6a   :  { %13954 = vmatpush1.bf16.msra.mxu0 %v16723_v48 }
 0xf6b   :  { %14004 = vmatprep.subr.bf16.mxu0 %v16468_v4 }
 0xf6d   :  { %13415 = vmatmul.mubr.msk.f32.vlgmr.msra.gmra.mrb[14].mxu0 %vm98_vm0, %v2115_v49 }
 0xf6e   :  { %14006 = vmatpush1.bf16.msra.mxu0 %v16479_v8  ;;  %2533 = vmatprep.mubr.f32.mxu0 %v16405_v3 }
 0xf6f   :  { %14008 = vmatprep.subr.bf16.mxu0 %v16481_v9 }
 0xf72   :  { %14010 = vmatpush1.bf16.msra.mxu0 %v16498_v14 }
 0xf73   :  { %14012 = vmatprep.subr.bf16.mxu0 %v16502_v15 }
 0xf76   :  { %14014 = vmatpush1.bf16.msra.mxu0 %v16518_v20 }
 0xf77   :  { %14016 = vmatprep.subr.bf16.mxu0 %v16522_v21 }
 0xf7a   :  { %14018 = vmatpush1.bf16.msra.mxu0 %v16532_v24 }
 0xf7b   :  { %14020 = vmatprep.subr.bf16.mxu0 %v16589_v51 }
 0xfd4   :  { %v2275_v53 = vpop.f32.mrb[16].mxu1 }
 0xfd5   :  { %v2280_v17 = vadd.f32 %v13416_v11, %v2275_v53  ;;  %v2277_v18 = vpop.f32.mrb[17].mxu1 }
 0xfd6   :  { %v2281_v22 = vadd.f32 %v13417_v45, %v2277_v18 }
 0xfd7   :  { %16027 = vtanh.f32 %v2280_v17 }
 0xfd8   :  { %16029 = vtanh.f32 %v2281_v22  ;;  %v13421_v22 = vld [vmem:[%s21286_s0 + $0x90] sm:$0xff] }
 0xfe1   :  { %v16028_v0 = vpop.eup %16027 }
 0xfe2   :  { %v16030_v7 = vpop.eup %16029  ;;  %v2284_v27 = vmul.f32 %v16028_v0, %v16558_v37  ;;  %v13422_v0 = vld [vmem:[%s21286_s0 + $0x98] sm:$0xff] }
 0xfe3   :  { %v2285_v28 = vmul.f32 %v16030_v7, %v16561_v38 }
 0xfe4   :  { %v2286_v32 = vadd.f32 %v2284_v27, %v16564_v39 }
 0xfe5   :  { %v2287_v12 = vadd.f32 %v2285_v28, %v16567_v41 }
 0xfe6   :  { %v2288_v1 = vmul.f32 %v2286_v32, %v17129_v60 }
 0xfe7   :  { %v2289_v19 = vmul.f32 %v2287_v12, %v2286_v32 }
 0xfe9   :  { %2291 = vrot.lane.b32.xlu1 %v2289_v19, %s16406_s7 }
0x1040   :  { %v2184_v36 = vpop.f32.mrb[14].mxu0 }
0x1041   :  { %v2189_v40 = vadd.f32 %v2184_v36, %v16758_v46  ;;  %v2186_v47 = vpop.f32.mrb[15].mxu0 }
0x1042   :  { %v2190_v26 = vadd.f32 %v2186_v47, %v16764_v59 }
0x1043   :  { %16031 = vtanh.f32 %v2189_v40 }
0x1044   :  { %16033 = vtanh.f32 %v2190_v26 }
0x104d   :  { %v16032_v29 = vpop.eup %16031 }
0x104e   :  { %v16034_v50 = vpop.eup %16033  ;;  %v2193_v54 = vmul.f32 %v16032_v29, %v16558_v37 }
0x104f   :  { %v2194_v58 = vmul.f32 %v16034_v50, %v16561_v38 }
0x1050   :  { %v2195_v34 = vadd.f32 %v2193_v54, %v16564_v39 }
0x1051   :  { %v2196_v44 = vadd.f32 %v2194_v58, %v16567_v41 }
0x1052   :  { %v2197_v11 = vmul.f32 %v2195_v34, %v17134_v52 }
0x1053   :  { %v2198_v63 = vmul.f32 %v2196_v44, %v2195_v34 }
0x1055   :  { %2200 = vrot.lane.b32.xlu0 %v2198_v63, %s16406_s7 }
0x105b   :  { %v2292_v2 = vpop.permute.xlu1 %2291 }
0x105c   :  { %v17187_v10 = vadd.f32 %v2292_v2, %v2288_v1 }
0x105e   :  { %16035 = vtanh.f32 %v17187_v10 }
0x1068   :  { %v16036_v49 = vpop.eup %16035 }
0x1069   :  { %v2296_v57 = vmul.f32 %v16036_v49, %v2287_v12 }
0x106b   :  { %2374 = vrot.lane.b32.xlu1 %v2296_v57, %s16406_s7 }
0x10c7   :  { %v2201_v45 = vpop.permute.xlu0 %2200 }
0x10c8   :  { %v17192_v53 = vadd.f32 %v2201_v45, %v2197_v11 }
0x10ca   :  { %16037 = vtanh.f32 %v17192_v53 }
0x10d4   :  { %v16038_v17 = vpop.eup %16037 }
0x10d5   :  { %v2205_v18 = vmul.f32 %v16038_v17, %v2196_v44 }
0x10d7   :  { %2298 = vrot.lane.b32.xlu0 %v2205_v18, %s16406_s7 }
0x10dd   :  { %v2375_v60 = vpop.permute.xlu1 %2374 }
0x10de   :  { %13423 = vmatmul.mubr.msk.f32.vlgmr.msra.gmra.mrb[16].mxu0 %vm98_vm0, %v2375_v60 }
0x10df   :  { %14022 = vmatpush1.bf16.msra.mxu0 %v16600_v55  ;;  %2626 = vmatprep.mubr.f32.mxu0 %v16405_v3 }
0x10e0   :  { %14024 = vmatprep.subr.bf16.mxu0 %v16602_v56 }
0x10e3   :  { %14026 = vmatpush1.bf16.msra.mxu0 %v16619_v61 }
0x10e4   :  { %14028 = vmatprep.subr.bf16.mxu0 %v16622_v62 }
0x10e7   :  { %14030 = vmatpush1.bf16.msra.mxu0 %v16637_v5 }
0x10e8   :  { %14032 = vmatprep.subr.bf16.mxu0 %v16640_v6 }
0x10eb   :  { %14034 = vmatpush1.bf16.msra.mxu0 %v16655_v13 }
0x10ec   :  { %14036 = vmatprep.subr.bf16.mxu0 %v16658_v16 }
0x1149   :  { %v2299_v52 = vpop.permute.xlu0 %2298 }
0x114a   :  { %13419 = vmatmul.mubr.msk.f32.vlgmr.msra.gmra.mrb[18].mxu1 %vm98_vm0, %v2299_v52 }
0x114b   :  { %13990 = vmatpush1.bf16.msra.mxu1 %v16673_v23  ;;  %2442 = vmatprep.mubr.f32.mxu1 %v16405_v3 }
0x114c   :  { %13992 = vmatprep.subr.bf16.mxu1 %v16676_v25 }
0x114f   :  { %13994 = vmatpush1.bf16.msra.mxu1 %v16692_v30 }
0x1150   :  { %13996 = vmatprep.subr.bf16.mxu1 %v16696_v31 }
0x1153   :  { %13998 = vmatpush1.bf16.msra.mxu1 %v16711_v42 }
0x1154   :  { %14000 = vmatprep.subr.bf16.mxu1 %v16714_v43 }
0x1157   :  { %14002 = vmatpush1.bf16.msra.mxu1 %v16723_v48 }
0x1158   :  { %14052 = vmatprep.subr.bf16.mxu1 %v16468_v4 }
0x115a   :  { %13420 = vmatmul.mubr.msk.f32.vlgmr.msra.gmra.mrb[18].mxu1 %vm98_vm0, %v2375_v60 }
0x115b   :  { %14054 = vmatpush1.bf16.msra.mxu1 %v16479_v8  ;;  %2793 = vmatprep.mubr.f32.mxu1 %v16405_v3 }
0x115c   :  { %14056 = vmatprep.subr.bf16.mxu1 %v16481_v9 }
0x115f   :  { %14058 = vmatpush1.bf16.msra.mxu1 %v16498_v14 }
0x1160   :  { %14060 = vmatprep.subr.bf16.mxu1 %v16502_v15 }
0x1163   :  { %14062 = vmatpush1.bf16.msra.mxu1 %v16518_v20 }
0x1164   :  { %14064 = vmatprep.subr.bf16.mxu1 %v16522_v21 }
0x1167   :  { %14066 = vmatpush1.bf16.msra.mxu1 %v16532_v24 }
0x1168   :  { %14068 = vmatprep.subr.bf16.mxu1 %v16589_v51 }
0x11b1   :  { %v2535_v7 = vpop.f32.mrb[16].mxu0 }
0x11b2   :  { %v2540_v27 = vadd.f32 %v13421_v22, %v2535_v7  ;;  %v2537_v28 = vpop.f32.mrb[17].mxu0 }
0x11b3   :  { %v2541_v32 = vadd.f32 %v13422_v0, %v2537_v28 }
0x11b4   :  { %16039 = vtanh.f32 %v2540_v27 }
0x11b5   :  { %16041 = vtanh.f32 %v2541_v32  ;;  %v13426_v32 = vld [vmem:[%s21286_s0 + $0xa0] sm:$0xff] }
0x11be   :  { %v16040_v12 = vpop.eup %16039 }
0x11bf   :  { %v16042_v19 = vpop.eup %16041  ;;  %v2544_v36 = vmul.f32 %v16040_v12, %v16558_v37  ;;  %v13427_v12 = vld [vmem:[%s21286_s0 + $0xa8] sm:$0xff] }
0x11c0   :  { %v2545_v40 = vmul.f32 %v16042_v19, %v16561_v38 }
0x11c1   :  { %v2546_v47 = vadd.f32 %v2544_v36, %v16564_v39 }
0x11c2   :  { %v2547_v26 = vadd.f32 %v2545_v40, %v16567_v41 }
0x11c3   :  { %v2548_v44 = vmul.f32 %v2546_v47, %v17187_v10 }
0x11c4   :  { %v2549_v29 = vmul.f32 %v2547_v26, %v2546_v47 }
0x11c6   :  { %2551 = vrot.lane.b32.xlu1 %v2549_v29, %s16406_s7 }
0x122d   :  { %v2444_v50 = vpop.f32.mrb[18].mxu1 }
0x122e   :  { %v2449_v54 = vadd.f32 %v2444_v50, %v16758_v46  ;;  %v2446_v58 = vpop.f32.mrb[19].mxu1 }
0x122f   :  { %v2450_v34 = vadd.f32 %v2446_v58, %v16764_v59 }
0x1230   :  { %16043 = vtanh.f32 %v2449_v54 }
0x1231   :  { %16045 = vtanh.f32 %v2450_v34 }
0x1238   :  { %v2552_v63 = vpop.permute.xlu1 %2551 }
0x1239   :  { %v17240_v1 = vadd.f32 %v2552_v63, %v2548_v44 }
0x123a   :  { %v16044_v2 = vpop.eup %16043 }
0x123b   :  { %v16046_v49 = vpop.eup %16045  ;;  %16047 = vtanh.f32 %v17240_v1  ;;  %v2453_v57 = vmul.f32 %v16044_v2, %v16558_v37 }
0x123c   :  { %v2454_v11 = vmul.f32 %v16046_v49, %v16561_v38 }
0x123d   :  { %v2455_v45 = vadd.f32 %v2453_v57, %v16564_v39 }
0x123e   :  { %v2456_v17 = vadd.f32 %v2454_v11, %v16567_v41 }
0x123f   :  { %v2457_v52 = vmul.f32 %v2455_v45, %v17192_v53 }
0x1240   :  { %v2458_v18 = vmul.f32 %v2456_v17, %v2455_v45 }
0x1242   :  { %2460 = vrot.lane.b32.xlu0 %v2458_v18, %s16406_s7 }
0x1245   :  { %v16048_v60 = vpop.eup %16047 }
0x1246   :  { %v2556_v10 = vmul.f32 %v16048_v60, %v2547_v26 }
0x1248   :  { %2634 = vrot.lane.b32.xlu1 %v2556_v10, %s16406_s7 }
0x12b4   :  { %v2461_v22 = vpop.permute.xlu0 %2460 }
0x12b5   :  { %v17250_v0 = vadd.f32 %v2461_v22, %v2457_v52 }
0x12b7   :  { %16049 = vtanh.f32 %v17250_v0 }
0x12ba   :  { %v2635_v7 = vpop.permute.xlu1 %2634 }
0x12bb   :  { %13428 = vmatmul.mubr.msk.f32.vlgmr.msra.gmra.mrb[20].mxu1 %vm98_vm0, %v2635_v7 }
0x12bc   :  { %14070 = vmatpush1.bf16.msra.mxu1 %v16600_v55  ;;  %2886 = vmatprep.mubr.f32.mxu1 %v16405_v3 }
0x12bd   :  { %14072 = vmatprep.subr.bf16.mxu1 %v16602_v56 }
0x12c0   :  { %14074 = vmatpush1.bf16.msra.mxu1 %v16619_v61 }
0x12c1   :  { %v16050_v27 = vpop.eup %16049  ;;  %14076 = vmatprep.subr.bf16.mxu1 %v16622_v62 }
0x12c2   :  { %v2465_v53 = vmul.f32 %v16050_v27, %v2456_v17 }
0x12c4   :  { %2558 = vrot.lane.b32.xlu0 %v2465_v53, %s16406_s7  ;;  %14078 = vmatpush1.bf16.msra.mxu1 %v16637_v5 }
0x12c5   :  { %14080 = vmatprep.subr.bf16.mxu1 %v16640_v6 }
0x12c8   :  { %14082 = vmatpush1.bf16.msra.mxu1 %v16655_v13 }
0x12c9   :  { %14084 = vmatprep.subr.bf16.mxu1 %v16658_v16 }
0x1336   :  { %v2559_v28 = vpop.permute.xlu0 %2558 }
0x1337   :  { %13424 = vmatmul.mubr.msk.f32.vlgmr.msra.gmra.mrb[18].mxu0 %vm98_vm0, %v2559_v28 }
0x1338   :  { %14038 = vmatpush1.bf16.msra.mxu0 %v16673_v23  ;;  %2702 = vmatprep.mubr.f32.mxu0 %v16405_v3 }
0x1339   :  { %14040 = vmatprep.subr.bf16.mxu0 %v16676_v25 }
0x133c   :  { %14042 = vmatpush1.bf16.msra.mxu0 %v16692_v30 }
0x133d   :  { %14044 = vmatprep.subr.bf16.mxu0 %v16696_v31 }
0x1340   :  { %14046 = vmatpush1.bf16.msra.mxu0 %v16711_v42 }
0x1341   :  { %14048 = vmatprep.subr.bf16.mxu0 %v16714_v43 }
0x1344   :  { %14050 = vmatpush1.bf16.msra.mxu0 %v16723_v48 }
0x1345   :  { %14100 = vmatprep.subr.bf16.mxu0 %v16468_v4 }
0x1347   :  { %13425 = vmatmul.mubr.msk.f32.vlgmr.msra.gmra.mrb[18].mxu0 %vm98_vm0, %v2635_v7 }
0x1348   :  { %14102 = vmatpush1.bf16.msra.mxu0 %v16479_v8  ;;  %3053 = vmatprep.mubr.f32.mxu0 %v16405_v3 }
0x1349   :  { %14104 = vmatprep.subr.bf16.mxu0 %v16481_v9 }
0x134c   :  { %14106 = vmatpush1.bf16.msra.mxu0 %v16498_v14 }
0x134d   :  { %14108 = vmatprep.subr.bf16.mxu0 %v16502_v15 }
0x1350   :  { %14110 = vmatpush1.bf16.msra.mxu0 %v16518_v20 }
0x1351   :  { %14112 = vmatprep.subr.bf16.mxu0 %v16522_v21 }
0x1354   :  { %14114 = vmatpush1.bf16.msra.mxu0 %v16532_v24 }
0x1355   :  { %14116 = vmatprep.subr.bf16.mxu0 %v16589_v51 }
0x138e   :  { %v2795_v19 = vpop.f32.mrb[20].mxu1 }
0x138f   :  { %v2800_v36 = vadd.f32 %v13426_v32, %v2795_v19  ;;  %v2797_v40 = vpop.f32.mrb[21].mxu1 }
0x1390   :  { %v2801_v47 = vadd.f32 %v13427_v12, %v2797_v40 }
0x1391   :  { %16051 = vtanh.f32 %v2800_v36 }
0x1392   :  { %16053 = vtanh.f32 %v2801_v47 }
0x139b   :  { %v16052_v26 = vpop.eup %16051 }
0x139c   :  { %v16054_v29 = vpop.eup %16053  ;;  %v2804_v50 = vmul.f32 %v16052_v26, %v16558_v37  ;;  %v13432_v26 = vld [vmem:[%s21286_s0 + $0xb8] sm:$0xff] }
0x139d   :  { %v2805_v54 = vmul.f32 %v16054_v29, %v16561_v38 }
0x139e   :  { %v2806_v58 = vadd.f32 %v2804_v50, %v16564_v39 }
0x139f   :  { %v2807_v34 = vadd.f32 %v2805_v54, %v16567_v41 }
0x13a0   :  { %v2808_v63 = vmul.f32 %v2806_v58, %v17240_v1 }
0x13a1   :  { %v2809_v44 = vmul.f32 %v2807_v34, %v2806_v58 }
0x13a3   :  { %2811 = vrot.lane.b32.xlu1 %v2809_v44, %s16406_s7 }
0x1415   :  { %v2812_v2 = vpop.permute.xlu1 %2811 }
0x1416   :  { %v17296_v49 = vadd.f32 %v2812_v2, %v2808_v63 }
0x1418   :  { %16055 = vtanh.f32 %v17296_v49 }
0x141a   :  { %v2704_v57 = vpop.f32.mrb[18].mxu0 }
0x141b   :  { %v2709_v11 = vadd.f32 %v2704_v57, %v16758_v46  ;;  %v2706_v45 = vpop.f32.mrb[19].mxu0 }
0x141c   :  { %v2710_v17 = vadd.f32 %v2706_v45, %v16764_v59 }
0x141d   :  { %16057 = vtanh.f32 %v2709_v11 }
0x141e   :  { %16059 = vtanh.f32 %v2710_v17 }
0x1422   :  { %v16056_v18 = vpop.eup %16055 }
0x1423   :  { %v2816_v60 = vmul.f32 %v16056_v18, %v2807_v34 }
0x1425   :  { %2894 = vrot.lane.b32.xlu1 %v2816_v60, %s16406_s7 }
0x1427   :  { %v16058_v10 = vpop.eup %16057 }
0x1428   :  { %v16060_v52 = vpop.eup %16059  ;;  %v2713_v1 = vmul.f32 %v16058_v10, %v16558_v37 }
0x1429   :  { %v2714_v22 = vmul.f32 %v16060_v52, %v16561_v38 }
0x142a   :  { %v2715_v7 = vadd.f32 %v2713_v1, %v16564_v39 }
0x142b   :  { %v2716_v27 = vadd.f32 %v2714_v22, %v16567_v41 }
0x142c   :  { %v2717_v32 = vmul.f32 %v2715_v7, %v17250_v0  ;;  %v13431_v0 = vld [vmem:[%s21286_s0 + $0xb0] sm:$0xff] }
0x142d   :  { %v2718_v53 = vmul.f32 %v2716_v27, %v2715_v7 }
0x142f   :  { %2720 = vrot.lane.b32.xlu0 %v2718_v53, %s16406_s7 }
0x1497   :  { %v2895_v28 = vpop.permute.xlu1 %2894 }
0x1498   :  { %13433 = vmatmul.mubr.msk.f32.vlgmr.msra.gmra.mrb[20].mxu0 %vm98_vm0, %v2895_v28 }
0x1499   :  { %14118 = vmatpush1.bf16.msra.mxu0 %v16600_v55  ;;  %3146 = vmatprep.mubr.f32.mxu0 %v16405_v3 }
0x149a   :  { %14120 = vmatprep.subr.bf16.mxu0 %v16602_v56 }
0x149d   :  { %14122 = vmatpush1.bf16.msra.mxu0 %v16619_v61 }
0x149e   :  { %14124 = vmatprep.subr.bf16.mxu0 %v16622_v62 }
0x14a1   :  { %v2721_v12 = vpop.permute.xlu0 %2720  ;;  %14126 = vmatpush1.bf16.msra.mxu0 %v16637_v5 }
0x14a2   :  { %v17315_v19 = vadd.f32 %v2721_v12, %v2717_v32  ;;  %14128 = vmatprep.subr.bf16.mxu0 %v16640_v6 }
0x14a4   :  { %16061 = vtanh.f32 %v17315_v19 }
0x14a5   :  { %14130 = vmatpush1.bf16.msra.mxu0 %v16655_v13 }
0x14a6   :  { %14132 = vmatprep.subr.bf16.mxu0 %v16658_v16 }
0x14ae   :  { %v16062_v36 = vpop.eup %16061 }
0x14af   :  { %v2725_v40 = vmul.f32 %v16062_v36, %v2716_v27 }
0x14b1   :  { %2818 = vrot.lane.b32.xlu0 %v2725_v40, %s16406_s7 }
0x1523   :  { %v2819_v47 = vpop.permute.xlu0 %2818 }
0x1524   :  { %13429 = vmatmul.mubr.msk.f32.vlgmr.msra.gmra.mrb[22].mxu1 %vm98_vm0, %v2819_v47 }
0x1525   :  { %14086 = vmatpush1.bf16.msra.mxu1 %v16673_v23  ;;  %2962 = vmatprep.mubr.f32.mxu1 %v16405_v3 }
0x1526   :  { %14088 = vmatprep.subr.bf16.mxu1 %v16676_v25 }
0x1529   :  { %14090 = vmatpush1.bf16.msra.mxu1 %v16692_v30 }
0x152a   :  { %14092 = vmatprep.subr.bf16.mxu1 %v16696_v31 }
0x152d   :  { %14094 = vmatpush1.bf16.msra.mxu1 %v16711_v42 }
0x152e   :  { %14096 = vmatprep.subr.bf16.mxu1 %v16714_v43 }
0x1531   :  { %14098 = vmatpush1.bf16.msra.mxu1 %v16723_v48 }
0x1532   :  { %14148 = vmatprep.subr.bf16.mxu1 %v16468_v4 }
0x1534   :  { %13430 = vmatmul.mubr.msk.f32.vlgmr.msra.gmra.mrb[22].mxu1 %vm98_vm0, %v2895_v28 }
0x1535   :  { %14150 = vmatpush1.bf16.msra.mxu1 %v16479_v8  ;;  %3313 = vmatprep.mubr.f32.mxu1 %v16405_v3 }
0x1536   :  { %14152 = vmatprep.subr.bf16.mxu1 %v16481_v9 }
0x1539   :  { %14154 = vmatpush1.bf16.msra.mxu1 %v16498_v14 }
0x153a   :  { %14156 = vmatprep.subr.bf16.mxu1 %v16502_v15 }
0x153d   :  { %14158 = vmatpush1.bf16.msra.mxu1 %v16518_v20 }
0x153e   :  { %14160 = vmatprep.subr.bf16.mxu1 %v16522_v21 }
0x1541   :  { %14162 = vmatpush1.bf16.msra.mxu1 %v16532_v24 }
0x1542   :  { %14164 = vmatprep.subr.bf16.mxu1 %v16589_v51 }
0x156b   :  { %v3055_v29 = vpop.f32.mrb[20].mxu0 }
0x156c   :  { %v3060_v50 = vadd.f32 %v13431_v0, %v3055_v29  ;;  %v3057_v54 = vpop.f32.mrb[21].mxu0 }
0x156d   :  { %v3061_v58 = vadd.f32 %v13432_v26, %v3057_v54 }
0x156e   :  { %16063 = vtanh.f32 %v3060_v50 }
0x156f   :  { %16065 = vtanh.f32 %v3061_v58 }
0x1578   :  { %v16064_v34 = vpop.eup %16063 }
0x1579   :  { %v16066_v44 = vpop.eup %16065  ;;  %v3064_v63 = vmul.f32 %v16064_v34, %v16558_v37  ;;  %v13437_v34 = vld [vmem:[%s21286_s0 + $0xc8] sm:$0xff] }
0x157a   :  { %v3065_v2 = vmul.f32 %v16066_v44, %v16561_v38 }
0x157b   :  { %v3066_v57 = vadd.f32 %v3064_v63, %v16564_v39 }
0x157c   :  { %v3067_v11 = vadd.f32 %v3065_v2, %v16567_v41 }
0x157d   :  { %v3068_v17 = vmul.f32 %v3066_v57, %v17296_v49 }
0x157e   :  { %v3069_v45 = vmul.f32 %v3067_v11, %v3066_v57 }
0x1580   :  { %3071 = vrot.lane.b32.xlu1 %v3069_v45, %s16406_s7 }
0x15f2   :  { %v3072_v18 = vpop.permute.xlu1 %3071 }
0x15f3   :  { %v17354_v60 = vadd.f32 %v3072_v18, %v3068_v17 }
0x15f5   :  { %16067 = vtanh.f32 %v17354_v60 }
0x15ff   :  { %v16068_v10 = vpop.eup %16067 }
0x1600   :  { %v3076_v52 = vmul.f32 %v16068_v10, %v3067_v11 }
0x1602   :  { %3154 = vrot.lane.b32.xlu1 %v3076_v52, %s16406_s7 }
0x1607   :  { %v2964_v1 = vpop.f32.mrb[22].mxu1 }
0x1608   :  { %v2969_v22 = vadd.f32 %v2964_v1, %v16758_v46  ;;  %v2966_v7 = vpop.f32.mrb[23].mxu1 }
0x1609   :  { %v2970_v27 = vadd.f32 %v2966_v7, %v16764_v59 }
0x160a   :  { %16069 = vtanh.f32 %v2969_v22 }
0x160b   :  { %16071 = vtanh.f32 %v2970_v27 }
0x1614   :  { %v16070_v53 = vpop.eup %16069 }
0x1615   :  { %v16072_v28 = vpop.eup %16071  ;;  %v2973_v49 = vmul.f32 %v16070_v53, %v16558_v37 }
0x1616   :  { %v2974_v32 = vmul.f32 %v16072_v28, %v16561_v38 }
0x1617   :  { %v2975_v12 = vadd.f32 %v2973_v49, %v16564_v39 }
0x1618   :  { %v2976_v36 = vadd.f32 %v2974_v32, %v16567_v41 }
0x1619   :  { %v2977_v0 = vmul.f32 %v2975_v12, %v17315_v19  ;;  %v13436_v19 = vld [vmem:[%s21286_s0 + $0xc0] sm:$0xff] }
0x161a   :  { %v2978_v40 = vmul.f32 %v2976_v36, %v2975_v12 }
0x161c   :  { %2980 = vrot.lane.b32.xlu0 %v2978_v40, %s16406_s7 }
0x1674   :  { %v3155_v47 = vpop.permute.xlu1 %3154 }
0x1675   :  { %13438 = vmatmul.mubr.msk.f32.vlgmr.msra.gmra.mrb[24].mxu1 %vm98_vm0, %v3155_v47 }
0x1676   :  { %14166 = vmatpush1.bf16.msra.mxu1 %v16600_v55  ;;  %3406 = vmatprep.mubr.f32.mxu1 %v16405_v3 }
0x1677   :  { %14168 = vmatprep.subr.bf16.mxu1 %v16602_v56 }
0x167a   :  { %14170 = vmatpush1.bf16.msra.mxu1 %v16619_v61 }
0x167b   :  { %14172 = vmatprep.subr.bf16.mxu1 %v16622_v62 }
0x167e   :  { %14174 = vmatpush1.bf16.msra.mxu1 %v16637_v5 }
0x167f   :  { %14176 = vmatprep.subr.bf16.mxu1 %v16640_v6 }
0x1682   :  { %14178 = vmatpush1.bf16.msra.mxu1 %v16655_v13 }
0x1683   :  { %14180 = vmatprep.subr.bf16.mxu1 %v16658_v16 }
0x168e   :  { %v2981_v26 = vpop.permute.xlu0 %2980 }
0x168f   :  { %v17376_v29 = vadd.f32 %v2981_v26, %v2977_v0 }
0x1691   :  { %16073 = vtanh.f32 %v17376_v29 }
0x169b   :  { %v16074_v50 = vpop.eup %16073 }
0x169c   :  { %v2985_v54 = vmul.f32 %v16074_v50, %v2976_v36 }
0x169e   :  { %3078 = vrot.lane.b32.xlu0 %v2985_v54, %s16406_s7 }
0x1710   :  { %v3079_v58 = vpop.permute.xlu0 %3078 }
0x1711   :  { %13434 = vmatmul.mubr.msk.f32.vlgmr.msra.gmra.mrb[22].mxu0 %vm98_vm0, %v3079_v58 }
0x1712   :  { %14134 = vmatpush1.bf16.msra.mxu0 %v16673_v23  ;;  %3222 = vmatprep.mubr.f32.mxu0 %v16405_v3 }
0x1713   :  { %14136 = vmatprep.subr.bf16.mxu0 %v16676_v25 }
0x1716   :  { %14138 = vmatpush1.bf16.msra.mxu0 %v16692_v30 }
0x1717   :  { %14140 = vmatprep.subr.bf16.mxu0 %v16696_v31 }
0x171a   :  { %14142 = vmatpush1.bf16.msra.mxu0 %v16711_v42 }
0x171b   :  { %14144 = vmatprep.subr.bf16.mxu0 %v16714_v43 }
0x171e   :  { %14146 = vmatpush1.bf16.msra.mxu0 %v16723_v48 }
0x171f   :  { %14196 = vmatprep.subr.bf16.mxu0 %v16468_v4 }
0x1721   :  { %13435 = vmatmul.mubr.msk.f32.vlgmr.msra.gmra.mrb[22].mxu0 %vm98_vm0, %v3155_v47 }
0x1722   :  { %14198 = vmatpush1.bf16.msra.mxu0 %v16479_v8  ;;  %3573 = vmatprep.mubr.f32.mxu0 %v16405_v3 }
0x1723   :  { %14200 = vmatprep.subr.bf16.mxu0 %v16481_v9 }
0x1726   :  { %14202 = vmatpush1.bf16.msra.mxu0 %v16498_v14 }
0x1727   :  { %14204 = vmatprep.subr.bf16.mxu0 %v16502_v15 }
0x172a   :  { %14206 = vmatpush1.bf16.msra.mxu0 %v16518_v20 }
0x172b   :  { %14208 = vmatprep.subr.bf16.mxu0 %v16522_v21 }
0x172e   :  { %14210 = vmatpush1.bf16.msra.mxu0 %v16532_v24 }
0x172f   :  { %14212 = vmatprep.subr.bf16.mxu0 %v16589_v51 }
0x1748   :  { %v3315_v44 = vpop.f32.mrb[24].mxu1 }
0x1749   :  { %v3320_v63 = vadd.f32 %v13436_v19, %v3315_v44  ;;  %v3317_v2 = vpop.f32.mrb[25].mxu1 }
0x174a   :  { %v3321_v57 = vadd.f32 %v13437_v34, %v3317_v2 }
0x174b   :  { %16075 = vtanh.f32 %v3320_v63 }
0x174c   :  { %16077 = vtanh.f32 %v3321_v57 }
0x1755   :  { %v16076_v11 = vpop.eup %16075 }
0x1756   :  { %v16078_v45 = vpop.eup %16077  ;;  %v3324_v17 = vmul.f32 %v16076_v11, %v16558_v37  ;;  %v13442_v11 = vld [vmem:[%s21286_s0 + $0xd8] sm:$0xff] }
0x1757   :  { %v3325_v18 = vmul.f32 %v16078_v45, %v16561_v38 }
0x1758   :  { %v3326_v10 = vadd.f32 %v3324_v17, %v16564_v39 }
0x1759   :  { %v3327_v52 = vadd.f32 %v3325_v18, %v16567_v41 }
0x175a   :  { %v3328_v22 = vmul.f32 %v3326_v10, %v17354_v60 }
0x175b   :  { %v3329_v1 = vmul.f32 %v3327_v52, %v3326_v10 }
0x175d   :  { %3331 = vrot.lane.b32.xlu1 %v3329_v1, %s16406_s7 }
0x17cf   :  { %v3332_v7 = vpop.permute.xlu1 %3331 }
0x17d0   :  { %v17412_v27 = vadd.f32 %v3332_v7, %v3328_v22 }
0x17d2   :  { %16079 = vtanh.f32 %v17412_v27 }
0x17dc   :  { %v16080_v53 = vpop.eup %16079 }
0x17dd   :  { %v3336_v28 = vmul.f32 %v16080_v53, %v3327_v52 }
0x17df   :  { %3414 = vrot.lane.b32.xlu1 %v3336_v28, %s16406_s7 }
0x17f4   :  { %v3224_v49 = vpop.f32.mrb[22].mxu0 }
0x17f5   :  { %v3229_v32 = vadd.f32 %v3224_v49, %v16758_v46  ;;  %v3226_v12 = vpop.f32.mrb[23].mxu0 }
0x17f6   :  { %v3230_v36 = vadd.f32 %v3226_v12, %v16764_v59 }
0x17f7   :  { %16081 = vtanh.f32 %v3229_v32 }
0x17f8   :  { %16083 = vtanh.f32 %v3230_v36 }
0x1801   :  { %v16082_v40 = vpop.eup %16081 }
0x1802   :  { %v16084_v47 = vpop.eup %16083  ;;  %v3233_v60 = vmul.f32 %v16082_v40, %v16558_v37 }
0x1803   :  { %v3234_v0 = vmul.f32 %v16084_v47, %v16561_v38 }
0x1804   :  { %v3235_v26 = vadd.f32 %v3233_v60, %v16564_v39 }
0x1805   :  { %v3236_v50 = vadd.f32 %v3234_v0, %v16567_v41 }
0x1806   :  { %v3237_v19 = vmul.f32 %v3235_v26, %v17376_v29  ;;  %v13441_v29 = vld [vmem:[%s21286_s0 + $0xd0] sm:$0xff] }
0x1807   :  { %v3238_v54 = vmul.f32 %v3236_v50, %v3235_v26 }
0x1809   :  { %3240 = vrot.lane.b32.xlu0 %v3238_v54, %s16406_s7 }
0x1851   :  { %v3415_v58 = vpop.permute.xlu1 %3414 }
0x1852   :  { %13443 = vmatmul.mubr.msk.f32.vlgmr.msra.gmra.mrb[24].mxu0 %vm98_vm0, %v3415_v58 }
0x1853   :  { %14214 = vmatpush1.bf16.msra.mxu0 %v16600_v55  ;;  %3666 = vmatprep.mubr.f32.mxu0 %v16405_v3 }
0x1854   :  { %14216 = vmatprep.subr.bf16.mxu0 %v16602_v56 }
0x1857   :  { %14218 = vmatpush1.bf16.msra.mxu0 %v16619_v61 }
0x1858   :  { %14220 = vmatprep.subr.bf16.mxu0 %v16622_v62 }
0x185b   :  { %14222 = vmatpush1.bf16.msra.mxu0 %v16637_v5 }
0x185c   :  { %14224 = vmatprep.subr.bf16.mxu0 %v16640_v6 }
0x185f   :  { %14226 = vmatpush1.bf16.msra.mxu0 %v16655_v13 }
0x1860   :  { %14228 = vmatprep.subr.bf16.mxu0 %v16658_v16 }
0x187b   :  { %v3241_v34 = vpop.permute.xlu0 %3240 }
0x187c   :  { %v17434_v44 = vadd.f32 %v3241_v34, %v3237_v19 }
0x187e   :  { %16085 = vtanh.f32 %v17434_v44 }
0x1888   :  { %v16086_v63 = vpop.eup %16085 }
0x1889   :  { %v3245_v2 = vmul.f32 %v16086_v63, %v3236_v50 }
0x188b   :  { %3338 = vrot.lane.b32.xlu0 %v3245_v2, %s16406_s7 }
0x18fd   :  { %v3339_v57 = vpop.permute.xlu0 %3338 }
0x18fe   :  { %13439 = vmatmul.mubr.msk.f32.vlgmr.msra.gmra.mrb[26].mxu1 %vm98_vm0, %v3339_v57 }
0x18ff   :  { %14182 = vmatpush1.bf16.msra.mxu1 %v16673_v23  ;;  %3482 = vmatprep.mubr.f32.mxu1 %v16405_v3 }
0x1900   :  { %14184 = vmatprep.subr.bf16.mxu1 %v16676_v25 }
0x1903   :  { %14186 = vmatpush1.bf16.msra.mxu1 %v16692_v30 }
0x1904   :  { %14188 = vmatprep.subr.bf16.mxu1 %v16696_v31 }
0x1907   :  { %14190 = vmatpush1.bf16.msra.mxu1 %v16711_v42 }
0x1908   :  { %14192 = vmatprep.subr.bf16.mxu1 %v16714_v43 }
0x190b   :  { %14194 = vmatpush1.bf16.msra.mxu1 %v16723_v48 }
0x190c   :  { %14244 = vmatprep.subr.bf16.mxu1 %v16468_v4 }
0x190e   :  { %13440 = vmatmul.mubr.msk.f32.vlgmr.msra.gmra.mrb[26].mxu1 %vm98_vm0, %v3415_v58 }
0x190f   :  { %14246 = vmatpush1.bf16.msra.mxu1 %v16479_v8  ;;  %3833 = vmatprep.mubr.f32.mxu1 %v16405_v3 }
0x1910   :  { %14248 = vmatprep.subr.bf16.mxu1 %v16481_v9 }
0x1913   :  { %14250 = vmatpush1.bf16.msra.mxu1 %v16498_v14 }
0x1914   :  { %14252 = vmatprep.subr.bf16.mxu1 %v16502_v15 }
0x1917   :  { %14254 = vmatpush1.bf16.msra.mxu1 %v16518_v20 }
0x1918   :  { %14256 = vmatprep.subr.bf16.mxu1 %v16522_v21 }
0x191b   :  { %14258 = vmatpush1.bf16.msra.mxu1 %v16532_v24 }
0x191c   :  { %14260 = vmatprep.subr.bf16.mxu1 %v16589_v51 }
0x1925   :  { %v3575_v45 = vpop.f32.mrb[24].mxu0 }
0x1926   :  { %v3580_v17 = vadd.f32 %v13441_v29, %v3575_v45  ;;  %v3577_v18 = vpop.f32.mrb[25].mxu0 }
0x1927   :  { %v3581_v10 = vadd.f32 %v13442_v11, %v3577_v18 }
0x1928   :  { %16087 = vtanh.f32 %v3580_v17 }
0x1929   :  { %16089 = vtanh.f32 %v3581_v10 }
0x1932   :  { %v16088_v52 = vpop.eup %16087 }
0x1933   :  { %v16090_v1 = vpop.eup %16089  ;;  %v3584_v22 = vmul.f32 %v16088_v52, %v16558_v37  ;;  %v13447_v52 = vld [vmem:[%s21286_s0 + $0xe8] sm:$0xff] }
0x1934   :  { %v3585_v7 = vmul.f32 %v16090_v1, %v16561_v38 }
0x1935   :  { %v3586_v53 = vadd.f32 %v3584_v22, %v16564_v39 }
0x1936   :  { %v3587_v28 = vadd.f32 %v3585_v7, %v16567_v41 }
0x1937   :  { %v3588_v32 = vmul.f32 %v3586_v53, %v17412_v27 }
0x1938   :  { %v3589_v49 = vmul.f32 %v3587_v28, %v3586_v53 }
0x193a   :  { %3591 = vrot.lane.b32.xlu1 %v3589_v49, %s16406_s7 }
0x19ac   :  { %v3592_v12 = vpop.permute.xlu1 %3591 }
0x19ad   :  { %v17470_v36 = vadd.f32 %v3592_v12, %v3588_v32 }
0x19af   :  { %16091 = vtanh.f32 %v17470_v36 }
0x19b9   :  { %v16092_v40 = vpop.eup %16091 }
0x19ba   :  { %v3596_v47 = vmul.f32 %v16092_v40, %v3587_v28 }
0x19bc   :  { %3674 = vrot.lane.b32.xlu1 %v3596_v47, %s16406_s7 }
0x19e1   :  { %v3484_v60 = vpop.f32.mrb[26].mxu1 }
0x19e2   :  { %v3489_v0 = vadd.f32 %v3484_v60, %v16758_v46  ;;  %v3486_v26 = vpop.f32.mrb[27].mxu1 }
0x19e3   :  { %v3490_v50 = vadd.f32 %v3486_v26, %v16764_v59 }
0x19e4   :  { %16093 = vtanh.f32 %v3489_v0 }
0x19e5   :  { %16095 = vtanh.f32 %v3490_v50 }
0x19ee   :  { %v16094_v54 = vpop.eup %16093 }
0x19ef   :  { %v16096_v58 = vpop.eup %16095  ;;  %v3493_v27 = vmul.f32 %v16094_v54, %v16558_v37 }
0x19f0   :  { %v3494_v19 = vmul.f32 %v16096_v58, %v16561_v38 }
0x19f1   :  { %v3495_v34 = vadd.f32 %v3493_v27, %v16564_v39 }
0x19f2   :  { %v3496_v63 = vadd.f32 %v3494_v19, %v16567_v41 }
0x19f3   :  { %v3497_v29 = vmul.f32 %v3495_v34, %v17434_v44  ;;  %v13446_v44 = vld [vmem:[%s21286_s0 + $0xe0] sm:$0xff] }
0x19f4   :  { %v3498_v2 = vmul.f32 %v3496_v63, %v3495_v34 }
0x19f6   :  { %3500 = vrot.lane.b32.xlu0 %v3498_v2, %s16406_s7 }
0x1a2e   :  { %v3675_v57 = vpop.permute.xlu1 %3674 }
0x1a2f   :  { %13448 = vmatmul.mubr.msk.f32.vlgmr.msra.gmra.mrb[28].mxu1 %vm98_vm0, %v3675_v57 }
0x1a30   :  { %14262 = vmatpush1.bf16.msra.mxu1 %v16600_v55  ;;  %3926 = vmatprep.mubr.f32.mxu1 %v16405_v3 }
0x1a31   :  { %14264 = vmatprep.subr.bf16.mxu1 %v16602_v56 }
0x1a34   :  { %14266 = vmatpush1.bf16.msra.mxu1 %v16619_v61 }
0x1a35   :  { %14268 = vmatprep.subr.bf16.mxu1 %v16622_v62 }
0x1a38   :  { %14270 = vmatpush1.bf16.msra.mxu1 %v16637_v5 }
0x1a39   :  { %14272 = vmatprep.subr.bf16.mxu1 %v16640_v6 }
0x1a3c   :  { %14274 = vmatpush1.bf16.msra.mxu1 %v16655_v13 }
0x1a3d   :  { %14276 = vmatprep.subr.bf16.mxu1 %v16658_v16 }
0x1a68   :  { %v3501_v11 = vpop.permute.xlu0 %3500 }
0x1a69   :  { %v17492_v45 = vadd.f32 %v3501_v11, %v3497_v29 }
0x1a6b   :  { %16097 = vtanh.f32 %v17492_v45 }
0x1a75   :  { %v16098_v17 = vpop.eup %16097 }
0x1a76   :  { %v3505_v18 = vmul.f32 %v16098_v17, %v3496_v63 }
0x1a78   :  { %3598 = vrot.lane.b32.xlu0 %v3505_v18, %s16406_s7 }
0x1aea   :  { %v3599_v10 = vpop.permute.xlu0 %3598 }
0x1aeb   :  { %13444 = vmatmul.mubr.msk.f32.vlgmr.msra.gmra.mrb[26].mxu0 %vm98_vm0, %v3599_v10 }
0x1aec   :  { %14230 = vmatpush1.bf16.msra.mxu0 %v16673_v23  ;;  %3742 = vmatprep.mubr.f32.mxu0 %v16405_v3 }
0x1aed   :  { %14232 = vmatprep.subr.bf16.mxu0 %v16676_v25 }
0x1af0   :  { %14234 = vmatpush1.bf16.msra.mxu0 %v16692_v30 }
0x1af1   :  { %14236 = vmatprep.subr.bf16.mxu0 %v16696_v31 }
0x1af4   :  { %14238 = vmatpush1.bf16.msra.mxu0 %v16711_v42 }
0x1af5   :  { %14240 = vmatprep.subr.bf16.mxu0 %v16714_v43 }
0x1af8   :  { %14242 = vmatpush1.bf16.msra.mxu0 %v16723_v48 }
0x1af9   :  { %14292 = vmatprep.subr.bf16.mxu0 %v16468_v4 }
0x1afb   :  { %13445 = vmatmul.mubr.msk.f32.vlgmr.msra.gmra.mrb[26].mxu0 %vm98_vm0, %v3675_v57 }
0x1afc   :  { %14294 = vmatpush1.bf16.msra.mxu0 %v16479_v8  ;;  %4093 = vmatprep.mubr.f32.mxu0 %v16405_v3 }
0x1afd   :  { %14296 = vmatprep.subr.bf16.mxu0 %v16481_v9 }
0x1b00   :  { %14298 = vmatpush1.bf16.msra.mxu0 %v16498_v14 }
0x1b01   :  { %14300 = vmatprep.subr.bf16.mxu0 %v16502_v15 }
0x1b02   :  { %v3835_v4 = vpop.f32.mrb[28].mxu1 }
0x1b03   :  { %v3840_v1 = vadd.f32 %v13446_v44, %v3835_v4  ;;  %v3837_v22 = vpop.f32.mrb[29].mxu1  ;;  %v4310_v4 = vld [vmem:[%s21285_s1 + $0x18] sm:$0xff] }
0x1b04   :  { %v3841_v8 = vadd.f32 %v13447_v52, %v3837_v22  ;;  %14302 = vmatpush1.bf16.msra.mxu0 %v16518_v20  ;;  %v4308_v52 = vld [vmem:[%s21285_s1 + $0x8] sm:$0xff] }
0x1b05   :  { %16099 = vtanh.f32 %v3840_v1  ;;  %14304 = vmatprep.subr.bf16.mxu0 %v16522_v21  ;;  %v4307_v1 = vld [vmem:[%s21285_s1] sm:$0xff]  ;;  %v17585_v22 = vpack.c.bf16 %v4310_v4, %v4308_v52 }
0x1b06   :  { %16101 = vtanh.f32 %v3841_v8  ;;  %v4309_v8 = vld [vmem:[%s21285_s1 + $0x10] sm:$0xff] }
0x1b08   :  { %14306 = vmatpush1.bf16.msra.mxu0 %v16532_v24 }
0x1b09   :  { %14308 = vmatprep.subr.bf16.mxu0 %v16589_v51 }
0x1b0f   :  { %v16100_v9 = vpop.eup %16099 }
0x1b10   :  { %v16102_v14 = vpop.eup %16101  ;;  %v3844_v7 = vmul.f32 %v16100_v9, %v16558_v37  ;;  %v4312_v9 = vld [vmem:[%s21285_s1 + $0x28] sm:$0xff] }
0x1b11   :  { %v3845_v15 = vmul.f32 %v16102_v14, %v16561_v38  ;;  %v4314_v14 = vld [vmem:[%s21285_s1 + $0x38] sm:$0xff] }
0x1b12   :  { %v3846_v53 = vadd.f32 %v3844_v7, %v16564_v39  ;;  %v17596_v7 = vpack.c.bf16 %v4309_v8, %v4307_v1  ;;  %v4501_v8 = vld [vmem:[%s21289_s3 + $0x8] sm:$0xff] }
0x1b13   :  { %v3847_v28 = vadd.f32 %v3845_v15, %v16567_v41  ;;  %v17598_v15 = vpack.c.bf16 %v4314_v14, %v4312_v9  ;;  %v4503_v9 = vld [vmem:[%s21289_s3 + $0x18] sm:$0xff]  ;;  %v4500_v14 = vld [vmem:[%s21289_s3] sm:$0xff] }
0x1b14   :  { %v3848_v20 = vmul.f32 %v3846_v53, %v17470_v36 }
0x1b15   :  { %v3849_v49 = vmul.f32 %v3847_v28, %v3846_v53  ;;  %v4311_v53 = vld [vmem:[%s21285_s1 + $0x20] sm:$0xff] }
0x1b17   :  { %3851 = vrot.lane.b32.xlu1 %v3849_v49, %s16406_s7  ;;  %v4316_v49 = vld [vmem:[%s21285_s1 + $0x48] sm:$0xff] }
0x1b89   :  { %v3852_v21 = vpop.permute.xlu1 %3851 }
0x1b8a   :  { %v17528_v32 = vadd.f32 %v3852_v21, %v3848_v20  ;;  %v4318_v20 = vld [vmem:[%s21285_s1 + $0x58] sm:$0xff] }
0x1b8c   :  { %16103 = vtanh.f32 %v17528_v32 }
0x1b96   :  { %v16104_v24 = vpop.eup %16103 }
0x1b97   :  { %v3856_v51 = vmul.f32 %v16104_v24, %v3847_v28  ;;  %v4313_v28 = vld [vmem:[%s21285_s1 + $0x30] sm:$0xff]  ;;  %v17617_v24 = vpack.c.bf16 %v4318_v20, %v4316_v49  ;;  %v17706_v49 = vpack.c.bf16 %v4503_v9, %v4501_v8  ;;  %v4291_v20 = vld [vmem:[%s21292_s5] sm:$0xff] }
0x1b98   :  { %v17614_v21 = vpack.c.bf16 %v4313_v28, %v4311_v53  ;;  %v4292_v53 = vld [vmem:[%s21292_s5 + $0x8] sm:$0xff]  ;;  %v4294_v28 = vld [vmem:[%s21292_s5 + $0x18] sm:$0xff]  ;;  %v4305_v8 = vld [vmem:[%s21292_s5 + $0x70] sm:$0xff] }
0x1b99   :  { %3934 = vrot.lane.b32.xlu1 %v3856_v51, %s16406_s7  ;;  %v4315_v51 = vld [vmem:[%s21285_s1 + $0x40] sm:$0xff] }
0x1b9a   :  { %v4512_v9 = vld [vmem:[%s21289_s3 + $0x60] sm:$0xff] }
0x1bce   :  { %v3744_v12 = vpop.f32.mrb[26].mxu0 }
0x1bcf   :  { %v3749_v40 = vadd.f32 %v3744_v12, %v16758_v46  ;;  %v3746_v47 = vpop.f32.mrb[27].mxu0  ;;  %v4317_v12 = vld [vmem:[%s21285_s1 + $0x50] sm:$0xff] }
0x1bd0   :  { %v3750_v60 = vadd.f32 %v3746_v47, %v16764_v59  ;;  %v4322_v47 = vld [vmem:[%s21285_s1 + $0x78] sm:$0xff] }
0x1bd1   :  { %16105 = vtanh.f32 %v3749_v40  ;;  %v4320_v40 = vld [vmem:[%s21285_s1 + $0x68] sm:$0xff] }
0x1bd2   :  { %16107 = vtanh.f32 %v3750_v60  ;;  %v17632_v60 = vpack.c.bf16 %v4317_v12, %v4315_v51  ;;  %v17711_v51 = vpack.c.bf16 %v4294_v28, %v4292_v53  ;;  %v4293_v12 = vld [vmem:[%s21292_s5 + $0x10] sm:$0xff] }
0x1bdb   :  { %v16106_v0 = vpop.eup %16105 }
0x1bdc   :  { %v16108_v26 = vpop.eup %16107  ;;  %v3753_v36 = vmul.f32 %v16106_v0, %v16558_v37  ;;  %v17635_v0 = vpack.c.bf16 %v4322_v47, %v4320_v40  ;;  %v4502_v40 = vld [vmem:[%s21289_s3 + $0x10] sm:$0xff]  ;;  %v4296_v47 = vld [vmem:[%s21292_s5 + $0x28] sm:$0xff] }
0x1bdd   :  { %v3754_v50 = vmul.f32 %v16108_v26, %v16561_v38  ;;  %v4319_v26 = vld [vmem:[%s21285_s1 + $0x60] sm:$0xff] }
0x1bde   :  { %v3755_v54 = vadd.f32 %v3753_v36, %v16564_v39  ;;  %v4321_v36 = vld [vmem:[%s21285_s1 + $0x70] sm:$0xff] }
0x1bdf   :  { %v3756_v58 = vadd.f32 %v3754_v50, %v16567_v41  ;;  %v17644_v50 = vpack.c.bf16 %v4321_v36, %v4319_v26  ;;  %v17723_v26 = vpack.c.bf16 %v4293_v12, %v4291_v20  ;;  %v17725_v36 = vpack.c.bf16 %v4502_v40, %v4500_v14  ;;  %v4514_v14 = vld [vmem:[%s21289_s3 + $0x70] sm:$0xff] }
0x1be0   :  { %v3757_v34 = vmul.f32 %v3755_v54, %v17492_v45  ;;  %v17829_v28 = vpack.c.bf16 %v4514_v14, %v4512_v9  ;;  %v4490_v9 = vld [vmem:[%s21290_s2 + $0x30] sm:$0xff]  ;;  %v4493_v14 = vld [vmem:[%s21290_s2 + $0x48] sm:$0xff] }
0x1be1   :  { %v3758_v27 = vmul.f32 %v3756_v58, %v3755_v54 }
0x1be3   :  { %3760 = vrot.lane.b32.xlu0 %v3758_v27, %s16406_s7 }
0x1c0b   :  { %v3935_v19 = vpop.permute.xlu1 %3934 }
0x1c0c   :  { %13453 = vmatmul.mubr.msk.f32.vlgmr.msra.gmra.mrb[28].mxu0 %vm98_vm0, %v3935_v19 }
0x1c0d   :  { %14310 = vmatpush1.bf16.msra.mxu0 %v16600_v55  ;;  %4186 = vmatprep.mubr.f32.mxu0 %v16405_v3 }
0x1c0e   :  { %14312 = vmatprep.subr.bf16.mxu0 %v16602_v56 }
0x1c11   :  { %14314 = vmatpush1.bf16.msra.mxu0 %v16619_v61 }
0x1c12   :  { %14316 = vmatprep.subr.bf16.mxu0 %v16622_v62  ;;  %v13451_v62 = vld [vmem:[%s21286_s0 + $0xf0] sm:$0xff] }
0x1c15   :  { %14318 = vmatpush1.bf16.msra.mxu0 %v16637_v5  ;;  %v13452_v5 = vld [vmem:[%s21286_s0 + $0xf8] sm:$0xff] }
0x1c16   :  { %14320 = vmatprep.subr.bf16.mxu0 %v16640_v6 }
0x1c19   :  { %14322 = vmatpush1.bf16.msra.mxu0 %v16655_v13 }
0x1c1a   :  { %14324 = vmatprep.subr.bf16.mxu0 %v16658_v16 }
0x1c55   :  { %v3761_v63 = vpop.permute.xlu0 %3760 }
0x1c56   :  { %v17550_v55 = vadd.f32 %v3761_v63, %v3757_v34 }
0x1c58   :  { %16109 = vtanh.f32 %v17550_v55 }
0x1c62   :  { %v16110_v56 = vpop.eup %16109 }
0x1c63   :  { %v3765_v2 = vmul.f32 %v16110_v56, %v3756_v58 }
0x1c65   :  { %3858 = vrot.lane.b32.xlu0 %v3765_v2, %s16406_s7 }
0x1cd7   :  { %v3859_v61 = vpop.permute.xlu0 %3858 }
0x1cd8   :  { %13449 = vmatmul.mubr.msk.f32.vlgmr.msra.gmra.mrb[30].mxu1 %vm98_vm0, %v3859_v61 }
0x1cd9   :  { %14278 = vmatpush1.bf16.msra.mxu1 %v16673_v23  ;;  %4002 = vmatprep.mubr.f32.mxu1 %v16405_v3 }
0x1cda   :  { %14280 = vmatprep.subr.bf16.mxu1 %v16676_v25 }
0x1cdd   :  { %14282 = vmatpush1.bf16.msra.mxu1 %v16692_v30 }
0x1cde   :  { %14284 = vmatprep.subr.bf16.mxu1 %v16696_v31 }
0x1cdf   :  { %v4095_v6 = vpop.f32.mrb[28].mxu0 }
0x1ce0   :  { %v4100_v13 = vadd.f32 %v13451_v62, %v4095_v6  ;;  %v4097_v16 = vpop.f32.mrb[29].mxu0 }
0x1ce1   :  { %14286 = vmatpush1.bf16.msra.mxu1 %v16711_v42  ;;  %v4101_v57 = vadd.f32 %v13452_v5, %v4097_v16 }
0x1ce2   :  { %14288 = vmatprep.subr.bf16.mxu1 %v16714_v43  ;;  %16111 = vtanh.f32 %v4100_v13 }
0x1ce3   :  { %16113 = vtanh.f32 %v4101_v57 }
0x1ce5   :  { %14290 = vmatpush1.bf16.msra.mxu1 %v16723_v48 }
0x1ce6   :  { %14340 = vmatprep.subr.bf16.mxu1 %v17585_v22 }
0x1ce8   :  { %13450 = vmatmul.mubr.msk.f32.vlgmr.msra.gmra.mrb[30].mxu1 %vm98_vm0, %v3935_v19 }
0x1ce9   :  { %4387 = vmatprep.mubr.f32.mxu1 %v16405_v3  ;;  %14342 = vmatpush1.bf16.msra.mxu1 %v17596_v7 }
0x1cea   :  { %14344 = vmatprep.subr.bf16.mxu1 %v17598_v15 }
0x1cec   :  { %v16112_v29 = vpop.eup %16111 }
0x1ced   :  { %v16114_v11 = vpop.eup %16113  ;;  %v4104_v45 = vmul.f32 %v16112_v29, %v16558_v37  ;;  %14346 = vmatpush1.bf16.msra.mxu1 %v17614_v21 }
0x1cee   :  { %v4105_v17 = vmul.f32 %v16114_v11, %v16561_v38  ;;  %14348 = vmatprep.subr.bf16.mxu1 %v17617_v24 }
0x1cef   :  { %v4106_v18 = vadd.f32 %v4104_v45, %v16564_v39 }
0x1cf0   :  { %v4107_v10 = vadd.f32 %v4105_v17, %v16567_v41 }
0x1cf1   :  { %14350 = vmatpush1.bf16.msra.mxu1 %v17632_v60  ;;  %v4108_v54 = vmul.f32 %v4106_v18, %v17528_v32 }
0x1cf2   :  { %v4109_v44 = vmul.f32 %v4107_v10, %v4106_v18  ;;  %14352 = vmatprep.subr.bf16.mxu1 %v17635_v0 }
0x1cf4   :  { %4111 = vrot.lane.b32.xlu1 %v4109_v44, %s16406_s7 }
0x1cf5   :  { %14354 = vmatpush1.bf16.msra.mxu1 %v17644_v50 }
0x1cf6   :  { %14356 = vmatprep.subr.bf16.mxu1 %v17711_v51 }
0x1d66   :  { %v4112_v58 = vpop.permute.xlu1 %4111 }
0x1d67   :  { %v17649_v27 = vadd.f32 %v4112_v58, %v4108_v54  ;;  %v4298_v54 = vld [vmem:[%s21292_s5 + $0x38] sm:$0xff]  ;;  %v4505_v58 = vld [vmem:[%s21289_s3 + $0x28] sm:$0xff] }
0x1d69   :  { %16115 = vtanh.f32 %v17649_v27 }
0x1d73   :  { %v16116_v19 = vpop.eup %16115 }
0x1d74   :  { %v4116_v34 = vmul.f32 %v16116_v19, %v4107_v10  ;;  %v4507_v19 = vld [vmem:[%s21289_s3 + $0x38] sm:$0xff] }
0x1d76   :  { %4194 = vrot.lane.b32.xlu1 %v4116_v34, %s16406_s7  ;;  %v17737_v34 = vpack.c.bf16 %v4298_v54, %v4296_v47 }
0x1dbb   :  { %v4004_v63 = vpop.f32.mrb[30].mxu1 }
0x1dbc   :  { %v4009_v56 = vadd.f32 %v4004_v63, %v16758_v46  ;;  %v4006_v2 = vpop.f32.mrb[31].mxu1  ;;  %v17739_v63 = vpack.c.bf16 %v4507_v19, %v4505_v58 }
0x1dbd   :  { %v4010_v61 = vadd.f32 %v4006_v2, %v16764_v59  ;;  %v4297_v2 = vld [vmem:[%s21292_s5 + $0x30] sm:$0xff] }
0x1dbe   :  { %16117 = vtanh.f32 %v4009_v56  ;;  %v4295_v56 = vld [vmem:[%s21292_s5 + $0x20] sm:$0xff] }
0x1dbf   :  { %16119 = vtanh.f32 %v4010_v61  ;;  %v4504_v61 = vld [vmem:[%s21289_s3 + $0x20] sm:$0xff] }
0x1dc8   :  { %v16118_v62 = vpop.eup %16117 }
0x1dc9   :  { %v16120_v5 = vpop.eup %16119  ;;  %v4013_v32 = vmul.f32 %v16118_v62, %v16558_v37  ;;  %v17752_v62 = vpack.c.bf16 %v4297_v2, %v4295_v56 }
0x1dca   :  { %v4014_v6 = vmul.f32 %v16120_v5, %v16561_v38  ;;  %v4506_v5 = vld [vmem:[%s21289_s3 + $0x30] sm:$0xff] }
0x1dcb   :  { %v4015_v13 = vadd.f32 %v4013_v32, %v16564_v39  ;;  %v4300_v32 = vld [vmem:[%s21292_s5 + $0x48] sm:$0xff] }
0x1dcc   :  { %v4016_v16 = vadd.f32 %v4014_v6, %v16567_v41  ;;  %v4302_v6 = vld [vmem:[%s21292_s5 + $0x58] sm:$0xff] }
0x1dcd   :  { %v4017_v11 = vmul.f32 %v4015_v13, %v17550_v55 }
0x1dce   :  { %v4018_v57 = vmul.f32 %v4016_v16, %v4015_v13  ;;  %v17765_v13 = vpack.c.bf16 %v4506_v5, %v4504_v61 }
0x1dd0   :  { %4020 = vrot.lane.b32.xlu0 %v4018_v57, %s16406_s7  ;;  %v4509_v57 = vld [vmem:[%s21289_s3 + $0x48] sm:$0xff] }
0x1de8   :  { %v4195_v29 = vpop.permute.xlu1 %4194 }
0x1de9   :  { %13456 = vmatmul.mubr.msk.f32.vlgmr.msra.gmra.mrb[32].mxu1 %vm98_vm0, %v4195_v29 }
0x1dea   :  { %4460 = vmatprep.mubr.f32.mxu1 %v16405_v3  ;;  %14358 = vmatpush1.bf16.msra.mxu1 %v17723_v26 }
0x1deb   :  { %14360 = vmatprep.subr.bf16.mxu1 %v17737_v34 }
0x1dee   :  { %14362 = vmatpush1.bf16.msra.mxu1 %v17752_v62 }
0x1e42   :  { %v4021_v45 = vpop.permute.xlu0 %4020 }
0x1e43   :  { %v17663_v17 = vadd.f32 %v4021_v45, %v4017_v11  ;;  %v4299_v11 = vld [vmem:[%s21292_s5 + $0x40] sm:$0xff] }
0x1e45   :  { %16121 = vtanh.f32 %v17663_v17 }
0x1e4f   :  { %v16122_v18 = vpop.eup %16121 }
0x1e50   :  { %v4025_v10 = vmul.f32 %v16122_v18, %v4016_v16  ;;  %v17767_v16 = vpack.c.bf16 %v4302_v6, %v4300_v32  ;;  %v4301_v18 = vld [vmem:[%s21292_s5 + $0x50] sm:$0xff] }
0x1e52   :  { %4118 = vrot.lane.b32.xlu0 %v4025_v10, %s16406_s7  ;;  %v4508_v10 = vld [vmem:[%s21289_s3 + $0x40] sm:$0xff]  ;;  %14364 = vmatprep.subr.bf16.mxu1 %v17767_v16 }
0x1ec4   :  { %v4119_v44 = vpop.permute.xlu0 %4118 }
0x1ec5   :  { %13454 = vmatmul.mubr.msk.f32.vlgmr.msra.gmra.mrb[30].mxu0 %vm98_vm0, %v4119_v44  ;;  %v4510_v44 = vld [vmem:[%s21289_s3 + $0x50] sm:$0xff] }
0x1ec6   :  { %14326 = vmatpush1.bf16.msra.mxu0 %v16673_v23  ;;  %4262 = vmatprep.mubr.f32.mxu0 %v16405_v3 }
0x1ec7   :  { %14328 = vmatprep.subr.bf16.mxu0 %v16676_v25 }
0x1eca   :  { %14330 = vmatpush1.bf16.msra.mxu0 %v16692_v30 }
0x1ecb   :  { %14332 = vmatprep.subr.bf16.mxu0 %v16696_v31 }
0x1ece   :  { %14334 = vmatpush1.bf16.msra.mxu0 %v16711_v42 }
0x1ecf   :  { %14336 = vmatprep.subr.bf16.mxu0 %v16714_v43 }
0x1ed2   :  { %14338 = vmatpush1.bf16.msra.mxu0 %v16723_v48 }
0x1ed3   :  { %14372 = vmatprep.subr.bf16.mxu0 %v17706_v49 }
0x1ed5   :  { %13455 = vmatmul.mubr.msk.f32.vlgmr.msra.gmra.mrb[30].mxu0 %vm98_vm0, %v4195_v29  ;;  %v4511_v29 = vld [vmem:[%s21289_s3 + $0x58] sm:$0xff] }
0x1ed6   :  { %4580 = vmatprep.mubr.f32.mxu0 %v16405_v3  ;;  %14374 = vmatpush1.bf16.msra.mxu0 %v17725_v36  ;;  %v17778_v45 = vpack.c.bf16 %v4511_v29, %v4509_v57 }
0x1ed7   :  { %14376 = vmatprep.subr.bf16.mxu0 %v17739_v63 }
0x1eda   :  { %14378 = vmatpush1.bf16.msra.mxu0 %v17765_v13 }
0x1edb   :  { %14380 = vmatprep.subr.bf16.mxu0 %v17778_v45 }
0x1fa8   :  { %v4264_v55 = vpop.f32.mrb[30].mxu0 }
0x1fa9   :  { %v4269_v23 = vadd.f32 %v4264_v55, %v16758_v46  ;;  %v4266_v52 = vpop.f32.mrb[31].mxu0  ;;  %v4304_v55 = vld [vmem:[%s21292_s5 + $0x68] sm:$0xff] }
0x1faa   :  { %v4270_v25 = vadd.f32 %v4266_v52, %v16764_v59  ;;  %v4513_v52 = vld [vmem:[%s21289_s3 + $0x68] sm:$0xff] }
0x1fab   :  { %16123 = vtanh.f32 %v4269_v23  ;;  %v4306_v23 = vld [vmem:[%s21292_s5 + $0x78] sm:$0xff] }
0x1fac   :  { %16125 = vtanh.f32 %v4270_v25  ;;  %v17800_v25 = vpack.c.bf16 %v4301_v18, %v4299_v11  ;;  %v4485_v11 = vld [vmem:[%s21290_s2 + $0x8] sm:$0xff]  ;;  %v4487_v18 = vld [vmem:[%s21290_s2 + $0x18] sm:$0xff] }
0x1fae   :  { %14366 = vmatpush1.bf16.msra.mxu1 %v17800_v25 }
0x1fb5   :  { %v16124_v30 = vpop.eup %16123 }
0x1fb6   :  { %v16126_v31 = vpop.eup %16125  ;;  %v4273_v42 = vmul.f32 %v16124_v30, %v16558_v37  ;;  %v17802_v30 = vpack.c.bf16 %v4510_v44, %v4508_v10  ;;  %v4484_v10 = vld [vmem:[%s21290_s2] sm:$0xff]  ;;  %v17884_v44 = vpack.c.bf16 %v4487_v18, %v4485_v11 }
0x1fb7   :  { %v4274_v43 = vmul.f32 %v16126_v31, %v16561_v38  ;;  %v4515_v31 = vld [vmem:[%s21289_s3 + $0x78] sm:$0xff] }
0x1fb8   :  { %v17683_v48 = vadd.f32 %v4273_v42, %v16564_v39  ;;  %v4303_v42 = vld [vmem:[%s21292_s5 + $0x60] sm:$0xff]  ;;  %14382 = vmatpush1.bf16.msra.mxu0 %v17802_v30 }
0x1fb9   :  { %v17686_v4 = vadd.f32 %v4274_v43, %v16567_v41  ;;  %v17812_v43 = vpack.c.bf16 %v4306_v23, %v4304_v55  ;;  %v17827_v53 = vpack.c.bf16 %v4305_v8, %v4303_v42  ;;  %v4486_v55 = vld [vmem:[%s21290_s2 + $0x10] sm:$0xff]  ;;  %v4489_v23 = vld [vmem:[%s21290_s2 + $0x28] sm:$0xff]  ;;  %v4488_v8 = vld [vmem:[%s21290_s2 + $0x20] sm:$0xff] }
0x1fba   :  { %v4277_v20 = vmul.f32 %v17683_v48, %v17663_v17  ;;  %v68_v17 = vld [vmem:[%s21294_s6] sm:$0x3] }
0x1fbb   :  { %v4278_v1 = vmul.f32 %v17686_v4, %v17683_v48  ;;  %14368 = vmatprep.subr.bf16.mxu1 %v17812_v43  ;;  %v17863_v48 = vrot.slane %v68_v17, %v16547_v33 }
0x1fbc   :  { %14370 = vmatpush1.bf16.msra.mxu1 %v17827_v53 }
0x1fbd   :  { %4280 = vrot.lane.b32.xlu0 %v4278_v1, %s16406_s7  ;;  %v17814_v1 = vpack.c.bf16 %v4515_v31, %v4513_v52  ;;  %14404 = vmatprep.subr.bf16.mxu1 %v17585_v22  ;;  %v4491_v52 = vld [vmem:[%s21290_s2 + $0x38] sm:$0xff]  ;;  %v17895_v31 = vpack.c.bf16 %v4486_v55, %v4484_v10 }
0x1fbe   :  { %v17897_v42 = vpack.c.bf16 %v4491_v52, %v4489_v23 }
0x1fbf   :  { %14384 = vmatprep.subr.bf16.mxu0 %v17814_v1 }
0x1fc0   :  { %14386 = vmatpush1.bf16.msra.mxu0 %v17829_v28 }
0x1fc1   :  { %14388 = vmatprep.subr.bf16.mxu0 %v17884_v44 }
0x202f   :  { %v4281_v12 = vpop.permute.xlu0 %4280 }
0x2030   :  { %v17838_v40 = vadd.f32 %v4281_v12, %v4277_v20  ;;  %v4495_v20 = vld [vmem:[%s21290_s2 + $0x58] sm:$0xff]  ;;  %v17913_v12 = vpack.c.bf16 %v4490_v9, %v4488_v8 }
0x2032   :  { %16127 = vtanh.f32 %v17838_v40 }
0x203c   :  { %v16128_v47 = vpop.eup %16127 }
0x203d   :  { %v4285_v54 = vmul.f32 %v16128_v47, %v17686_v4  ;;  %v17866_v4 = vrot.slane %v68_v17, %v16552_v35  ;;  %v17916_v47 = vpack.c.bf16 %v4495_v20, %v4493_v14  ;;  %v4497_v17 = vld [vmem:[%s21290_s2 + $0x68] sm:$0xff] }
0x203f   :  { %4287 = vrot.lane.b32.xlu1 %v4285_v54, %s16406_s7  ;;  %v4492_v54 = vld [vmem:[%s21290_s2 + $0x40] sm:$0xff] }
0x20b1   :  { %v4288_v58 = vpop.permute.xlu1 %4287 }
0x20b2   :  { %4290 = vst.msk [vmem:[%s21293_s9] sm:$0xff] %vm98_vm0, %v4288_v58  ;;  %13457 = vmatmul.mubr.msk.f32.vlgmr.msra.gmra.mrb[32].mxu1 %vm98_vm0, %v4288_v58  ;;  %13458 = vmatmul.mubr.msk.f32.vlgmr.msra.gmra.mrb[32].mxu0 %vm98_vm0, %v4288_v58  ;;  %v4494_v58 = vld [vmem:[%s21290_s2 + $0x50] sm:$0xff] }
0x20b3   :  { %14406 = vmatpush1.bf16.msra.mxu1 %v17596_v7  ;;  %4656 = vmatprep.mubr.f32.mxu0 %v16405_v3 }
0x20b4   :  { %14408 = vmatprep.subr.bf16.mxu1 %v17598_v15  ;;  %4782 = vmatprep.mubr.f32.mxu1 %v16405_v3 }
0x20b5   :  { %14390 = vmatpush1.bf16.msra.mxu0 %v17895_v31 }
0x20b6   :  { %14392 = vmatprep.subr.bf16.mxu0 %v17897_v42 }
0x20b7   :  { %14410 = vmatpush1.bf16.msra.mxu1 %v17614_v21 }
0x20b8   :  { %14412 = vmatprep.subr.bf16.mxu1 %v17617_v24 }
0x20b9   :  { %14394 = vmatpush1.bf16.msra.mxu0 %v17913_v12 }
0x20ba   :  { %14396 = vmatprep.subr.bf16.mxu0 %v17916_v47 }
0x20bb   :  { %14414 = vmatpush1.bf16.msra.mxu1 %v17632_v60 }
0x20bc   :  { %14416 = vmatprep.subr.bf16.mxu1 %v17635_v0 }
0x20bf   :  { %14418 = vmatpush1.bf16.msra.mxu1 %v17644_v50 }
0x20c0   :  { %14420 = vmatprep.subr.bf16.mxu1 %v17711_v51 }
0x2185   :  { %v4462_v19 = vpop.f32.mrb[32].mxu1 }
0x2186   :  { %v4467_v56 = vadd.f32 %v4462_v19, %v17863_v48  ;;  %v4464_v2 = vpop.f32.mrb[33].mxu1  ;;  %v4499_v19 = vld [vmem:[%s21290_s2 + $0x78] sm:$0xff] }
0x2187   :  { %v4468_v61 = vadd.f32 %v4464_v2, %v17866_v4  ;;  %v17934_v2 = vpack.c.bf16 %v4499_v19, %v4497_v17 }
0x2188   :  { %16129 = vtanh.f32 %v4467_v56  ;;  %v17931_v56 = vpack.c.bf16 %v4494_v58, %v4492_v54 }
0x2189   :  { %16131 = vtanh.f32 %v4468_v61  ;;  %v4496_v61 = vld [vmem:[%s21290_s2 + $0x60] sm:$0xff] }
0x218a   :  { %14398 = vmatpush1.bf16.msra.mxu0 %v17931_v56 }
0x218b   :  { %14400 = vmatprep.subr.bf16.mxu0 %v17934_v2 }
0x2192   :  { %v16130_v5 = vpop.eup %16129 }
0x2193   :  { %v16132_v32 = vpop.eup %16131  ;;  %v4471_v6 = vmul.f32 %v16130_v5, %v16558_v37  ;;  %v4498_v5 = vld [vmem:[%s21290_s2 + $0x70] sm:$0xff] }
0x2194   :  { %v4472_v57 = vmul.f32 %v16132_v32, %v16561_v38  ;;  %v17943_v32 = vpack.c.bf16 %v4498_v5, %v4496_v61 }
0x2195   :  { %v4473_v33 = vadd.f32 %v4471_v6, %v16564_v39 }
0x2196   :  { %v4474_v29 = vadd.f32 %v4472_v57, %v16567_v41  ;;  %14402 = vmatpush1.bf16.msra.mxu0 %v17943_v32 }
0x2197   :  { %14436 = vmatprep.subr.bf16.mxu0 %v17706_v49  ;;  %v4475_v6 = vmul.f32 %v4473_v33, %v17649_v27 }
0x2198   :  { %v4476_v35 = vmul.f32 %v4474_v29, %v4473_v33 }
0x219a   :  { %4478 = vrot.lane.b32.xlu0 %v4476_v35, %s16406_s7 }
0x220c   :  { %v4479_v57 = vpop.permute.xlu0 %4478 }
0x220d   :  { %v17949_v35 = vadd.f32 %v4479_v57, %v4475_v6 }
0x220f   :  { %16133 = vtanh.f32 %v17949_v35 }
0x2219   :  { %v16134_v11 = vpop.eup %16133 }
0x221a   :  { %v4483_v18 = vmul.f32 %v16134_v11, %v4474_v29 }
0x221c   :  { %4588 = vrot.lane.b32.xlu1 %v4483_v18, %s16406_s7 }
0x228e   :  { %v4589_v10 = vpop.permute.xlu1 %4588 }
0x228f   :  { %13459 = vmatmul.mubr.msk.f32.vlgmr.msra.gmra.mrb[32].mxu0 %vm98_vm0, %v4589_v10  ;;  %13461 = vmatmul.mubr.msk.f32.vlgmr.msra.gmra.mrb[34].mxu1 %vm98_vm0, %v4589_v10 }
0x2290   :  { %14422 = vmatpush1.bf16.msra.mxu1 %v17723_v26  ;;  %14438 = vmatpush1.bf16.msra.mxu0 %v17725_v36 }
0x2291   :  { %14424 = vmatprep.subr.bf16.mxu1 %v17737_v34  ;;  %14440 = vmatprep.subr.bf16.mxu0 %v17739_v63 }
0x2292   :  { %4855 = vmatprep.mubr.f32.mxu1 %v16405_v3  ;;  %4975 = vmatprep.mubr.f32.mxu0 %v16405_v3 }
0x2294   :  { %14426 = vmatpush1.bf16.msra.mxu1 %v17752_v62  ;;  %14442 = vmatpush1.bf16.msra.mxu0 %v17765_v13 }
0x2295   :  { %14428 = vmatprep.subr.bf16.mxu1 %v17767_v16  ;;  %14444 = vmatprep.subr.bf16.mxu0 %v17778_v45 }
0x2298   :  { %14430 = vmatpush1.bf16.msra.mxu1 %v17800_v25  ;;  %14446 = vmatpush1.bf16.msra.mxu0 %v17802_v30 }
0x2299   :  { %14432 = vmatprep.subr.bf16.mxu1 %v17812_v43  ;;  %14448 = vmatprep.subr.bf16.mxu0 %v17814_v1 }
0x229c   :  { %14434 = vmatpush1.bf16.msra.mxu1 %v17827_v53  ;;  %14450 = vmatpush1.bf16.msra.mxu0 %v17829_v28 }
0x229d   :  { %14452 = vmatprep.subr.bf16.mxu0 %v17884_v44  ;;  %14468 = vmatprep.subr.bf16.mxu1 %v17585_v22 }
0x2362   :  { %v4658_v27 = vpop.f32.mrb[32].mxu0 }
0x2363   :  { %v4663_v33 = vadd.f32 %v4658_v27, %v16758_v46  ;;  %v4660_v29 = vpop.f32.mrb[33].mxu0 }
0x2364   :  { %v4664_v55 = vadd.f32 %v4660_v29, %v16764_v59 }
0x2365   :  { %16135 = vtanh.f32 %v4663_v33 }
0x2366   :  { %16137 = vtanh.f32 %v4664_v55 }
0x236f   :  { %v16136_v23 = vpop.eup %16135 }
0x2370   :  { %v16138_v52 = vpop.eup %16137  ;;  %v4667_v8 = vmul.f32 %v16136_v23, %v16558_v37 }
0x2371   :  { %v4668_v9 = vmul.f32 %v16138_v52, %v16561_v38 }
0x2372   :  { %v4669_v14 = vadd.f32 %v4667_v8, %v16564_v39 }
0x2373   :  { %v4670_v20 = vadd.f32 %v4668_v9, %v16567_v41 }
0x2374   :  { %v4671_v22 = vmul.f32 %v4669_v14, %v17838_v40 }
0x2375   :  { %v4672_v54 = vmul.f32 %v4670_v20, %v4669_v14  ;;  %v5495_v14 = vld [vmem:[%s21285_s1 + $0x18] sm:$0xff] }
0x2377   :  { %4674 = vrot.lane.b32.xlu0 %v4672_v54, %s16406_s7 }
0x23e9   :  { %v4675_v58 = vpop.permute.xlu0 %4674 }
0x23ea   :  { %v17981_v17 = vadd.f32 %v4675_v58, %v4671_v22  ;;  %v5494_v22 = vld [vmem:[%s21285_s1 + $0x10] sm:$0xff]  ;;  %v5497_v58 = vld [vmem:[%s21285_s1 + $0x28] sm:$0xff] }
0x23ec   :  { %16139 = vtanh.f32 %v17981_v17 }
0x23f6   :  { %v16140_v19 = vpop.eup %16139 }
0x23f7   :  { %v4679_v61 = vmul.f32 %v16140_v19, %v4670_v20  ;;  %v5492_v20 = vld [vmem:[%s21285_s1] sm:$0xff] }
0x23f8   :  { %v18094_v19 = vpack.c.bf16 %v5494_v22, %v5492_v20  ;;  %v5692_v20 = vld [vmem:[%s21289_s3 + $0x38] sm:$0xff] }
0x23f9   :  { %4681 = vrot.lane.b32.xlu1 %v4679_v61, %s16406_s7 }
0x246b   :  { %v4682_v5 = vpop.permute.xlu1 %4681 }
0x246c   :  { %13460 = vst.msk [vmem:[%s21293_s9 + $0x8] sm:$0xff] %vm98_vm0, %v4682_v5  ;;  %13462 = vmatmul.mubr.msk.f32.vlgmr.msra.gmra.mrb[34].mxu1 %vm98_vm0, %v4682_v5  ;;  %13463 = vmatmul.mubr.msk.f32.vlgmr.msra.gmra.mrb[34].mxu0 %vm98_vm0, %v4682_v5  ;;  %v5496_v5 = vld [vmem:[%s21285_s1 + $0x20] sm:$0xff] }
0x246d   :  { %14454 = vmatpush1.bf16.msra.mxu0 %v17895_v31  ;;  %14470 = vmatpush1.bf16.msra.mxu1 %v17596_v7 }
0x246e   :  { %14456 = vmatprep.subr.bf16.mxu0 %v17897_v42  ;;  %14472 = vmatprep.subr.bf16.mxu1 %v17598_v15 }
0x246f   :  { %5051 = vmatprep.mubr.f32.mxu0 %v16405_v3  ;;  %5177 = vmatprep.mubr.f32.mxu1 %v16405_v3 }
0x2471   :  { %14458 = vmatpush1.bf16.msra.mxu0 %v17913_v12  ;;  %14474 = vmatpush1.bf16.msra.mxu1 %v17614_v21 }
0x2472   :  { %14460 = vmatprep.subr.bf16.mxu0 %v17916_v47  ;;  %14476 = vmatprep.subr.bf16.mxu1 %v17617_v24 }
0x2475   :  { %14462 = vmatpush1.bf16.msra.mxu0 %v17931_v56  ;;  %14478 = vmatpush1.bf16.msra.mxu1 %v17632_v60 }
0x2476   :  { %14464 = vmatprep.subr.bf16.mxu0 %v17934_v2  ;;  %14480 = vmatprep.subr.bf16.mxu1 %v17635_v0 }
0x2479   :  { %14466 = vmatpush1.bf16.msra.mxu0 %v17943_v32  ;;  %14482 = vmatpush1.bf16.msra.mxu1 %v17644_v50 }
0x247a   :  { %14484 = vmatprep.subr.bf16.mxu1 %v17711_v51  ;;  %14500 = vmatprep.subr.bf16.mxu0 %v17706_v49 }
0x253f   :  { %v4857_v7 = vpop.f32.mrb[34].mxu1 }
0x2540   :  { %v4862_v15 = vadd.f32 %v4857_v7, %v17863_v48  ;;  %v4859_v21 = vpop.f32.mrb[35].mxu1  ;;  %v5498_v7 = vld [vmem:[%s21285_s1 + $0x30] sm:$0xff] }
0x2541   :  { %v4863_v24 = vadd.f32 %v4859_v21, %v17866_v4  ;;  %v5503_v21 = vld [vmem:[%s21285_s1 + $0x58] sm:$0xff] }
0x2542   :  { %16141 = vtanh.f32 %v4862_v15  ;;  %v5501_v15 = vld [vmem:[%s21285_s1 + $0x48] sm:$0xff] }
0x2543   :  { %16143 = vtanh.f32 %v4863_v24  ;;  %v18112_v24 = vpack.c.bf16 %v5498_v7, %v5496_v5  ;;  %v5482_v5 = vld [vmem:[%s21292_s5 + $0x30] sm:$0xff]  ;;  %v5689_v7 = vld [vmem:[%s21289_s3 + $0x20] sm:$0xff] }
0x254c   :  { %v16142_v60 = vpop.eup %16141 }
0x254d   :  { %v16144_v40 = vpop.eup %16143  ;;  %v4866_v0 = vmul.f32 %v16142_v60, %v16558_v37  ;;  %v18115_v60 = vpack.c.bf16 %v5503_v21, %v5501_v15  ;;  %v5691_v21 = vld [vmem:[%s21289_s3 + $0x30] sm:$0xff] }
0x254e   :  { %v4867_v6 = vmul.f32 %v16144_v40, %v16561_v38  ;;  %v5500_v40 = vld [vmem:[%s21285_s1 + $0x40] sm:$0xff] }
0x254f   :  { %v4868_v50 = vadd.f32 %v4866_v0, %v16564_v39  ;;  %v5502_v0 = vld [vmem:[%s21285_s1 + $0x50] sm:$0xff] }
0x2550   :  { %v4869_v51 = vadd.f32 %v4867_v6, %v16567_v41  ;;  %v5505_v6 = vld [vmem:[%s21285_s1 + $0x68] sm:$0xff] }
0x2551   :  { %v4870_v49 = vmul.f32 %v4868_v50, %v17949_v35 }
0x2552   :  { %v4871_v57 = vmul.f32 %v4869_v51, %v4868_v50  ;;  %v5507_v50 = vld [vmem:[%s21285_s1 + $0x78] sm:$0xff] }
0x2554   :  { %4873 = vrot.lane.b32.xlu0 %v4871_v57, %s16406_s7  ;;  %v18133_v57 = vpack.c.bf16 %v5507_v50, %v5505_v6  ;;  %v18242_v6 = vpack.c.bf16 %v5691_v21, %v5689_v7 }
0x25c6   :  { %v4874_v11 = vpop.permute.xlu0 %4873 }
0x25c7   :  { %v18017_v18 = vadd.f32 %v4874_v11, %v4870_v49  ;;  %v5504_v49 = vld [vmem:[%s21285_s1 + $0x60] sm:$0xff]  ;;  %v5506_v11 = vld [vmem:[%s21285_s1 + $0x70] sm:$0xff] }
0x25c9   :  { %16145 = vtanh.f32 %v18017_v18 }
0x25d3   :  { %v16146_v10 = vpop.eup %16145 }
0x25d4   :  { %v4878_v27 = vmul.f32 %v16146_v10, %v4869_v51  ;;  %v18130_v51 = vpack.c.bf16 %v5502_v0, %v5500_v40  ;;  %v18142_v10 = vpack.c.bf16 %v5506_v11, %v5504_v49  ;;  %v5485_v40 = vld [vmem:[%s21292_s5 + $0x48] sm:$0xff]  ;;  %v5487_v0 = vld [vmem:[%s21292_s5 + $0x58] sm:$0xff] }
0x25d5   :  { %v18244_v50 = vpack.c.bf16 %v5487_v0, %v5485_v40  ;;  %v5694_v49 = vld [vmem:[%s21289_s3 + $0x48] sm:$0xff]  ;;  %v5696_v11 = vld [vmem:[%s21289_s3 + $0x58] sm:$0xff] }
0x25d6   :  { %4983 = vrot.lane.b32.xlu1 %v4878_v27, %s16406_s7 }
0x2648   :  { %v4984_v33 = vpop.permute.xlu1 %4983 }
0x2649   :  { %13464 = vmatmul.mubr.msk.f32.vlgmr.msra.gmra.mrb[34].mxu0 %vm98_vm0, %v4984_v33  ;;  %13466 = vmatmul.mubr.msk.f32.vlgmr.msra.gmra.mrb[36].mxu1 %vm98_vm0, %v4984_v33 }
0x264a   :  { %14486 = vmatpush1.bf16.msra.mxu1 %v17723_v26  ;;  %14502 = vmatpush1.bf16.msra.mxu0 %v17725_v36 }
0x264b   :  { %14488 = vmatprep.subr.bf16.mxu1 %v17737_v34  ;;  %14504 = vmatprep.subr.bf16.mxu0 %v17739_v63 }
0x264c   :  { %5250 = vmatprep.mubr.f32.mxu1 %v16405_v3  ;;  %5370 = vmatprep.mubr.f32.mxu0 %v16405_v3 }
0x264e   :  { %14490 = vmatpush1.bf16.msra.mxu1 %v17752_v62  ;;  %14506 = vmatpush1.bf16.msra.mxu0 %v17765_v13 }
0x264f   :  { %14492 = vmatprep.subr.bf16.mxu1 %v17767_v16  ;;  %14508 = vmatprep.subr.bf16.mxu0 %v17778_v45 }
0x2652   :  { %14494 = vmatpush1.bf16.msra.mxu1 %v17800_v25  ;;  %14510 = vmatpush1.bf16.msra.mxu0 %v17802_v30 }
0x2653   :  { %14496 = vmatprep.subr.bf16.mxu1 %v17812_v43  ;;  %14512 = vmatprep.subr.bf16.mxu0 %v17814_v1 }
0x2656   :  { %14498 = vmatpush1.bf16.msra.mxu1 %v17827_v53  ;;  %14514 = vmatpush1.bf16.msra.mxu0 %v17829_v28 }
0x2657   :  { %14516 = vmatprep.subr.bf16.mxu0 %v17884_v44 }
0x271c   :  { %v5053_v26 = vpop.f32.mrb[34].mxu0 }
0x271d   :  { %v5058_v36 = vadd.f32 %v5053_v26, %v16758_v46  ;;  %v5055_v34 = vpop.f32.mrb[35].mxu0 }
0x271e   :  { %v5059_v63 = vadd.f32 %v5055_v34, %v16764_v59 }
0x271f   :  { %16147 = vtanh.f32 %v5058_v36 }
0x2720   :  { %16149 = vtanh.f32 %v5059_v63 }
0x2729   :  { %v16148_v62 = vpop.eup %16147 }
0x272a   :  { %v16150_v13 = vpop.eup %16149  ;;  %v5062_v16 = vmul.f32 %v16148_v62, %v16558_v37 }
0x272b   :  { %v5063_v45 = vmul.f32 %v16150_v13, %v16561_v38 }
0x272c   :  { %v5064_v25 = vadd.f32 %v5062_v16, %v16564_v39 }
0x272d   :  { %v5065_v30 = vadd.f32 %v5063_v45, %v16567_v41 }
0x272e   :  { %v5066_v1 = vmul.f32 %v5064_v25, %v17981_v17  ;;  %v5499_v17 = vld [vmem:[%s21285_s1 + $0x38] sm:$0xff] }
0x272f   :  { %v5067_v43 = vmul.f32 %v5065_v30, %v5064_v25  ;;  %v18096_v61 = vpack.c.bf16 %v5499_v17, %v5497_v58  ;;  %v5480_v17 = vld [vmem:[%s21292_s5 + $0x20] sm:$0xff] }
0x2730   :  { %v18229_v15 = vpack.c.bf16 %v5482_v5, %v5480_v17 }
0x2731   :  { %5069 = vrot.lane.b32.xlu0 %v5067_v43, %s16406_s7 }
0x27a3   :  { %v5070_v53 = vpop.permute.xlu0 %5069 }
0x27a4   :  { %v18048_v28 = vadd.f32 %v5070_v53, %v5066_v1 }
0x27a6   :  { %16151 = vtanh.f32 %v18048_v28 }
0x27b0   :  { %v16152_v44 = vpop.eup %16151 }
0x27b1   :  { %v5074_v35 = vmul.f32 %v16152_v44, %v5065_v30 }
0x27b3   :  { %5076 = vrot.lane.b32.xlu1 %v5074_v35, %s16406_s7  ;;  %v5477_v35 = vld [vmem:[%s21292_s5 + $0x8] sm:$0xff] }
0x2825   :  { %v5077_v29 = vpop.permute.xlu1 %5076 }
0x2826   :  { %13465 = vst.msk [vmem:[%s21293_s9 + $0x10] sm:$0xff] %vm98_vm0, %v5077_v29  ;;  %13467 = vmatmul.mubr.msk.f32.vlgmr.msra.gmra.mrb[36].mxu1 %vm98_vm0, %v5077_v29  ;;  %13468 = vmatmul.mubr.msk.f32.vlgmr.msra.gmra.mrb[36].mxu0 %vm98_vm0, %v5077_v29  ;;  %v5479_v29 = vld [vmem:[%s21292_s5 + $0x18] sm:$0xff] }
0x2827   :  { %14518 = vmatpush1.bf16.msra.mxu0 %v17895_v31  ;;  %5446 = vmatprep.mubr.f32.mxu0 %v16405_v3 }
0x2828   :  { %14520 = vmatprep.subr.bf16.mxu0 %v17897_v42  ;;  %5572 = vmatprep.mubr.f32.mxu1 %v16405_v3 }
0x282b   :  { %14522 = vmatpush1.bf16.msra.mxu0 %v17913_v12 }
0x282c   :  { %14524 = vmatprep.subr.bf16.mxu0 %v17916_v47 }
0x282f   :  { %14526 = vmatpush1.bf16.msra.mxu0 %v17931_v56 }
0x2830   :  { %14528 = vmatprep.subr.bf16.mxu0 %v17934_v2 }
0x2833   :  { %14530 = vmatpush1.bf16.msra.mxu0 %v17943_v32  ;;  %v5493_v32 = vld [vmem:[%s21285_s1 + $0x8] sm:$0xff] }
0x2834   :  { %v18083_v54 = vpack.c.bf16 %v5495_v14, %v5493_v32  ;;  %v5483_v32 = vld [vmem:[%s21292_s5 + $0x38] sm:$0xff]  ;;  %v5690_v14 = vld [vmem:[%s21289_s3 + $0x28] sm:$0xff] }
0x2835   :  { %v18217_v58 = vpack.c.bf16 %v5692_v20, %v5690_v14 }
0x2836   :  { %14532 = vmatprep.subr.bf16.mxu1 %v18083_v54 }
0x2837   :  { %14534 = vmatpush1.bf16.msra.mxu1 %v18094_v19 }
0x2838   :  { %14536 = vmatprep.subr.bf16.mxu1 %v18096_v61 }
0x283b   :  { %14538 = vmatpush1.bf16.msra.mxu1 %v18112_v24 }
0x283c   :  { %14540 = vmatprep.subr.bf16.mxu1 %v18115_v60 }
0x283f   :  { %14542 = vmatpush1.bf16.msra.mxu1 %v18130_v51 }
0x2840   :  { %14544 = vmatprep.subr.bf16.mxu1 %v18133_v57 }
0x2843   :  { %14546 = vmatpush1.bf16.msra.mxu1 %v18142_v10 }
0x28f9   :  { %v5252_v55 = vpop.f32.mrb[36].mxu1 }
0x28fa   :  { %v5257_v23 = vadd.f32 %v5252_v55, %v17863_v48  ;;  %v5254_v31 = vpop.f32.mrb[37].mxu1  ;;  %v5686_v55 = vld [vmem:[%s21289_s3 + $0x8] sm:$0xff] }
0x28fb   :  { %v5258_v52 = vadd.f32 %v5254_v31, %v17866_v4  ;;  %v5688_v31 = vld [vmem:[%s21289_s3 + $0x18] sm:$0xff] }
0x28fc   :  { %16153 = vtanh.f32 %v5257_v23  ;;  %v18177_v23 = vpack.c.bf16 %v5479_v29, %v5477_v35  ;;  %v5697_v29 = vld [vmem:[%s21289_s3 + $0x60] sm:$0xff] }
0x28fd   :  { %16155 = vtanh.f32 %v5258_v52  ;;  %v5476_v52 = vld [vmem:[%s21292_s5] sm:$0xff] }
0x28fe   :  { %14548 = vmatprep.subr.bf16.mxu1 %v18177_v23 }
0x2906   :  { %v16154_v42 = vpop.eup %16153 }
0x2907   :  { %v16156_v8 = vpop.eup %16155  ;;  %v5261_v12 = vmul.f32 %v16154_v42, %v16558_v37  ;;  %v5478_v42 = vld [vmem:[%s21292_s5 + $0x10] sm:$0xff] }
0x2908   :  { %v5262_v47 = vmul.f32 %v16156_v8, %v16561_v38  ;;  %v18188_v8 = vpack.c.bf16 %v5688_v31, %v5686_v55  ;;  %v5699_v55 = vld [vmem:[%s21289_s3 + $0x70] sm:$0xff] }
0x2909   :  { %v5263_v56 = vadd.f32 %v5261_v12, %v16564_v39  ;;  %v18190_v12 = vpack.c.bf16 %v5478_v42, %v5476_v52  ;;  %v18307_v52 = vpack.c.bf16 %v5699_v55, %v5697_v29  ;;  %v5678_v29 = vld [vmem:[%s21290_s2 + $0x48] sm:$0xff]  ;;  %v5680_v55 = vld [vmem:[%s21290_s2 + $0x58] sm:$0xff] }
0x290a   :  { %v5264_v2 = vadd.f32 %v5262_v47, %v16567_v41  ;;  %v5685_v47 = vld [vmem:[%s21289_s3] sm:$0xff]  ;;  %14564 = vmatprep.subr.bf16.mxu0 %v18188_v8 }
0x290b   :  { %v5265_v27 = vmul.f32 %v5263_v56, %v18017_v18 }
0x290c   :  { %v5266_v9 = vmul.f32 %v5264_v2, %v5263_v56  ;;  %v5687_v56 = vld [vmem:[%s21289_s3 + $0x10] sm:$0xff] }
0x290e   :  { %5268 = vrot.lane.b32.xlu0 %v5266_v9, %s16406_s7  ;;  %v18202_v9 = vpack.c.bf16 %v5687_v56, %v5685_v47 }
0x2980   :  { %v5269_v33 = vpop.permute.xlu0 %5268 }
0x2981   :  { %v18147_v26 = vadd.f32 %v5269_v33, %v5265_v27  ;;  %v5484_v27 = vld [vmem:[%s21292_s5 + $0x40] sm:$0xff]  ;;  %v18255_v33 = vpack.c.bf16 %v5696_v11, %v5694_v49  ;;  %v5670_v11 = vld [vmem:[%s21290_s2 + $0x8] sm:$0xff] }
0x2983   :  { %16157 = vtanh.f32 %v18147_v26 }
0x298d   :  { %v16158_v36 = vpop.eup %16157 }
0x298e   :  { %v5273_v34 = vmul.f32 %v16158_v36, %v5264_v2  ;;  %v5481_v2 = vld [vmem:[%s21292_s5 + $0x28] sm:$0xff]  ;;  %v5486_v36 = vld [vmem:[%s21292_s5 + $0x50] sm:$0xff] }
0x298f   :  { %v18215_v22 = vpack.c.bf16 %v5483_v32, %v5481_v2 }
0x2990   :  { %5378 = vrot.lane.b32.xlu1 %v5273_v34, %s16406_s7  ;;  %v5693_v34 = vld [vmem:[%s21289_s3 + $0x40] sm:$0xff] }
0x2a02   :  { %v5379_v63 = vpop.permute.xlu1 %5378 }
0x2a03   :  { %13469 = vmatmul.mubr.msk.f32.vlgmr.msra.gmra.mrb[36].mxu0 %vm98_vm0, %v5379_v63  ;;  %13471 = vmatmul.mubr.msk.f32.vlgmr.msra.gmra.mrb[38].mxu1 %vm98_vm0, %v5379_v63  ;;  %v5695_v63 = vld [vmem:[%s21289_s3 + $0x50] sm:$0xff] }
0x2a04   :  { %5645 = vmatprep.mubr.f32.mxu1 %v16405_v3  ;;  %5765 = vmatprep.mubr.f32.mxu0 %v16405_v3 }
0x2a05   :  { %14550 = vmatpush1.bf16.msra.mxu1 %v18190_v12  ;;  %14566 = vmatpush1.bf16.msra.mxu0 %v18202_v9 }
0x2a06   :  { %14552 = vmatprep.subr.bf16.mxu1 %v18215_v22  ;;  %14568 = vmatprep.subr.bf16.mxu0 %v18217_v58 }
0x2a09   :  { %14554 = vmatpush1.bf16.msra.mxu1 %v18229_v15  ;;  %14570 = vmatpush1.bf16.msra.mxu0 %v18242_v6 }
0x2a0a   :  { %14556 = vmatprep.subr.bf16.mxu1 %v18244_v50  ;;  %14572 = vmatprep.subr.bf16.mxu0 %v18255_v33 }
0x2ad6   :  { %v5448_v62 = vpop.f32.mrb[36].mxu0 }
0x2ad7   :  { %v5453_v18 = vadd.f32 %v5448_v62, %v16758_v46  ;;  %v5450_v13 = vpop.f32.mrb[37].mxu0  ;;  %v18267_v62 = vpack.c.bf16 %v5486_v36, %v5484_v27  ;;  %v5672_v27 = vld [vmem:[%s21290_s2 + $0x18] sm:$0xff]  ;;  %v5669_v36 = vld [vmem:[%s21290_s2] sm:$0xff] }
0x2ad8   :  { %v5454_v16 = vadd.f32 %v5450_v13, %v16764_v59  ;;  %v5491_v13 = vld [vmem:[%s21292_s5 + $0x78] sm:$0xff] }
0x2ad9   :  { %16159 = vtanh.f32 %v5453_v18  ;;  %v5489_v18 = vld [vmem:[%s21292_s5 + $0x68] sm:$0xff]  ;;  %14558 = vmatpush1.bf16.msra.mxu1 %v18267_v62 }
0x2ada   :  { %16161 = vtanh.f32 %v5454_v16  ;;  %v5698_v16 = vld [vmem:[%s21289_s3 + $0x68] sm:$0xff] }
0x2ae3   :  { %v16160_v45 = vpop.eup %16159 }
0x2ae4   :  { %v16162_v25 = vpop.eup %16161  ;;  %v5457_v30 = vmul.f32 %v16160_v45, %v16558_v37  ;;  %v18280_v45 = vpack.c.bf16 %v5695_v63, %v5693_v34  ;;  %v18352_v34 = vpack.c.bf16 %v5672_v27, %v5670_v11  ;;  %v5671_v63 = vld [vmem:[%s21290_s2 + $0x10] sm:$0xff] }
0x2ae5   :  { %v5458_v43 = vmul.f32 %v16162_v25, %v16561_v38  ;;  %v18282_v25 = vpack.c.bf16 %v5491_v13, %v5489_v18  ;;  %v5674_v18 = vld [vmem:[%s21290_s2 + $0x28] sm:$0xff]  ;;  %v5676_v13 = vld [vmem:[%s21290_s2 + $0x38] sm:$0xff] }
0x2ae6   :  { %v18160_v1 = vadd.f32 %v5457_v30, %v16564_v39  ;;  %v5700_v30 = vld [vmem:[%s21289_s3 + $0x78] sm:$0xff]  ;;  %14574 = vmatpush1.bf16.msra.mxu0 %v18280_v45 }
0x2ae7   :  { %v18163_v53 = vadd.f32 %v5458_v43, %v16567_v41  ;;  %v5488_v43 = vld [vmem:[%s21292_s5 + $0x60] sm:$0xff]  ;;  %v18294_v35 = vpack.c.bf16 %v5700_v30, %v5698_v16  ;;  %14560 = vmatprep.subr.bf16.mxu1 %v18282_v25  ;;  %v18363_v16 = vpack.c.bf16 %v5671_v63, %v5669_v36  ;;  %v18365_v30 = vpack.c.bf16 %v5676_v13, %v5674_v18 }
0x2ae8   :  { %v5461_v42 = vmul.f32 %v18160_v1, %v18048_v28 }
0x2ae9   :  { %v5462_v44 = vmul.f32 %v18163_v53, %v18160_v1  ;;  %14576 = vmatprep.subr.bf16.mxu0 %v18294_v35 }
0x2aea   :  { %14578 = vmatpush1.bf16.msra.mxu0 %v18307_v52 }
0x2aeb   :  { %5464 = vrot.lane.b32.xlu0 %v5462_v44, %s16406_s7  ;;  %v5490_v44 = vld [vmem:[%s21292_s5 + $0x70] sm:$0xff]  ;;  %14580 = vmatprep.subr.bf16.mxu0 %v18352_v34 }
0x2aec   :  { %v18303_v31 = vpack.c.bf16 %v5490_v44, %v5488_v43  ;;  %v5673_v43 = vld [vmem:[%s21290_s2 + $0x20] sm:$0xff]  ;;  %v5675_v44 = vld [vmem:[%s21290_s2 + $0x30] sm:$0xff] }
0x2aee   :  { %14562 = vmatpush1.bf16.msra.mxu1 %v18303_v31 }
0x2aef   :  { %14596 = vmatprep.subr.bf16.mxu1 %v18083_v54 }
0x2b5d   :  { %v5465_v47 = vpop.permute.xlu0 %5464 }
0x2b5e   :  { %v18315_v56 = vadd.f32 %v5465_v47, %v5461_v42  ;;  %v18381_v42 = vpack.c.bf16 %v5675_v44, %v5673_v43  ;;  %v18384_v47 = vpack.c.bf16 %v5680_v55, %v5678_v29 }
0x2b60   :  { %16163 = vtanh.f32 %v18315_v56 }
0x2b6a   :  { %v16164_v2 = vpop.eup %16163 }
0x2b6b   :  { %v5469_v32 = vmul.f32 %v16164_v2, %v18163_v53  ;;  %v5677_v2 = vld [vmem:[%s21290_s2 + $0x40] sm:$0xff] }
0x2b6d   :  { %5471 = vrot.lane.b32.xlu1 %v5469_v32, %s16406_s7  ;;  %v5679_v32 = vld [vmem:[%s21290_s2 + $0x50] sm:$0xff] }
0x2bdf   :  { %v5472_v14 = vpop.permute.xlu1 %5471 }
0x2be0   :  { %13470 = vst.msk [vmem:[%s21293_s9 + $0x18] sm:$0xff] %vm98_vm0, %v5472_v14  ;;  %13472 = vmatmul.mubr.msk.f32.vlgmr.msra.gmra.mrb[38].mxu1 %vm98_vm0, %v5472_v14  ;;  %13473 = vmatmul.mubr.msk.f32.vlgmr.msra.gmra.mrb[38].mxu0 %vm98_vm0, %v5472_v14  ;;  %v5682_v14 = vld [vmem:[%s21290_s2 + $0x68] sm:$0xff] }
0x2be1   :  { %14598 = vmatpush1.bf16.msra.mxu1 %v18094_v19  ;;  %5841 = vmatprep.mubr.f32.mxu0 %v16405_v3 }
0x2be2   :  { %14600 = vmatprep.subr.bf16.mxu1 %v18096_v61  ;;  %5967 = vmatprep.mubr.f32.mxu1 %v16405_v3 }
0x2be3   :  { %14582 = vmatpush1.bf16.msra.mxu0 %v18363_v16 }
0x2be4   :  { %14584 = vmatprep.subr.bf16.mxu0 %v18365_v30 }
0x2be5   :  { %14602 = vmatpush1.bf16.msra.mxu1 %v18112_v24 }
0x2be6   :  { %14604 = vmatprep.subr.bf16.mxu1 %v18115_v60 }
0x2be7   :  { %14586 = vmatpush1.bf16.msra.mxu0 %v18381_v42 }
0x2be8   :  { %14588 = vmatprep.subr.bf16.mxu0 %v18384_v47 }
0x2be9   :  { %14606 = vmatpush1.bf16.msra.mxu1 %v18130_v51 }
0x2bea   :  { %14608 = vmatprep.subr.bf16.mxu1 %v18133_v57 }
0x2bed   :  { %14610 = vmatpush1.bf16.msra.mxu1 %v18142_v10 }
0x2bee   :  { %14612 = vmatprep.subr.bf16.mxu1 %v18177_v23 }
0x2cb3   :  { %v5647_v28 = vpop.f32.mrb[38].mxu1 }
0x2cb4   :  { %v5652_v1 = vadd.f32 %v5647_v28, %v17863_v48  ;;  %v5649_v53 = vpop.f32.mrb[39].mxu1  ;;  %v5684_v28 = vld [vmem:[%s21290_s2 + $0x78] sm:$0xff] }
0x2cb5   :  { %v5653_v20 = vadd.f32 %v5649_v53, %v17866_v4  ;;  %v18402_v53 = vpack.c.bf16 %v5684_v28, %v5682_v14 }
0x2cb6   :  { %16165 = vtanh.f32 %v5652_v1  ;;  %v18399_v1 = vpack.c.bf16 %v5679_v32, %v5677_v2 }
0x2cb7   :  { %16167 = vtanh.f32 %v5653_v20  ;;  %v5681_v20 = vld [vmem:[%s21290_s2 + $0x60] sm:$0xff] }
0x2cb8   :  { %14590 = vmatpush1.bf16.msra.mxu0 %v18399_v1 }
0x2cb9   :  { %14592 = vmatprep.subr.bf16.mxu0 %v18402_v53 }
0x2cc0   :  { %v16166_v17 = vpop.eup %16165 }
0x2cc1   :  { %v16168_v5 = vpop.eup %16167  ;;  %v5656_v7 = vmul.f32 %v16166_v17, %v16558_v37  ;;  %v5683_v17 = vld [vmem:[%s21290_s2 + $0x70] sm:$0xff] }
0x2cc2   :  { %v5657_v21 = vmul.f32 %v16168_v5, %v16561_v38  ;;  %v18411_v5 = vpack.c.bf16 %v5683_v17, %v5681_v20 }
0x2cc3   :  { %v5658_v40 = vadd.f32 %v5656_v7, %v16564_v39 }
0x2cc4   :  { %v5659_v0 = vadd.f32 %v5657_v21, %v16567_v41  ;;  %14594 = vmatpush1.bf16.msra.mxu0 %v18411_v5 }
0x2cc5   :  { %14628 = vmatprep.subr.bf16.mxu0 %v18188_v8  ;;  %v5660_v7 = vmul.f32 %v5658_v40, %v18147_v26 }
0x2cc6   :  { %v5661_v49 = vmul.f32 %v5659_v0, %v5658_v40 }
0x2cc8   :  { %5663 = vrot.lane.b32.xlu0 %v5661_v49, %s16406_s7 }
0x2d3a   :  { %v5664_v21 = vpop.permute.xlu0 %5663 }
0x2d3b   :  { %v18417_v49 = vadd.f32 %v5664_v21, %v5660_v7 }
0x2d3d   :  { %16169 = vtanh.f32 %v18417_v49 }
0x2d47   :  { %v16170_v11 = vpop.eup %16169 }
0x2d48   :  { %v5668_v27 = vmul.f32 %v16170_v11, %v5659_v0 }
0x2d4a   :  { %5773 = vrot.lane.b32.xlu1 %v5668_v27, %s16406_s7 }
0x2dbc   :  { %v5774_v36 = vpop.permute.xlu1 %5773 }
0x2dbd   :  { %13474 = vmatmul.mubr.msk.f32.vlgmr.msra.gmra.mrb[38].mxu0 %vm98_vm0, %v5774_v36  ;;  %13476 = vmatmul.mubr.msk.f32.vlgmr.msra.gmra.mrb[40].mxu1 %vm98_vm0, %v5774_v36 }
0x2dbe   :  { %14614 = vmatpush1.bf16.msra.mxu1 %v18190_v12  ;;  %14630 = vmatpush1.bf16.msra.mxu0 %v18202_v9 }
0x2dbf   :  { %14616 = vmatprep.subr.bf16.mxu1 %v18215_v22  ;;  %14632 = vmatprep.subr.bf16.mxu0 %v18217_v58 }
0x2dc0   :  { %6040 = vmatprep.mubr.f32.mxu1 %v16405_v3  ;;  %6160 = vmatprep.mubr.f32.mxu0 %v16405_v3 }
0x2dc2   :  { %14618 = vmatpush1.bf16.msra.mxu1 %v18229_v15  ;;  %14634 = vmatpush1.bf16.msra.mxu0 %v18242_v6 }
0x2dc3   :  { %14620 = vmatprep.subr.bf16.mxu1 %v18244_v50  ;;  %14636 = vmatprep.subr.bf16.mxu0 %v18255_v33 }
0x2dc6   :  { %14622 = vmatpush1.bf16.msra.mxu1 %v18267_v62  ;;  %14638 = vmatpush1.bf16.msra.mxu0 %v18280_v45 }
0x2dc7   :  { %14624 = vmatprep.subr.bf16.mxu1 %v18282_v25  ;;  %14640 = vmatprep.subr.bf16.mxu0 %v18294_v35 }
0x2dca   :  { %14626 = vmatpush1.bf16.msra.mxu1 %v18303_v31  ;;  %14642 = vmatpush1.bf16.msra.mxu0 %v18307_v52 }
0x2dcb   :  { %14644 = vmatprep.subr.bf16.mxu0 %v18352_v34  ;;  %14660 = vmatprep.subr.bf16.mxu1 %v18083_v54 }
0x2e90   :  { %v5843_v26 = vpop.f32.mrb[38].mxu0 }
0x2e91   :  { %v5848_v40 = vadd.f32 %v5843_v26, %v16758_v46  ;;  %v5845_v0 = vpop.f32.mrb[39].mxu0 }
0x2e92   :  { %v5849_v63 = vadd.f32 %v5845_v0, %v16764_v59 }
0x2e93   :  { %16171 = vtanh.f32 %v5848_v40 }
0x2e94   :  { %16173 = vtanh.f32 %v5849_v63 }
0x2e9d   :  { %v16172_v18 = vpop.eup %16171 }
0x2e9e   :  { %v16174_v13 = vpop.eup %16173  ;;  %v5852_v43 = vmul.f32 %v16172_v18, %v16558_v37 }
0x2e9f   :  { %v5853_v44 = vmul.f32 %v16174_v13, %v16561_v38 }
0x2ea0   :  { %v5854_v29 = vadd.f32 %v5852_v43, %v16564_v39 }
0x2ea1   :  { %v5855_v55 = vadd.f32 %v5853_v44, %v16567_v41 }
0x2ea2   :  { %v5856_v54 = vmul.f32 %v5854_v29, %v18315_v56 }
0x2ea3   :  { %v5857_v2 = vmul.f32 %v5855_v55, %v5854_v29  ;;  %v6680_v29 = vld [vmem:[%s21285_s1 + $0x18] sm:$0xff] }
0x2ea5   :  { %5859 = vrot.lane.b32.xlu0 %v5857_v2, %s16406_s7 }
0x2f17   :  { %v5860_v32 = vpop.permute.xlu0 %5859 }
0x2f18   :  { %v18449_v14 = vadd.f32 %v5860_v32, %v5856_v54  ;;  %v6679_v54 = vld [vmem:[%s21285_s1 + $0x10] sm:$0xff]  ;;  %v6682_v32 = vld [vmem:[%s21285_s1 + $0x28] sm:$0xff] }
0x2f1a   :  { %16175 = vtanh.f32 %v18449_v14 }
0x2f24   :  { %v16176_v28 = vpop.eup %16175 }
0x2f25   :  { %v5864_v20 = vmul.f32 %v16176_v28, %v5855_v55  ;;  %v6677_v55 = vld [vmem:[%s21285_s1] sm:$0xff] }
0x2f26   :  { %v18562_v28 = vpack.c.bf16 %v6679_v54, %v6677_v55  ;;  %v6877_v55 = vld [vmem:[%s21289_s3 + $0x38] sm:$0xff] }
0x2f27   :  { %5866 = vrot.lane.b32.xlu1 %v5864_v20, %s16406_s7 }
0x2f99   :  { %v5867_v17 = vpop.permute.xlu1 %5866 }
0x2f9a   :  { %13475 = vst.msk [vmem:[%s21293_s9 + $0x20] sm:$0xff] %vm98_vm0, %v5867_v17  ;;  %13477 = vmatmul.mubr.msk.f32.vlgmr.msra.gmra.mrb[40].mxu1 %vm98_vm0, %v5867_v17  ;;  %13478 = vmatmul.mubr.msk.f32.vlgmr.msra.gmra.mrb[40].mxu0 %vm98_vm0, %v5867_v17  ;;  %v6681_v17 = vld [vmem:[%s21285_s1 + $0x20] sm:$0xff] }
0x2f9b   :  { %14646 = vmatpush1.bf16.msra.mxu0 %v18363_v16  ;;  %14662 = vmatpush1.bf16.msra.mxu1 %v18094_v19 }
0x2f9c   :  { %14648 = vmatprep.subr.bf16.mxu0 %v18365_v30  ;;  %14664 = vmatprep.subr.bf16.mxu1 %v18096_v61 }
0x2f9d   :  { %6236 = vmatprep.mubr.f32.mxu0 %v16405_v3  ;;  %6362 = vmatprep.mubr.f32.mxu1 %v16405_v3 }
0x2f9f   :  { %14650 = vmatpush1.bf16.msra.mxu0 %v18381_v42  ;;  %14666 = vmatpush1.bf16.msra.mxu1 %v18112_v24 }
0x2fa0   :  { %14652 = vmatprep.subr.bf16.mxu0 %v18384_v47  ;;  %14668 = vmatprep.subr.bf16.mxu1 %v18115_v60 }
0x2fa3   :  { %14654 = vmatpush1.bf16.msra.mxu0 %v18399_v1  ;;  %14670 = vmatpush1.bf16.msra.mxu1 %v18130_v51 }
0x2fa4   :  { %14656 = vmatprep.subr.bf16.mxu0 %v18402_v53  ;;  %14672 = vmatprep.subr.bf16.mxu1 %v18133_v57 }
0x2fa7   :  { %14658 = vmatpush1.bf16.msra.mxu0 %v18411_v5  ;;  %14674 = vmatpush1.bf16.msra.mxu1 %v18142_v10 }
0x2fa8   :  { %14676 = vmatprep.subr.bf16.mxu1 %v18177_v23  ;;  %14692 = vmatprep.subr.bf16.mxu0 %v18188_v8 }
0x306d   :  { %v6042_v19 = vpop.f32.mrb[40].mxu1 }
0x306e   :  { %v6047_v61 = vadd.f32 %v6042_v19, %v17863_v48  ;;  %v6044_v24 = vpop.f32.mrb[41].mxu1  ;;  %v6683_v19 = vld [vmem:[%s21285_s1 + $0x30] sm:$0xff] }
0x306f   :  { %v6048_v60 = vadd.f32 %v6044_v24, %v17866_v4  ;;  %v6688_v24 = vld [vmem:[%s21285_s1 + $0x58] sm:$0xff] }
0x3070   :  { %16177 = vtanh.f32 %v6047_v61  ;;  %v6686_v61 = vld [vmem:[%s21285_s1 + $0x48] sm:$0xff] }
0x3071   :  { %16179 = vtanh.f32 %v6048_v60  ;;  %v18580_v60 = vpack.c.bf16 %v6683_v19, %v6681_v17  ;;  %v6667_v17 = vld [vmem:[%s21292_s5 + $0x30] sm:$0xff]  ;;  %v6874_v19 = vld [vmem:[%s21289_s3 + $0x20] sm:$0xff] }
0x307a   :  { %v16178_v51 = vpop.eup %16177 }
0x307b   :  { %v16180_v56 = vpop.eup %16179  ;;  %v6051_v57 = vmul.f32 %v16178_v51, %v16558_v37  ;;  %v18583_v51 = vpack.c.bf16 %v6688_v24, %v6686_v61  ;;  %v6876_v24 = vld [vmem:[%s21289_s3 + $0x30] sm:$0xff] }
0x307c   :  { %v6052_v7 = vmul.f32 %v16180_v56, %v16561_v38  ;;  %v6685_v56 = vld [vmem:[%s21285_s1 + $0x40] sm:$0xff] }
0x307d   :  { %v6053_v10 = vadd.f32 %v6051_v57, %v16564_v39  ;;  %v6687_v57 = vld [vmem:[%s21285_s1 + $0x50] sm:$0xff] }
0x307e   :  { %v6054_v23 = vadd.f32 %v6052_v7, %v16567_v41  ;;  %v6690_v7 = vld [vmem:[%s21285_s1 + $0x68] sm:$0xff] }
0x307f   :  { %v6055_v8 = vmul.f32 %v6053_v10, %v18417_v49 }
0x3080   :  { %v6056_v21 = vmul.f32 %v6054_v23, %v6053_v10  ;;  %v6692_v10 = vld [vmem:[%s21285_s1 + $0x78] sm:$0xff] }
0x3082   :  { %6058 = vrot.lane.b32.xlu0 %v6056_v21, %s16406_s7  ;;  %v18601_v21 = vpack.c.bf16 %v6692_v10, %v6690_v7  ;;  %v18710_v7 = vpack.c.bf16 %v6876_v24, %v6874_v19 }
0x30f4   :  { %v6059_v11 = vpop.permute.xlu0 %6058 }
0x30f5   :  { %v18485_v27 = vadd.f32 %v6059_v11, %v6055_v8  ;;  %v6689_v8 = vld [vmem:[%s21285_s1 + $0x60] sm:$0xff]  ;;  %v6691_v11 = vld [vmem:[%s21285_s1 + $0x70] sm:$0xff] }
0x30f7   :  { %16181 = vtanh.f32 %v18485_v27 }
0x3101   :  { %v16182_v36 = vpop.eup %16181 }
0x3102   :  { %v6063_v26 = vmul.f32 %v16182_v36, %v6054_v23  ;;  %v18598_v23 = vpack.c.bf16 %v6687_v57, %v6685_v56  ;;  %v18610_v36 = vpack.c.bf16 %v6691_v11, %v6689_v8  ;;  %v6670_v56 = vld [vmem:[%s21292_s5 + $0x48] sm:$0xff]  ;;  %v6672_v57 = vld [vmem:[%s21292_s5 + $0x58] sm:$0xff] }
0x3103   :  { %v18712_v10 = vpack.c.bf16 %v6672_v57, %v6670_v56  ;;  %v6879_v8 = vld [vmem:[%s21289_s3 + $0x48] sm:$0xff]  ;;  %v6881_v11 = vld [vmem:[%s21289_s3 + $0x58] sm:$0xff] }
0x3104   :  { %6168 = vrot.lane.b32.xlu1 %v6063_v26, %s16406_s7 }
0x3176   :  { %v6169_v40 = vpop.permute.xlu1 %6168 }
0x3177   :  { %13479 = vmatmul.mubr.msk.f32.vlgmr.msra.gmra.mrb[40].mxu0 %vm98_vm0, %v6169_v40  ;;  %13481 = vmatmul.mubr.msk.f32.vlgmr.msra.gmra.mrb[42].mxu1 %vm98_vm0, %v6169_v40 }
0x3178   :  { %14678 = vmatpush1.bf16.msra.mxu1 %v18190_v12  ;;  %14694 = vmatpush1.bf16.msra.mxu0 %v18202_v9 }
0x3179   :  { %14680 = vmatprep.subr.bf16.mxu1 %v18215_v22  ;;  %14696 = vmatprep.subr.bf16.mxu0 %v18217_v58 }
0x317a   :  { %6435 = vmatprep.mubr.f32.mxu1 %v16405_v3  ;;  %6555 = vmatprep.mubr.f32.mxu0 %v16405_v3 }
0x317c   :  { %14682 = vmatpush1.bf16.msra.mxu1 %v18229_v15  ;;  %14698 = vmatpush1.bf16.msra.mxu0 %v18242_v6 }
0x317d   :  { %14684 = vmatprep.subr.bf16.mxu1 %v18244_v50  ;;  %14700 = vmatprep.subr.bf16.mxu0 %v18255_v33 }
0x3180   :  { %14686 = vmatpush1.bf16.msra.mxu1 %v18267_v62  ;;  %14702 = vmatpush1.bf16.msra.mxu0 %v18280_v45 }
0x3181   :  { %14688 = vmatprep.subr.bf16.mxu1 %v18282_v25  ;;  %14704 = vmatprep.subr.bf16.mxu0 %v18294_v35 }
0x3184   :  { %14690 = vmatpush1.bf16.msra.mxu1 %v18303_v31  ;;  %14706 = vmatpush1.bf16.msra.mxu0 %v18307_v52 }
0x3185   :  { %14708 = vmatprep.subr.bf16.mxu0 %v18352_v34 }
0x324a   :  { %v6238_v12 = vpop.f32.mrb[40].mxu0 }
0x324b   :  { %v6243_v9 = vadd.f32 %v6238_v12, %v16758_v46  ;;  %v6240_v22 = vpop.f32.mrb[41].mxu0 }
0x324c   :  { %v6244_v58 = vadd.f32 %v6240_v22, %v16764_v59 }
0x324d   :  { %16183 = vtanh.f32 %v6243_v9 }
0x324e   :  { %16185 = vtanh.f32 %v6244_v58 }
0x3257   :  { %v16184_v15 = vpop.eup %16183 }
0x3258   :  { %v16186_v6 = vpop.eup %16185  ;;  %v6247_v50 = vmul.f32 %v16184_v15, %v16558_v37 }
0x3259   :  { %v6248_v33 = vmul.f32 %v16186_v6, %v16561_v38 }
0x325a   :  { %v6249_v62 = vadd.f32 %v6247_v50, %v16564_v39 }
0x325b   :  { %v6250_v45 = vadd.f32 %v6248_v33, %v16567_v41 }
0x325c   :  { %v6251_v35 = vmul.f32 %v6249_v62, %v18449_v14  ;;  %v6684_v14 = vld [vmem:[%s21285_s1 + $0x38] sm:$0xff] }
0x325d   :  { %v6252_v25 = vmul.f32 %v6250_v45, %v6249_v62  ;;  %v18564_v20 = vpack.c.bf16 %v6684_v14, %v6682_v32  ;;  %v6665_v14 = vld [vmem:[%s21292_s5 + $0x20] sm:$0xff] }
0x325e   :  { %v18697_v61 = vpack.c.bf16 %v6667_v17, %v6665_v14 }
0x325f   :  { %6254 = vrot.lane.b32.xlu0 %v6252_v25, %s16406_s7 }
0x32d1   :  { %v6255_v31 = vpop.permute.xlu0 %6254 }
0x32d2   :  { %v18516_v52 = vadd.f32 %v6255_v31, %v6251_v35 }
0x32d4   :  { %16187 = vtanh.f32 %v18516_v52 }
0x32de   :  { %v16188_v34 = vpop.eup %16187 }
0x32df   :  { %v6259_v49 = vmul.f32 %v16188_v34, %v6250_v45 }
0x32e1   :  { %6261 = vrot.lane.b32.xlu1 %v6259_v49, %s16406_s7  ;;  %v6662_v49 = vld [vmem:[%s21292_s5 + $0x8] sm:$0xff] }
0x3353   :  { %v6262_v0 = vpop.permute.xlu1 %6261 }
0x3354   :  { %13480 = vst.msk [vmem:[%s21293_s9 + $0x28] sm:$0xff] %vm98_vm0, %v6262_v0  ;;  %13482 = vmatmul.mubr.msk.f32.vlgmr.msra.gmra.mrb[42].mxu1 %vm98_vm0, %v6262_v0  ;;  %13483 = vmatmul.mubr.msk.f32.vlgmr.msra.gmra.mrb[42].mxu0 %vm98_vm0, %v6262_v0  ;;  %v6664_v0 = vld [vmem:[%s21292_s5 + $0x18] sm:$0xff] }
0x3355   :  { %14710 = vmatpush1.bf16.msra.mxu0 %v18363_v16  ;;  %6631 = vmatprep.mubr.f32.mxu0 %v16405_v3 }
0x3356   :  { %14712 = vmatprep.subr.bf16.mxu0 %v18365_v30  ;;  %6757 = vmatprep.mubr.f32.mxu1 %v16405_v3 }
0x3359   :  { %14714 = vmatpush1.bf16.msra.mxu0 %v18381_v42 }
0x335a   :  { %14716 = vmatprep.subr.bf16.mxu0 %v18384_v47 }
0x335d   :  { %14718 = vmatpush1.bf16.msra.mxu0 %v18399_v1 }
0x335e   :  { %14720 = vmatprep.subr.bf16.mxu0 %v18402_v53 }
0x3361   :  { %14722 = vmatpush1.bf16.msra.mxu0 %v18411_v5  ;;  %v6678_v5 = vld [vmem:[%s21285_s1 + $0x8] sm:$0xff] }
0x3362   :  { %v18551_v2 = vpack.c.bf16 %v6680_v29, %v6678_v5  ;;  %v6668_v5 = vld [vmem:[%s21292_s5 + $0x38] sm:$0xff]  ;;  %v6875_v29 = vld [vmem:[%s21289_s3 + $0x28] sm:$0xff] }
0x3363   :  { %v18685_v32 = vpack.c.bf16 %v6877_v55, %v6875_v29 }
0x3364   :  { %14724 = vmatprep.subr.bf16.mxu1 %v18551_v2 }
0x3365   :  { %14726 = vmatpush1.bf16.msra.mxu1 %v18562_v28 }
0x3366   :  { %14728 = vmatprep.subr.bf16.mxu1 %v18564_v20 }
0x3369   :  { %14730 = vmatpush1.bf16.msra.mxu1 %v18580_v60 }
0x336a   :  { %14732 = vmatprep.subr.bf16.mxu1 %v18583_v51 }
0x336d   :  { %14734 = vmatpush1.bf16.msra.mxu1 %v18598_v23 }
0x336e   :  { %14736 = vmatprep.subr.bf16.mxu1 %v18601_v21 }
0x3371   :  { %14738 = vmatpush1.bf16.msra.mxu1 %v18610_v36 }
0x3427   :  { %v6437_v63 = vpop.f32.mrb[42].mxu1 }
0x3428   :  { %v6442_v18 = vadd.f32 %v6437_v63, %v17863_v48  ;;  %v6439_v16 = vpop.f32.mrb[43].mxu1  ;;  %v6871_v63 = vld [vmem:[%s21289_s3 + $0x8] sm:$0xff] }
0x3429   :  { %v6443_v13 = vadd.f32 %v6439_v16, %v17866_v4  ;;  %v6873_v16 = vld [vmem:[%s21289_s3 + $0x18] sm:$0xff] }
0x342a   :  { %16189 = vtanh.f32 %v6442_v18  ;;  %v18645_v18 = vpack.c.bf16 %v6664_v0, %v6662_v49  ;;  %v6882_v0 = vld [vmem:[%s21289_s3 + $0x60] sm:$0xff] }
0x342b   :  { %16191 = vtanh.f32 %v6443_v13  ;;  %v6661_v13 = vld [vmem:[%s21292_s5] sm:$0xff] }
0x342c   :  { %14740 = vmatprep.subr.bf16.mxu1 %v18645_v18 }
0x3434   :  { %v16190_v30 = vpop.eup %16189 }
0x3435   :  { %v16192_v43 = vpop.eup %16191  ;;  %v6446_v42 = vmul.f32 %v16190_v30, %v16558_v37  ;;  %v6663_v30 = vld [vmem:[%s21292_s5 + $0x10] sm:$0xff] }
0x3436   :  { %v6447_v47 = vmul.f32 %v16192_v43, %v16561_v38  ;;  %v18656_v43 = vpack.c.bf16 %v6873_v16, %v6871_v63  ;;  %v6884_v63 = vld [vmem:[%s21289_s3 + $0x70] sm:$0xff] }
0x3437   :  { %v6448_v1 = vadd.f32 %v6446_v42, %v16564_v39  ;;  %v18658_v42 = vpack.c.bf16 %v6663_v30, %v6661_v13  ;;  %v18775_v13 = vpack.c.bf16 %v6884_v63, %v6882_v0  ;;  %v6863_v0 = vld [vmem:[%s21290_s2 + $0x48] sm:$0xff]  ;;  %v6865_v63 = vld [vmem:[%s21290_s2 + $0x58] sm:$0xff] }
0x3438   :  { %v6449_v53 = vadd.f32 %v6447_v47, %v16567_v41  ;;  %v6870_v47 = vld [vmem:[%s21289_s3] sm:$0xff]  ;;  %14756 = vmatprep.subr.bf16.mxu0 %v18656_v43 }
0x3439   :  { %v6450_v26 = vmul.f32 %v6448_v1, %v18485_v27 }
0x343a   :  { %v6451_v44 = vmul.f32 %v6449_v53, %v6448_v1  ;;  %v6872_v1 = vld [vmem:[%s21289_s3 + $0x10] sm:$0xff] }
0x343c   :  { %6453 = vrot.lane.b32.xlu0 %v6451_v44, %s16406_s7  ;;  %v18670_v44 = vpack.c.bf16 %v6872_v1, %v6870_v47 }
0x34ae   :  { %v6454_v40 = vpop.permute.xlu0 %6453 }
0x34af   :  { %v18615_v12 = vadd.f32 %v6454_v40, %v6450_v26  ;;  %v6669_v26 = vld [vmem:[%s21292_s5 + $0x40] sm:$0xff]  ;;  %v18723_v40 = vpack.c.bf16 %v6881_v11, %v6879_v8  ;;  %v6855_v11 = vld [vmem:[%s21290_s2 + $0x8] sm:$0xff] }
0x34b1   :  { %16193 = vtanh.f32 %v18615_v12 }
0x34bb   :  { %v16194_v9 = vpop.eup %16193 }
0x34bc   :  { %v6458_v22 = vmul.f32 %v16194_v9, %v6449_v53  ;;  %v6666_v53 = vld [vmem:[%s21292_s5 + $0x28] sm:$0xff]  ;;  %v6671_v9 = vld [vmem:[%s21292_s5 + $0x50] sm:$0xff] }
0x34bd   :  { %v18683_v54 = vpack.c.bf16 %v6668_v5, %v6666_v53 }
0x34be   :  { %6563 = vrot.lane.b32.xlu1 %v6458_v22, %s16406_s7  ;;  %v6878_v22 = vld [vmem:[%s21289_s3 + $0x40] sm:$0xff] }
0x3530   :  { %v6564_v58 = vpop.permute.xlu1 %6563 }
0x3531   :  { %13484 = vmatmul.mubr.msk.f32.vlgmr.msra.gmra.mrb[42].mxu0 %vm98_vm0, %v6564_v58  ;;  %13486 = vmatmul.mubr.msk.f32.vlgmr.msra.gmra.mrb[44].mxu1 %vm98_vm0, %v6564_v58  ;;  %v6880_v58 = vld [vmem:[%s21289_s3 + $0x50] sm:$0xff] }
0x3532   :  { %6830 = vmatprep.mubr.f32.mxu1 %v16405_v3  ;;  %6950 = vmatprep.mubr.f32.mxu0 %v16405_v3 }
0x3533   :  { %14742 = vmatpush1.bf16.msra.mxu1 %v18658_v42  ;;  %14758 = vmatpush1.bf16.msra.mxu0 %v18670_v44 }
0x3534   :  { %14744 = vmatprep.subr.bf16.mxu1 %v18683_v54  ;;  %14760 = vmatprep.subr.bf16.mxu0 %v18685_v32 }
0x3537   :  { %14746 = vmatpush1.bf16.msra.mxu1 %v18697_v61  ;;  %14762 = vmatpush1.bf16.msra.mxu0 %v18710_v7 }
0x3538   :  { %14748 = vmatprep.subr.bf16.mxu1 %v18712_v10  ;;  %14764 = vmatprep.subr.bf16.mxu0 %v18723_v40 }
0x3604   :  { %v6633_v15 = vpop.f32.mrb[42].mxu0 }
0x3605   :  { %v6638_v27 = vadd.f32 %v6633_v15, %v16758_v46  ;;  %v6635_v6 = vpop.f32.mrb[43].mxu0  ;;  %v18735_v15 = vpack.c.bf16 %v6671_v9, %v6669_v26  ;;  %v6857_v26 = vld [vmem:[%s21290_s2 + $0x18] sm:$0xff]  ;;  %v6854_v9 = vld [vmem:[%s21290_s2] sm:$0xff] }
0x3606   :  { %v6639_v50 = vadd.f32 %v6635_v6, %v16764_v59  ;;  %v6676_v6 = vld [vmem:[%s21292_s5 + $0x78] sm:$0xff] }
0x3607   :  { %16195 = vtanh.f32 %v6638_v27  ;;  %v6674_v27 = vld [vmem:[%s21292_s5 + $0x68] sm:$0xff]  ;;  %14750 = vmatpush1.bf16.msra.mxu1 %v18735_v15 }
0x3608   :  { %16197 = vtanh.f32 %v6639_v50  ;;  %v6883_v50 = vld [vmem:[%s21289_s3 + $0x68] sm:$0xff] }
0x3611   :  { %v16196_v33 = vpop.eup %16195 }
0x3612   :  { %v16198_v62 = vpop.eup %16197  ;;  %v6642_v45 = vmul.f32 %v16196_v33, %v16558_v37  ;;  %v18748_v33 = vpack.c.bf16 %v6880_v58, %v6878_v22  ;;  %v18820_v22 = vpack.c.bf16 %v6857_v26, %v6855_v11  ;;  %v6856_v58 = vld [vmem:[%s21290_s2 + $0x10] sm:$0xff] }
0x3613   :  { %v6643_v25 = vmul.f32 %v16198_v62, %v16561_v38  ;;  %v18750_v62 = vpack.c.bf16 %v6676_v6, %v6674_v27  ;;  %v6859_v27 = vld [vmem:[%s21290_s2 + $0x28] sm:$0xff]  ;;  %v6861_v6 = vld [vmem:[%s21290_s2 + $0x38] sm:$0xff] }
0x3614   :  { %v18628_v35 = vadd.f32 %v6642_v45, %v16564_v39  ;;  %v6885_v45 = vld [vmem:[%s21289_s3 + $0x78] sm:$0xff]  ;;  %14766 = vmatpush1.bf16.msra.mxu0 %v18748_v33 }
0x3615   :  { %v18631_v31 = vadd.f32 %v6643_v25, %v16567_v41  ;;  %v6673_v25 = vld [vmem:[%s21292_s5 + $0x60] sm:$0xff]  ;;  %v18762_v49 = vpack.c.bf16 %v6885_v45, %v6883_v50  ;;  %14752 = vmatprep.subr.bf16.mxu1 %v18750_v62  ;;  %v18831_v50 = vpack.c.bf16 %v6856_v58, %v6854_v9  ;;  %v18833_v45 = vpack.c.bf16 %v6861_v6, %v6859_v27 }
0x3616   :  { %v6646_v30 = vmul.f32 %v18628_v35, %v18516_v52 }
0x3617   :  { %v6647_v34 = vmul.f32 %v18631_v31, %v18628_v35  ;;  %14768 = vmatprep.subr.bf16.mxu0 %v18762_v49 }
0x3618   :  { %14770 = vmatpush1.bf16.msra.mxu0 %v18775_v13 }
0x3619   :  { %6649 = vrot.lane.b32.xlu0 %v6647_v34, %s16406_s7  ;;  %v6675_v34 = vld [vmem:[%s21292_s5 + $0x70] sm:$0xff]  ;;  %14772 = vmatprep.subr.bf16.mxu0 %v18820_v22 }
0x361a   :  { %v18771_v16 = vpack.c.bf16 %v6675_v34, %v6673_v25  ;;  %v6858_v25 = vld [vmem:[%s21290_s2 + $0x20] sm:$0xff]  ;;  %v6860_v34 = vld [vmem:[%s21290_s2 + $0x30] sm:$0xff] }
0x361c   :  { %14754 = vmatpush1.bf16.msra.mxu1 %v18771_v16 }
0x361d   :  { %14788 = vmatprep.subr.bf16.mxu1 %v18551_v2 }
0x368b   :  { %v6650_v47 = vpop.permute.xlu0 %6649 }
0x368c   :  { %v18783_v1 = vadd.f32 %v6650_v47, %v6646_v30  ;;  %v18849_v30 = vpack.c.bf16 %v6860_v34, %v6858_v25  ;;  %v18852_v47 = vpack.c.bf16 %v6865_v63, %v6863_v0 }
0x368e   :  { %16199 = vtanh.f32 %v18783_v1 }
0x3698   :  { %v16200_v53 = vpop.eup %16199 }
0x3699   :  { %v6654_v5 = vmul.f32 %v16200_v53, %v18631_v31  ;;  %v6862_v53 = vld [vmem:[%s21290_s2 + $0x40] sm:$0xff] }
0x369b   :  { %6656 = vrot.lane.b32.xlu1 %v6654_v5, %s16406_s7  ;;  %v6864_v5 = vld [vmem:[%s21290_s2 + $0x50] sm:$0xff] }
0x370d   :  { %v6657_v29 = vpop.permute.xlu1 %6656 }
0x370e   :  { %13485 = vst.msk [vmem:[%s21293_s9 + $0x30] sm:$0xff] %vm98_vm0, %v6657_v29  ;;  %13487 = vmatmul.mubr.msk.f32.vlgmr.msra.gmra.mrb[44].mxu1 %vm98_vm0, %v6657_v29  ;;  %13488 = vmatmul.mubr.msk.f32.vlgmr.msra.gmra.mrb[44].mxu0 %vm98_vm0, %v6657_v29  ;;  %v6867_v29 = vld [vmem:[%s21290_s2 + $0x68] sm:$0xff] }
0x370f   :  { %14790 = vmatpush1.bf16.msra.mxu1 %v18562_v28  ;;  %7026 = vmatprep.mubr.f32.mxu0 %v16405_v3 }
0x3710   :  { %14792 = vmatprep.subr.bf16.mxu1 %v18564_v20  ;;  %7152 = vmatprep.mubr.f32.mxu1 %v16405_v3 }
0x3711   :  { %14774 = vmatpush1.bf16.msra.mxu0 %v18831_v50 }
0x3712   :  { %14776 = vmatprep.subr.bf16.mxu0 %v18833_v45 }
0x3713   :  { %14794 = vmatpush1.bf16.msra.mxu1 %v18580_v60 }
0x3714   :  { %14796 = vmatprep.subr.bf16.mxu1 %v18583_v51 }
0x3715   :  { %14778 = vmatpush1.bf16.msra.mxu0 %v18849_v30 }
0x3716   :  { %14780 = vmatprep.subr.bf16.mxu0 %v18852_v47 }
0x3717   :  { %14798 = vmatpush1.bf16.msra.mxu1 %v18598_v23 }
0x3718   :  { %14800 = vmatprep.subr.bf16.mxu1 %v18601_v21 }
0x371b   :  { %14802 = vmatpush1.bf16.msra.mxu1 %v18610_v36 }
0x371c   :  { %14804 = vmatprep.subr.bf16.mxu1 %v18645_v18 }
0x37e1   :  { %v6832_v52 = vpop.f32.mrb[44].mxu1 }
0x37e2   :  { %v6837_v35 = vadd.f32 %v6832_v52, %v17863_v48  ;;  %v6834_v31 = vpop.f32.mrb[45].mxu1  ;;  %v6869_v52 = vld [vmem:[%s21290_s2 + $0x78] sm:$0xff] }
0x37e3   :  { %v6838_v55 = vadd.f32 %v6834_v31, %v17866_v4  ;;  %v18870_v31 = vpack.c.bf16 %v6869_v52, %v6867_v29 }
0x37e4   :  { %16201 = vtanh.f32 %v6837_v35  ;;  %v18867_v35 = vpack.c.bf16 %v6864_v5, %v6862_v53 }
0x37e5   :  { %16203 = vtanh.f32 %v6838_v55  ;;  %v6866_v55 = vld [vmem:[%s21290_s2 + $0x60] sm:$0xff] }
0x37e6   :  { %14782 = vmatpush1.bf16.msra.mxu0 %v18867_v35 }
0x37e7   :  { %14784 = vmatprep.subr.bf16.mxu0 %v18870_v31 }
0x37ee   :  { %v16202_v14 = vpop.eup %16201 }
0x37ef   :  { %v16204_v17 = vpop.eup %16203  ;;  %v6841_v19 = vmul.f32 %v16202_v14, %v16558_v37  ;;  %v6868_v14 = vld [vmem:[%s21290_s2 + $0x70] sm:$0xff] }
0x37f0   :  { %v6842_v24 = vmul.f32 %v16204_v17, %v16561_v38  ;;  %v18879_v17 = vpack.c.bf16 %v6868_v14, %v6866_v55 }
0x37f1   :  { %v6843_v56 = vadd.f32 %v6841_v19, %v16564_v39 }
0x37f2   :  { %v6844_v57 = vadd.f32 %v6842_v24, %v16567_v41  ;;  %14786 = vmatpush1.bf16.msra.mxu0 %v18879_v17 }
0x37f3   :  { %14820 = vmatprep.subr.bf16.mxu0 %v18656_v43  ;;  %v6845_v19 = vmul.f32 %v6843_v56, %v18615_v12 }
0x37f4   :  { %v6846_v8 = vmul.f32 %v6844_v57, %v6843_v56 }
0x37f6   :  { %6848 = vrot.lane.b32.xlu0 %v6846_v8, %s16406_s7 }
0x3868   :  { %v6849_v24 = vpop.permute.xlu0 %6848 }
0x3869   :  { %v18885_v8 = vadd.f32 %v6849_v24, %v6845_v19 }
0x386b   :  { %16205 = vtanh.f32 %v18885_v8 }
0x3875   :  { %v16206_v11 = vpop.eup %16205 }
0x3876   :  { %v6853_v26 = vmul.f32 %v16206_v11, %v6844_v57 }
0x3878   :  { %6958 = vrot.lane.b32.xlu1 %v6853_v26, %s16406_s7 }
0x38ea   :  { %v6959_v9 = vpop.permute.xlu1 %6958 }
0x38eb   :  { %13489 = vmatmul.mubr.msk.f32.vlgmr.msra.gmra.mrb[44].mxu0 %vm98_vm0, %v6959_v9  ;;  %13491 = vmatmul.mubr.msk.f32.vlgmr.msra.gmra.mrb[46].mxu1 %vm98_vm0, %v6959_v9 }
0x38ec   :  { %14806 = vmatpush1.bf16.msra.mxu1 %v18658_v42  ;;  %14822 = vmatpush1.bf16.msra.mxu0 %v18670_v44 }
0x38ed   :  { %14808 = vmatprep.subr.bf16.mxu1 %v18683_v54  ;;  %14824 = vmatprep.subr.bf16.mxu0 %v18685_v32 }
0x38ee   :  { %7225 = vmatprep.mubr.f32.mxu1 %v16405_v3  ;;  %7345 = vmatprep.mubr.f32.mxu0 %v16405_v3 }
0x38f0   :  { %14810 = vmatpush1.bf16.msra.mxu1 %v18697_v61  ;;  %14826 = vmatpush1.bf16.msra.mxu0 %v18710_v7 }
0x38f1   :  { %14812 = vmatprep.subr.bf16.mxu1 %v18712_v10  ;;  %14828 = vmatprep.subr.bf16.mxu0 %v18723_v40 }
0x38f4   :  { %14814 = vmatpush1.bf16.msra.mxu1 %v18735_v15  ;;  %14830 = vmatpush1.bf16.msra.mxu0 %v18748_v33 }
0x38f5   :  { %14816 = vmatprep.subr.bf16.mxu1 %v18750_v62  ;;  %14832 = vmatprep.subr.bf16.mxu0 %v18762_v49 }
0x38f8   :  { %14818 = vmatpush1.bf16.msra.mxu1 %v18771_v16  ;;  %14834 = vmatpush1.bf16.msra.mxu0 %v18775_v13 }
0x38f9   :  { %14836 = vmatprep.subr.bf16.mxu0 %v18820_v22  ;;  %14852 = vmatprep.subr.bf16.mxu1 %v18551_v2 }
0x39be   :  { %v7028_v12 = vpop.f32.mrb[44].mxu0 }
0x39bf   :  { %v7033_v56 = vadd.f32 %v7028_v12, %v16758_v46  ;;  %v7030_v57 = vpop.f32.mrb[45].mxu0 }
0x39c0   :  { %v7034_v58 = vadd.f32 %v7030_v57, %v16764_v59 }
0x39c1   :  { %16207 = vtanh.f32 %v7033_v56 }
0x39c2   :  { %16209 = vtanh.f32 %v7034_v58 }
0x39cb   :  { %v16208_v27 = vpop.eup %16207 }
0x39cc   :  { %v16210_v6 = vpop.eup %16209  ;;  %v7037_v25 = vmul.f32 %v16208_v27, %v16558_v37 }
0x39cd   :  { %v7038_v34 = vmul.f32 %v16210_v6, %v16561_v38 }
0x39ce   :  { %v7039_v0 = vadd.f32 %v7037_v25, %v16564_v39 }
0x39cf   :  { %v7040_v63 = vadd.f32 %v7038_v34, %v16567_v41 }
0x39d0   :  { %v7041_v2 = vmul.f32 %v7039_v0, %v18783_v1 }
0x39d1   :  { %v7042_v53 = vmul.f32 %v7040_v63, %v7039_v0  ;;  %v7865_v0 = vld [vmem:[%s21285_s1 + $0x18] sm:$0xff] }
0x39d3   :  { %7044 = vrot.lane.b32.xlu0 %v7042_v53, %s16406_s7 }
0x3a45   :  { %v7045_v5 = vpop.permute.xlu0 %7044 }
0x3a46   :  { %v18917_v29 = vadd.f32 %v7045_v5, %v7041_v2  ;;  %v7864_v2 = vld [vmem:[%s21285_s1 + $0x10] sm:$0xff]  ;;  %v7867_v5 = vld [vmem:[%s21285_s1 + $0x28] sm:$0xff] }
0x3a48   :  { %16211 = vtanh.f32 %v18917_v29 }
0x3a52   :  { %v16212_v52 = vpop.eup %16211 }
0x3a53   :  { %v7049_v55 = vmul.f32 %v16212_v52, %v7040_v63  ;;  %v7862_v63 = vld [vmem:[%s21285_s1] sm:$0xff] }
0x3a54   :  { %v19030_v52 = vpack.c.bf16 %v7864_v2, %v7862_v63  ;;  %v8062_v63 = vld [vmem:[%s21289_s3 + $0x38] sm:$0xff] }
0x3a55   :  { %7051 = vrot.lane.b32.xlu1 %v7049_v55, %s16406_s7 }
0x3ac7   :  { %v7052_v14 = vpop.permute.xlu1 %7051 }
0x3ac8   :  { %13490 = vst.msk [vmem:[%s21293_s9 + $0x38] sm:$0xff] %vm98_vm0, %v7052_v14  ;;  %13492 = vmatmul.mubr.msk.f32.vlgmr.msra.gmra.mrb[46].mxu1 %vm98_vm0, %v7052_v14  ;;  %13493 = vmatmul.mubr.msk.f32.vlgmr.msra.gmra.mrb[46].mxu0 %vm98_vm0, %v7052_v14  ;;  %v7866_v14 = vld [vmem:[%s21285_s1 + $0x20] sm:$0xff] }
0x3ac9   :  { %14838 = vmatpush1.bf16.msra.mxu0 %v18831_v50  ;;  %14854 = vmatpush1.bf16.msra.mxu1 %v18562_v28 }
0x3aca   :  { %14840 = vmatprep.subr.bf16.mxu0 %v18833_v45  ;;  %14856 = vmatprep.subr.bf16.mxu1 %v18564_v20 }
0x3acb   :  { %7421 = vmatprep.mubr.f32.mxu0 %v16405_v3  ;;  %7547 = vmatprep.mubr.f32.mxu1 %v16405_v3 }
0x3acd   :  { %14842 = vmatpush1.bf16.msra.mxu0 %v18849_v30  ;;  %14858 = vmatpush1.bf16.msra.mxu1 %v18580_v60 }
0x3ace   :  { %14844 = vmatprep.subr.bf16.mxu0 %v18852_v47  ;;  %14860 = vmatprep.subr.bf16.mxu1 %v18583_v51 }
0x3ad1   :  { %14846 = vmatpush1.bf16.msra.mxu0 %v18867_v35  ;;  %14862 = vmatpush1.bf16.msra.mxu1 %v18598_v23 }
0x3ad2   :  { %14848 = vmatprep.subr.bf16.mxu0 %v18870_v31  ;;  %14864 = vmatprep.subr.bf16.mxu1 %v18601_v21 }
0x3ad5   :  { %14850 = vmatpush1.bf16.msra.mxu0 %v18879_v17  ;;  %14866 = vmatpush1.bf16.msra.mxu1 %v18610_v36 }
0x3ad6   :  { %14868 = vmatprep.subr.bf16.mxu1 %v18645_v18  ;;  %14884 = vmatprep.subr.bf16.mxu0 %v18656_v43 }
0x3b9b   :  { %v7227_v28 = vpop.f32.mrb[46].mxu1 }
0x3b9c   :  { %v7232_v20 = vadd.f32 %v7227_v28, %v17863_v48  ;;  %v7229_v60 = vpop.f32.mrb[47].mxu1  ;;  %v7868_v28 = vld [vmem:[%s21285_s1 + $0x30] sm:$0xff] }
0x3b9d   :  { %v7233_v51 = vadd.f32 %v7229_v60, %v17866_v4  ;;  %v7873_v60 = vld [vmem:[%s21285_s1 + $0x58] sm:$0xff] }
0x3b9e   :  { %16213 = vtanh.f32 %v7232_v20  ;;  %v7871_v20 = vld [vmem:[%s21285_s1 + $0x48] sm:$0xff] }
0x3b9f   :  { %16215 = vtanh.f32 %v7233_v51  ;;  %v19048_v51 = vpack.c.bf16 %v7868_v28, %v7866_v14  ;;  %v7852_v14 = vld [vmem:[%s21292_s5 + $0x30] sm:$0xff]  ;;  %v8059_v28 = vld [vmem:[%s21289_s3 + $0x20] sm:$0xff] }
0x3ba8   :  { %v16214_v23 = vpop.eup %16213 }
0x3ba9   :  { %v16216_v1 = vpop.eup %16215  ;;  %v7236_v21 = vmul.f32 %v16214_v23, %v16558_v37  ;;  %v19051_v23 = vpack.c.bf16 %v7873_v60, %v7871_v20  ;;  %v8061_v60 = vld [vmem:[%s21289_s3 + $0x30] sm:$0xff] }
0x3baa   :  { %v7237_v19 = vmul.f32 %v16216_v1, %v16561_v38  ;;  %v7870_v1 = vld [vmem:[%s21285_s1 + $0x40] sm:$0xff] }
0x3bab   :  { %v7238_v36 = vadd.f32 %v7236_v21, %v16564_v39  ;;  %v7872_v21 = vld [vmem:[%s21285_s1 + $0x50] sm:$0xff] }
0x3bac   :  { %v7239_v18 = vadd.f32 %v7237_v19, %v16567_v41  ;;  %v7875_v19 = vld [vmem:[%s21285_s1 + $0x68] sm:$0xff] }
0x3bad   :  { %v7240_v43 = vmul.f32 %v7238_v36, %v18885_v8 }
0x3bae   :  { %v7241_v24 = vmul.f32 %v7239_v18, %v7238_v36  ;;  %v7877_v36 = vld [vmem:[%s21285_s1 + $0x78] sm:$0xff] }
0x3bb0   :  { %7243 = vrot.lane.b32.xlu0 %v7241_v24, %s16406_s7  ;;  %v19069_v24 = vpack.c.bf16 %v7877_v36, %v7875_v19  ;;  %v19178_v19 = vpack.c.bf16 %v8061_v60, %v8059_v28 }
0x3c22   :  { %v7244_v11 = vpop.permute.xlu0 %7243 }
0x3c23   :  { %v18953_v26 = vadd.f32 %v7244_v11, %v7240_v43  ;;  %v7874_v43 = vld [vmem:[%s21285_s1 + $0x60] sm:$0xff]  ;;  %v7876_v11 = vld [vmem:[%s21285_s1 + $0x70] sm:$0xff] }
0x3c25   :  { %16217 = vtanh.f32 %v18953_v26 }
0x3c2f   :  { %v16218_v9 = vpop.eup %16217 }
0x3c30   :  { %v7248_v12 = vmul.f32 %v16218_v9, %v7239_v18  ;;  %v19066_v18 = vpack.c.bf16 %v7872_v21, %v7870_v1  ;;  %v19078_v9 = vpack.c.bf16 %v7876_v11, %v7874_v43  ;;  %v7855_v1 = vld [vmem:[%s21292_s5 + $0x48] sm:$0xff]  ;;  %v7857_v21 = vld [vmem:[%s21292_s5 + $0x58] sm:$0xff] }
0x3c31   :  { %v19180_v36 = vpack.c.bf16 %v7857_v21, %v7855_v1  ;;  %v8064_v43 = vld [vmem:[%s21289_s3 + $0x48] sm:$0xff]  ;;  %v8066_v11 = vld [vmem:[%s21289_s3 + $0x58] sm:$0xff] }
0x3c32   :  { %7353 = vrot.lane.b32.xlu1 %v7248_v12, %s16406_s7 }
0x3ca4   :  { %v7354_v56 = vpop.permute.xlu1 %7353 }
0x3ca5   :  { %13494 = vmatmul.mubr.msk.f32.vlgmr.msra.gmra.mrb[46].mxu0 %vm98_vm0, %v7354_v56  ;;  %13496 = vmatmul.mubr.msk.f32.vlgmr.msra.gmra.mrb[48].mxu1 %vm98_vm0, %v7354_v56 }
0x3ca6   :  { %14870 = vmatpush1.bf16.msra.mxu1 %v18658_v42  ;;  %14886 = vmatpush1.bf16.msra.mxu0 %v18670_v44 }
0x3ca7   :  { %14872 = vmatprep.subr.bf16.mxu1 %v18683_v54  ;;  %14888 = vmatprep.subr.bf16.mxu0 %v18685_v32 }
0x3ca8   :  { %7620 = vmatprep.mubr.f32.mxu1 %v16405_v3  ;;  %7740 = vmatprep.mubr.f32.mxu0 %v16405_v3 }
0x3caa   :  { %14874 = vmatpush1.bf16.msra.mxu1 %v18697_v61  ;;  %14890 = vmatpush1.bf16.msra.mxu0 %v18710_v7 }
0x3cab   :  { %14876 = vmatprep.subr.bf16.mxu1 %v18712_v10  ;;  %14892 = vmatprep.subr.bf16.mxu0 %v18723_v40 }
0x3cae   :  { %14878 = vmatpush1.bf16.msra.mxu1 %v18735_v15  ;;  %14894 = vmatpush1.bf16.msra.mxu0 %v18748_v33 }
0x3caf   :  { %14880 = vmatprep.subr.bf16.mxu1 %v18750_v62  ;;  %14896 = vmatprep.subr.bf16.mxu0 %v18762_v49 }
0x3cb2   :  { %14882 = vmatpush1.bf16.msra.mxu1 %v18771_v16  ;;  %14898 = vmatpush1.bf16.msra.mxu0 %v18775_v13 }
0x3cb3   :  { %14900 = vmatprep.subr.bf16.mxu0 %v18820_v22 }
0x3d78   :  { %v7423_v42 = vpop.f32.mrb[46].mxu0 }
0x3d79   :  { %v7428_v44 = vadd.f32 %v7423_v42, %v16758_v46  ;;  %v7425_v54 = vpop.f32.mrb[47].mxu0 }
0x3d7a   :  { %v7429_v32 = vadd.f32 %v7425_v54, %v16764_v59 }
0x3d7b   :  { %16219 = vtanh.f32 %v7428_v44 }
0x3d7c   :  { %16221 = vtanh.f32 %v7429_v32 }
0x3d85   :  { %v16220_v61 = vpop.eup %16219 }
0x3d86   :  { %v16222_v7 = vpop.eup %16221  ;;  %v7432_v10 = vmul.f32 %v16220_v61, %v16558_v37 }
0x3d87   :  { %v7433_v40 = vmul.f32 %v16222_v7, %v16561_v38 }
0x3d88   :  { %v7434_v15 = vadd.f32 %v7432_v10, %v16564_v39 }
0x3d89   :  { %v7435_v33 = vadd.f32 %v7433_v40, %v16567_v41 }
0x3d8a   :  { %v7436_v49 = vmul.f32 %v7434_v15, %v18917_v29  ;;  %v7869_v29 = vld [vmem:[%s21285_s1 + $0x38] sm:$0xff] }
0x3d8b   :  { %v7437_v62 = vmul.f32 %v7435_v33, %v7434_v15  ;;  %v19032_v55 = vpack.c.bf16 %v7869_v29, %v7867_v5  ;;  %v7850_v29 = vld [vmem:[%s21292_s5 + $0x20] sm:$0xff] }
0x3d8c   :  { %v19165_v20 = vpack.c.bf16 %v7852_v14, %v7850_v29 }
0x3d8d   :  { %7439 = vrot.lane.b32.xlu0 %v7437_v62, %s16406_s7 }
0x3dff   :  { %v7440_v16 = vpop.permute.xlu0 %7439 }
0x3e00   :  { %v18984_v13 = vadd.f32 %v7440_v16, %v7436_v49 }
0x3e02   :  { %16223 = vtanh.f32 %v18984_v13 }
0x3e0c   :  { %v16224_v22 = vpop.eup %16223 }
0x3e0d   :  { %v7444_v8 = vmul.f32 %v16224_v22, %v7435_v33 }
0x3e0f   :  { %7446 = vrot.lane.b32.xlu1 %v7444_v8, %s16406_s7  ;;  %v7847_v8 = vld [vmem:[%s21292_s5 + $0x8] sm:$0xff] }
0x3e81   :  { %v7447_v57 = vpop.permute.xlu1 %7446 }
0x3e82   :  { %13495 = vst.msk [vmem:[%s21293_s9 + $0x40] sm:$0xff] %vm98_vm0, %v7447_v57  ;;  %13497 = vmatmul.mubr.msk.f32.vlgmr.msra.gmra.mrb[48].mxu1 %vm98_vm0, %v7447_v57  ;;  %13498 = vmatmul.mubr.msk.f32.vlgmr.msra.gmra.mrb[48].mxu0 %vm98_vm0, %v7447_v57  ;;  %v7849_v57 = vld [vmem:[%s21292_s5 + $0x18] sm:$0xff] }
0x3e83   :  { %14902 = vmatpush1.bf16.msra.mxu0 %v18831_v50  ;;  %7816 = vmatprep.mubr.f32.mxu0 %v16405_v3 }
0x3e84   :  { %14904 = vmatprep.subr.bf16.mxu0 %v18833_v45  ;;  %7942 = vmatprep.mubr.f32.mxu1 %v16405_v3 }
0x3e87   :  { %14906 = vmatpush1.bf16.msra.mxu0 %v18849_v30 }
0x3e88   :  { %14908 = vmatprep.subr.bf16.mxu0 %v18852_v47 }
0x3e8b   :  { %14910 = vmatpush1.bf16.msra.mxu0 %v18867_v35 }
0x3e8c   :  { %14912 = vmatprep.subr.bf16.mxu0 %v18870_v31 }
0x3e8f   :  { %14914 = vmatpush1.bf16.msra.mxu0 %v18879_v17  ;;  %v7863_v17 = vld [vmem:[%s21285_s1 + $0x8] sm:$0xff] }
0x3e90   :  { %v19019_v53 = vpack.c.bf16 %v7865_v0, %v7863_v17  ;;  %v7853_v17 = vld [vmem:[%s21292_s5 + $0x38] sm:$0xff]  ;;  %v8060_v0 = vld [vmem:[%s21289_s3 + $0x28] sm:$0xff] }
0x3e91   :  { %v19153_v5 = vpack.c.bf16 %v8062_v63, %v8060_v0 }
0x3e92   :  { %14916 = vmatprep.subr.bf16.mxu1 %v19019_v53 }
0x3e93   :  { %14918 = vmatpush1.bf16.msra.mxu1 %v19030_v52 }
0x3e94   :  { %14920 = vmatprep.subr.bf16.mxu1 %v19032_v55 }
0x3e97   :  { %14922 = vmatpush1.bf16.msra.mxu1 %v19048_v51 }
0x3e98   :  { %14924 = vmatprep.subr.bf16.mxu1 %v19051_v23 }
0x3e9b   :  { %14926 = vmatpush1.bf16.msra.mxu1 %v19066_v18 }
0x3e9c   :  { %14928 = vmatprep.subr.bf16.mxu1 %v19069_v24 }
0x3e9f   :  { %14930 = vmatpush1.bf16.msra.mxu1 %v19078_v9 }
0x3f55   :  { %v7622_v58 = vpop.f32.mrb[48].mxu1 }
0x3f56   :  { %v7627_v27 = vadd.f32 %v7622_v58, %v17863_v48  ;;  %v7624_v50 = vpop.f32.mrb[49].mxu1  ;;  %v8056_v58 = vld [vmem:[%s21289_s3 + $0x8] sm:$0xff] }
0x3f57   :  { %v7628_v6 = vadd.f32 %v7624_v50, %v17866_v4  ;;  %v8058_v50 = vld [vmem:[%s21289_s3 + $0x18] sm:$0xff] }
0x3f58   :  { %16225 = vtanh.f32 %v7627_v27  ;;  %v19113_v27 = vpack.c.bf16 %v7849_v57, %v7847_v8  ;;  %v8067_v57 = vld [vmem:[%s21289_s3 + $0x60] sm:$0xff] }
0x3f59   :  { %16227 = vtanh.f32 %v7628_v6  ;;  %v7846_v6 = vld [vmem:[%s21292_s5] sm:$0xff] }
0x3f5a   :  { %14932 = vmatprep.subr.bf16.mxu1 %v19113_v27 }
0x3f62   :  { %v16226_v45 = vpop.eup %16225 }
0x3f63   :  { %v16228_v25 = vpop.eup %16227  ;;  %v7631_v30 = vmul.f32 %v16226_v45, %v16558_v37  ;;  %v7848_v45 = vld [vmem:[%s21292_s5 + $0x10] sm:$0xff] }
0x3f64   :  { %v7632_v47 = vmul.f32 %v16228_v25, %v16561_v38  ;;  %v19124_v25 = vpack.c.bf16 %v8058_v50, %v8056_v58  ;;  %v8069_v58 = vld [vmem:[%s21289_s3 + $0x70] sm:$0xff] }
0x3f65   :  { %v7633_v35 = vadd.f32 %v7631_v30, %v16564_v39  ;;  %v19126_v30 = vpack.c.bf16 %v7848_v45, %v7846_v6  ;;  %v19243_v6 = vpack.c.bf16 %v8069_v58, %v8067_v57  ;;  %v8048_v57 = vld [vmem:[%s21290_s2 + $0x48] sm:$0xff]  ;;  %v8050_v58 = vld [vmem:[%s21290_s2 + $0x58] sm:$0xff] }
0x3f66   :  { %v7634_v31 = vadd.f32 %v7632_v47, %v16567_v41  ;;  %v8055_v47 = vld [vmem:[%s21289_s3] sm:$0xff]  ;;  %14948 = vmatprep.subr.bf16.mxu0 %v19124_v25 }
0x3f67   :  { %v7635_v12 = vmul.f32 %v7633_v35, %v18953_v26 }
0x3f68   :  { %v7636_v34 = vmul.f32 %v7634_v31, %v7633_v35  ;;  %v8057_v35 = vld [vmem:[%s21289_s3 + $0x10] sm:$0xff] }
0x3f6a   :  { %7638 = vrot.lane.b32.xlu0 %v7636_v34, %s16406_s7  ;;  %v19138_v34 = vpack.c.bf16 %v8057_v35, %v8055_v47 }
0x3fdc   :  { %v7639_v56 = vpop.permute.xlu0 %7638 }
0x3fdd   :  { %v19083_v42 = vadd.f32 %v7639_v56, %v7635_v12  ;;  %v7854_v12 = vld [vmem:[%s21292_s5 + $0x40] sm:$0xff]  ;;  %v19191_v56 = vpack.c.bf16 %v8066_v11, %v8064_v43  ;;  %v8040_v11 = vld [vmem:[%s21290_s2 + $0x8] sm:$0xff] }
0x3fdf   :  { %16229 = vtanh.f32 %v19083_v42 }
0x3fe9   :  { %v16230_v44 = vpop.eup %16229 }
0x3fea   :  { %v7643_v54 = vmul.f32 %v16230_v44, %v7634_v31  ;;  %v7851_v31 = vld [vmem:[%s21292_s5 + $0x28] sm:$0xff]  ;;  %v7856_v44 = vld [vmem:[%s21292_s5 + $0x50] sm:$0xff] }
0x3feb   :  { %v19151_v2 = vpack.c.bf16 %v7853_v17, %v7851_v31 }
0x3fec   :  { %7748 = vrot.lane.b32.xlu1 %v7643_v54, %s16406_s7  ;;  %v8063_v54 = vld [vmem:[%s21289_s3 + $0x40] sm:$0xff] }
0x405e   :  { %v7749_v32 = vpop.permute.xlu1 %7748 }
0x405f   :  { %13499 = vmatmul.mubr.msk.f32.vlgmr.msra.gmra.mrb[48].mxu0 %vm98_vm0, %v7749_v32  ;;  %13501 = vmatmul.mubr.msk.f32.vlgmr.msra.gmra.mrb[50].mxu1 %vm98_vm0, %v7749_v32  ;;  %v8065_v32 = vld [vmem:[%s21289_s3 + $0x50] sm:$0xff] }
0x4060   :  { %8015 = vmatprep.mubr.f32.mxu1 %v16405_v3  ;;  %8135 = vmatprep.mubr.f32.mxu0 %v16405_v3 }
0x4061   :  { %14934 = vmatpush1.bf16.msra.mxu1 %v19126_v30  ;;  %14950 = vmatpush1.bf16.msra.mxu0 %v19138_v34 }
0x4062   :  { %14936 = vmatprep.subr.bf16.mxu1 %v19151_v2  ;;  %14952 = vmatprep.subr.bf16.mxu0 %v19153_v5 }
0x4065   :  { %14938 = vmatpush1.bf16.msra.mxu1 %v19165_v20  ;;  %14954 = vmatpush1.bf16.msra.mxu0 %v19178_v19 }
0x4066   :  { %14940 = vmatprep.subr.bf16.mxu1 %v19180_v36  ;;  %14956 = vmatprep.subr.bf16.mxu0 %v19191_v56 }
0x4132   :  { %v7818_v61 = vpop.f32.mrb[48].mxu0 }
0x4133   :  { %v7823_v26 = vadd.f32 %v7818_v61, %v16758_v46  ;;  %v7820_v7 = vpop.f32.mrb[49].mxu0  ;;  %v19203_v61 = vpack.c.bf16 %v7856_v44, %v7854_v12  ;;  %v8042_v12 = vld [vmem:[%s21290_s2 + $0x18] sm:$0xff]  ;;  %v8039_v44 = vld [vmem:[%s21290_s2] sm:$0xff] }
0x4134   :  { %v7824_v10 = vadd.f32 %v7820_v7, %v16764_v59  ;;  %v7861_v7 = vld [vmem:[%s21292_s5 + $0x78] sm:$0xff] }
0x4135   :  { %16231 = vtanh.f32 %v7823_v26  ;;  %v7859_v26 = vld [vmem:[%s21292_s5 + $0x68] sm:$0xff]  ;;  %14942 = vmatpush1.bf16.msra.mxu1 %v19203_v61 }
0x4136   :  { %16233 = vtanh.f32 %v7824_v10  ;;  %v8068_v10 = vld [vmem:[%s21289_s3 + $0x68] sm:$0xff] }
0x413f   :  { %v16232_v40 = vpop.eup %16231 }
0x4140   :  { %v16234_v15 = vpop.eup %16233  ;;  %v7827_v33 = vmul.f32 %v16232_v40, %v16558_v37  ;;  %v19216_v40 = vpack.c.bf16 %v8065_v32, %v8063_v54  ;;  %v19288_v54 = vpack.c.bf16 %v8042_v12, %v8040_v11  ;;  %v8041_v32 = vld [vmem:[%s21290_s2 + $0x10] sm:$0xff] }
0x4141   :  { %v7828_v62 = vmul.f32 %v16234_v15, %v16561_v38  ;;  %v19218_v15 = vpack.c.bf16 %v7861_v7, %v7859_v26  ;;  %v8044_v26 = vld [vmem:[%s21290_s2 + $0x28] sm:$0xff]  ;;  %v8046_v7 = vld [vmem:[%s21290_s2 + $0x38] sm:$0xff] }
0x4142   :  { %v19096_v49 = vadd.f32 %v7827_v33, %v16564_v39  ;;  %v8070_v33 = vld [vmem:[%s21289_s3 + $0x78] sm:$0xff]  ;;  %14958 = vmatpush1.bf16.msra.mxu0 %v19216_v40 }
0x4143   :  { %v19099_v16 = vadd.f32 %v7828_v62, %v16567_v41  ;;  %v7858_v62 = vld [vmem:[%s21292_s5 + $0x60] sm:$0xff]  ;;  %v19230_v8 = vpack.c.bf16 %v8070_v33, %v8068_v10  ;;  %14944 = vmatprep.subr.bf16.mxu1 %v19218_v15  ;;  %v19299_v10 = vpack.c.bf16 %v8041_v32, %v8039_v44  ;;  %v19301_v33 = vpack.c.bf16 %v8046_v7, %v8044_v26 }
0x4144   :  { %v7831_v45 = vmul.f32 %v19096_v49, %v18984_v13 }
0x4145   :  { %v7832_v22 = vmul.f32 %v19099_v16, %v19096_v49  ;;  %14960 = vmatprep.subr.bf16.mxu0 %v19230_v8 }
0x4146   :  { %14962 = vmatpush1.bf16.msra.mxu0 %v19243_v6 }
0x4147   :  { %7834 = vrot.lane.b32.xlu0 %v7832_v22, %s16406_s7  ;;  %v7860_v22 = vld [vmem:[%s21292_s5 + $0x70] sm:$0xff]  ;;  %14964 = vmatprep.subr.bf16.mxu0 %v19288_v54 }
0x4148   :  { %v19239_v50 = vpack.c.bf16 %v7860_v22, %v7858_v62  ;;  %v8043_v62 = vld [vmem:[%s21290_s2 + $0x20] sm:$0xff]  ;;  %v8045_v22 = vld [vmem:[%s21290_s2 + $0x30] sm:$0xff] }
0x414a   :  { %14946 = vmatpush1.bf16.msra.mxu1 %v19239_v50 }
0x414b   :  { %14980 = vmatprep.subr.bf16.mxu1 %v19019_v53 }
0x41b9   :  { %v7835_v47 = vpop.permute.xlu0 %7834 }
0x41ba   :  { %v19251_v35 = vadd.f32 %v7835_v47, %v7831_v45  ;;  %v19317_v45 = vpack.c.bf16 %v8045_v22, %v8043_v62  ;;  %v19320_v47 = vpack.c.bf16 %v8050_v58, %v8048_v57 }
0x41bc   :  { %16235 = vtanh.f32 %v19251_v35 }
0x41c6   :  { %v16236_v31 = vpop.eup %16235 }
0x41c7   :  { %v7839_v17 = vmul.f32 %v16236_v31, %v19099_v16  ;;  %v8047_v31 = vld [vmem:[%s21290_s2 + $0x40] sm:$0xff] }
0x41c9   :  { %7841 = vrot.lane.b32.xlu1 %v7839_v17, %s16406_s7  ;;  %v8049_v17 = vld [vmem:[%s21290_s2 + $0x50] sm:$0xff] }
0x423b   :  { %v7842_v0 = vpop.permute.xlu1 %7841 }
0x423c   :  { %13500 = vst.msk [vmem:[%s21293_s9 + $0x48] sm:$0xff] %vm98_vm0, %v7842_v0  ;;  %13502 = vmatmul.mubr.msk.f32.vlgmr.msra.gmra.mrb[50].mxu1 %vm98_vm0, %v7842_v0  ;;  %13503 = vmatmul.mubr.msk.f32.vlgmr.msra.gmra.mrb[50].mxu0 %vm98_vm0, %v7842_v0  ;;  %v8052_v0 = vld [vmem:[%s21290_s2 + $0x68] sm:$0xff] }
0x423d   :  { %14982 = vmatpush1.bf16.msra.mxu1 %v19030_v52  ;;  %8211 = vmatprep.mubr.f32.mxu0 %v16405_v3 }
0x423e   :  { %14984 = vmatprep.subr.bf16.mxu1 %v19032_v55  ;;  %8337 = vmatprep.mubr.f32.mxu1 %v16405_v3 }
0x423f   :  { %14966 = vmatpush1.bf16.msra.mxu0 %v19299_v10 }
0x4240   :  { %14968 = vmatprep.subr.bf16.mxu0 %v19301_v33 }
0x4241   :  { %14986 = vmatpush1.bf16.msra.mxu1 %v19048_v51 }
0x4242   :  { %14988 = vmatprep.subr.bf16.mxu1 %v19051_v23 }
0x4243   :  { %14970 = vmatpush1.bf16.msra.mxu0 %v19317_v45 }
0x4244   :  { %14972 = vmatprep.subr.bf16.mxu0 %v19320_v47 }
0x4245   :  { %14990 = vmatpush1.bf16.msra.mxu1 %v19066_v18 }
0x4246   :  { %14992 = vmatprep.subr.bf16.mxu1 %v19069_v24 }
0x4249   :  { %14994 = vmatpush1.bf16.msra.mxu1 %v19078_v9 }
0x424a   :  { %14996 = vmatprep.subr.bf16.mxu1 %v19113_v27 }
0x430f   :  { %v8017_v13 = vpop.f32.mrb[50].mxu1 }
0x4310   :  { %v8022_v49 = vadd.f32 %v8017_v13, %v17863_v48  ;;  %v8019_v16 = vpop.f32.mrb[51].mxu1  ;;  %v8054_v13 = vld [vmem:[%s21290_s2 + $0x78] sm:$0xff] }
0x4311   :  { %v8023_v63 = vadd.f32 %v8019_v16, %v17866_v4  ;;  %v19338_v16 = vpack.c.bf16 %v8054_v13, %v8052_v0 }
0x4312   :  { %16237 = vtanh.f32 %v8022_v49  ;;  %v19335_v49 = vpack.c.bf16 %v8049_v17, %v8047_v31 }
0x4313   :  { %16239 = vtanh.f32 %v8023_v63  ;;  %v8051_v63 = vld [vmem:[%s21290_s2 + $0x60] sm:$0xff] }
0x4314   :  { %14974 = vmatpush1.bf16.msra.mxu0 %v19335_v49 }
0x4315   :  { %14976 = vmatprep.subr.bf16.mxu0 %v19338_v16 }
0x431c   :  { %v16238_v29 = vpop.eup %16237 }
0x431d   :  { %v16240_v14 = vpop.eup %16239  ;;  %v8026_v28 = vmul.f32 %v16238_v29, %v16558_v37  ;;  %v8053_v29 = vld [vmem:[%s21290_s2 + $0x70] sm:$0xff] }
0x431e   :  { %v8027_v60 = vmul.f32 %v16240_v14, %v16561_v38  ;;  %v19347_v14 = vpack.c.bf16 %v8053_v29, %v8051_v63 }
0x431f   :  { %v8028_v1 = vadd.f32 %v8026_v28, %v16564_v39 }
0x4320   :  { %v8029_v21 = vadd.f32 %v8027_v60, %v16567_v41  ;;  %14978 = vmatpush1.bf16.msra.mxu0 %v19347_v14 }
0x4321   :  { %15012 = vmatprep.subr.bf16.mxu0 %v19124_v25  ;;  %v8030_v28 = vmul.f32 %v8028_v1, %v19083_v42 }
0x4322   :  { %v8031_v43 = vmul.f32 %v8029_v21, %v8028_v1 }
0x4324   :  { %8033 = vrot.lane.b32.xlu0 %v8031_v43, %s16406_s7 }
0x4396   :  { %v8034_v60 = vpop.permute.xlu0 %8033 }
0x4397   :  { %v19353_v43 = vadd.f32 %v8034_v60, %v8030_v28 }
0x4399   :  { %16241 = vtanh.f32 %v19353_v43 }
0x43a3   :  { %v16242_v11 = vpop.eup %16241 }
0x43a4   :  { %v8038_v12 = vmul.f32 %v16242_v11, %v8029_v21 }
0x43a6   :  { %8143 = vrot.lane.b32.xlu1 %v8038_v12, %s16406_s7 }
0x4418   :  { %v8144_v44 = vpop.permute.xlu1 %8143 }
0x4419   :  { %13504 = vmatmul.mubr.msk.f32.vlgmr.msra.gmra.mrb[50].mxu0 %vm98_vm0, %v8144_v44  ;;  %13506 = vmatmul.mubr.msk.f32.vlgmr.msra.gmra.mrb[52].mxu1 %vm98_vm0, %v8144_v44 }
0x441a   :  { %14998 = vmatpush1.bf16.msra.mxu1 %v19126_v30  ;;  %15014 = vmatpush1.bf16.msra.mxu0 %v19138_v34 }
0x441b   :  { %15000 = vmatprep.subr.bf16.mxu1 %v19151_v2  ;;  %15016 = vmatprep.subr.bf16.mxu0 %v19153_v5 }
0x441c   :  { %8410 = vmatprep.mubr.f32.mxu1 %v16405_v3  ;;  %8530 = vmatprep.mubr.f32.mxu0 %v16405_v3 }
0x441e   :  { %15002 = vmatpush1.bf16.msra.mxu1 %v19165_v20  ;;  %15018 = vmatpush1.bf16.msra.mxu0 %v19178_v19 }
0x441f   :  { %15004 = vmatprep.subr.bf16.mxu1 %v19180_v36  ;;  %15020 = vmatprep.subr.bf16.mxu0 %v19191_v56 }
0x4422   :  { %15006 = vmatpush1.bf16.msra.mxu1 %v19203_v61  ;;  %15022 = vmatpush1.bf16.msra.mxu0 %v19216_v40 }
0x4423   :  { %15008 = vmatprep.subr.bf16.mxu1 %v19218_v15  ;;  %15024 = vmatprep.subr.bf16.mxu0 %v19230_v8 }
0x4426   :  { %15010 = vmatpush1.bf16.msra.mxu1 %v19239_v50  ;;  %15026 = vmatpush1.bf16.msra.mxu0 %v19243_v6 }
0x4427   :  { %15028 = vmatprep.subr.bf16.mxu0 %v19288_v54  ;;  %15044 = vmatprep.subr.bf16.mxu1 %v19019_v53 }
0x44ec   :  { %v8213_v42 = vpop.f32.mrb[50].mxu0 }
0x44ed   :  { %v8218_v1 = vadd.f32 %v8213_v42, %v16758_v46  ;;  %v8215_v21 = vpop.f32.mrb[51].mxu0 }
0x44ee   :  { %v8219_v32 = vadd.f32 %v8215_v21, %v16764_v59 }
0x44ef   :  { %16243 = vtanh.f32 %v8218_v1 }
0x44f0   :  { %16245 = vtanh.f32 %v8219_v32 }
0x44f9   :  { %v16244_v26 = vpop.eup %16243 }
0x44fa   :  { %v16246_v7 = vpop.eup %16245  ;;  %v8222_v62 = vmul.f32 %v16244_v26, %v16558_v37 }
0x44fb   :  { %v8223_v22 = vmul.f32 %v16246_v7, %v16561_v38 }
0x44fc   :  { %v8224_v57 = vadd.f32 %v8222_v62, %v16564_v39 }
0x44fd   :  { %v8225_v58 = vadd.f32 %v8223_v22, %v16567_v41 }
0x44fe   :  { %v8226_v53 = vmul.f32 %v8224_v57, %v19251_v35 }
0x44ff   :  { %v8227_v31 = vmul.f32 %v8225_v58, %v8224_v57  ;;  %v9050_v57 = vld [vmem:[%s21285_s1 + $0x18] sm:$0xff] }
0x4501   :  { %8229 = vrot.lane.b32.xlu0 %v8227_v31, %s16406_s7 }
0x4573   :  { %v8230_v17 = vpop.permute.xlu0 %8229 }
0x4574   :  { %v19385_v0 = vadd.f32 %v8230_v17, %v8226_v53  ;;  %v9049_v53 = vld [vmem:[%s21285_s1 + $0x10] sm:$0xff]  ;;  %v9052_v17 = vld [vmem:[%s21285_s1 + $0x28] sm:$0xff] }
0x4576   :  { %16247 = vtanh.f32 %v19385_v0 }
0x4580   :  { %v16248_v13 = vpop.eup %16247 }
0x4581   :  { %v8234_v63 = vmul.f32 %v16248_v13, %v8225_v58  ;;  %v9047_v58 = vld [vmem:[%s21285_s1] sm:$0xff] }
0x4582   :  { %v19498_v13 = vpack.c.bf16 %v9049_v53, %v9047_v58  ;;  %v9247_v58 = vld [vmem:[%s21289_s3 + $0x38] sm:$0xff] }
0x4583   :  { %8236 = vrot.lane.b32.xlu1 %v8234_v63, %s16406_s7 }
0x45f5   :  { %v8237_v29 = vpop.permute.xlu1 %8236 }
0x45f6   :  { %13505 = vst.msk [vmem:[%s21293_s9 + $0x50] sm:$0xff] %vm98_vm0, %v8237_v29  ;;  %13507 = vmatmul.mubr.msk.f32.vlgmr.msra.gmra.mrb[52].mxu1 %vm98_vm0, %v8237_v29  ;;  %13508 = vmatmul.mubr.msk.f32.vlgmr.msra.gmra.mrb[52].mxu0 %vm98_vm0, %v8237_v29  ;;  %v9051_v29 = vld [vmem:[%s21285_s1 + $0x20] sm:$0xff] }
0x45f7   :  { %15030 = vmatpush1.bf16.msra.mxu0 %v19299_v10  ;;  %15046 = vmatpush1.bf16.msra.mxu1 %v19030_v52 }
0x45f8   :  { %15032 = vmatprep.subr.bf16.mxu0 %v19301_v33  ;;  %15048 = vmatprep.subr.bf16.mxu1 %v19032_v55 }
0x45f9   :  { %8606 = vmatprep.mubr.f32.mxu0 %v16405_v3  ;;  %8732 = vmatprep.mubr.f32.mxu1 %v16405_v3 }
0x45fb   :  { %15034 = vmatpush1.bf16.msra.mxu0 %v19317_v45  ;;  %15050 = vmatpush1.bf16.msra.mxu1 %v19048_v51 }
0x45fc   :  { %15036 = vmatprep.subr.bf16.mxu0 %v19320_v47  ;;  %15052 = vmatprep.subr.bf16.mxu1 %v19051_v23 }
0x45ff   :  { %15038 = vmatpush1.bf16.msra.mxu0 %v19335_v49  ;;  %15054 = vmatpush1.bf16.msra.mxu1 %v19066_v18 }
0x4600   :  { %15040 = vmatprep.subr.bf16.mxu0 %v19338_v16  ;;  %15056 = vmatprep.subr.bf16.mxu1 %v19069_v24 }
0x4603   :  { %15042 = vmatpush1.bf16.msra.mxu0 %v19347_v14  ;;  %15058 = vmatpush1.bf16.msra.mxu1 %v19078_v9 }
0x4604   :  { %15060 = vmatprep.subr.bf16.mxu1 %v19113_v27  ;;  %15076 = vmatprep.subr.bf16.mxu0 %v19124_v25 }
0x46c9   :  { %v8412_v52 = vpop.f32.mrb[52].mxu1 }
0x46ca   :  { %v8417_v55 = vadd.f32 %v8412_v52, %v17863_v48  ;;  %v8414_v51 = vpop.f32.mrb[53].mxu1  ;;  %v9053_v52 = vld [vmem:[%s21285_s1 + $0x30] sm:$0xff] }
0x46cb   :  { %v8418_v23 = vadd.f32 %v8414_v51, %v17866_v4  ;;  %v9058_v51 = vld [vmem:[%s21285_s1 + $0x58] sm:$0xff] }
0x46cc   :  { %16249 = vtanh.f32 %v8417_v55  ;;  %v9056_v55 = vld [vmem:[%s21285_s1 + $0x48] sm:$0xff] }
0x46cd   :  { %16251 = vtanh.f32 %v8418_v23  ;;  %v19516_v23 = vpack.c.bf16 %v9053_v52, %v9051_v29  ;;  %v9037_v29 = vld [vmem:[%s21292_s5 + $0x30] sm:$0xff]  ;;  %v9244_v52 = vld [vmem:[%s21289_s3 + $0x20] sm:$0xff] }
0x46d6   :  { %v16250_v18 = vpop.eup %16249 }
0x46d7   :  { %v16252_v35 = vpop.eup %16251  ;;  %v8421_v24 = vmul.f32 %v16250_v18, %v16558_v37  ;;  %v19519_v18 = vpack.c.bf16 %v9058_v51, %v9056_v55  ;;  %v9246_v51 = vld [vmem:[%s21289_s3 + $0x30] sm:$0xff] }
0x46d8   :  { %v8422_v28 = vmul.f32 %v16252_v35, %v16561_v38  ;;  %v9055_v35 = vld [vmem:[%s21285_s1 + $0x40] sm:$0xff] }
0x46d9   :  { %v8423_v9 = vadd.f32 %v8421_v24, %v16564_v39  ;;  %v9057_v24 = vld [vmem:[%s21285_s1 + $0x50] sm:$0xff] }
0x46da   :  { %v8424_v27 = vadd.f32 %v8422_v28, %v16567_v41  ;;  %v9060_v28 = vld [vmem:[%s21285_s1 + $0x68] sm:$0xff] }
0x46db   :  { %v8425_v25 = vmul.f32 %v8423_v9, %v19353_v43 }
0x46dc   :  { %v8426_v60 = vmul.f32 %v8424_v27, %v8423_v9  ;;  %v9062_v9 = vld [vmem:[%s21285_s1 + $0x78] sm:$0xff] }
0x46de   :  { %8428 = vrot.lane.b32.xlu0 %v8426_v60, %s16406_s7  ;;  %v19537_v60 = vpack.c.bf16 %v9062_v9, %v9060_v28  ;;  %v19646_v28 = vpack.c.bf16 %v9246_v51, %v9244_v52 }
0x4750   :  { %v8429_v11 = vpop.permute.xlu0 %8428 }
0x4751   :  { %v19421_v12 = vadd.f32 %v8429_v11, %v8425_v25  ;;  %v9059_v25 = vld [vmem:[%s21285_s1 + $0x60] sm:$0xff]  ;;  %v9061_v11 = vld [vmem:[%s21285_s1 + $0x70] sm:$0xff] }
0x4753   :  { %16253 = vtanh.f32 %v19421_v12 }
0x475d   :  { %v16254_v44 = vpop.eup %16253 }
0x475e   :  { %v8433_v42 = vmul.f32 %v16254_v44, %v8424_v27  ;;  %v19534_v27 = vpack.c.bf16 %v9057_v24, %v9055_v35  ;;  %v19546_v44 = vpack.c.bf16 %v9061_v11, %v9059_v25  ;;  %v9040_v35 = vld [vmem:[%s21292_s5 + $0x48] sm:$0xff]  ;;  %v9042_v24 = vld [vmem:[%s21292_s5 + $0x58] sm:$0xff] }
0x475f   :  { %v19648_v9 = vpack.c.bf16 %v9042_v24, %v9040_v35  ;;  %v9249_v25 = vld [vmem:[%s21289_s3 + $0x48] sm:$0xff]  ;;  %v9251_v11 = vld [vmem:[%s21289_s3 + $0x58] sm:$0xff] }
0x4760   :  { %8538 = vrot.lane.b32.xlu1 %v8433_v42, %s16406_s7 }
0x47d2   :  { %v8539_v1 = vpop.permute.xlu1 %8538 }
0x47d3   :  { %13509 = vmatmul.mubr.msk.f32.vlgmr.msra.gmra.mrb[52].mxu0 %vm98_vm0, %v8539_v1  ;;  %13511 = vmatmul.mubr.msk.f32.vlgmr.msra.gmra.mrb[54].mxu1 %vm98_vm0, %v8539_v1 }
0x47d4   :  { %15062 = vmatpush1.bf16.msra.mxu1 %v19126_v30  ;;  %15078 = vmatpush1.bf16.msra.mxu0 %v19138_v34 }
0x47d5   :  { %15064 = vmatprep.subr.bf16.mxu1 %v19151_v2  ;;  %15080 = vmatprep.subr.bf16.mxu0 %v19153_v5 }
0x47d6   :  { %8805 = vmatprep.mubr.f32.mxu1 %v16405_v3  ;;  %8925 = vmatprep.mubr.f32.mxu0 %v16405_v3 }
0x47d8   :  { %15066 = vmatpush1.bf16.msra.mxu1 %v19165_v20  ;;  %15082 = vmatpush1.bf16.msra.mxu0 %v19178_v19 }
0x47d9   :  { %15068 = vmatprep.subr.bf16.mxu1 %v19180_v36  ;;  %15084 = vmatprep.subr.bf16.mxu0 %v19191_v56 }
0x47dc   :  { %15070 = vmatpush1.bf16.msra.mxu1 %v19203_v61  ;;  %15086 = vmatpush1.bf16.msra.mxu0 %v19216_v40 }
0x47dd   :  { %15072 = vmatprep.subr.bf16.mxu1 %v19218_v15  ;;  %15088 = vmatprep.subr.bf16.mxu0 %v19230_v8 }
0x47e0   :  { %15074 = vmatpush1.bf16.msra.mxu1 %v19239_v50  ;;  %15090 = vmatpush1.bf16.msra.mxu0 %v19243_v6 }
0x47e1   :  { %15092 = vmatprep.subr.bf16.mxu0 %v19288_v54 }
0x48a6   :  { %v8608_v30 = vpop.f32.mrb[52].mxu0 }
0x48a7   :  { %v8613_v34 = vadd.f32 %v8608_v30, %v16758_v46  ;;  %v8610_v2 = vpop.f32.mrb[53].mxu0 }
0x48a8   :  { %v8614_v5 = vadd.f32 %v8610_v2, %v16764_v59 }
0x48a9   :  { %16255 = vtanh.f32 %v8613_v34 }
0x48aa   :  { %16257 = vtanh.f32 %v8614_v5 }
0x48b3   :  { %v16256_v20 = vpop.eup %16255 }
0x48b4   :  { %v16258_v19 = vpop.eup %16257  ;;  %v8617_v36 = vmul.f32 %v16256_v20, %v16558_v37 }
0x48b5   :  { %v8618_v56 = vmul.f32 %v16258_v19, %v16561_v38 }
0x48b6   :  { %v8619_v61 = vadd.f32 %v8617_v36, %v16564_v39 }
0x48b7   :  { %v8620_v40 = vadd.f32 %v8618_v56, %v16567_v41 }
0x48b8   :  { %v8621_v8 = vmul.f32 %v8619_v61, %v19385_v0  ;;  %v9054_v0 = vld [vmem:[%s21285_s1 + $0x38] sm:$0xff] }
0x48b9   :  { %v8622_v15 = vmul.f32 %v8620_v40, %v8619_v61  ;;  %v19500_v63 = vpack.c.bf16 %v9054_v0, %v9052_v17  ;;  %v9035_v0 = vld [vmem:[%s21292_s5 + $0x20] sm:$0xff] }
0x48ba   :  { %v19633_v55 = vpack.c.bf16 %v9037_v29, %v9035_v0 }
0x48bb   :  { %8624 = vrot.lane.b32.xlu0 %v8622_v15, %s16406_s7 }
0x492d   :  { %v8625_v50 = vpop.permute.xlu0 %8624 }
0x492e   :  { %v19452_v6 = vadd.f32 %v8625_v50, %v8621_v8 }
0x4930   :  { %16259 = vtanh.f32 %v19452_v6 }
0x493a   :  { %v16260_v54 = vpop.eup %16259 }
0x493b   :  { %v8629_v43 = vmul.f32 %v16260_v54, %v8620_v40 }
0x493d   :  { %8631 = vrot.lane.b32.xlu1 %v8629_v43, %s16406_s7  ;;  %v9032_v43 = vld [vmem:[%s21292_s5 + $0x8] sm:$0xff] }
0x49af   :  { %v8632_v21 = vpop.permute.xlu1 %8631 }
0x49b0   :  { %13510 = vst.msk [vmem:[%s21293_s9 + $0x58] sm:$0xff] %vm98_vm0, %v8632_v21  ;;  %13512 = vmatmul.mubr.msk.f32.vlgmr.msra.gmra.mrb[54].mxu1 %vm98_vm0, %v8632_v21  ;;  %13513 = vmatmul.mubr.msk.f32.vlgmr.msra.gmra.mrb[54].mxu0 %vm98_vm0, %v8632_v21  ;;  %v9034_v21 = vld [vmem:[%s21292_s5 + $0x18] sm:$0xff] }
0x49b1   :  { %15094 = vmatpush1.bf16.msra.mxu0 %v19299_v10  ;;  %9001 = vmatprep.mubr.f32.mxu0 %v16405_v3 }
0x49b2   :  { %15096 = vmatprep.subr.bf16.mxu0 %v19301_v33  ;;  %9127 = vmatprep.mubr.f32.mxu1 %v16405_v3 }
0x49b5   :  { %15098 = vmatpush1.bf16.msra.mxu0 %v19317_v45 }
0x49b6   :  { %15100 = vmatprep.subr.bf16.mxu0 %v19320_v47 }
0x49b9   :  { %15102 = vmatpush1.bf16.msra.mxu0 %v19335_v49 }
0x49ba   :  { %15104 = vmatprep.subr.bf16.mxu0 %v19338_v16 }
0x49bd   :  { %15106 = vmatpush1.bf16.msra.mxu0 %v19347_v14  ;;  %v9048_v14 = vld [vmem:[%s21285_s1 + $0x8] sm:$0xff] }
0x49be   :  { %v19487_v31 = vpack.c.bf16 %v9050_v57, %v9048_v14  ;;  %v9038_v14 = vld [vmem:[%s21292_s5 + $0x38] sm:$0xff]  ;;  %v9245_v57 = vld [vmem:[%s21289_s3 + $0x28] sm:$0xff] }
0x49bf   :  { %v19621_v17 = vpack.c.bf16 %v9247_v58, %v9245_v57 }
0x49c0   :  { %15108 = vmatprep.subr.bf16.mxu1 %v19487_v31 }
0x49c1   :  { %15110 = vmatpush1.bf16.msra.mxu1 %v19498_v13 }
0x49c2   :  { %15112 = vmatprep.subr.bf16.mxu1 %v19500_v63 }
0x49c5   :  { %15114 = vmatpush1.bf16.msra.mxu1 %v19516_v23 }
0x49c6   :  { %15116 = vmatprep.subr.bf16.mxu1 %v19519_v18 }
0x49c9   :  { %15118 = vmatpush1.bf16.msra.mxu1 %v19534_v27 }
0x49ca   :  { %15120 = vmatprep.subr.bf16.mxu1 %v19537_v60 }
0x49cd   :  { %15122 = vmatpush1.bf16.msra.mxu1 %v19546_v44 }
0x4a83   :  { %v8807_v32 = vpop.f32.mrb[54].mxu1 }
0x4a84   :  { %v8812_v26 = vadd.f32 %v8807_v32, %v17863_v48  ;;  %v8809_v10 = vpop.f32.mrb[55].mxu1  ;;  %v9241_v32 = vld [vmem:[%s21289_s3 + $0x8] sm:$0xff] }
0x4a85   :  { %v8813_v7 = vadd.f32 %v8809_v10, %v17866_v4  ;;  %v9243_v10 = vld [vmem:[%s21289_s3 + $0x18] sm:$0xff] }
0x4a86   :  { %16261 = vtanh.f32 %v8812_v26  ;;  %v19581_v26 = vpack.c.bf16 %v9034_v21, %v9032_v43  ;;  %v9252_v21 = vld [vmem:[%s21289_s3 + $0x60] sm:$0xff] }
0x4a87   :  { %16263 = vtanh.f32 %v8813_v7  ;;  %v9031_v7 = vld [vmem:[%s21292_s5] sm:$0xff] }
0x4a88   :  { %15124 = vmatprep.subr.bf16.mxu1 %v19581_v26 }
0x4a90   :  { %v16262_v33 = vpop.eup %16261 }
0x4a91   :  { %v16264_v62 = vpop.eup %16263  ;;  %v8816_v45 = vmul.f32 %v16262_v33, %v16558_v37  ;;  %v9033_v33 = vld [vmem:[%s21292_s5 + $0x10] sm:$0xff] }
0x4a92   :  { %v8817_v47 = vmul.f32 %v16264_v62, %v16561_v38  ;;  %v19592_v62 = vpack.c.bf16 %v9243_v10, %v9241_v32  ;;  %v9254_v32 = vld [vmem:[%s21289_s3 + $0x70] sm:$0xff] }
0x4a93   :  { %v8818_v49 = vadd.f32 %v8816_v45, %v16564_v39  ;;  %v19594_v45 = vpack.c.bf16 %v9033_v33, %v9031_v7  ;;  %v19711_v7 = vpack.c.bf16 %v9254_v32, %v9252_v21  ;;  %v9233_v21 = vld [vmem:[%s21290_s2 + $0x48] sm:$0xff]  ;;  %v9235_v32 = vld [vmem:[%s21290_s2 + $0x58] sm:$0xff] }
0x4a94   :  { %v8819_v16 = vadd.f32 %v8817_v47, %v16567_v41  ;;  %v9240_v47 = vld [vmem:[%s21289_s3] sm:$0xff]  ;;  %15140 = vmatprep.subr.bf16.mxu0 %v19592_v62 }
0x4a95   :  { %v8820_v42 = vmul.f32 %v8818_v49, %v19421_v12 }
0x4a96   :  { %v8821_v22 = vmul.f32 %v8819_v16, %v8818_v49  ;;  %v9242_v49 = vld [vmem:[%s21289_s3 + $0x10] sm:$0xff] }
0x4a98   :  { %8823 = vrot.lane.b32.xlu0 %v8821_v22, %s16406_s7  ;;  %v19606_v22 = vpack.c.bf16 %v9242_v49, %v9240_v47 }
0x4b0a   :  { %v8824_v1 = vpop.permute.xlu0 %8823 }
0x4b0b   :  { %v19551_v30 = vadd.f32 %v8824_v1, %v8820_v42  ;;  %v9039_v42 = vld [vmem:[%s21292_s5 + $0x40] sm:$0xff]  ;;  %v19659_v1 = vpack.c.bf16 %v9251_v11, %v9249_v25  ;;  %v9225_v11 = vld [vmem:[%s21290_s2 + $0x8] sm:$0xff] }
0x4b0d   :  { %16265 = vtanh.f32 %v19551_v30 }
0x4b17   :  { %v16266_v34 = vpop.eup %16265 }
0x4b18   :  { %v8828_v2 = vmul.f32 %v16266_v34, %v8819_v16  ;;  %v9036_v16 = vld [vmem:[%s21292_s5 + $0x28] sm:$0xff]  ;;  %v9041_v34 = vld [vmem:[%s21292_s5 + $0x50] sm:$0xff] }
0x4b19   :  { %v19619_v53 = vpack.c.bf16 %v9038_v14, %v9036_v16 }
0x4b1a   :  { %8933 = vrot.lane.b32.xlu1 %v8828_v2, %s16406_s7  ;;  %v9248_v2 = vld [vmem:[%s21289_s3 + $0x40] sm:$0xff] }
0x4b8c   :  { %v8934_v5 = vpop.permute.xlu1 %8933 }
0x4b8d   :  { %13514 = vmatmul.mubr.msk.f32.vlgmr.msra.gmra.mrb[54].mxu0 %vm98_vm0, %v8934_v5  ;;  %13516 = vmatmul.mubr.msk.f32.vlgmr.msra.gmra.mrb[56].mxu1 %vm98_vm0, %v8934_v5  ;;  %v9250_v5 = vld [vmem:[%s21289_s3 + $0x50] sm:$0xff] }
0x4b8e   :  { %9200 = vmatprep.mubr.f32.mxu1 %v16405_v3  ;;  %9320 = vmatprep.mubr.f32.mxu0 %v16405_v3 }
0x4b8f   :  { %15126 = vmatpush1.bf16.msra.mxu1 %v19594_v45  ;;  %15142 = vmatpush1.bf16.msra.mxu0 %v19606_v22 }
0x4b90   :  { %15128 = vmatprep.subr.bf16.mxu1 %v19619_v53  ;;  %15144 = vmatprep.subr.bf16.mxu0 %v19621_v17 }
0x4b93   :  { %15130 = vmatpush1.bf16.msra.mxu1 %v19633_v55  ;;  %15146 = vmatpush1.bf16.msra.mxu0 %v19646_v28 }
0x4b94   :  { %15132 = vmatprep.subr.bf16.mxu1 %v19648_v9  ;;  %15148 = vmatprep.subr.bf16.mxu0 %v19659_v1 }
0x4c60   :  { %v9003_v20 = vpop.f32.mrb[54].mxu0 }
0x4c61   :  { %v9008_v12 = vadd.f32 %v9003_v20, %v16758_v46  ;;  %v9005_v19 = vpop.f32.mrb[55].mxu0  ;;  %v19671_v20 = vpack.c.bf16 %v9041_v34, %v9039_v42  ;;  %v9227_v42 = vld [vmem:[%s21290_s2 + $0x18] sm:$0xff]  ;;  %v9224_v34 = vld [vmem:[%s21290_s2] sm:$0xff] }
0x4c62   :  { %v9009_v36 = vadd.f32 %v9005_v19, %v16764_v59  ;;  %v9046_v19 = vld [vmem:[%s21292_s5 + $0x78] sm:$0xff] }
0x4c63   :  { %16267 = vtanh.f32 %v9008_v12  ;;  %v9044_v12 = vld [vmem:[%s21292_s5 + $0x68] sm:$0xff]  ;;  %15134 = vmatpush1.bf16.msra.mxu1 %v19671_v20 }
0x4c64   :  { %16269 = vtanh.f32 %v9009_v36  ;;  %v9253_v36 = vld [vmem:[%s21289_s3 + $0x68] sm:$0xff] }
0x4c6d   :  { %v16268_v56 = vpop.eup %16267 }
0x4c6e   :  { %v16270_v61 = vpop.eup %16269  ;;  %v9012_v40 = vmul.f32 %v16268_v56, %v16558_v37  ;;  %v19684_v56 = vpack.c.bf16 %v9250_v5, %v9248_v2  ;;  %v19756_v2 = vpack.c.bf16 %v9227_v42, %v9225_v11  ;;  %v9226_v5 = vld [vmem:[%s21290_s2 + $0x10] sm:$0xff] }
0x4c6f   :  { %v9013_v15 = vmul.f32 %v16270_v61, %v16561_v38  ;;  %v19686_v61 = vpack.c.bf16 %v9046_v19, %v9044_v12  ;;  %v9229_v12 = vld [vmem:[%s21290_s2 + $0x28] sm:$0xff]  ;;  %v9231_v19 = vld [vmem:[%s21290_s2 + $0x38] sm:$0xff] }
0x4c70   :  { %v19564_v8 = vadd.f32 %v9012_v40, %v16564_v39  ;;  %v9255_v40 = vld [vmem:[%s21289_s3 + $0x78] sm:$0xff]  ;;  %15150 = vmatpush1.bf16.msra.mxu0 %v19684_v56 }
0x4c71   :  { %v19567_v50 = vadd.f32 %v9013_v15, %v16567_v41  ;;  %v9043_v15 = vld [vmem:[%s21292_s5 + $0x60] sm:$0xff]  ;;  %v19698_v43 = vpack.c.bf16 %v9255_v40, %v9253_v36  ;;  %15136 = vmatprep.subr.bf16.mxu1 %v19686_v61  ;;  %v19767_v36 = vpack.c.bf16 %v9226_v5, %v9224_v34  ;;  %v19769_v40 = vpack.c.bf16 %v9231_v19, %v9229_v12 }
0x4c72   :  { %v9016_v33 = vmul.f32 %v19564_v8, %v19452_v6 }
0x4c73   :  { %v9017_v54 = vmul.f32 %v19567_v50, %v19564_v8  ;;  %15152 = vmatprep.subr.bf16.mxu0 %v19698_v43 }
0x4c74   :  { %15154 = vmatpush1.bf16.msra.mxu0 %v19711_v7 }
0x4c75   :  { %9019 = vrot.lane.b32.xlu0 %v9017_v54, %s16406_s7  ;;  %v9045_v54 = vld [vmem:[%s21292_s5 + $0x70] sm:$0xff]  ;;  %15156 = vmatprep.subr.bf16.mxu0 %v19756_v2 }
0x4c76   :  { %v19707_v10 = vpack.c.bf16 %v9045_v54, %v9043_v15  ;;  %v9228_v15 = vld [vmem:[%s21290_s2 + $0x20] sm:$0xff]  ;;  %v9230_v54 = vld [vmem:[%s21290_s2 + $0x30] sm:$0xff] }
0x4c78   :  { %15138 = vmatpush1.bf16.msra.mxu1 %v19707_v10 }
0x4c79   :  { %15172 = vmatprep.subr.bf16.mxu1 %v19487_v31 }
0x4ce7   :  { %v9020_v47 = vpop.permute.xlu0 %9019 }
0x4ce8   :  { %v19719_v49 = vadd.f32 %v9020_v47, %v9016_v33  ;;  %v19785_v33 = vpack.c.bf16 %v9230_v54, %v9228_v15  ;;  %v19788_v47 = vpack.c.bf16 %v9235_v32, %v9233_v21 }
0x4cea   :  { %16271 = vtanh.f32 %v19719_v49 }
0x4cf4   :  { %v16272_v16 = vpop.eup %16271 }
0x4cf5   :  { %v9024_v14 = vmul.f32 %v16272_v16, %v19567_v50  ;;  %v9232_v16 = vld [vmem:[%s21290_s2 + $0x40] sm:$0xff] }
0x4cf7   :  { %9026 = vrot.lane.b32.xlu1 %v9024_v14, %s16406_s7  ;;  %v9234_v14 = vld [vmem:[%s21290_s2 + $0x50] sm:$0xff] }
0x4d69   :  { %v9027_v57 = vpop.permute.xlu1 %9026 }
0x4d6a   :  { %13515 = vst.msk [vmem:[%s21293_s9 + $0x60] sm:$0xff] %vm98_vm0, %v9027_v57  ;;  %13517 = vmatmul.mubr.msk.f32.vlgmr.msra.gmra.mrb[56].mxu1 %vm98_vm0, %v9027_v57  ;;  %13518 = vmatmul.mubr.msk.f32.vlgmr.msra.gmra.mrb[56].mxu0 %vm98_vm0, %v9027_v57  ;;  %v9237_v57 = vld [vmem:[%s21290_s2 + $0x68] sm:$0xff] }
0x4d6b   :  { %15174 = vmatpush1.bf16.msra.mxu1 %v19498_v13  ;;  %9396 = vmatprep.mubr.f32.mxu0 %v16405_v3 }
0x4d6c   :  { %15176 = vmatprep.subr.bf16.mxu1 %v19500_v63  ;;  %9522 = vmatprep.mubr.f32.mxu1 %v16405_v3 }
0x4d6d   :  { %15158 = vmatpush1.bf16.msra.mxu0 %v19767_v36 }
0x4d6e   :  { %15160 = vmatprep.subr.bf16.mxu0 %v19769_v40 }
0x4d6f   :  { %15178 = vmatpush1.bf16.msra.mxu1 %v19516_v23 }
0x4d70   :  { %15180 = vmatprep.subr.bf16.mxu1 %v19519_v18 }
0x4d71   :  { %15162 = vmatpush1.bf16.msra.mxu0 %v19785_v33 }
0x4d72   :  { %15164 = vmatprep.subr.bf16.mxu0 %v19788_v47 }
0x4d73   :  { %15182 = vmatpush1.bf16.msra.mxu1 %v19534_v27 }
0x4d74   :  { %15184 = vmatprep.subr.bf16.mxu1 %v19537_v60 }
0x4d77   :  { %15186 = vmatpush1.bf16.msra.mxu1 %v19546_v44 }
0x4d78   :  { %15188 = vmatprep.subr.bf16.mxu1 %v19581_v26 }
0x4e3d   :  { %v9202_v6 = vpop.f32.mrb[56].mxu1 }
0x4e3e   :  { %v9207_v8 = vadd.f32 %v9202_v6, %v17863_v48  ;;  %v9204_v50 = vpop.f32.mrb[57].mxu1  ;;  %v9239_v6 = vld [vmem:[%s21290_s2 + $0x78] sm:$0xff] }
0x4e3f   :  { %v9208_v58 = vadd.f32 %v9204_v50, %v17866_v4  ;;  %v19806_v50 = vpack.c.bf16 %v9239_v6, %v9237_v57 }
0x4e40   :  { %16273 = vtanh.f32 %v9207_v8  ;;  %v19803_v8 = vpack.c.bf16 %v9234_v14, %v9232_v16 }
0x4e41   :  { %16275 = vtanh.f32 %v9208_v58  ;;  %v9236_v58 = vld [vmem:[%s21290_s2 + $0x60] sm:$0xff] }
0x4e42   :  { %15166 = vmatpush1.bf16.msra.mxu0 %v19803_v8 }
0x4e43   :  { %15168 = vmatprep.subr.bf16.mxu0 %v19806_v50 }
0x4e4a   :  { %v16274_v0 = vpop.eup %16273 }
0x4e4b   :  { %v16276_v29 = vpop.eup %16275  ;;  %v9211_v52 = vmul.f32 %v16274_v0, %v16558_v37  ;;  %v9238_v0 = vld [vmem:[%s21290_s2 + $0x70] sm:$0xff] }
0x4e4c   :  { %v9212_v51 = vmul.f32 %v16276_v29, %v16561_v38  ;;  %v19815_v29 = vpack.c.bf16 %v9238_v0, %v9236_v58 }
0x4e4d   :  { %v9213_v35 = vadd.f32 %v9211_v52, %v16564_v39 }
0x4e4e   :  { %v9214_v24 = vadd.f32 %v9212_v51, %v16567_v41  ;;  %15170 = vmatpush1.bf16.msra.mxu0 %v19815_v29 }
0x4e4f   :  { %15204 = vmatprep.subr.bf16.mxu0 %v19592_v62  ;;  %v9215_v52 = vmul.f32 %v9213_v35, %v19551_v30 }
0x4e50   :  { %v9216_v25 = vmul.f32 %v9214_v24, %v9213_v35 }
0x4e52   :  { %9218 = vrot.lane.b32.xlu0 %v9216_v25, %s16406_s7 }
0x4ec4   :  { %v9219_v51 = vpop.permute.xlu0 %9218 }
0x4ec5   :  { %v19821_v25 = vadd.f32 %v9219_v51, %v9215_v52 }
0x4ec7   :  { %16277 = vtanh.f32 %v19821_v25 }
0x4ed1   :  { %v16278_v11 = vpop.eup %16277 }
0x4ed2   :  { %v9223_v42 = vmul.f32 %v16278_v11, %v9214_v24 }
0x4ed4   :  { %9328 = vrot.lane.b32.xlu1 %v9223_v42, %s16406_s7 }
0x4f46   :  { %v9329_v34 = vpop.permute.xlu1 %9328 }
0x4f47   :  { %13519 = vmatmul.mubr.msk.f32.vlgmr.msra.gmra.mrb[56].mxu0 %vm98_vm0, %v9329_v34  ;;  %13521 = vmatmul.mubr.msk.f32.vlgmr.msra.gmra.mrb[58].mxu1 %vm98_vm0, %v9329_v34 }
0x4f48   :  { %15190 = vmatpush1.bf16.msra.mxu1 %v19594_v45  ;;  %15206 = vmatpush1.bf16.msra.mxu0 %v19606_v22 }
0x4f49   :  { %15192 = vmatprep.subr.bf16.mxu1 %v19619_v53  ;;  %15208 = vmatprep.subr.bf16.mxu0 %v19621_v17 }
0x4f4a   :  { %9595 = vmatprep.mubr.f32.mxu1 %v16405_v3  ;;  %9715 = vmatprep.mubr.f32.mxu0 %v16405_v3 }
0x4f4c   :  { %15194 = vmatpush1.bf16.msra.mxu1 %v19633_v55  ;;  %15210 = vmatpush1.bf16.msra.mxu0 %v19646_v28 }
0x4f4d   :  { %15196 = vmatprep.subr.bf16.mxu1 %v19648_v9  ;;  %15212 = vmatprep.subr.bf16.mxu0 %v19659_v1 }
0x4f50   :  { %15198 = vmatpush1.bf16.msra.mxu1 %v19671_v20  ;;  %15214 = vmatpush1.bf16.msra.mxu0 %v19684_v56 }
0x4f51   :  { %15200 = vmatprep.subr.bf16.mxu1 %v19686_v61  ;;  %15216 = vmatprep.subr.bf16.mxu0 %v19698_v43 }
0x4f54   :  { %15202 = vmatpush1.bf16.msra.mxu1 %v19707_v10  ;;  %15218 = vmatpush1.bf16.msra.mxu0 %v19711_v7 }
0x4f55   :  { %15220 = vmatprep.subr.bf16.mxu0 %v19756_v2  ;;  %15236 = vmatprep.subr.bf16.mxu1 %v19487_v31 }
0x501a   :  { %v9398_v30 = vpop.f32.mrb[56].mxu0 }
0x501b   :  { %v9403_v35 = vadd.f32 %v9398_v30, %v16758_v46  ;;  %v9400_v24 = vpop.f32.mrb[57].mxu0 }
0x501c   :  { %v9404_v5 = vadd.f32 %v9400_v24, %v16764_v59 }
0x501d   :  { %16279 = vtanh.f32 %v9403_v35 }
0x501e   :  { %16281 = vtanh.f32 %v9404_v5 }
0x5027   :  { %v16280_v12 = vpop.eup %16279 }
0x5028   :  { %v16282_v19 = vpop.eup %16281  ;;  %v9407_v15 = vmul.f32 %v16280_v12, %v16558_v37 }
0x5029   :  { %v9408_v54 = vmul.f32 %v16282_v19, %v16561_v38 }
0x502a   :  { %v9409_v21 = vadd.f32 %v9407_v15, %v16564_v39 }
0x502b   :  { %v9410_v32 = vadd.f32 %v9408_v54, %v16567_v41 }
0x502c   :  { %v9411_v31 = vmul.f32 %v9409_v21, %v19719_v49 }
0x502d   :  { %v9412_v16 = vmul.f32 %v9410_v32, %v9409_v21  ;;  %v10235_v21 = vld [vmem:[%s21285_s1 + $0x18] sm:$0xff] }
0x502f   :  { %9414 = vrot.lane.b32.xlu0 %v9412_v16, %s16406_s7 }
0x50a1   :  { %v9415_v14 = vpop.permute.xlu0 %9414 }
0x50a2   :  { %v19853_v57 = vadd.f32 %v9415_v14, %v9411_v31  ;;  %v10234_v31 = vld [vmem:[%s21285_s1 + $0x10] sm:$0xff]  ;;  %v10237_v14 = vld [vmem:[%s21285_s1 + $0x28] sm:$0xff] }
0x50a4   :  { %16283 = vtanh.f32 %v19853_v57 }
0x50ae   :  { %v16284_v6 = vpop.eup %16283 }
0x50af   :  { %v9419_v58 = vmul.f32 %v16284_v6, %v9410_v32  ;;  %v10232_v32 = vld [vmem:[%s21285_s1] sm:$0xff] }
0x50b0   :  { %v19966_v6 = vpack.c.bf16 %v10234_v31, %v10232_v32  ;;  %v10432_v32 = vld [vmem:[%s21289_s3 + $0x38] sm:$0xff] }
0x50b1   :  { %9421 = vrot.lane.b32.xlu1 %v9419_v58, %s16406_s7 }
0x5123   :  { %v9422_v0 = vpop.permute.xlu1 %9421 }
0x5124   :  { %13520 = vst.msk [vmem:[%s21293_s9 + $0x68] sm:$0xff] %vm98_vm0, %v9422_v0  ;;  %13522 = vmatmul.mubr.msk.f32.vlgmr.msra.gmra.mrb[58].mxu1 %vm98_vm0, %v9422_v0  ;;  %13523 = vmatmul.mubr.msk.f32.vlgmr.msra.gmra.mrb[58].mxu0 %vm98_vm0, %v9422_v0  ;;  %v10236_v0 = vld [vmem:[%s21285_s1 + $0x20] sm:$0xff] }
0x5125   :  { %15222 = vmatpush1.bf16.msra.mxu0 %v19767_v36  ;;  %15238 = vmatpush1.bf16.msra.mxu1 %v19498_v13 }
0x5126   :  { %15224 = vmatprep.subr.bf16.mxu0 %v19769_v40  ;;  %15240 = vmatprep.subr.bf16.mxu1 %v19500_v63 }
0x5127   :  { %9791 = vmatprep.mubr.f32.mxu0 %v16405_v3  ;;  %9917 = vmatprep.mubr.f32.mxu1 %v16405_v3 }
0x5129   :  { %15226 = vmatpush1.bf16.msra.mxu0 %v19785_v33  ;;  %15242 = vmatpush1.bf16.msra.mxu1 %v19516_v23 }
0x512a   :  { %15228 = vmatprep.subr.bf16.mxu0 %v19788_v47  ;;  %15244 = vmatprep.subr.bf16.mxu1 %v19519_v18 }
0x512d   :  { %15230 = vmatpush1.bf16.msra.mxu0 %v19803_v8  ;;  %15246 = vmatpush1.bf16.msra.mxu1 %v19534_v27 }
0x512e   :  { %15232 = vmatprep.subr.bf16.mxu0 %v19806_v50  ;;  %15248 = vmatprep.subr.bf16.mxu1 %v19537_v60 }
0x5131   :  { %15234 = vmatpush1.bf16.msra.mxu0 %v19815_v29  ;;  %15250 = vmatpush1.bf16.msra.mxu1 %v19546_v44 }
0x5132   :  { %15252 = vmatprep.subr.bf16.mxu1 %v19581_v26  ;;  %15268 = vmatprep.subr.bf16.mxu0 %v19592_v62 }
0x51f7   :  { %v9597_v13 = vpop.f32.mrb[58].mxu1 }
0x51f8   :  { %v9602_v63 = vadd.f32 %v9597_v13, %v17863_v48  ;;  %v9599_v23 = vpop.f32.mrb[59].mxu1  ;;  %v10238_v13 = vld [vmem:[%s21285_s1 + $0x30] sm:$0xff] }
0x51f9   :  { %v9603_v18 = vadd.f32 %v9599_v23, %v17866_v4  ;;  %v10243_v23 = vld [vmem:[%s21285_s1 + $0x58] sm:$0xff] }
0x51fa   :  { %16285 = vtanh.f32 %v9602_v63  ;;  %v10241_v63 = vld [vmem:[%s21285_s1 + $0x48] sm:$0xff] }
0x51fb   :  { %16287 = vtanh.f32 %v9603_v18  ;;  %v19984_v18 = vpack.c.bf16 %v10238_v13, %v10236_v0  ;;  %v10222_v0 = vld [vmem:[%s21292_s5 + $0x30] sm:$0xff]  ;;  %v10429_v13 = vld [vmem:[%s21289_s3 + $0x20] sm:$0xff] }
0x5204   :  { %v16286_v27 = vpop.eup %16285 }
0x5205   :  { %v16288_v49 = vpop.eup %16287  ;;  %v9606_v60 = vmul.f32 %v16286_v27, %v16558_v37  ;;  %v19987_v27 = vpack.c.bf16 %v10243_v23, %v10241_v63  ;;  %v10431_v23 = vld [vmem:[%s21289_s3 + $0x30] sm:$0xff] }
0x5206   :  { %v9607_v52 = vmul.f32 %v16288_v49, %v16561_v38  ;;  %v10240_v49 = vld [vmem:[%s21285_s1 + $0x40] sm:$0xff] }
0x5207   :  { %v9608_v44 = vadd.f32 %v9606_v60, %v16564_v39  ;;  %v10242_v60 = vld [vmem:[%s21285_s1 + $0x50] sm:$0xff] }
0x5208   :  { %v9609_v26 = vadd.f32 %v9607_v52, %v16567_v41  ;;  %v10245_v52 = vld [vmem:[%s21285_s1 + $0x68] sm:$0xff] }
0x5209   :  { %v9610_v62 = vmul.f32 %v9608_v44, %v19821_v25 }
0x520a   :  { %v9611_v51 = vmul.f32 %v9609_v26, %v9608_v44  ;;  %v10247_v44 = vld [vmem:[%s21285_s1 + $0x78] sm:$0xff] }
0x520c   :  { %9613 = vrot.lane.b32.xlu0 %v9611_v51, %s16406_s7  ;;  %v20005_v51 = vpack.c.bf16 %v10247_v44, %v10245_v52  ;;  %v20114_v52 = vpack.c.bf16 %v10431_v23, %v10429_v13 }
0x527e   :  { %v9614_v11 = vpop.permute.xlu0 %9613 }
0x527f   :  { %v19889_v42 = vadd.f32 %v9614_v11, %v9610_v62  ;;  %v10244_v62 = vld [vmem:[%s21285_s1 + $0x60] sm:$0xff]  ;;  %v10246_v11 = vld [vmem:[%s21285_s1 + $0x70] sm:$0xff] }
0x5281   :  { %16289 = vtanh.f32 %v19889_v42 }
0x528b   :  { %v16290_v34 = vpop.eup %16289 }
0x528c   :  { %v9618_v30 = vmul.f32 %v16290_v34, %v9609_v26  ;;  %v20002_v26 = vpack.c.bf16 %v10242_v60, %v10240_v49  ;;  %v20014_v34 = vpack.c.bf16 %v10246_v11, %v10244_v62  ;;  %v10225_v49 = vld [vmem:[%s21292_s5 + $0x48] sm:$0xff]  ;;  %v10227_v60 = vld [vmem:[%s21292_s5 + $0x58] sm:$0xff] }
0x528d   :  { %v20116_v44 = vpack.c.bf16 %v10227_v60, %v10225_v49  ;;  %v10434_v62 = vld [vmem:[%s21289_s3 + $0x48] sm:$0xff]  ;;  %v10436_v11 = vld [vmem:[%s21289_s3 + $0x58] sm:$0xff] }
0x528e   :  { %9723 = vrot.lane.b32.xlu1 %v9618_v30, %s16406_s7 }
0x5300   :  { %v9724_v35 = vpop.permute.xlu1 %9723 }
0x5301   :  { %13524 = vmatmul.mubr.msk.f32.vlgmr.msra.gmra.mrb[58].mxu0 %vm98_vm0, %v9724_v35  ;;  %13526 = vmatmul.mubr.msk.f32.vlgmr.msra.gmra.mrb[60].mxu1 %vm98_vm0, %v9724_v35 }
0x5302   :  { %15254 = vmatpush1.bf16.msra.mxu1 %v19594_v45  ;;  %15270 = vmatpush1.bf16.msra.mxu0 %v19606_v22 }
0x5303   :  { %15256 = vmatprep.subr.bf16.mxu1 %v19619_v53  ;;  %15272 = vmatprep.subr.bf16.mxu0 %v19621_v17 }
0x5304   :  { %9990 = vmatprep.mubr.f32.mxu1 %v16405_v3  ;;  %10110 = vmatprep.mubr.f32.mxu0 %v16405_v3 }
0x5306   :  { %15258 = vmatpush1.bf16.msra.mxu1 %v19633_v55  ;;  %15274 = vmatpush1.bf16.msra.mxu0 %v19646_v28 }
0x5307   :  { %15260 = vmatprep.subr.bf16.mxu1 %v19648_v9  ;;  %15276 = vmatprep.subr.bf16.mxu0 %v19659_v1 }
0x530a   :  { %15262 = vmatpush1.bf16.msra.mxu1 %v19671_v20  ;;  %15278 = vmatpush1.bf16.msra.mxu0 %v19684_v56 }
0x530b   :  { %15264 = vmatprep.subr.bf16.mxu1 %v19686_v61  ;;  %15280 = vmatprep.subr.bf16.mxu0 %v19698_v43 }
0x530e   :  { %15266 = vmatpush1.bf16.msra.mxu1 %v19707_v10  ;;  %15282 = vmatpush1.bf16.msra.mxu0 %v19711_v7 }
0x530f   :  { %15284 = vmatprep.subr.bf16.mxu0 %v19756_v2 }
0x53d4   :  { %v9793_v45 = vpop.f32.mrb[58].mxu0 }
0x53d5   :  { %v9798_v22 = vadd.f32 %v9793_v45, %v16758_v46  ;;  %v9795_v53 = vpop.f32.mrb[59].mxu0 }
0x53d6   :  { %v9799_v17 = vadd.f32 %v9795_v53, %v16764_v59 }
0x53d7   :  { %16291 = vtanh.f32 %v9798_v22 }
0x53d8   :  { %16293 = vtanh.f32 %v9799_v17 }
0x53e1   :  { %v16292_v55 = vpop.eup %16291 }
0x53e2   :  { %v16294_v28 = vpop.eup %16293  ;;  %v9802_v9 = vmul.f32 %v16292_v55, %v16558_v37 }
0x53e3   :  { %v9803_v1 = vmul.f32 %v16294_v28, %v16561_v38 }
0x53e4   :  { %v9804_v20 = vadd.f32 %v9802_v9, %v16564_v39 }
0x53e5   :  { %v9805_v56 = vadd.f32 %v9803_v1, %v16567_v41 }
0x53e6   :  { %v9806_v43 = vmul.f32 %v9804_v20, %v19853_v57  ;;  %v10239_v57 = vld [vmem:[%s21285_s1 + $0x38] sm:$0xff] }
0x53e7   :  { %v9807_v61 = vmul.f32 %v9805_v56, %v9804_v20  ;;  %v19968_v58 = vpack.c.bf16 %v10239_v57, %v10237_v14  ;;  %v10220_v57 = vld [vmem:[%s21292_s5 + $0x20] sm:$0xff] }
0x53e8   :  { %v20101_v63 = vpack.c.bf16 %v10222_v0, %v10220_v57 }
0x53e9   :  { %9809 = vrot.lane.b32.xlu0 %v9807_v61, %s16406_s7 }
0x545b   :  { %v9810_v10 = vpop.permute.xlu0 %9809 }
0x545c   :  { %v19920_v7 = vadd.f32 %v9810_v10, %v9806_v43 }
0x545e   :  { %16295 = vtanh.f32 %v19920_v7 }
0x5468   :  { %v16296_v2 = vpop.eup %16295 }
0x5469   :  { %v9814_v25 = vmul.f32 %v16296_v2, %v9805_v56 }
0x546b   :  { %9816 = vrot.lane.b32.xlu1 %v9814_v25, %s16406_s7  ;;  %v10217_v25 = vld [vmem:[%s21292_s5 + $0x8] sm:$0xff] }
0x54dd   :  { %v9817_v24 = vpop.permute.xlu1 %9816 }
0x54de   :  { %13525 = vst.msk [vmem:[%s21293_s9 + $0x70] sm:$0xff] %vm98_vm0, %v9817_v24  ;;  %13527 = vmatmul.mubr.msk.f32.vlgmr.msra.gmra.mrb[60].mxu1 %vm98_vm0, %v9817_v24  ;;  %13528 = vmatmul.mubr.msk.f32.vlgmr.msra.gmra.mrb[60].mxu0 %vm98_vm0, %v9817_v24  ;;  %v10219_v24 = vld [vmem:[%s21292_s5 + $0x18] sm:$0xff] }
0x54df   :  { %15286 = vmatpush1.bf16.msra.mxu0 %v19767_v36  ;;  %10186 = vmatprep.mubr.f32.mxu0 %v16405_v3 }
0x54e0   :  { %15288 = vmatprep.subr.bf16.mxu0 %v19769_v40  ;;  %10312 = vmatprep.mubr.f32.mxu1 %v16405_v3 }
0x54e3   :  { %15290 = vmatpush1.bf16.msra.mxu0 %v19785_v33 }
0x54e4   :  { %15292 = vmatprep.subr.bf16.mxu0 %v19788_v47 }
0x54e7   :  { %15294 = vmatpush1.bf16.msra.mxu0 %v19803_v8 }
0x54e8   :  { %15296 = vmatprep.subr.bf16.mxu0 %v19806_v50 }
0x54eb   :  { %15298 = vmatpush1.bf16.msra.mxu0 %v19815_v29  ;;  %v10233_v29 = vld [vmem:[%s21285_s1 + $0x8] sm:$0xff] }
0x54ec   :  { %v19955_v16 = vpack.c.bf16 %v10235_v21, %v10233_v29  ;;  %v10223_v29 = vld [vmem:[%s21292_s5 + $0x38] sm:$0xff]  ;;  %v10430_v21 = vld [vmem:[%s21289_s3 + $0x28] sm:$0xff] }
0x54ed   :  { %v20089_v14 = vpack.c.bf16 %v10432_v32, %v10430_v21 }
0x54ee   :  { %15300 = vmatprep.subr.bf16.mxu1 %v19955_v16 }
0x54ef   :  { %15302 = vmatpush1.bf16.msra.mxu1 %v19966_v6 }
0x54f0   :  { %15304 = vmatprep.subr.bf16.mxu1 %v19968_v58 }
0x54f3   :  { %15306 = vmatpush1.bf16.msra.mxu1 %v19984_v18 }
0x54f4   :  { %15308 = vmatprep.subr.bf16.mxu1 %v19987_v27 }
0x54f7   :  { %15310 = vmatpush1.bf16.msra.mxu1 %v20002_v26 }
0x54f8   :  { %15312 = vmatprep.subr.bf16.mxu1 %v20005_v51 }
0x54fb   :  { %15314 = vmatpush1.bf16.msra.mxu1 %v20014_v34 }
0x55b1   :  { %v9992_v5 = vpop.f32.mrb[60].mxu1 }
0x55b2   :  { %v9997_v12 = vadd.f32 %v9992_v5, %v17863_v48  ;;  %v9994_v36 = vpop.f32.mrb[61].mxu1  ;;  %v10426_v5 = vld [vmem:[%s21289_s3 + $0x8] sm:$0xff] }
0x55b3   :  { %v9998_v19 = vadd.f32 %v9994_v36, %v17866_v4  ;;  %v10428_v36 = vld [vmem:[%s21289_s3 + $0x18] sm:$0xff] }
0x55b4   :  { %16297 = vtanh.f32 %v9997_v12  ;;  %v20049_v12 = vpack.c.bf16 %v10219_v24, %v10217_v25  ;;  %v10437_v24 = vld [vmem:[%s21289_s3 + $0x60] sm:$0xff] }
0x55b5   :  { %16299 = vtanh.f32 %v9998_v19  ;;  %v10216_v19 = vld [vmem:[%s21292_s5] sm:$0xff] }
0x55b6   :  { %15316 = vmatprep.subr.bf16.mxu1 %v20049_v12 }
0x55be   :  { %v16298_v40 = vpop.eup %16297 }
0x55bf   :  { %v16300_v15 = vpop.eup %16299  ;;  %v10001_v33 = vmul.f32 %v16298_v40, %v16558_v37  ;;  %v10218_v40 = vld [vmem:[%s21292_s5 + $0x10] sm:$0xff] }
0x55c0   :  { %v10002_v47 = vmul.f32 %v16300_v15, %v16561_v38  ;;  %v20060_v15 = vpack.c.bf16 %v10428_v36, %v10426_v5  ;;  %v10439_v5 = vld [vmem:[%s21289_s3 + $0x70] sm:$0xff] }
0x55c1   :  { %v10003_v8 = vadd.f32 %v10001_v33, %v16564_v39  ;;  %v20062_v33 = vpack.c.bf16 %v10218_v40, %v10216_v19  ;;  %v20179_v19 = vpack.c.bf16 %v10439_v5, %v10437_v24  ;;  %v10418_v24 = vld [vmem:[%s21290_s2 + $0x48] sm:$0xff]  ;;  %v10420_v5 = vld [vmem:[%s21290_s2 + $0x58] sm:$0xff] }
0x55c2   :  { %v10004_v50 = vadd.f32 %v10002_v47, %v16567_v41  ;;  %v10425_v47 = vld [vmem:[%s21289_s3] sm:$0xff]  ;;  %15332 = vmatprep.subr.bf16.mxu0 %v20060_v15 }
0x55c3   :  { %v10005_v30 = vmul.f32 %v10003_v8, %v19889_v42 }
0x55c4   :  { %v10006_v54 = vmul.f32 %v10004_v50, %v10003_v8  ;;  %v10427_v8 = vld [vmem:[%s21289_s3 + $0x10] sm:$0xff] }
0x55c6   :  { %10008 = vrot.lane.b32.xlu0 %v10006_v54, %s16406_s7  ;;  %v20074_v54 = vpack.c.bf16 %v10427_v8, %v10425_v47 }
0x5638   :  { %v10009_v35 = vpop.permute.xlu0 %10008 }
0x5639   :  { %v20019_v45 = vadd.f32 %v10009_v35, %v10005_v30  ;;  %v10224_v30 = vld [vmem:[%s21292_s5 + $0x40] sm:$0xff]  ;;  %v20127_v35 = vpack.c.bf16 %v10436_v11, %v10434_v62  ;;  %v10410_v11 = vld [vmem:[%s21290_s2 + $0x8] sm:$0xff] }
0x563b   :  { %16301 = vtanh.f32 %v20019_v45 }
0x5645   :  { %v16302_v22 = vpop.eup %16301 }
0x5646   :  { %v10013_v53 = vmul.f32 %v16302_v22, %v10004_v50  ;;  %v10221_v50 = vld [vmem:[%s21292_s5 + $0x28] sm:$0xff]  ;;  %v10226_v22 = vld [vmem:[%s21292_s5 + $0x50] sm:$0xff] }
0x5647   :  { %v20087_v31 = vpack.c.bf16 %v10223_v29, %v10221_v50 }
0x5648   :  { %10118 = vrot.lane.b32.xlu1 %v10013_v53, %s16406_s7  ;;  %v10433_v53 = vld [vmem:[%s21289_s3 + $0x40] sm:$0xff] }
0x56ba   :  { %v10119_v17 = vpop.permute.xlu1 %10118 }
0x56bb   :  { %13529 = vmatmul.mubr.msk.f32.vlgmr.msra.gmra.mrb[60].mxu0 %vm98_vm0, %v10119_v17  ;;  %13531 = vmatmul.mubr.msk.f32.vlgmr.msra.gmra.mrb[62].mxu1 %vm98_vm0, %v10119_v17  ;;  %v10435_v17 = vld [vmem:[%s21289_s3 + $0x50] sm:$0xff] }
0x56bc   :  { %10385 = vmatprep.mubr.f32.mxu1 %v16405_v3  ;;  %10505 = vmatprep.mubr.f32.mxu0 %v16405_v3 }
0x56bd   :  { %15318 = vmatpush1.bf16.msra.mxu1 %v20062_v33  ;;  %15334 = vmatpush1.bf16.msra.mxu0 %v20074_v54 }
0x56be   :  { %15320 = vmatprep.subr.bf16.mxu1 %v20087_v31  ;;  %15336 = vmatprep.subr.bf16.mxu0 %v20089_v14 }
0x56c1   :  { %15322 = vmatpush1.bf16.msra.mxu1 %v20101_v63  ;;  %15338 = vmatpush1.bf16.msra.mxu0 %v20114_v52 }
0x56c2   :  { %15324 = vmatprep.subr.bf16.mxu1 %v20116_v44  ;;  %15340 = vmatprep.subr.bf16.mxu0 %v20127_v35 }
0x578e   :  { %v10188_v55 = vpop.f32.mrb[60].mxu0 }
0x578f   :  { %v10193_v42 = vadd.f32 %v10188_v55, %v16758_v46  ;;  %v10190_v28 = vpop.f32.mrb[61].mxu0  ;;  %v20139_v55 = vpack.c.bf16 %v10226_v22, %v10224_v30  ;;  %v10412_v30 = vld [vmem:[%s21290_s2 + $0x18] sm:$0xff]  ;;  %v10409_v22 = vld [vmem:[%s21290_s2] sm:$0xff] }
0x5790   :  { %v10194_v9 = vadd.f32 %v10190_v28, %v16764_v59  ;;  %v10231_v28 = vld [vmem:[%s21292_s5 + $0x78] sm:$0xff] }
0x5791   :  { %16303 = vtanh.f32 %v10193_v42  ;;  %v10229_v42 = vld [vmem:[%s21292_s5 + $0x68] sm:$0xff]  ;;  %15326 = vmatpush1.bf16.msra.mxu1 %v20139_v55 }
0x5792   :  { %16305 = vtanh.f32 %v10194_v9  ;;  %v10438_v9 = vld [vmem:[%s21289_s3 + $0x68] sm:$0xff] }
0x579b   :  { %v16304_v1 = vpop.eup %16303 }
0x579c   :  { %v16306_v20 = vpop.eup %16305  ;;  %v10197_v56 = vmul.f32 %v16304_v1, %v16558_v37  ;;  %v20152_v1 = vpack.c.bf16 %v10435_v17, %v10433_v53  ;;  %v20224_v53 = vpack.c.bf16 %v10412_v30, %v10410_v11  ;;  %v10411_v17 = vld [vmem:[%s21290_s2 + $0x10] sm:$0xff] }
0x579d   :  { %v10198_v61 = vmul.f32 %v16306_v20, %v16561_v38  ;;  %v20154_v20 = vpack.c.bf16 %v10231_v28, %v10229_v42  ;;  %v10414_v42 = vld [vmem:[%s21290_s2 + $0x28] sm:$0xff]  ;;  %v10416_v28 = vld [vmem:[%s21290_s2 + $0x38] sm:$0xff] }
0x579e   :  { %v20032_v43 = vadd.f32 %v10197_v56, %v16564_v39  ;;  %v10440_v56 = vld [vmem:[%s21289_s3 + $0x78] sm:$0xff]  ;;  %15342 = vmatpush1.bf16.msra.mxu0 %v20152_v1 }
0x579f   :  { %v20035_v10 = vadd.f32 %v10198_v61, %v16567_v41  ;;  %v10228_v61 = vld [vmem:[%s21292_s5 + $0x60] sm:$0xff]  ;;  %v20166_v25 = vpack.c.bf16 %v10440_v56, %v10438_v9  ;;  %15328 = vmatprep.subr.bf16.mxu1 %v20154_v20  ;;  %v20235_v9 = vpack.c.bf16 %v10411_v17, %v10409_v22  ;;  %v20237_v56 = vpack.c.bf16 %v10416_v28, %v10414_v42 }
0x57a0   :  { %v10201_v40 = vmul.f32 %v20032_v43, %v19920_v7 }
0x57a1   :  { %v10202_v2 = vmul.f32 %v20035_v10, %v20032_v43  ;;  %15344 = vmatprep.subr.bf16.mxu0 %v20166_v25 }
0x57a2   :  { %15346 = vmatpush1.bf16.msra.mxu0 %v20179_v19 }
0x57a3   :  { %10204 = vrot.lane.b32.xlu0 %v10202_v2, %s16406_s7  ;;  %v10230_v2 = vld [vmem:[%s21292_s5 + $0x70] sm:$0xff]  ;;  %15348 = vmatprep.subr.bf16.mxu0 %v20224_v53 }
0x57a4   :  { %v20175_v36 = vpack.c.bf16 %v10230_v2, %v10228_v61  ;;  %v10413_v61 = vld [vmem:[%s21290_s2 + $0x20] sm:$0xff]  ;;  %v10415_v2 = vld [vmem:[%s21290_s2 + $0x30] sm:$0xff] }
0x57a6   :  { %15330 = vmatpush1.bf16.msra.mxu1 %v20175_v36 }
0x57a7   :  { %15364 = vmatprep.subr.bf16.mxu1 %v19955_v16 }
0x5815   :  { %v10205_v47 = vpop.permute.xlu0 %10204 }
0x5816   :  { %v20187_v8 = vadd.f32 %v10205_v47, %v10201_v40  ;;  %v20253_v40 = vpack.c.bf16 %v10415_v2, %v10413_v61  ;;  %v20256_v47 = vpack.c.bf16 %v10420_v5, %v10418_v24 }
0x5818   :  { %16307 = vtanh.f32 %v20187_v8 }
0x5822   :  { %v16308_v50 = vpop.eup %16307 }
0x5823   :  { %v10209_v29 = vmul.f32 %v16308_v50, %v20035_v10  ;;  %v10417_v50 = vld [vmem:[%s21290_s2 + $0x40] sm:$0xff] }
0x5825   :  { %10211 = vrot.lane.b32.xlu1 %v10209_v29, %s16406_s7  ;;  %v10419_v29 = vld [vmem:[%s21290_s2 + $0x50] sm:$0xff] }
0x5897   :  { %v10212_v21 = vpop.permute.xlu1 %10211 }
0x5898   :  { %13530 = vst.msk [vmem:[%s21293_s9 + $0x78] sm:$0xff] %vm98_vm0, %v10212_v21  ;;  %13532 = vmatmul.mubr.msk.f32.vlgmr.msra.gmra.mrb[62].mxu1 %vm98_vm0, %v10212_v21  ;;  %13533 = vmatmul.mubr.msk.f32.vlgmr.msra.gmra.mrb[62].mxu0 %vm98_vm0, %v10212_v21  ;;  %v10422_v21 = vld [vmem:[%s21290_s2 + $0x68] sm:$0xff] }
0x5899   :  { %15366 = vmatpush1.bf16.msra.mxu1 %v19966_v6  ;;  %10581 = vmatprep.mubr.f32.mxu0 %v16405_v3 }
0x589a   :  { %15368 = vmatprep.subr.bf16.mxu1 %v19968_v58  ;;  %10707 = vmatprep.mubr.f32.mxu1 %v16405_v3 }
0x589b   :  { %15350 = vmatpush1.bf16.msra.mxu0 %v20235_v9 }
0x589c   :  { %15352 = vmatprep.subr.bf16.mxu0 %v20237_v56 }
0x589d   :  { %15370 = vmatpush1.bf16.msra.mxu1 %v19984_v18 }
0x589e   :  { %15372 = vmatprep.subr.bf16.mxu1 %v19987_v27 }
0x589f   :  { %15354 = vmatpush1.bf16.msra.mxu0 %v20253_v40 }
0x58a0   :  { %15356 = vmatprep.subr.bf16.mxu0 %v20256_v47 }
0x58a1   :  { %15374 = vmatpush1.bf16.msra.mxu1 %v20002_v26 }
0x58a2   :  { %15376 = vmatprep.subr.bf16.mxu1 %v20005_v51 }
0x58a5   :  { %15378 = vmatpush1.bf16.msra.mxu1 %v20014_v34 }
0x58a6   :  { %15380 = vmatprep.subr.bf16.mxu1 %v20049_v12 }
0x596b   :  { %v10387_v7 = vpop.f32.mrb[62].mxu1 }
0x596c   :  { %v10392_v43 = vadd.f32 %v10387_v7, %v17863_v48  ;;  %v10389_v10 = vpop.f32.mrb[63].mxu1  ;;  %v10424_v7 = vld [vmem:[%s21290_s2 + $0x78] sm:$0xff] }
0x596d   :  { %v10393_v32 = vadd.f32 %v10389_v10, %v17866_v4  ;;  %v20274_v10 = vpack.c.bf16 %v10424_v7, %v10422_v21 }
0x596e   :  { %16309 = vtanh.f32 %v10392_v43  ;;  %v20271_v43 = vpack.c.bf16 %v10419_v29, %v10417_v50 }
0x596f   :  { %16311 = vtanh.f32 %v10393_v32  ;;  %v10421_v32 = vld [vmem:[%s21290_s2 + $0x60] sm:$0xff] }
0x5970   :  { %15358 = vmatpush1.bf16.msra.mxu0 %v20271_v43 }
0x5971   :  { %15360 = vmatprep.subr.bf16.mxu0 %v20274_v10 }
0x5978   :  { %v16310_v57 = vpop.eup %16309 }
0x5979   :  { %v16312_v0 = vpop.eup %16311  ;;  %v10396_v13 = vmul.f32 %v16310_v57, %v16558_v37  ;;  %v10423_v57 = vld [vmem:[%s21290_s2 + $0x70] sm:$0xff] }
0x597a   :  { %v10397_v23 = vmul.f32 %v16312_v0, %v16561_v38  ;;  %v20283_v0 = vpack.c.bf16 %v10423_v57, %v10421_v32 }
0x597b   :  { %v10398_v49 = vadd.f32 %v10396_v13, %v16564_v39 }
0x597c   :  { %v10399_v60 = vadd.f32 %v10397_v23, %v16567_v41  ;;  %15362 = vmatpush1.bf16.msra.mxu0 %v20283_v0 }
0x597d   :  { %15396 = vmatprep.subr.bf16.mxu0 %v20060_v15  ;;  %v10400_v13 = vmul.f32 %v10398_v49, %v20019_v45 }
0x597e   :  { %v10401_v62 = vmul.f32 %v10399_v60, %v10398_v49 }
0x5980   :  { %10403 = vrot.lane.b32.xlu0 %v10401_v62, %s16406_s7 }
0x59f2   :  { %v10404_v23 = vpop.permute.xlu0 %10403 }
0x59f3   :  { %v20289_v62 = vadd.f32 %v10404_v23, %v10400_v13 }
0x59f5   :  { %16313 = vtanh.f32 %v20289_v62 }
0x59ff   :  { %v16314_v11 = vpop.eup %16313 }
0x5a00   :  { %v10408_v30 = vmul.f32 %v16314_v11, %v10399_v60 }
0x5a02   :  { %10513 = vrot.lane.b32.xlu1 %v10408_v30, %s16406_s7 }
0x5a74   :  { %v10514_v22 = vpop.permute.xlu1 %10513 }
0x5a75   :  { %13534 = vmatmul.mubr.msk.f32.vlgmr.msra.gmra.mrb[62].mxu0 %vm98_vm0, %v10514_v22  ;;  %13536 = vmatmul.mubr.msk.f32.vlgmr.msra.gmra.mrb[64].mxu1 %vm98_vm0, %v10514_v22 }
0x5a76   :  { %15382 = vmatpush1.bf16.msra.mxu1 %v20062_v33  ;;  %15398 = vmatpush1.bf16.msra.mxu0 %v20074_v54 }
0x5a77   :  { %15384 = vmatprep.subr.bf16.mxu1 %v20087_v31  ;;  %15400 = vmatprep.subr.bf16.mxu0 %v20089_v14 }
0x5a78   :  { %10780 = vmatprep.mubr.f32.mxu1 %v16405_v3  ;;  %10900 = vmatprep.mubr.f32.mxu0 %v16405_v3 }
0x5a7a   :  { %15386 = vmatpush1.bf16.msra.mxu1 %v20101_v63  ;;  %15402 = vmatpush1.bf16.msra.mxu0 %v20114_v52 }
0x5a7b   :  { %15388 = vmatprep.subr.bf16.mxu1 %v20116_v44  ;;  %15404 = vmatprep.subr.bf16.mxu0 %v20127_v35 }
0x5a7e   :  { %15390 = vmatpush1.bf16.msra.mxu1 %v20139_v55  ;;  %15406 = vmatpush1.bf16.msra.mxu0 %v20152_v1 }
0x5a7f   :  { %15392 = vmatprep.subr.bf16.mxu1 %v20154_v20  ;;  %15408 = vmatprep.subr.bf16.mxu0 %v20166_v25 }
0x5a82   :  { %15394 = vmatpush1.bf16.msra.mxu1 %v20175_v36  ;;  %15410 = vmatpush1.bf16.msra.mxu0 %v20179_v19 }
0x5a83   :  { %15412 = vmatprep.subr.bf16.mxu0 %v20224_v53  ;;  %15428 = vmatprep.subr.bf16.mxu1 %v19955_v16 }
0x5b48   :  { %v10583_v45 = vpop.f32.mrb[62].mxu0 }
0x5b49   :  { %v10588_v49 = vadd.f32 %v10583_v45, %v16758_v46  ;;  %v10585_v60 = vpop.f32.mrb[63].mxu0 }
0x5b4a   :  { %v10589_v17 = vadd.f32 %v10585_v60, %v16764_v59 }
0x5b4b   :  { %16315 = vtanh.f32 %v10588_v49 }
0x5b4c   :  { %16317 = vtanh.f32 %v10589_v17 }
0x5b55   :  { %v16316_v42 = vpop.eup %16315 }
0x5b56   :  { %v16318_v28 = vpop.eup %16317  ;;  %v10592_v61 = vmul.f32 %v16316_v42, %v16558_v37 }
0x5b57   :  { %v10593_v2 = vmul.f32 %v16318_v28, %v16561_v38 }
0x5b58   :  { %v10594_v24 = vadd.f32 %v10592_v61, %v16564_v39 }
0x5b59   :  { %v10595_v5 = vadd.f32 %v10593_v2, %v16567_v41 }
0x5b5a   :  { %v10596_v16 = vmul.f32 %v10594_v24, %v20187_v8 }
0x5b5b   :  { %v10597_v50 = vmul.f32 %v10595_v5, %v10594_v24  ;;  %v11420_v24 = vld [vmem:[%s21285_s1 + $0x18] sm:$0xff] }
0x5b5d   :  { %10599 = vrot.lane.b32.xlu0 %v10597_v50, %s16406_s7 }
0x5bcf   :  { %v10600_v29 = vpop.permute.xlu0 %10599 }
0x5bd0   :  { %v20321_v21 = vadd.f32 %v10600_v29, %v10596_v16  ;;  %v11419_v16 = vld [vmem:[%s21285_s1 + $0x10] sm:$0xff]  ;;  %v11422_v29 = vld [vmem:[%s21285_s1 + $0x28] sm:$0xff] }
0x5bd2   :  { %16319 = vtanh.f32 %v20321_v21 }
0x5bdc   :  { %v16320_v7 = vpop.eup %16319 }
0x5bdd   :  { %v10604_v32 = vmul.f32 %v16320_v7, %v10595_v5  ;;  %v11417_v5 = vld [vmem:[%s21285_s1] sm:$0xff] }
0x5bde   :  { %v20434_v7 = vpack.c.bf16 %v11419_v16, %v11417_v5  ;;  %v11617_v5 = vld [vmem:[%s21289_s3 + $0x38] sm:$0xff] }
0x5bdf   :  { %10606 = vrot.lane.b32.xlu1 %v10604_v32, %s16406_s7 }
0x5c51   :  { %v10607_v57 = vpop.permute.xlu1 %10606 }
0x5c52   :  { %13535 = vst.msk [vmem:[%s21293_s9 + $0x80] sm:$0xff] %vm98_vm0, %v10607_v57  ;;  %13537 = vmatmul.mubr.msk.f32.vlgmr.msra.gmra.mrb[64].mxu1 %vm98_vm0, %v10607_v57  ;;  %13538 = vmatmul.mubr.msk.f32.vlgmr.msra.gmra.mrb[64].mxu0 %vm98_vm0, %v10607_v57  ;;  %v11421_v57 = vld [vmem:[%s21285_s1 + $0x20] sm:$0xff] }
0x5c53   :  { %15414 = vmatpush1.bf16.msra.mxu0 %v20235_v9  ;;  %15430 = vmatpush1.bf16.msra.mxu1 %v19966_v6 }
0x5c54   :  { %15416 = vmatprep.subr.bf16.mxu0 %v20237_v56  ;;  %15432 = vmatprep.subr.bf16.mxu1 %v19968_v58 }
0x5c55   :  { %10976 = vmatprep.mubr.f32.mxu0 %v16405_v3  ;;  %11102 = vmatprep.mubr.f32.mxu1 %v16405_v3 }
0x5c57   :  { %15418 = vmatpush1.bf16.msra.mxu0 %v20253_v40  ;;  %15434 = vmatpush1.bf16.msra.mxu1 %v19984_v18 }
0x5c58   :  { %15420 = vmatprep.subr.bf16.mxu0 %v20256_v47  ;;  %15436 = vmatprep.subr.bf16.mxu1 %v19987_v27 }
0x5c5b   :  { %15422 = vmatpush1.bf16.msra.mxu0 %v20271_v43  ;;  %15438 = vmatpush1.bf16.msra.mxu1 %v20002_v26 }
0x5c5c   :  { %15424 = vmatprep.subr.bf16.mxu0 %v20274_v10  ;;  %15440 = vmatprep.subr.bf16.mxu1 %v20005_v51 }
0x5c5f   :  { %15426 = vmatpush1.bf16.msra.mxu0 %v20283_v0  ;;  %15442 = vmatpush1.bf16.msra.mxu1 %v20014_v34 }
0x5c60   :  { %15444 = vmatprep.subr.bf16.mxu1 %v20049_v12  ;;  %15460 = vmatprep.subr.bf16.mxu0 %v20060_v15 }
0x5d25   :  { %v10782_v6 = vpop.f32.mrb[64].mxu1 }
0x5d26   :  { %v10787_v58 = vadd.f32 %v10782_v6, %v17863_v48  ;;  %v10784_v18 = vpop.f32.mrb[65].mxu1  ;;  %v11423_v6 = vld [vmem:[%s21285_s1 + $0x30] sm:$0xff] }
0x5d27   :  { %v10788_v27 = vadd.f32 %v10784_v18, %v17866_v4  ;;  %v11428_v18 = vld [vmem:[%s21285_s1 + $0x58] sm:$0xff] }
0x5d28   :  { %16321 = vtanh.f32 %v10787_v58  ;;  %v11426_v58 = vld [vmem:[%s21285_s1 + $0x48] sm:$0xff] }
0x5d29   :  { %16323 = vtanh.f32 %v10788_v27  ;;  %v20452_v27 = vpack.c.bf16 %v11423_v6, %v11421_v57  ;;  %v11407_v57 = vld [vmem:[%s21292_s5 + $0x30] sm:$0xff]  ;;  %v11614_v6 = vld [vmem:[%s21289_s3 + $0x20] sm:$0xff] }
0x5d32   :  { %v16322_v26 = vpop.eup %16321 }
0x5d33   :  { %v16324_v8 = vpop.eup %16323  ;;  %v10791_v51 = vmul.f32 %v16322_v26, %v16558_v37  ;;  %v20455_v26 = vpack.c.bf16 %v11428_v18, %v11426_v58  ;;  %v11616_v18 = vld [vmem:[%s21289_s3 + $0x30] sm:$0xff] }
0x5d34   :  { %v10792_v13 = vmul.f32 %v16324_v8, %v16561_v38  ;;  %v11425_v8 = vld [vmem:[%s21285_s1 + $0x40] sm:$0xff] }
0x5d35   :  { %v10793_v34 = vadd.f32 %v10791_v51, %v16564_v39  ;;  %v11427_v51 = vld [vmem:[%s21285_s1 + $0x50] sm:$0xff] }
0x5d36   :  { %v10794_v12 = vadd.f32 %v10792_v13, %v16567_v41  ;;  %v11430_v13 = vld [vmem:[%s21285_s1 + $0x68] sm:$0xff] }
0x5d37   :  { %v10795_v15 = vmul.f32 %v10793_v34, %v20289_v62 }
0x5d38   :  { %v10796_v23 = vmul.f32 %v10794_v12, %v10793_v34  ;;  %v11432_v34 = vld [vmem:[%s21285_s1 + $0x78] sm:$0xff] }
0x5d3a   :  { %10798 = vrot.lane.b32.xlu0 %v10796_v23, %s16406_s7  ;;  %v20473_v23 = vpack.c.bf16 %v11432_v34, %v11430_v13  ;;  %v20582_v13 = vpack.c.bf16 %v11616_v18, %v11614_v6 }
0x5dac   :  { %v10799_v11 = vpop.permute.xlu0 %10798 }
0x5dad   :  { %v20357_v30 = vadd.f32 %v10799_v11, %v10795_v15  ;;  %v11429_v15 = vld [vmem:[%s21285_s1 + $0x60] sm:$0xff]  ;;  %v11431_v11 = vld [vmem:[%s21285_s1 + $0x70] sm:$0xff] }
0x5daf   :  { %16325 = vtanh.f32 %v20357_v30 }
0x5db9   :  { %v16326_v22 = vpop.eup %16325 }
0x5dba   :  { %v10803_v45 = vmul.f32 %v16326_v22, %v10794_v12  ;;  %v20470_v12 = vpack.c.bf16 %v11427_v51, %v11425_v8  ;;  %v20482_v22 = vpack.c.bf16 %v11431_v11, %v11429_v15  ;;  %v11410_v8 = vld [vmem:[%s21292_s5 + $0x48] sm:$0xff]  ;;  %v11412_v51 = vld [vmem:[%s21292_s5 + $0x58] sm:$0xff] }
0x5dbb   :  { %v20584_v34 = vpack.c.bf16 %v11412_v51, %v11410_v8  ;;  %v11619_v15 = vld [vmem:[%s21289_s3 + $0x48] sm:$0xff]  ;;  %v11621_v11 = vld [vmem:[%s21289_s3 + $0x58] sm:$0xff] }
0x5dbc   :  { %10908 = vrot.lane.b32.xlu1 %v10803_v45, %s16406_s7 }
0x5e2e   :  { %v10909_v49 = vpop.permute.xlu1 %10908 }
0x5e2f   :  { %13539 = vmatmul.mubr.msk.f32.vlgmr.msra.gmra.mrb[64].mxu0 %vm98_vm0, %v10909_v49  ;;  %13541 = vmatmul.mubr.msk.f32.vlgmr.msra.gmra.mrb[66].mxu1 %vm98_vm0, %v10909_v49 }
0x5e30   :  { %15446 = vmatpush1.bf16.msra.mxu1 %v20062_v33  ;;  %15462 = vmatpush1.bf16.msra.mxu0 %v20074_v54 }
0x5e31   :  { %15448 = vmatprep.subr.bf16.mxu1 %v20087_v31  ;;  %15464 = vmatprep.subr.bf16.mxu0 %v20089_v14 }
0x5e32   :  { %11175 = vmatprep.mubr.f32.mxu1 %v16405_v3  ;;  %11295 = vmatprep.mubr.f32.mxu0 %v16405_v3 }
0x5e34   :  { %15450 = vmatpush1.bf16.msra.mxu1 %v20101_v63  ;;  %15466 = vmatpush1.bf16.msra.mxu0 %v20114_v52 }
0x5e35   :  { %15452 = vmatprep.subr.bf16.mxu1 %v20116_v44  ;;  %15468 = vmatprep.subr.bf16.mxu0 %v20127_v35 }
0x5e38   :  { %15454 = vmatpush1.bf16.msra.mxu1 %v20139_v55  ;;  %15470 = vmatpush1.bf16.msra.mxu0 %v20152_v1 }
0x5e39   :  { %15456 = vmatprep.subr.bf16.mxu1 %v20154_v20  ;;  %15472 = vmatprep.subr.bf16.mxu0 %v20166_v25 }
0x5e3c   :  { %15458 = vmatpush1.bf16.msra.mxu1 %v20175_v36  ;;  %15474 = vmatpush1.bf16.msra.mxu0 %v20179_v19 }
0x5e3d   :  { %15476 = vmatprep.subr.bf16.mxu0 %v20224_v53 }
0x5f02   :  { %v10978_v33 = vpop.f32.mrb[64].mxu0 }
0x5f03   :  { %v10983_v54 = vadd.f32 %v10978_v33, %v16758_v46  ;;  %v10980_v31 = vpop.f32.mrb[65].mxu0 }
0x5f04   :  { %v10984_v14 = vadd.f32 %v10980_v31, %v16764_v59 }
0x5f05   :  { %16327 = vtanh.f32 %v10983_v54 }
0x5f06   :  { %16329 = vtanh.f32 %v10984_v14 }
0x5f0f   :  { %v16328_v63 = vpop.eup %16327 }
0x5f10   :  { %v16330_v52 = vpop.eup %16329  ;;  %v10987_v44 = vmul.f32 %v16328_v63, %v16558_v37 }
0x5f11   :  { %v10988_v35 = vmul.f32 %v16330_v52, %v16561_v38 }
0x5f12   :  { %v10989_v55 = vadd.f32 %v10987_v44, %v16564_v39 }
0x5f13   :  { %v10990_v1 = vadd.f32 %v10988_v35, %v16567_v41 }
0x5f14   :  { %v10991_v25 = vmul.f32 %v10989_v55, %v20321_v21  ;;  %v11424_v21 = vld [vmem:[%s21285_s1 + $0x38] sm:$0xff] }
0x5f15   :  { %v10992_v20 = vmul.f32 %v10990_v1, %v10989_v55  ;;  %v20436_v32 = vpack.c.bf16 %v11424_v21, %v11422_v29  ;;  %v11405_v21 = vld [vmem:[%s21292_s5 + $0x20] sm:$0xff] }
0x5f16   :  { %v20569_v58 = vpack.c.bf16 %v11407_v57, %v11405_v21 }
0x5f17   :  { %10994 = vrot.lane.b32.xlu0 %v10992_v20, %s16406_s7 }
0x5f89   :  { %v10995_v36 = vpop.permute.xlu0 %10994 }
0x5f8a   :  { %v20388_v19 = vadd.f32 %v10995_v36, %v10991_v25 }
0x5f8c   :  { %16331 = vtanh.f32 %v20388_v19 }
0x5f96   :  { %v16332_v53 = vpop.eup %16331 }
0x5f97   :  { %v10999_v62 = vmul.f32 %v16332_v53, %v10990_v1 }
0x5f99   :  { %11001 = vrot.lane.b32.xlu1 %v10999_v62, %s16406_s7  ;;  %v11402_v62 = vld [vmem:[%s21292_s5 + $0x8] sm:$0xff] }
0x600b   :  { %v11002_v60 = vpop.permute.xlu1 %11001 }
0x600c   :  { %13540 = vst.msk [vmem:[%s21293_s9 + $0x88] sm:$0xff] %vm98_vm0, %v11002_v60  ;;  %13542 = vmatmul.mubr.msk.f32.vlgmr.msra.gmra.mrb[66].mxu1 %vm98_vm0, %v11002_v60  ;;  %13543 = vmatmul.mubr.msk.f32.vlgmr.msra.gmra.mrb[66].mxu0 %vm98_vm0, %v11002_v60  ;;  %v11404_v60 = vld [vmem:[%s21292_s5 + $0x18] sm:$0xff] }
0x600d   :  { %15478 = vmatpush1.bf16.msra.mxu0 %v20235_v9  ;;  %11371 = vmatprep.mubr.f32.mxu0 %v16405_v3 }
0x600e   :  { %15480 = vmatprep.subr.bf16.mxu0 %v20237_v56  ;;  %11497 = vmatprep.mubr.f32.mxu1 %v16405_v3 }
0x6011   :  { %15482 = vmatpush1.bf16.msra.mxu0 %v20253_v40 }
0x6012   :  { %15484 = vmatprep.subr.bf16.mxu0 %v20256_v47 }
0x6015   :  { %15486 = vmatpush1.bf16.msra.mxu0 %v20271_v43 }
0x6016   :  { %15488 = vmatprep.subr.bf16.mxu0 %v20274_v10 }
0x6019   :  { %15490 = vmatpush1.bf16.msra.mxu0 %v20283_v0  ;;  %v11418_v0 = vld [vmem:[%s21285_s1 + $0x8] sm:$0xff] }
0x601a   :  { %v20423_v50 = vpack.c.bf16 %v11420_v24, %v11418_v0  ;;  %v11408_v0 = vld [vmem:[%s21292_s5 + $0x38] sm:$0xff]  ;;  %v11615_v24 = vld [vmem:[%s21289_s3 + $0x28] sm:$0xff] }
0x601b   :  { %v20557_v29 = vpack.c.bf16 %v11617_v5, %v11615_v24 }
0x601c   :  { %15492 = vmatprep.subr.bf16.mxu1 %v20423_v50 }
0x601d   :  { %15494 = vmatpush1.bf16.msra.mxu1 %v20434_v7 }
0x601e   :  { %15496 = vmatprep.subr.bf16.mxu1 %v20436_v32 }
0x6021   :  { %15498 = vmatpush1.bf16.msra.mxu1 %v20452_v27 }
0x6022   :  { %15500 = vmatprep.subr.bf16.mxu1 %v20455_v26 }
0x6025   :  { %15502 = vmatpush1.bf16.msra.mxu1 %v20470_v12 }
0x6026   :  { %15504 = vmatprep.subr.bf16.mxu1 %v20473_v23 }
0x6029   :  { %15506 = vmatpush1.bf16.msra.mxu1 %v20482_v22 }
0x60df   :  { %v11177_v17 = vpop.f32.mrb[66].mxu1 }
0x60e0   :  { %v11182_v42 = vadd.f32 %v11177_v17, %v17863_v48  ;;  %v11179_v9 = vpop.f32.mrb[67].mxu1  ;;  %v11611_v17 = vld [vmem:[%s21289_s3 + $0x8] sm:$0xff] }
0x60e1   :  { %v11183_v28 = vadd.f32 %v11179_v9, %v17866_v4  ;;  %v11613_v9 = vld [vmem:[%s21289_s3 + $0x18] sm:$0xff] }
0x60e2   :  { %16333 = vtanh.f32 %v11182_v42  ;;  %v20517_v42 = vpack.c.bf16 %v11404_v60, %v11402_v62  ;;  %v11622_v60 = vld [vmem:[%s21289_s3 + $0x60] sm:$0xff] }
0x60e3   :  { %16335 = vtanh.f32 %v11183_v28  ;;  %v11401_v28 = vld [vmem:[%s21292_s5] sm:$0xff] }
0x60e4   :  { %15508 = vmatprep.subr.bf16.mxu1 %v20517_v42 }
0x60ec   :  { %v16334_v56 = vpop.eup %16333 }
0x60ed   :  { %v16336_v61 = vpop.eup %16335  ;;  %v11186_v40 = vmul.f32 %v16334_v56, %v16558_v37  ;;  %v11403_v56 = vld [vmem:[%s21292_s5 + $0x10] sm:$0xff] }
0x60ee   :  { %v11187_v47 = vmul.f32 %v16336_v61, %v16561_v38  ;;  %v20528_v61 = vpack.c.bf16 %v11613_v9, %v11611_v17  ;;  %v11624_v17 = vld [vmem:[%s21289_s3 + $0x70] sm:$0xff] }
0x60ef   :  { %v11188_v43 = vadd.f32 %v11186_v40, %v16564_v39  ;;  %v20530_v40 = vpack.c.bf16 %v11403_v56, %v11401_v28  ;;  %v20647_v28 = vpack.c.bf16 %v11624_v17, %v11622_v60  ;;  %v11603_v60 = vld [vmem:[%s21290_s2 + $0x48] sm:$0xff]  ;;  %v11605_v17 = vld [vmem:[%s21290_s2 + $0x58] sm:$0xff] }
0x60f0   :  { %v11189_v10 = vadd.f32 %v11187_v47, %v16567_v41  ;;  %v11610_v47 = vld [vmem:[%s21289_s3] sm:$0xff]  ;;  %15524 = vmatprep.subr.bf16.mxu0 %v20528_v61 }
0x60f1   :  { %v11190_v45 = vmul.f32 %v11188_v43, %v20357_v30 }
0x60f2   :  { %v11191_v2 = vmul.f32 %v11189_v10, %v11188_v43  ;;  %v11612_v43 = vld [vmem:[%s21289_s3 + $0x10] sm:$0xff] }
0x60f4   :  { %11193 = vrot.lane.b32.xlu0 %v11191_v2, %s16406_s7  ;;  %v20542_v2 = vpack.c.bf16 %v11612_v43, %v11610_v47 }
0x6166   :  { %v11194_v49 = vpop.permute.xlu0 %11193 }
0x6167   :  { %v20487_v33 = vadd.f32 %v11194_v49, %v11190_v45  ;;  %v11409_v45 = vld [vmem:[%s21292_s5 + $0x40] sm:$0xff]  ;;  %v20595_v49 = vpack.c.bf16 %v11621_v11, %v11619_v15  ;;  %v11595_v11 = vld [vmem:[%s21290_s2 + $0x8] sm:$0xff] }
0x6169   :  { %16337 = vtanh.f32 %v20487_v33 }
0x6173   :  { %v16338_v54 = vpop.eup %16337 }
0x6174   :  { %v11198_v31 = vmul.f32 %v16338_v54, %v11189_v10  ;;  %v11406_v10 = vld [vmem:[%s21292_s5 + $0x28] sm:$0xff]  ;;  %v11411_v54 = vld [vmem:[%s21292_s5 + $0x50] sm:$0xff] }
0x6175   :  { %v20555_v16 = vpack.c.bf16 %v11408_v0, %v11406_v10 }
0x6176   :  { %11303 = vrot.lane.b32.xlu1 %v11198_v31, %s16406_s7  ;;  %v11618_v31 = vld [vmem:[%s21289_s3 + $0x40] sm:$0xff] }
0x61e8   :  { %v11304_v14 = vpop.permute.xlu1 %11303 }
0x61e9   :  { %13544 = vmatmul.mubr.msk.f32.vlgmr.msra.gmra.mrb[66].mxu0 %vm98_vm0, %v11304_v14  ;;  %13546 = vmatmul.mubr.msk.f32.vlgmr.msra.gmra.mrb[68].mxu1 %vm98_vm0, %v11304_v14  ;;  %v11620_v14 = vld [vmem:[%s21289_s3 + $0x50] sm:$0xff] }
0x61ea   :  { %11570 = vmatprep.mubr.f32.mxu1 %v16405_v3  ;;  %11690 = vmatprep.mubr.f32.mxu0 %v16405_v3 }
0x61eb   :  { %15510 = vmatpush1.bf16.msra.mxu1 %v20530_v40  ;;  %15526 = vmatpush1.bf16.msra.mxu0 %v20542_v2 }
0x61ec   :  { %15512 = vmatprep.subr.bf16.mxu1 %v20555_v16  ;;  %15528 = vmatprep.subr.bf16.mxu0 %v20557_v29 }
0x61ef   :  { %15514 = vmatpush1.bf16.msra.mxu1 %v20569_v58  ;;  %15530 = vmatpush1.bf16.msra.mxu0 %v20582_v13 }
0x61f0   :  { %15516 = vmatprep.subr.bf16.mxu1 %v20584_v34  ;;  %15532 = vmatprep.subr.bf16.mxu0 %v20595_v49 }
0x62bc   :  { %v11373_v63 = vpop.f32.mrb[66].mxu0 }
0x62bd   :  { %v11378_v30 = vadd.f32 %v11373_v63, %v16758_v46  ;;  %v11375_v52 = vpop.f32.mrb[67].mxu0  ;;  %v20607_v63 = vpack.c.bf16 %v11411_v54, %v11409_v45  ;;  %v11597_v45 = vld [vmem:[%s21290_s2 + $0x18] sm:$0xff]  ;;  %v11594_v54 = vld [vmem:[%s21290_s2] sm:$0xff] }
0x62be   :  { %v11379_v44 = vadd.f32 %v11375_v52, %v16764_v59  ;;  %v11416_v52 = vld [vmem:[%s21292_s5 + $0x78] sm:$0xff] }
0x62bf   :  { %16339 = vtanh.f32 %v11378_v30  ;;  %v11414_v30 = vld [vmem:[%s21292_s5 + $0x68] sm:$0xff]  ;;  %15518 = vmatpush1.bf16.msra.mxu1 %v20607_v63 }
0x62c0   :  { %16341 = vtanh.f32 %v11379_v44  ;;  %v11623_v44 = vld [vmem:[%s21289_s3 + $0x68] sm:$0xff] }
0x62c9   :  { %v16340_v35 = vpop.eup %16339 }
0x62ca   :  { %v16342_v55 = vpop.eup %16341  ;;  %v11382_v1 = vmul.f32 %v16340_v35, %v16558_v37  ;;  %v20620_v35 = vpack.c.bf16 %v11620_v14, %v11618_v31  ;;  %v20692_v31 = vpack.c.bf16 %v11597_v45, %v11595_v11  ;;  %v11596_v14 = vld [vmem:[%s21290_s2 + $0x10] sm:$0xff] }
0x62cb   :  { %v11383_v20 = vmul.f32 %v16342_v55, %v16561_v38  ;;  %v20622_v55 = vpack.c.bf16 %v11416_v52, %v11414_v30  ;;  %v11599_v30 = vld [vmem:[%s21290_s2 + $0x28] sm:$0xff]  ;;  %v11601_v52 = vld [vmem:[%s21290_s2 + $0x38] sm:$0xff] }
0x62cc   :  { %v20500_v25 = vadd.f32 %v11382_v1, %v16564_v39  ;;  %v11625_v1 = vld [vmem:[%s21289_s3 + $0x78] sm:$0xff]  ;;  %15534 = vmatpush1.bf16.msra.mxu0 %v20620_v35 }
0x62cd   :  { %v20503_v36 = vadd.f32 %v11383_v20, %v16567_v41  ;;  %v11413_v20 = vld [vmem:[%s21292_s5 + $0x60] sm:$0xff]  ;;  %v20634_v62 = vpack.c.bf16 %v11625_v1, %v11623_v44  ;;  %15520 = vmatprep.subr.bf16.mxu1 %v20622_v55  ;;  %v20703_v44 = vpack.c.bf16 %v11596_v14, %v11594_v54  ;;  %v20705_v1 = vpack.c.bf16 %v11601_v52, %v11599_v30 }
0x62ce   :  { %v11386_v56 = vmul.f32 %v20500_v25, %v20388_v19 }
0x62cf   :  { %v11387_v53 = vmul.f32 %v20503_v36, %v20500_v25  ;;  %15536 = vmatprep.subr.bf16.mxu0 %v20634_v62 }
0x62d0   :  { %15538 = vmatpush1.bf16.msra.mxu0 %v20647_v28 }
0x62d1   :  { %11389 = vrot.lane.b32.xlu0 %v11387_v53, %s16406_s7  ;;  %v11415_v53 = vld [vmem:[%s21292_s5 + $0x70] sm:$0xff]  ;;  %15540 = vmatprep.subr.bf16.mxu0 %v20692_v31 }
0x62d2   :  { %v20643_v9 = vpack.c.bf16 %v11415_v53, %v11413_v20  ;;  %v11598_v20 = vld [vmem:[%s21290_s2 + $0x20] sm:$0xff]  ;;  %v11600_v53 = vld [vmem:[%s21290_s2 + $0x30] sm:$0xff] }
0x62d4   :  { %15522 = vmatpush1.bf16.msra.mxu1 %v20643_v9 }
0x62d5   :  { %15556 = vmatprep.subr.bf16.mxu1 %v20423_v50 }
0x6343   :  { %v11390_v47 = vpop.permute.xlu0 %11389 }
0x6344   :  { %v20655_v43 = vadd.f32 %v11390_v47, %v11386_v56  ;;  %v20721_v56 = vpack.c.bf16 %v11600_v53, %v11598_v20  ;;  %v20724_v47 = vpack.c.bf16 %v11605_v17, %v11603_v60 }
0x6346   :  { %16343 = vtanh.f32 %v20655_v43 }
0x6350   :  { %v16344_v10 = vpop.eup %16343 }
0x6351   :  { %v11394_v0 = vmul.f32 %v16344_v10, %v20503_v36  ;;  %v11602_v10 = vld [vmem:[%s21290_s2 + $0x40] sm:$0xff] }
0x6353   :  { %11396 = vrot.lane.b32.xlu1 %v11394_v0, %s16406_s7  ;;  %v11604_v0 = vld [vmem:[%s21290_s2 + $0x50] sm:$0xff] }
0x63c5   :  { %v11397_v24 = vpop.permute.xlu1 %11396 }
0x63c6   :  { %13545 = vst.msk [vmem:[%s21293_s9 + $0x90] sm:$0xff] %vm98_vm0, %v11397_v24  ;;  %13547 = vmatmul.mubr.msk.f32.vlgmr.msra.gmra.mrb[68].mxu1 %vm98_vm0, %v11397_v24  ;;  %13548 = vmatmul.mubr.msk.f32.vlgmr.msra.gmra.mrb[68].mxu0 %vm98_vm0, %v11397_v24  ;;  %v11607_v24 = vld [vmem:[%s21290_s2 + $0x68] sm:$0xff] }
0x63c7   :  { %15558 = vmatpush1.bf16.msra.mxu1 %v20434_v7  ;;  %11766 = vmatprep.mubr.f32.mxu0 %v16405_v3 }
0x63c8   :  { %15560 = vmatprep.subr.bf16.mxu1 %v20436_v32  ;;  %11892 = vmatprep.mubr.f32.mxu1 %v16405_v3 }
0x63c9   :  { %15542 = vmatpush1.bf16.msra.mxu0 %v20703_v44 }
0x63ca   :  { %15544 = vmatprep.subr.bf16.mxu0 %v20705_v1 }
0x63cb   :  { %15562 = vmatpush1.bf16.msra.mxu1 %v20452_v27 }
0x63cc   :  { %15564 = vmatprep.subr.bf16.mxu1 %v20455_v26 }
0x63cd   :  { %15546 = vmatpush1.bf16.msra.mxu0 %v20721_v56 }
0x63ce   :  { %15548 = vmatprep.subr.bf16.mxu0 %v20724_v47 }
0x63cf   :  { %15566 = vmatpush1.bf16.msra.mxu1 %v20470_v12 }
0x63d0   :  { %15568 = vmatprep.subr.bf16.mxu1 %v20473_v23 }
0x63d3   :  { %15570 = vmatpush1.bf16.msra.mxu1 %v20482_v22 }
0x63d4   :  { %15572 = vmatprep.subr.bf16.mxu1 %v20517_v42 }
0x6499   :  { %v11572_v19 = vpop.f32.mrb[68].mxu1 }
0x649a   :  { %v11577_v25 = vadd.f32 %v11572_v19, %v17863_v48  ;;  %v11574_v36 = vpop.f32.mrb[69].mxu1  ;;  %v11609_v19 = vld [vmem:[%s21290_s2 + $0x78] sm:$0xff] }
0x649b   :  { %v11578_v5 = vadd.f32 %v11574_v36, %v17866_v4  ;;  %v20742_v36 = vpack.c.bf16 %v11609_v19, %v11607_v24 }
0x649c   :  { %16345 = vtanh.f32 %v11577_v25  ;;  %v20739_v25 = vpack.c.bf16 %v11604_v0, %v11602_v10 }
0x649d   :  { %16347 = vtanh.f32 %v11578_v5  ;;  %v11606_v5 = vld [vmem:[%s21290_s2 + $0x60] sm:$0xff] }
0x649e   :  { %15550 = vmatpush1.bf16.msra.mxu0 %v20739_v25 }
0x649f   :  { %15552 = vmatprep.subr.bf16.mxu0 %v20742_v36 }
0x64a6   :  { %v16346_v21 = vpop.eup %16345 }
0x64a7   :  { %v16348_v57 = vpop.eup %16347  ;;  %v11581_v6 = vmul.f32 %v16346_v21, %v16558_v37  ;;  %v11608_v21 = vld [vmem:[%s21290_s2 + $0x70] sm:$0xff] }
0x64a8   :  { %v11582_v18 = vmul.f32 %v16348_v57, %v16561_v38  ;;  %v20751_v57 = vpack.c.bf16 %v11608_v21, %v11606_v5 }
0x64a9   :  { %v11583_v8 = vadd.f32 %v11581_v6, %v16564_v39 }
0x64aa   :  { %v11584_v51 = vadd.f32 %v11582_v18, %v16567_v41  ;;  %15554 = vmatpush1.bf16.msra.mxu0 %v20751_v57 }
0x64ab   :  { %15588 = vmatprep.subr.bf16.mxu0 %v20528_v61  ;;  %v11585_v6 = vmul.f32 %v11583_v8, %v20487_v33 }
0x64ac   :  { %v11586_v15 = vmul.f32 %v11584_v51, %v11583_v8 }
0x64ae   :  { %11588 = vrot.lane.b32.xlu0 %v11586_v15, %s16406_s7 }
0x6520   :  { %v11589_v18 = vpop.permute.xlu0 %11588 }
0x6521   :  { %v20757_v15 = vadd.f32 %v11589_v18, %v11585_v6 }
0x6523   :  { %16349 = vtanh.f32 %v20757_v15 }
0x652d   :  { %v16350_v11 = vpop.eup %16349 }
0x652e   :  { %v11593_v45 = vmul.f32 %v16350_v11, %v11584_v51 }
0x6530   :  { %11698 = vrot.lane.b32.xlu1 %v11593_v45, %s16406_s7 }
0x65a2   :  { %v11699_v54 = vpop.permute.xlu1 %11698 }
0x65a3   :  { %13549 = vmatmul.mubr.msk.f32.vlgmr.msra.gmra.mrb[68].mxu0 %vm98_vm0, %v11699_v54  ;;  %13551 = vmatmul.mubr.msk.f32.vlgmr.msra.gmra.mrb[70].mxu1 %vm98_vm0, %v11699_v54 }
0x65a4   :  { %15574 = vmatpush1.bf16.msra.mxu1 %v20530_v40  ;;  %15590 = vmatpush1.bf16.msra.mxu0 %v20542_v2 }
0x65a5   :  { %15576 = vmatprep.subr.bf16.mxu1 %v20555_v16  ;;  %15592 = vmatprep.subr.bf16.mxu0 %v20557_v29 }
0x65a6   :  { %11965 = vmatprep.mubr.f32.mxu1 %v16405_v3  ;;  %12085 = vmatprep.mubr.f32.mxu0 %v16405_v3 }
0x65a8   :  { %15578 = vmatpush1.bf16.msra.mxu1 %v20569_v58  ;;  %15594 = vmatpush1.bf16.msra.mxu0 %v20582_v13 }
0x65a9   :  { %15580 = vmatprep.subr.bf16.mxu1 %v20584_v34  ;;  %15596 = vmatprep.subr.bf16.mxu0 %v20595_v49 }
0x65ac   :  { %15582 = vmatpush1.bf16.msra.mxu1 %v20607_v63  ;;  %15598 = vmatpush1.bf16.msra.mxu0 %v20620_v35 }
0x65ad   :  { %15584 = vmatprep.subr.bf16.mxu1 %v20622_v55  ;;  %15600 = vmatprep.subr.bf16.mxu0 %v20634_v62 }
0x65b0   :  { %15586 = vmatpush1.bf16.msra.mxu1 %v20643_v9  ;;  %15602 = vmatpush1.bf16.msra.mxu0 %v20647_v28 }
0x65b1   :  { %15604 = vmatprep.subr.bf16.mxu0 %v20692_v31  ;;  %15620 = vmatprep.subr.bf16.mxu1 %v20423_v50 }
0x6676   :  { %v11768_v33 = vpop.f32.mrb[68].mxu0 }
0x6677   :  { %v11773_v8 = vadd.f32 %v11768_v33, %v16758_v46  ;;  %v11770_v51 = vpop.f32.mrb[69].mxu0 }
0x6678   :  { %v11774_v14 = vadd.f32 %v11770_v51, %v16764_v59 }
0x6679   :  { %16351 = vtanh.f32 %v11773_v8 }
0x667a   :  { %16353 = vtanh.f32 %v11774_v14 }
0x6683   :  { %v16352_v30 = vpop.eup %16351 }
0x6684   :  { %v16354_v52 = vpop.eup %16353  ;;  %v11777_v20 = vmul.f32 %v16352_v30, %v16558_v37 }
0x6685   :  { %v11778_v53 = vmul.f32 %v16354_v52, %v16561_v38 }
0x6686   :  { %v11779_v60 = vadd.f32 %v11777_v20, %v16564_v39 }
0x6687   :  { %v11780_v17 = vadd.f32 %v11778_v53, %v16567_v41 }
0x6688   :  { %v11781_v50 = vmul.f32 %v11779_v60, %v20655_v43 }
0x6689   :  { %v11782_v10 = vmul.f32 %v11780_v17, %v11779_v60  ;;  %v12605_v60 = vld [vmem:[%s21285_s1 + $0x18] sm:$0xff] }
0x668b   :  { %11784 = vrot.lane.b32.xlu0 %v11782_v10, %s16406_s7 }
0x66fd   :  { %v11785_v0 = vpop.permute.xlu0 %11784 }
0x66fe   :  { %v20789_v24 = vadd.f32 %v11785_v0, %v11781_v50  ;;  %v12604_v50 = vld [vmem:[%s21285_s1 + $0x10] sm:$0xff]  ;;  %v12607_v0 = vld [vmem:[%s21285_s1 + $0x28] sm:$0xff] }
0x6700   :  { %16355 = vtanh.f32 %v20789_v24 }
0x670a   :  { %v16356_v19 = vpop.eup %16355 }
0x670b   :  { %v11789_v5 = vmul.f32 %v16356_v19, %v11780_v17  ;;  %v12602_v17 = vld [vmem:[%s21285_s1] sm:$0xff] }
0x670c   :  { %v20902_v19 = vpack.c.bf16 %v12604_v50, %v12602_v17  ;;  %v12802_v17 = vld [vmem:[%s21289_s3 + $0x38] sm:$0xff] }
0x670d   :  { %11791 = vrot.lane.b32.xlu1 %v11789_v5, %s16406_s7 }
0x677f   :  { %v11792_v21 = vpop.permute.xlu1 %11791 }
0x6780   :  { %13550 = vst.msk [vmem:[%s21293_s9 + $0x98] sm:$0xff] %vm98_vm0, %v11792_v21  ;;  %13552 = vmatmul.mubr.msk.f32.vlgmr.msra.gmra.mrb[70].mxu1 %vm98_vm0, %v11792_v21  ;;  %13553 = vmatmul.mubr.msk.f32.vlgmr.msra.gmra.mrb[70].mxu0 %vm98_vm0, %v11792_v21  ;;  %v12606_v21 = vld [vmem:[%s21285_s1 + $0x20] sm:$0xff] }
0x6781   :  { %15606 = vmatpush1.bf16.msra.mxu0 %v20703_v44  ;;  %15622 = vmatpush1.bf16.msra.mxu1 %v20434_v7 }
0x6782   :  { %15608 = vmatprep.subr.bf16.mxu0 %v20705_v1  ;;  %15624 = vmatprep.subr.bf16.mxu1 %v20436_v32 }
0x6783   :  { %12161 = vmatprep.mubr.f32.mxu0 %v16405_v3  ;;  %12287 = vmatprep.mubr.f32.mxu1 %v16405_v3 }
0x6785   :  { %15610 = vmatpush1.bf16.msra.mxu0 %v20721_v56  ;;  %15626 = vmatpush1.bf16.msra.mxu1 %v20452_v27 }
0x6786   :  { %15612 = vmatprep.subr.bf16.mxu0 %v20724_v47  ;;  %15628 = vmatprep.subr.bf16.mxu1 %v20455_v26 }
0x6789   :  { %15614 = vmatpush1.bf16.msra.mxu0 %v20739_v25  ;;  %15630 = vmatpush1.bf16.msra.mxu1 %v20470_v12 }
0x678a   :  { %15616 = vmatprep.subr.bf16.mxu0 %v20742_v36  ;;  %15632 = vmatprep.subr.bf16.mxu1 %v20473_v23 }
0x678d   :  { %15618 = vmatpush1.bf16.msra.mxu0 %v20751_v57  ;;  %15634 = vmatpush1.bf16.msra.mxu1 %v20482_v22 }
0x678e   :  { %15636 = vmatprep.subr.bf16.mxu1 %v20517_v42  ;;  %15652 = vmatprep.subr.bf16.mxu0 %v20528_v61 }
0x6853   :  { %v11967_v7 = vpop.f32.mrb[70].mxu1 }
0x6854   :  { %v11972_v32 = vadd.f32 %v11967_v7, %v17863_v48  ;;  %v11969_v27 = vpop.f32.mrb[71].mxu1  ;;  %v12608_v7 = vld [vmem:[%s21285_s1 + $0x30] sm:$0xff] }
0x6855   :  { %v11973_v26 = vadd.f32 %v11969_v27, %v17866_v4  ;;  %v12613_v27 = vld [vmem:[%s21285_s1 + $0x58] sm:$0xff] }
0x6856   :  { %16357 = vtanh.f32 %v11972_v32  ;;  %v12611_v32 = vld [vmem:[%s21285_s1 + $0x48] sm:$0xff] }
0x6857   :  { %16359 = vtanh.f32 %v11973_v26  ;;  %v20920_v26 = vpack.c.bf16 %v12608_v7, %v12606_v21  ;;  %v12592_v21 = vld [vmem:[%s21292_s5 + $0x30] sm:$0xff]  ;;  %v12799_v7 = vld [vmem:[%s21289_s3 + $0x20] sm:$0xff] }
0x6860   :  { %v16358_v12 = vpop.eup %16357 }
0x6861   :  { %v16360_v43 = vpop.eup %16359  ;;  %v11976_v23 = vmul.f32 %v16358_v12, %v16558_v37  ;;  %v20923_v12 = vpack.c.bf16 %v12613_v27, %v12611_v32  ;;  %v12801_v27 = vld [vmem:[%s21289_s3 + $0x30] sm:$0xff] }
0x6862   :  { %v11977_v6 = vmul.f32 %v16360_v43, %v16561_v38  ;;  %v12610_v43 = vld [vmem:[%s21285_s1 + $0x40] sm:$0xff] }
0x6863   :  { %v11978_v22 = vadd.f32 %v11976_v23, %v16564_v39  ;;  %v12612_v23 = vld [vmem:[%s21285_s1 + $0x50] sm:$0xff] }
0x6864   :  { %v11979_v42 = vadd.f32 %v11977_v6, %v16567_v41  ;;  %v12615_v6 = vld [vmem:[%s21285_s1 + $0x68] sm:$0xff] }
0x6865   :  { %v11980_v61 = vmul.f32 %v11978_v22, %v20757_v15 }
0x6866   :  { %v11981_v18 = vmul.f32 %v11979_v42, %v11978_v22  ;;  %v12617_v22 = vld [vmem:[%s21285_s1 + $0x78] sm:$0xff] }
0x6868   :  { %11983 = vrot.lane.b32.xlu0 %v11981_v18, %s16406_s7  ;;  %v20941_v18 = vpack.c.bf16 %v12617_v22, %v12615_v6  ;;  %v21050_v6 = vpack.c.bf16 %v12801_v27, %v12799_v7  ;;  %v12781_v7 = vld [vmem:[%s21290_s2 + $0x10] sm:$0xff]  ;;  %v12784_v27 = vld [vmem:[%s21290_s2 + $0x28] sm:$0xff] }
0x68da   :  { %v11984_v11 = vpop.permute.xlu0 %11983 }
0x68db   :  { %v20825_v45 = vadd.f32 %v11984_v11, %v11980_v61  ;;  %v12614_v61 = vld [vmem:[%s21285_s1 + $0x60] sm:$0xff]  ;;  %v12616_v11 = vld [vmem:[%s21285_s1 + $0x70] sm:$0xff] }
0x68dd   :  { %16361 = vtanh.f32 %v20825_v45 }
0x68e7   :  { %v16362_v54 = vpop.eup %16361 }
0x68e8   :  { %v11988_v33 = vmul.f32 %v16362_v54, %v11979_v42  ;;  %v20938_v42 = vpack.c.bf16 %v12612_v23, %v12610_v43  ;;  %v20950_v54 = vpack.c.bf16 %v12616_v11, %v12614_v61  ;;  %v12595_v43 = vld [vmem:[%s21292_s5 + $0x48] sm:$0xff]  ;;  %v12597_v23 = vld [vmem:[%s21292_s5 + $0x58] sm:$0xff] }
0x68e9   :  { %v21052_v22 = vpack.c.bf16 %v12597_v23, %v12595_v43  ;;  %v12804_v61 = vld [vmem:[%s21289_s3 + $0x48] sm:$0xff]  ;;  %v12806_v11 = vld [vmem:[%s21289_s3 + $0x58] sm:$0xff] }
0x68ea   :  { %12093 = vrot.lane.b32.xlu1 %v11988_v33, %s16406_s7  ;;  %v12786_v43 = vld [vmem:[%s21290_s2 + $0x38] sm:$0xff] }
0x695c   :  { %v12094_v8 = vpop.permute.xlu1 %12093 }
0x695d   :  { %13554 = vmatmul.mubr.msk.f32.vlgmr.msra.gmra.mrb[70].mxu0 %vm98_vm0, %v12094_v8  ;;  %13556 = vmatmul.mubr.msk.f32.vlgmr.msra.gmra.mrb[72].mxu1 %vm98_vm0, %v12094_v8 }
0x695e   :  { %15638 = vmatpush1.bf16.msra.mxu1 %v20530_v40  ;;  %15654 = vmatpush1.bf16.msra.mxu0 %v20542_v2 }
0x695f   :  { %15640 = vmatprep.subr.bf16.mxu1 %v20555_v16  ;;  %15656 = vmatprep.subr.bf16.mxu0 %v20557_v29 }
0x6960   :  { %12360 = vmatprep.mubr.f32.mxu1 %v16405_v3  ;;  %12480 = vmatprep.mubr.f32.mxu0 %v16405_v3 }
0x6962   :  { %15642 = vmatpush1.bf16.msra.mxu1 %v20569_v58  ;;  %15658 = vmatpush1.bf16.msra.mxu0 %v20582_v13 }
0x6963   :  { %15644 = vmatprep.subr.bf16.mxu1 %v20584_v34  ;;  %15660 = vmatprep.subr.bf16.mxu0 %v20595_v49 }
0x6966   :  { %15646 = vmatpush1.bf16.msra.mxu1 %v20607_v63  ;;  %15662 = vmatpush1.bf16.msra.mxu0 %v20620_v35 }
0x6967   :  { %15648 = vmatprep.subr.bf16.mxu1 %v20622_v55  ;;  %15664 = vmatprep.subr.bf16.mxu0 %v20634_v62 }
0x696a   :  { %15650 = vmatpush1.bf16.msra.mxu1 %v20643_v9  ;;  %15666 = vmatpush1.bf16.msra.mxu0 %v20647_v28 }
0x696b   :  { %15668 = vmatprep.subr.bf16.mxu0 %v20692_v31 }
0x6a30   :  { %v12163_v40 = vpop.f32.mrb[70].mxu0 }
0x6a31   :  { %v12168_v2 = vadd.f32 %v12163_v40, %v16758_v46  ;;  %v12165_v16 = vpop.f32.mrb[71].mxu0 }
0x6a32   :  { %v12169_v29 = vadd.f32 %v12165_v16, %v16764_v59 }
0x6a33   :  { %16363 = vtanh.f32 %v12168_v2 }
0x6a34   :  { %16365 = vtanh.f32 %v12169_v29 }
0x6a3d   :  { %v16364_v58 = vpop.eup %16363 }
0x6a3e   :  { %v16366_v13 = vpop.eup %16365  ;;  %v12172_v34 = vmul.f32 %v16364_v58, %v16558_v37 }
0x6a3f   :  { %v12173_v49 = vmul.f32 %v16366_v13, %v16561_v38 }
0x6a40   :  { %v12174_v63 = vadd.f32 %v12172_v34, %v16564_v39 }
0x6a41   :  { %v12175_v35 = vadd.f32 %v12173_v49, %v16567_v41 }
0x6a42   :  { %v12176_v62 = vmul.f32 %v12174_v63, %v20789_v24  ;;  %v12609_v24 = vld [vmem:[%s21285_s1 + $0x38] sm:$0xff] }
0x6a43   :  { %v12177_v55 = vmul.f32 %v12175_v35, %v12174_v63  ;;  %v20904_v5 = vpack.c.bf16 %v12609_v24, %v12607_v0  ;;  %v12590_v24 = vld [vmem:[%s21292_s5 + $0x20] sm:$0xff] }
0x6a44   :  { %v21037_v32 = vpack.c.bf16 %v12592_v21, %v12590_v24  ;;  %v12779_v24 = vld [vmem:[%s21290_s2] sm:$0xff] }
0x6a45   :  { %12179 = vrot.lane.b32.xlu0 %v12177_v55, %s16406_s7  ;;  %v21169_v23 = vpack.c.bf16 %v12781_v7, %v12779_v24 }
0x6ab7   :  { %v12180_v9 = vpop.permute.xlu0 %12179 }
0x6ab8   :  { %v20856_v28 = vadd.f32 %v12180_v9, %v12176_v62 }
0x6aba   :  { %16367 = vtanh.f32 %v20856_v28 }
0x6ac4   :  { %v16368_v31 = vpop.eup %16367 }
0x6ac5   :  { %v12184_v15 = vmul.f32 %v16368_v31, %v12175_v35 }
0x6ac7   :  { %12186 = vrot.lane.b32.xlu1 %v12184_v15, %s16406_s7  ;;  %v12587_v15 = vld [vmem:[%s21292_s5 + $0x8] sm:$0xff] }
0x6b39   :  { %v12187_v51 = vpop.permute.xlu1 %12186 }
0x6b3a   :  { %13555 = vst.msk [vmem:[%s21293_s9 + $0xa0] sm:$0xff] %vm98_vm0, %v12187_v51  ;;  %13557 = vmatmul.mubr.msk.f32.vlgmr.msra.gmra.mrb[72].mxu1 %vm98_vm0, %v12187_v51  ;;  %13558 = vmatmul.mubr.msk.f32.vlgmr.msra.gmra.mrb[72].mxu0 %vm98_vm0, %v12187_v51  ;;  %v12589_v51 = vld [vmem:[%s21292_s5 + $0x18] sm:$0xff] }
0x6b3b   :  { %15670 = vmatpush1.bf16.msra.mxu0 %v20703_v44  ;;  %12556 = vmatprep.mubr.f32.mxu0 %v16405_v3 }
0x6b3c   :  { %15672 = vmatprep.subr.bf16.mxu0 %v20705_v1  ;;  %12682 = vmatprep.mubr.f32.mxu1 %v16405_v3 }
0x6b3f   :  { %15674 = vmatpush1.bf16.msra.mxu0 %v20721_v56 }
0x6b40   :  { %15676 = vmatprep.subr.bf16.mxu0 %v20724_v47 }
0x6b43   :  { %15678 = vmatpush1.bf16.msra.mxu0 %v20739_v25 }
0x6b44   :  { %15680 = vmatprep.subr.bf16.mxu0 %v20742_v36 }
0x6b47   :  { %15682 = vmatpush1.bf16.msra.mxu0 %v20751_v57  ;;  %v12603_v57 = vld [vmem:[%s21285_s1 + $0x8] sm:$0xff] }
0x6b48   :  { %v20891_v10 = vpack.c.bf16 %v12605_v60, %v12603_v57  ;;  %v12593_v57 = vld [vmem:[%s21292_s5 + $0x38] sm:$0xff]  ;;  %v12800_v60 = vld [vmem:[%s21289_s3 + $0x28] sm:$0xff] }
0x6b49   :  { %v21025_v0 = vpack.c.bf16 %v12802_v17, %v12800_v60  ;;  %v12782_v17 = vld [vmem:[%s21290_s2 + $0x18] sm:$0xff] }
0x6b4a   :  { %15684 = vmatprep.subr.bf16.mxu1 %v20891_v10 }
0x6b4b   :  { %15686 = vmatpush1.bf16.msra.mxu1 %v20902_v19 }
0x6b4c   :  { %15688 = vmatprep.subr.bf16.mxu1 %v20904_v5 }
0x6b4f   :  { %15690 = vmatpush1.bf16.msra.mxu1 %v20920_v26 }
0x6b50   :  { %15692 = vmatprep.subr.bf16.mxu1 %v20923_v12 }
0x6b53   :  { %15694 = vmatpush1.bf16.msra.mxu1 %v20938_v42 }
0x6b54   :  { %15696 = vmatprep.subr.bf16.mxu1 %v20941_v18 }
0x6b57   :  { %15698 = vmatpush1.bf16.msra.mxu1 %v20950_v54 }
0x6c0d   :  { %v12362_v14 = vpop.f32.mrb[72].mxu1 }
0x6c0e   :  { %v12367_v30 = vadd.f32 %v12362_v14, %v17863_v48  ;;  %v12364_v44 = vpop.f32.mrb[73].mxu1  ;;  %v12796_v14 = vld [vmem:[%s21289_s3 + $0x8] sm:$0xff] }
0x6c0f   :  { %v12368_v52 = vadd.f32 %v12364_v44, %v17866_v4  ;;  %v12798_v44 = vld [vmem:[%s21289_s3 + $0x18] sm:$0xff] }
0x6c10   :  { %16369 = vtanh.f32 %v12367_v30  ;;  %v20985_v30 = vpack.c.bf16 %v12589_v51, %v12587_v15  ;;  %v12807_v51 = vld [vmem:[%s21289_s3 + $0x60] sm:$0xff] }
0x6c11   :  { %16371 = vtanh.f32 %v12368_v52  ;;  %v12586_v52 = vld [vmem:[%s21292_s5] sm:$0xff] }
0x6c12   :  { %15700 = vmatprep.subr.bf16.mxu1 %v20985_v30 }
0x6c1a   :  { %v16370_v1 = vpop.eup %16369 }
0x6c1b   :  { %v16372_v20 = vpop.eup %16371  ;;  %v12371_v56 = vmul.f32 %v16370_v1, %v16558_v37  ;;  %v12588_v1 = vld [vmem:[%s21292_s5 + $0x10] sm:$0xff] }
0x6c1c   :  { %v12372_v47 = vmul.f32 %v16372_v20, %v16561_v38  ;;  %v20996_v20 = vpack.c.bf16 %v12798_v44, %v12796_v14  ;;  %v12809_v14 = vld [vmem:[%s21289_s3 + $0x70] sm:$0xff] }
0x6c1d   :  { %v12373_v25 = vadd.f32 %v12371_v56, %v16564_v39  ;;  %v20998_v56 = vpack.c.bf16 %v12588_v1, %v12586_v52  ;;  %v21115_v52 = vpack.c.bf16 %v12809_v14, %v12807_v51  ;;  %v12791_v14 = vld [vmem:[%s21290_s2 + $0x60] sm:$0xff] }
0x6c1e   :  { %v12374_v36 = vadd.f32 %v12372_v47, %v16567_v41  ;;  %v12795_v47 = vld [vmem:[%s21289_s3] sm:$0xff]  ;;  %15716 = vmatprep.subr.bf16.mxu0 %v20996_v20 }
0x6c1f   :  { %v12375_v33 = vmul.f32 %v12373_v25, %v20825_v45 }
0x6c20   :  { %v12376_v53 = vmul.f32 %v12374_v36, %v12373_v25  ;;  %v12797_v25 = vld [vmem:[%s21289_s3 + $0x10] sm:$0xff] }
0x6c22   :  { %12378 = vrot.lane.b32.xlu0 %v12376_v53, %s16406_s7  ;;  %v21010_v53 = vpack.c.bf16 %v12797_v25, %v12795_v47 }
0x6c94   :  { %v12379_v8 = vpop.permute.xlu0 %12378 }
0x6c95   :  { %v20955_v40 = vadd.f32 %v12379_v8, %v12375_v33  ;;  %v12594_v33 = vld [vmem:[%s21292_s5 + $0x40] sm:$0xff]  ;;  %v21063_v8 = vpack.c.bf16 %v12806_v11, %v12804_v61  ;;  %v21171_v61 = vpack.c.bf16 %v12786_v43, %v12784_v27 }
0x6c96   :  { %v12783_v11 = vld [vmem:[%s21290_s2 + $0x20] sm:$0xff] }
0x6c97   :  { %16373 = vtanh.f32 %v20955_v40 }
0x6ca1   :  { %v16374_v2 = vpop.eup %16373 }
0x6ca2   :  { %v12383_v16 = vmul.f32 %v16374_v2, %v12374_v36  ;;  %v12591_v36 = vld [vmem:[%s21292_s5 + $0x28] sm:$0xff]  ;;  %v12596_v2 = vld [vmem:[%s21292_s5 + $0x50] sm:$0xff] }
0x6ca3   :  { %v21023_v50 = vpack.c.bf16 %v12593_v57, %v12591_v36 }
0x6ca4   :  { %12488 = vrot.lane.b32.xlu1 %v12383_v16, %s16406_s7  ;;  %v12803_v16 = vld [vmem:[%s21289_s3 + $0x40] sm:$0xff] }
0x6d16   :  { %v12489_v29 = vpop.permute.xlu1 %12488 }
0x6d17   :  { %13559 = vmatmul.mubr.msk.f32.vlgmr.msra.gmra.mrb[72].mxu0 %vm98_vm0, %v12489_v29  ;;  %13561 = vmatmul.mubr.msk.f32.vlgmr.msra.gmra.mrb[74].mxu1 %vm98_vm0, %v12489_v29  ;;  %v12805_v29 = vld [vmem:[%s21289_s3 + $0x50] sm:$0xff] }
0x6d18   :  { %12755 = vmatprep.mubr.f32.mxu1 %v16405_v3  ;;  %12875 = vmatprep.mubr.f32.mxu0 %v16405_v3 }
0x6d19   :  { %15702 = vmatpush1.bf16.msra.mxu1 %v20998_v56  ;;  %15718 = vmatpush1.bf16.msra.mxu0 %v21010_v53 }
0x6d1a   :  { %15704 = vmatprep.subr.bf16.mxu1 %v21023_v50  ;;  %15720 = vmatprep.subr.bf16.mxu0 %v21025_v0 }
0x6d1d   :  { %15706 = vmatpush1.bf16.msra.mxu1 %v21037_v32  ;;  %15722 = vmatpush1.bf16.msra.mxu0 %v21050_v6 }
0x6d1e   :  { %15708 = vmatprep.subr.bf16.mxu1 %v21052_v22  ;;  %15724 = vmatprep.subr.bf16.mxu0 %v21063_v8 }
0x6dea   :  { %v12558_v58 = vpop.f32.mrb[72].mxu0 }
0x6deb   :  { %v12563_v45 = vadd.f32 %v12558_v58, %v16758_v46  ;;  %v12560_v13 = vpop.f32.mrb[73].mxu0  ;;  %v21075_v58 = vpack.c.bf16 %v12596_v2, %v12594_v33  ;;  %v12785_v33 = vld [vmem:[%s21290_s2 + $0x30] sm:$0xff]  ;;  %v12788_v2 = vld [vmem:[%s21290_s2 + $0x48] sm:$0xff] }
0x6dec   :  { %v12564_v34 = vadd.f32 %v12560_v13, %v16764_v59  ;;  %v12601_v13 = vld [vmem:[%s21292_s5 + $0x78] sm:$0xff] }
0x6ded   :  { %16375 = vtanh.f32 %v12563_v45  ;;  %v12599_v45 = vld [vmem:[%s21292_s5 + $0x68] sm:$0xff]  ;;  %15710 = vmatpush1.bf16.msra.mxu1 %v21075_v58 }
0x6dee   :  { %16377 = vtanh.f32 %v12564_v34  ;;  %v12808_v34 = vld [vmem:[%s21289_s3 + $0x68] sm:$0xff] }
0x6df7   :  { %v16376_v49 = vpop.eup %16375 }
0x6df8   :  { %v16378_v63 = vpop.eup %16377  ;;  %v12567_v35 = vmul.f32 %v16376_v49, %v16558_v37  ;;  %v21088_v49 = vpack.c.bf16 %v12805_v29, %v12803_v16  ;;  %v12790_v16 = vld [vmem:[%s21290_s2 + $0x58] sm:$0xff]  ;;  %v21186_v29 = vpack.c.bf16 %v12785_v33, %v12783_v11 }
0x6df9   :  { %v12568_v55 = vmul.f32 %v16378_v63, %v16561_v38  ;;  %v21090_v63 = vpack.c.bf16 %v12601_v13, %v12599_v45  ;;  %v21189_v45 = vpack.c.bf16 %v12790_v16, %v12788_v2  ;;  %v12787_v13 = vld [vmem:[%s21290_s2 + $0x40] sm:$0xff] }
0x6dfa   :  { %v20968_v62 = vadd.f32 %v12567_v35, %v16564_v39  ;;  %v12810_v35 = vld [vmem:[%s21289_s3 + $0x78] sm:$0xff]  ;;  %15726 = vmatpush1.bf16.msra.mxu0 %v21088_v49 }
0x6dfb   :  { %v20971_v9 = vadd.f32 %v12568_v55, %v16567_v41  ;;  %v12598_v55 = vld [vmem:[%s21292_s5 + $0x60] sm:$0xff]  ;;  %v21102_v15 = vpack.c.bf16 %v12810_v35, %v12808_v34  ;;  %15712 = vmatprep.subr.bf16.mxu1 %v21090_v63  ;;  %v12789_v34 = vld [vmem:[%s21290_s2 + $0x50] sm:$0xff]  ;;  %v12792_v35 = vld [vmem:[%s21290_s2 + $0x68] sm:$0xff] }
0x6dfc   :  { %v12571_v1 = vmul.f32 %v20968_v62, %v20856_v28 }
0x6dfd   :  { %v12572_v31 = vmul.f32 %v20971_v9, %v20968_v62  ;;  %15728 = vmatprep.subr.bf16.mxu0 %v21102_v15 }
0x6dfe   :  { %15730 = vmatpush1.bf16.msra.mxu0 %v21115_v52 }
0x6dff   :  { %12574 = vrot.lane.b32.xlu0 %v12572_v31, %s16406_s7  ;;  %v12600_v31 = vld [vmem:[%s21292_s5 + $0x70] sm:$0xff] }
0x6e00   :  { %v21111_v44 = vpack.c.bf16 %v12600_v31, %v12598_v55  ;;  %v12794_v55 = vld [vmem:[%s21290_s2 + $0x78] sm:$0xff]  ;;  %v21204_v31 = vpack.c.bf16 %v12789_v34, %v12787_v13 }
0x6e01   :  { %v21207_v51 = vpack.c.bf16 %v12794_v55, %v12792_v35 }
0x6e02   :  { %15714 = vmatpush1.bf16.msra.mxu1 %v21111_v44 }
0x6e03   :  { %15748 = vmatprep.subr.bf16.mxu1 %v20891_v10 }
0x6e71   :  { %v12575_v47 = vpop.permute.xlu0 %12574 }
0x6e72   :  { %v21123_v25 = vadd.f32 %v12575_v47, %v12571_v1  ;;  %v12793_v1 = vld [vmem:[%s21290_s2 + $0x70] sm:$0xff] }
0x6e73   :  { %v15745_v47 = vpack.c.bf16 %v12793_v1, %v12791_v14 }
0x6e74   :  { %16379 = vtanh.f32 %v21123_v25 }
0x6e7e   :  { %v16380_v36 = vpop.eup %16379 }
0x6e7f   :  { %v12579_v57 = vmul.f32 %v16380_v36, %v20971_v9 }
0x6e81   :  { %12581 = vrot.lane.b32.xlu1 %v12579_v57, %s16406_s7 }
0x6ef3   :  { %v12582_v60 = vpop.permute.xlu1 %12581 }
0x6ef4   :  { %13560 = vst.msk [vmem:[%s21293_s9 + $0xa8] sm:$0xff] %vm98_vm0, %v12582_v60  ;;  %13562 = vmatmul.mubr.msk.f32.vlgmr.msra.gmra.mrb[74].mxu1 %vm98_vm0, %v12582_v60  ;;  %13563 = vmatmul.mubr.msk.f32.vlgmr.msra.gmra.mrb[74].mxu0 %vm98_vm0, %v12582_v60 }
0x6ef5   :  { %15750 = vmatpush1.bf16.msra.mxu1 %v20902_v19  ;;  %12951 = vmatprep.mubr.f32.mxu0 %v16405_v3 }
0x6ef6   :  { %15752 = vmatprep.subr.bf16.mxu1 %v20904_v5  ;;  %13077 = vmatprep.mubr.f32.mxu1 %v16405_v3 }
0x6ef9   :  { %15754 = vmatpush1.bf16.msra.mxu1 %v20920_v26 }
0x6efa   :  { %15756 = vmatprep.subr.bf16.mxu1 %v20923_v12 }
0x6efd   :  { %15758 = vmatpush1.bf16.msra.mxu1 %v20938_v42 }
0x6efe   :  { %15760 = vmatprep.subr.bf16.mxu1 %v20941_v18 }
0x6f01   :  { %15762 = vmatpush1.bf16.msra.mxu1 %v20950_v54 }
0x6f02   :  { %15764 = vmatprep.subr.bf16.mxu1 %v20985_v30  ;;  %v12780_v30 = vld [vmem:[%s21290_s2 + $0x8] sm:$0xff] }
0x6f03   :  { %v15731_v21 = vpack.c.bf16 %v12782_v17, %v12780_v30 }
0x6f05   :  { %15732 = vmatprep.subr.bf16.mxu0 %v15731_v21 }
0x6f06   :  { %15734 = vmatpush1.bf16.msra.mxu0 %v21169_v23 }
0x6f07   :  { %15736 = vmatprep.subr.bf16.mxu0 %v21171_v61 }
0x6f0a   :  { %15738 = vmatpush1.bf16.msra.mxu0 %v21186_v29 }
0x6f0b   :  { %15740 = vmatprep.subr.bf16.mxu0 %v21189_v45 }
0x6f0e   :  { %15742 = vmatpush1.bf16.msra.mxu0 %v21204_v31 }
0x6f0f   :  { %15744 = vmatprep.subr.bf16.mxu0 %v21207_v51 }
0x6f12   :  { %15746 = vmatpush1.bf16.msra.mxu0 %v15745_v47 }
0x6f13   :  { %15780 = vmatprep.subr.bf16.mxu0 %v20996_v20 }
0x6fc7   :  { %v12757_v28 = vpop.f32.mrb[74].mxu1 }
0x6fc8   :  { %v12762_v10 = vadd.f32 %v12757_v28, %v17863_v48  ;;  %v12759_v19 = vpop.f32.mrb[75].mxu1 }
0x6fc9   :  { %v12763_v5 = vadd.f32 %v12759_v19, %v17866_v4 }
0x6fca   :  { %16381 = vtanh.f32 %v12762_v10 }
0x6fcb   :  { %16383 = vtanh.f32 %v12763_v5 }
0x6fd4   :  { %v16382_v62 = vpop.eup %16381 }
0x6fd5   :  { %v16384_v26 = vpop.eup %16383  ;;  %v12766_v12 = vmul.f32 %v16382_v62, %v16558_v37 }
0x6fd6   :  { %v12767_v42 = vmul.f32 %v16384_v26, %v16561_v38 }
0x6fd7   :  { %v12768_v18 = vadd.f32 %v12766_v12, %v16564_v39 }
0x6fd8   :  { %v12769_v54 = vadd.f32 %v12767_v42, %v16567_v41 }
0x6fd9   :  { %v12770_v36 = vmul.f32 %v12768_v18, %v20955_v40 }
0x6fda   :  { %v12771_v9 = vmul.f32 %v12769_v54, %v12768_v18 }
0x6fdc   :  { %12773 = vrot.lane.b32.xlu0 %v12771_v9, %s16406_s7 }
0x704e   :  { %v12774_v57 = vpop.permute.xlu0 %12773 }
0x704f   :  { %v21219_v60 = vadd.f32 %v12774_v57, %v12770_v36 }
0x7051   :  { %16385 = vtanh.f32 %v21219_v60 }
0x705b   :  { %v16386_v28 = vpop.eup %16385 }
0x705c   :  { %v12778_v10 = vmul.f32 %v16386_v28, %v12769_v54 }
0x705e   :  { %12883 = vrot.lane.b32.xlu1 %v12778_v10, %s16406_s7 }
0x70d0   :  { %v12884_v19 = vpop.permute.xlu1 %12883 }
0x70d1   :  { %13564 = vmatmul.mubr.msk.f32.vlgmr.msra.gmra.mrb[74].mxu0 %vm98_vm0, %v12884_v19  ;;  %13566 = vmatmul.mubr.msk.f32.vlgmr.msra.gmra.mrb[76].mxu1 %vm98_vm0, %v12884_v19 }
0x70d2   :  { %15766 = vmatpush1.bf16.msra.mxu1 %v20998_v56  ;;  %15782 = vmatpush1.bf16.msra.mxu0 %v21010_v53 }
0x70d3   :  { %15768 = vmatprep.subr.bf16.mxu1 %v21023_v50  ;;  %15784 = vmatprep.subr.bf16.mxu0 %v21025_v0 }
0x70d4   :  { %13150 = vmatprep.mubr.f32.mxu1 %v16405_v3  ;;  %13270 = vmatprep.mubr.f32.mxu0 %v16405_v3 }
0x70d6   :  { %15770 = vmatpush1.bf16.msra.mxu1 %v21037_v32  ;;  %15786 = vmatpush1.bf16.msra.mxu0 %v21050_v6 }
0x70d7   :  { %15772 = vmatprep.subr.bf16.mxu1 %v21052_v22  ;;  %15788 = vmatprep.subr.bf16.mxu0 %v21063_v8 }
0x70da   :  { %15774 = vmatpush1.bf16.msra.mxu1 %v21075_v58  ;;  %15790 = vmatpush1.bf16.msra.mxu0 %v21088_v49 }
0x70db   :  { %15776 = vmatprep.subr.bf16.mxu1 %v21090_v63  ;;  %15792 = vmatprep.subr.bf16.mxu0 %v21102_v15 }
0x70de   :  { %15778 = vmatpush1.bf16.msra.mxu1 %v21111_v44  ;;  %15794 = vmatpush1.bf16.msra.mxu0 %v21115_v52 }
0x70df   :  { %15796 = vmatprep.subr.bf16.mxu0 %v15731_v21 }
0x71a4   :  { %v12953_v40 = vpop.f32.mrb[74].mxu0 }
0x71a5   :  { %v12958_v20 = vadd.f32 %v12953_v40, %v16758_v46  ;;  %v12955_v56 = vpop.f32.mrb[75].mxu0 }
0x71a6   :  { %v12959_v53 = vadd.f32 %v12955_v56, %v16764_v59 }
0x71a7   :  { %16387 = vtanh.f32 %v12958_v20 }
0x71a8   :  { %16389 = vtanh.f32 %v12959_v53 }
0x71b1   :  { %v16388_v50 = vpop.eup %16387 }
0x71b2   :  { %v16390_v0 = vpop.eup %16389  ;;  %v12962_v32 = vmul.f32 %v16388_v50, %v16558_v37 }
0x71b3   :  { %v12963_v6 = vmul.f32 %v16390_v0, %v16561_v38 }
0x71b4   :  { %v12964_v22 = vadd.f32 %v12962_v32, %v16564_v39 }
0x71b5   :  { %v12965_v8 = vadd.f32 %v12963_v6, %v16567_v41 }
0x71b6   :  { %v12966_v49 = vmul.f32 %v12964_v22, %v21123_v25 }
0x71b7   :  { %v12967_v58 = vmul.f32 %v12965_v8, %v12964_v22 }
0x71b9   :  { %12969 = vrot.lane.b32.xlu0 %v12967_v58, %s16406_s7 }
0x722b   :  { %v12970_v63 = vpop.permute.xlu0 %12969 }
0x722c   :  { %v12972_v15 = vadd.f32 %v12970_v63, %v12966_v49 }
0x722e   :  { %16391 = vtanh.f32 %v12972_v15 }
0x7238   :  { %v16392_v44 = vpop.eup %16391 }
0x7239   :  { %v12974_v52 = vmul.f32 %v16392_v44, %v12965_v8 }
0x723b   :  { %12976 = vrot.lane.b32.xlu1 %v12974_v52, %s16406_s7 }
0x72ad   :  { %v12977_v5 = vpop.permute.xlu1 %12976 }
0x72ae   :  { %13565 = vst.msk [vmem:[%s21293_s9 + $0xb0] sm:$0xff] %vm98_vm0, %v12977_v5  ;;  %13567 = vmatmul.mubr.msk.f32.vlgmr.msra.gmra.mrb[76].mxu1 %vm98_vm0, %v12977_v5  ;;  %13568 = vmatmul.mubr.msk.f32.vlgmr.msra.gmra.mrb[76].mxu0 %vm98_vm0, %v12977_v5 }
0x72af   :  { %15798 = vmatpush1.bf16.msra.mxu0 %v21169_v23  ;;  %13346 = vmatprep.mubr.f32.mxu0 %v16405_v3 }
0x72b0   :  { %15800 = vmatprep.subr.bf16.mxu0 %v21171_v61 }
0x72b3   :  { %15802 = vmatpush1.bf16.msra.mxu0 %v21186_v29 }
0x72b4   :  { %15804 = vmatprep.subr.bf16.mxu0 %v21189_v45 }
0x72b7   :  { %15806 = vmatpush1.bf16.msra.mxu0 %v21204_v31 }
0x72b8   :  { %15808 = vmatprep.subr.bf16.mxu0 %v21207_v51 }
0x72bb   :  { %15810 = vmatpush1.bf16.msra.mxu0 %v15745_v47 }
0x7381   :  { %v13152_v25 = vpop.f32.mrb[76].mxu1 }
0x7382   :  { %v13157_v62 = vadd.f32 %v13152_v25, %v17863_v48  ;;  %v13154_v26 = vpop.f32.mrb[77].mxu1 }
0x7383   :  { %v13158_v12 = vadd.f32 %v13154_v26, %v17866_v4 }
0x7384   :  { %16393 = vtanh.f32 %v13157_v62 }
0x7385   :  { %16395 = vtanh.f32 %v13158_v12 }
0x738e   :  { %v16394_v3 = vpop.eup %16393 }
0x738f   :  { %v16396_v42 = vpop.eup %16395  ;;  %v13161_v18 = vmul.f32 %v16394_v3, %v16558_v37 }
0x7390   :  { %v13162_v54 = vmul.f32 %v16396_v42, %v16561_v38 }
0x7391   :  { %v13163_v9 = vadd.f32 %v13161_v18, %v16564_v39 }
0x7392   :  { %v13164_v30 = vadd.f32 %v13162_v54, %v16567_v41 }
0x7393   :  { %v13165_v48 = vmul.f32 %v13163_v9, %v21219_v60 }
0x7394   :  { %v13166_v17 = vmul.f32 %v13164_v30, %v13163_v9 }
0x7396   :  { %13168 = vrot.lane.b32.xlu0 %v13166_v17, %s16406_s7 }
0x7408   :  { %v13169_v24 = vpop.permute.xlu0 %13168 }
0x7409   :  { %v13171_v21 = vadd.f32 %v13169_v24, %v13165_v48 }
0x740b   :  { %16397 = vtanh.f32 %v13171_v21 }
0x7415   :  { %v16398_v4 = vpop.eup %16397 }
0x7416   :  { %v13173_v7 = vmul.f32 %v16398_v4, %v13164_v30 }
0x7418   :  { %13278 = vrot.lane.b32.xlu1 %v13173_v7, %s16406_s7 }
0x748a   :  { %v13279_v27 = vpop.permute.xlu1 %13278 }
0x748b   :  { %13569 = vmatmul.mubr.msk.f32.vlgmr.msra.gmra.mrb[76].mxu0 %vm98_vm0, %v13279_v27 }
0x755e   :  { %v13348_v43 = vpop.f32.mrb[76].mxu0 }
0x755f   :  { %v13353_v23 = vadd.f32 %v13348_v43, %v16758_v46  ;;  %v13350_v61 = vpop.f32.mrb[77].mxu0 }
0x7560   :  { %v13354_v11 = vadd.f32 %v13350_v61, %v16764_v59 }
0x7561   :  { %16399 = vtanh.f32 %v13353_v23 }
0x7562   :  { %16401 = vtanh.f32 %v13354_v11 }
0x756b   :  { %v16400_v33 = vpop.eup %16399 }
0x756c   :  { %v16402_v2 = vpop.eup %16401  ;;  %v13357_v16 = vmul.f32 %v16400_v33, %v16558_v37 }
0x756d   :  { %v13358_v29 = vmul.f32 %v16402_v2, %v16561_v38 }
0x756e   :  { %v13359_v45 = vadd.f32 %v13357_v16, %v16564_v39 }
0x756f   :  { %v13360_v13 = vadd.f32 %v13358_v29, %v16567_v41 }
0x7570   :  { %v13361_v35 = vmul.f32 %v13359_v45, %v12972_v15 }
0x7571   :  { %v13362_v34 = vmul.f32 %v13360_v13, %v13359_v45 }
0x7573   :  { %13364 = vrot.lane.b32.xlu0 %v13362_v34, %s16406_s7 }
0x75e5   :  { %v13365_v46 = vpop.permute.xlu0 %13364 }
0x75e6   :  { %v13367_v55 = vadd.f32 %v13365_v46, %v13361_v35 }
0x75e8   :  { %16403 = vtanh.f32 %v13367_v55 }
0x75f2   :  { %v16404_v59 = vpop.eup %16403 }
0x75f3   :  { %v13369_v31 = vmul.f32 %v16404_v59, %v13360_v13 }
0x75f5   :  { %13371 = vrot.lane.b32.xlu1 %v13369_v31, %s16406_s7 }
0x7667   :  { %v13372_v51 = vpop.permute.xlu1 %13371 }
0x7668   :  { %13570 = vst.msk [vmem:[%s21293_s9 + $0xb8] sm:$0xff] %vm98_vm0, %v13372_v51 }

</bundles_post_ra>
